<compile_context>
chip_gen: v6e
topology: v6e:2x2x1
jax: 0.10.0
libtpu: 0.0.40
codegen_flags: <defaults>
</compile_context>

<pallas_src>
import functools

import numpy as np
import jax
import jax.numpy as jnp
from jax.experimental import pallas as pl
from jax.experimental.pallas import tpu as pltpu

BN_EPS = 1e-5
LANE = 128          # TPU lane width; channel axis is zero-padded to a multiple


def _round_up(x, m):
    return (x + m - 1) // m * m


@functools.lru_cache(maxsize=None)
def _vmem_limit_bytes():
    """Chip-aware scoped-VMEM budget (96 MiB on 128-MiB parts, 32 MiB on v7x)."""
    try:
        cap = pltpu.get_tpu_info().vmem_capacity_bytes
    except Exception:
        return 32 * 1024 * 1024
    if cap >= 128 * 1024 * 1024:
        return 96 * 1024 * 1024
    return 32 * 1024 * 1024


# ---------------------------------------------------------------------------
# Pass A: 3x3 conv (9 shifted bf16 MXU matmuls) + per-image BN partials.
# Optionally fuses the PREVIOUS BatchNorm's scale/shift + ReLU into the input
# path (used for conv2, so BN1's output never touches HBM).
# ---------------------------------------------------------------------------
def _make_conv3x3_kernel(h, w, cp, fuse_bn_relu):
    hw = h * w

    def kernel(*refs):
        if fuse_bn_relu:
            x_ref, w_ref, scale_ref, shift_ref, y_ref, stat_ref, xpad_ref = refs
        else:
            x_ref, w_ref, y_ref, stat_ref, xpad_ref = refs
            scale_ref = shift_ref = None

        # Build the spatially zero-padded bf16 tile in VMEM.  When fusing, the
        # affine + ReLU is applied BEFORE writing the interior, so the halo
        # stays exactly zero (pad-after-BN, per the review).
        xpad_ref[...] = jnp.zeros_like(xpad_ref)
        xin = x_ref[0]                                            # (h, w, cp) bf16
        if fuse_bn_relu:
            xf = xin.astype(jnp.float32) * scale_ref[0] + shift_ref[0]
            xin = jnp.maximum(xf, 0.0).astype(jnp.bfloat16)
        xpad_ref[1:h + 1, 1:w + 1, :] = xin

        # 9 shifted bf16 slices straight from the VMEM scratch -> MXU matmuls
        # with f32 accumulation (no f32 image copy, no per-tap casts).
        acc = jnp.zeros((hw, cp), jnp.float32)
        for kh in range(3):                                       # unrolled: 9 taps
            for kw in range(3):
                patch = xpad_ref[kh:kh + h, kw:kw + w, :].reshape(hw, cp)
                acc = acc + jnp.dot(patch, w_ref[kh * 3 + kw],
                                    preferred_element_type=jnp.float32)
        # TODO(synk): pair taps along K (K=256) to better fill the 256-wide MXU
        # on v6e/v7x when Cp == 128.

        # bf16 activation store (halves the dominant HBM write + next read).
        y_ref[0] = acc.reshape(h, w, cp).astype(y_ref.dtype)

        # Per-image BN partials (f32): sum and CENTERED sum-of-squares, packed
        # into a single (2, Cp) row pair (no broadcast_to, no redundant writes).
        s = jnp.sum(acc, axis=0, keepdims=True)                   # (1, cp)
        d = acc - s * (1.0 / hw)
        m2 = jnp.sum(d * d, axis=0, keepdims=True)                # (1, cp)
        stat_ref[0] = jnp.concatenate([s, m2], axis=0)            # (2, cp)

    return kernel


def _conv3x3(x_img, w9, scale=None, shift=None):
    """3x3 conv over an NHWC, channel-padded bf16 image batch.

    x_img : (n, h, w, cp) bf16
    w9    : (9, cp, cp)   bf16 per-tap weight matrices (kh*3 + kw)
    scale, shift : optional (cp,) f32 — fuse `ReLU(x*scale + shift)` on the input.

    Returns (y_bf16 (n,h,w,cp), mean (cp,), var (cp,)) with batch BN statistics.
    """
    n, h, w, cp = x_img.shape
    hw = h * w
    fuse = scale is not None
    kernel = _make_conv3x3_kernel(h, w, cp, fuse)

    in_specs = [
        pl.BlockSpec((1, h, w, cp), lambda i: (i, 0, 0, 0)),
        pl.BlockSpec((9, cp, cp), lambda i: (0, 0, 0)),           # weights resident
    ]
    operands = [x_img, w9]
    if fuse:
        in_specs += [pl.BlockSpec((1, cp), lambda i: (0, 0)),
                     pl.BlockSpec((1, cp), lambda i: (0, 0))]
        operands += [scale.reshape(1, cp).astype(jnp.float32),
                     shift.reshape(1, cp).astype(jnp.float32)]

    flops = int(2 * n * hw * 9 * cp * cp)
    bytes_accessed = (int(x_img.size) * 2 + int(w9.size) * 2
                      + n * hw * cp * 2 + n * 2 * cp * 4)

    y, stats = pl.pallas_call(
        kernel,
        out_shape=(
            jax.ShapeDtypeStruct((n, h, w, cp), jnp.bfloat16),
            jax.ShapeDtypeStruct((n, 2, cp), jnp.float32),
        ),
        grid=(n,),
        in_specs=in_specs,
        out_specs=(
            pl.BlockSpec((1, h, w, cp), lambda i: (i, 0, 0, 0)),
            pl.BlockSpec((1, 2, cp), lambda i: (i, 0, 0)),
        ),
        scratch_shapes=[pltpu.VMEM((h + 2, w + 2, cp), jnp.bfloat16)],
        compiler_params=pltpu.CompilerParams(
            dimension_semantics=("parallel",),       # shards images across TCs
            vmem_limit_bytes=_vmem_limit_bytes(),
        ),
        cost_estimate=pl.CostEstimate(
            flops=flops, transcendentals=0, bytes_accessed=int(bytes_accessed)),
    )(*operands)
    # TODO(synk): add spatial row-tiling (grid=(n, cdiv(h, th)) with a 2-row
    # halo via manual DMA) for very large images on v7x; whole-image tiles fit
    # comfortably at all BasicBlock ResNet-18/34 stage sizes now that the f32
    # copies are gone.

    # Tiny (Cp,) cross-image combine in XLA: parallel-variance (Welford) merge
    # of per-image (sum, centered-M2) partials — no E[x^2]-E[x]^2 cancellation.
    total = float(n * hw)
    s_i = stats[:, 0, :]                                          # (n, cp)
    m2_i = stats[:, 1, :]                                         # (n, cp)
    mean_i = s_i * (1.0 / hw)
    mean = jnp.sum(s_i, axis=0) / total
    m2 = jnp.sum(m2_i, axis=0) + float(hw) * jnp.sum((mean_i - mean) ** 2, axis=0)
    var = jnp.maximum(m2 / total, 0.0)          # biased, PyTorch BN training fwd
    return y, mean, var


# ---------------------------------------------------------------------------
# Pass B: BN2 apply + residual add + ReLU, streamed over whole lane-dense images
# ---------------------------------------------------------------------------
def _bn_add_relu_kernel(y_ref, scale_ref, shift_ref, id_ref, o_ref):
    y = y_ref[0].astype(jnp.float32) * scale_ref[0] + shift_ref[0]
    y = y + id_ref[0].astype(jnp.float32)
    o_ref[0] = jnp.maximum(y, 0.0)


def _bn_add_relu(y_img, scale, shift, id_img):
    """y*scale + shift + identity -> ReLU.  y_img/id_img: (n, h, w, cp) bf16."""
    n, h, w, cp = y_img.shape
    scale2 = scale.reshape(1, cp).astype(jnp.float32)
    shift2 = shift.reshape(1, cp).astype(jnp.float32)

    img_spec = pl.BlockSpec((1, h, w, cp), lambda i: (i, 0, 0, 0))
    vec_spec = pl.BlockSpec((1, cp), lambda i: (0, 0))

    bytes_accessed = (int(y_img.size) * 2 + int(id_img.size) * 2
                      + 2 * cp * 4 + n * h * w * cp * 4)

    return pl.pallas_call(
        _bn_add_relu_kernel,
        out_shape=jax.ShapeDtypeStruct((n, h, w, cp), jnp.float32),
        grid=(n,),
        in_specs=[img_spec, vec_spec, vec_spec, img_spec],
        out_specs=img_spec,
        compiler_params=pltpu.CompilerParams(
            dimension_semantics=("parallel",),
            vmem_limit_bytes=_vmem_limit_bytes(),
        ),
        cost_estimate=pl.CostEstimate(
            flops=int(4 * n * h * w * cp), transcendentals=0,
            bytes_accessed=int(bytes_accessed)),
    )(y_img, scale2, shift2, id_img)


# ---------------------------------------------------------------------------
# Glue: layout conversion / parameter prep (boundary-only plumbing, no full-
# tensor pads between the kernels)
# ---------------------------------------------------------------------------
def _prep_weight(w_oihw, cp):
    """torch conv weight (Cout, Cin, 3, 3) -> (9, Cp, Cp) bf16, zero-padded."""
    c_out, c_in, _, _ = w_oihw.shape
    w = jnp.transpose(w_oihw, (2, 3, 1, 0)).reshape(9, c_in, c_out)
    w = jnp.pad(w, ((0, 0), (0, cp - c_in), (0, cp - c_out)))
    return w.astype(jnp.bfloat16)


def basic_block_forward(x_nchw, params):
    """Forward pass of BasicBlock (stride=1, down_sample=None)."""
    n, c_in, h, w = x_nchw.shape
    c_out = params["w1"].shape[0]
    assert c_in == c_out, "identity path requires matching channels (no down_sample)"
    # TODO(synk): stride>1 / down_sample (1x1 projection) path not implemented.

    cp = _round_up(max(c_in, c_out), LANE)       # lane-dense channel padding

    # Boundary plumbing: NCHW f32 -> NHWC bf16, channels zero-padded to Cp.
    # Padded lanes stay exactly 0 through conv/BN/residual (weights, gamma and
    # beta are zero-padded, BN stats are per channel).
    x_img = jnp.pad(jnp.transpose(x_nchw, (0, 2, 3, 1)),
                    ((0, 0), (0, 0), (0, 0), (0, cp - c_in))).astype(jnp.bfloat16)

    w1 = _prep_weight(params["w1"], cp)
    w2 = _prep_weight(params["w2"], cp)
    g1 = jnp.pad(params["gamma1"], (0, cp - c_out))      # padded lanes: gamma=0
    b1 = jnp.pad(params["beta1"], (0, cp - c_out))
    g2 = jnp.pad(params["gamma2"], (0, cp - c_out))
    b2 = jnp.pad(params["beta2"], (0, cp - c_out))

    # ---- conv1 (pass A) + BN1 batch statistics ----
    y1_raw, mean1, var1 = _conv3x3(x_img, w1)
    scale1 = g1 * jax.lax.rsqrt(var1 + BN_EPS)
    shift1 = b1 - mean1 * scale1

    # ---- conv2 with BN1-apply + ReLU fused into its prologue (pass A) ----
    y2_raw, mean2, var2 = _conv3x3(y1_raw, w2, scale=scale1, shift=shift1)
    scale2 = g2 * jax.lax.rsqrt(var2 + BN_EPS)
    shift2 = b2 - mean2 * scale2

    # ---- BN2 apply + residual (bf16 conv1 input reused as identity) + ReLU ----
    out_img = _bn_add_relu(y2_raw, scale2, shift2, x_img)

    return jnp.transpose(out_img[..., :c_out], (0, 3, 1, 2))       # back to NCHW


# ---------------------------------------------------------------------------
# Deterministic parameter init (shapes from BasicBlock.__init__) + reference
# ---------------------------------------------------------------------------
def init_params(key, c_in, c_out):
    k1, k2 = jax.random.split(key)
    s1 = 1.0 / (3 * 3 * c_in) ** 0.5
    s2 = 1.0 / (3 * 3 * c_out) ** 0.5
    return {
        "w1": jax.random.normal(k1, (c_out, c_in, 3, 3), jnp.float32) * s1,
        "w2": jax.random.normal(k2, (c_out, c_out, 3, 3), jnp.float32) * s2,
        "gamma1": jnp.ones((c_out,), jnp.float32),
        "beta1": jnp.zeros((c_out,), jnp.float32),
        "gamma2": jnp.ones((c_out,), jnp.float32),
        "beta2": jnp.zeros((c_out,), jnp.float32),
    }


def _reference_forward(x, params):
    """Pure-JAX f32 reference matching PyTorch BasicBlock training-mode forward."""
    def conv(x, w):
        return jax.lax.conv_general_dilated(
            x, w, window_strides=(1, 1), padding=((1, 1), (1, 1)),
            dimension_numbers=("NCHW", "OIHW", "NCHW"))

    def bn(y, gamma, beta):
        mean = jnp.mean(y, axis=(0, 2, 3), keepdims=True)
        var = jnp.mean((y - mean) ** 2, axis=(0, 2, 3), keepdims=True)
        return ((y - mean) * jax.lax.rsqrt(var + BN_EPS)
                * gamma.reshape(1, -1, 1, 1) + beta.reshape(1, -1, 1, 1))

    y = jnp.maximum(bn(conv(x, params["w1"]), params["gamma1"], params["beta1"]), 0.0)
    y = bn(conv(y, params["w2"]), params["gamma2"], params["beta2"])
    return jnp.maximum(y + x, 0.0)


if __name__ == "__main__":
    key = jax.random.PRNGKey(0)
    kx, kp = jax.random.split(key)

    N, C, H, W = 2, 4, 16, 16
    x = jax.random.normal(kx, (N, C, H, W), jnp.float32)
    params = init_params(kp, C, C)

    fwd = jax.jit(functools.partial(basic_block_forward, params=params))
    out = fwd(x)
    jax.block_until_ready(out)

    assert out.shape == (N, C, H, W)
    assert out.dtype == jnp.float32
    assert bool(jnp.all(jnp.isfinite(out)))

    ref = _reference_forward(x, params)
    max_err = float(jnp.max(jnp.abs(out - ref)))
    assert max_err < 0.15, f"mismatch vs f32 reference: max abs err {max_err}"

    print("KERNEL_OK")
</pallas_src>

<mosaic_0001>
module attributes {stable_mosaic.version = 11 : i64} {
  func.func @kernel(%arg0: i32, %arg1: memref<1x16x16x128xbf16, #tpu.memory_space<vmem>>, %arg2: memref<9x128x128xbf16, #tpu.memory_space<vmem>>, %arg3: memref<1x16x16x128xbf16, #tpu.memory_space<vmem>>, %arg4: memref<1x2x128xf32, #tpu.memory_space<vmem>>, %arg5: memref<18x18x128xbf16, #tpu.memory_space<vmem>>) attributes {dimension_semantics = [#tpu.dimension_semantics<parallel>], iteration_bounds = array<i64: 2>, scalar_prefetch = 0 : i64, scratch_operands = 1 : i64, tpu.core_type = #tpu.core_type<tc>, window_params = [{transform_indices = @transform_0, window_bounds = array<i64: 1, 16, 16, 128>}, {pipeline_mode = #tpu.pipeline_mode<synchronous>, transform_indices = @transform_1, window_bounds = array<i64: 9, 128, 128>}, {transform_indices = @transform_2, window_bounds = array<i64: 1, 16, 16, 128>}, {transform_indices = @transform_3, window_bounds = array<i64: 1, 2, 128>}]} {
    %cst = arith.constant 0.000000e+00 : bf16
    %0 = vector.broadcast %cst : bf16 to vector<18x18x128xbf16>
    %c0 = arith.constant 0 : index
    %c0_0 = arith.constant 0 : index
    %c0_1 = arith.constant 0 : index
    %1 = vector.load %arg5[%c0, %c0_0, %c0_1] : memref<18x18x128xbf16, #tpu.memory_space<vmem>>, vector<18x18x128xbf16>
    tpu.vector_store %arg5[%c0, %c0_0, %c0_1], %0 {strides = array<i32>} : memref<18x18x128xbf16, #tpu.memory_space<vmem>>, vector<18x18x128xbf16>,
    %c0_2 = arith.constant 0 : index
    %c0_3 = arith.constant 0 : index
    %c0_4 = arith.constant 0 : index
    %c0_5 = arith.constant 0 : index
    %2 = vector.load %arg1[%c0_2, %c0_3, %c0_4, %c0_5] : memref<1x16x16x128xbf16, #tpu.memory_space<vmem>>, vector<1x16x16x128xbf16>
    %3 = vector.shape_cast %2 : vector<1x16x16x128xbf16> to vector<16x16x128xbf16>
    %c1 = arith.constant 1 : index
    %c1_6 = arith.constant 1 : index
    %c0_7 = arith.constant 0 : index
    %4 = vector.load %arg5[%c1, %c1_6, %c0_7] : memref<18x18x128xbf16, #tpu.memory_space<vmem>>, vector<16x16x128xbf16>
    tpu.vector_store %arg5[%c1, %c1_6, %c0_7], %3 {strides = array<i32>} : memref<18x18x128xbf16, #tpu.memory_space<vmem>>, vector<16x16x128xbf16>,
    %cst_8 = arith.constant 0.000000e+00 : f32
    %5 = vector.broadcast %cst_8 : f32 to vector<256x128xf32>
    %c0_9 = arith.constant 0 : index
    %c0_10 = arith.constant 0 : index
    %c0_11 = arith.constant 0 : index
    %6 = vector.load %arg5[%c0_9, %c0_10, %c0_11] : memref<18x18x128xbf16, #tpu.memory_space<vmem>>, vector<16x16x128xbf16>
    %7 = vector.shape_cast %6 : vector<16x16x128xbf16> to vector<256x128xbf16>
    %c0_12 = arith.constant 0 : index
    %c0_13 = arith.constant 0 : index
    %c0_14 = arith.constant 0 : index
    %8 = vector.load %arg2[%c0_12, %c0_13, %c0_14] : memref<9x128x128xbf16, #tpu.memory_space<vmem>>, vector<1x128x128xbf16>
    %9 = vector.shape_cast %8 : vector<1x128x128xbf16> to vector<128x128xbf16>
    %cst_15 = arith.constant dense<0.000000e+00> : vector<256x128xf32>
    %10 = tpu.matmul %7, %9, %cst_15 {dimension_numbers = #tpu.dot_dimension_numbers<[1], [0], [0], [1], [0, 0, 1, 1], [], []>} : vector<256x128xbf16>, vector<128x128xbf16>, vector<256x128xf32> -> vector<256x128xf32>
    %11 = arith.addf %5, %10 : vector<256x128xf32>
    %c0_16 = arith.constant 0 : index
    %c1_17 = arith.constant 1 : index
    %c0_18 = arith.constant 0 : index
    %12 = vector.load %arg5[%c0_16, %c1_17, %c0_18] : memref<18x18x128xbf16, #tpu.memory_space<vmem>>, vector<16x16x128xbf16>
    %13 = vector.shape_cast %12 : vector<16x16x128xbf16> to vector<256x128xbf16>
    %c1_19 = arith.constant 1 : index
    %c0_20 = arith.constant 0 : index
    %c0_21 = arith.constant 0 : index
    %14 = vector.load %arg2[%c1_19, %c0_20, %c0_21] : memref<9x128x128xbf16, #tpu.memory_space<vmem>>, vector<1x128x128xbf16>
    %15 = vector.shape_cast %14 : vector<1x128x128xbf16> to vector<128x128xbf16>
    %cst_22 = arith.constant dense<0.000000e+00> : vector<256x128xf32>
    %16 = tpu.matmul %13, %15, %cst_22 {dimension_numbers = #tpu.dot_dimension_numbers<[1], [0], [0], [1], [0, 0, 1, 1], [], []>} : vector<256x128xbf16>, vector<128x128xbf16>, vector<256x128xf32> -> vector<256x128xf32>
    %17 = arith.addf %11, %16 : vector<256x128xf32>
    %c0_23 = arith.constant 0 : index
    %c2 = arith.constant 2 : index
    %c0_24 = arith.constant 0 : index
    %18 = vector.load %arg5[%c0_23, %c2, %c0_24] : memref<18x18x128xbf16, #tpu.memory_space<vmem>>, vector<16x16x128xbf16>
    %19 = vector.shape_cast %18 : vector<16x16x128xbf16> to vector<256x128xbf16>
    %c2_25 = arith.constant 2 : index
    %c0_26 = arith.constant 0 : index
    %c0_27 = arith.constant 0 : index
    %20 = vector.load %arg2[%c2_25, %c0_26, %c0_27] : memref<9x128x128xbf16, #tpu.memory_space<vmem>>, vector<1x128x128xbf16>
    %21 = vector.shape_cast %20 : vector<1x128x128xbf16> to vector<128x128xbf16>
    %cst_28 = arith.constant dense<0.000000e+00> : vector<256x128xf32>
    %22 = tpu.matmul %19, %21, %cst_28 {dimension_numbers = #tpu.dot_dimension_numbers<[1], [0], [0], [1], [0, 0, 1, 1], [], []>} : vector<256x128xbf16>, vector<128x128xbf16>, vector<256x128xf32> -> vector<256x128xf32>
    %23 = arith.addf %17, %22 : vector<256x128xf32>
    %c1_29 = arith.constant 1 : index
    %c0_30 = arith.constant 0 : index
    %c0_31 = arith.constant 0 : index
    %24 = vector.load %arg5[%c1_29, %c0_30, %c0_31] : memref<18x18x128xbf16, #tpu.memory_space<vmem>>, vector<16x16x128xbf16>
    %25 = vector.shape_cast %24 : vector<16x16x128xbf16> to vector<256x128xbf16>
    %c3 = arith.constant 3 : index
    %c0_32 = arith.constant 0 : index
    %c0_33 = arith.constant 0 : index
    %26 = vector.load %arg2[%c3, %c0_32, %c0_33] : memref<9x128x128xbf16, #tpu.memory_space<vmem>>, vector<1x128x128xbf16>
    %27 = vector.shape_cast %26 : vector<1x128x128xbf16> to vector<128x128xbf16>
    %cst_34 = arith.constant dense<0.000000e+00> : vector<256x128xf32>
    %28 = tpu.matmul %25, %27, %cst_34 {dimension_numbers = #tpu.dot_dimension_numbers<[1], [0], [0], [1], [0, 0, 1, 1], [], []>} : vector<256x128xbf16>, vector<128x128xbf16>, vector<256x128xf32> -> vector<256x128xf32>
    %29 = arith.addf %23, %28 : vector<256x128xf32>
    %c1_35 = arith.constant 1 : index
    %c1_36 = arith.constant 1 : index
    %c0_37 = arith.constant 0 : index
    %30 = vector.load %arg5[%c1_35, %c1_36, %c0_37] : memref<18x18x128xbf16, #tpu.memory_space<vmem>>, vector<16x16x128xbf16>
    %31 = vector.shape_cast %30 : vector<16x16x128xbf16> to vector<256x128xbf16>
    %c4 = arith.constant 4 : index
    %c0_38 = arith.constant 0 : index
    %c0_39 = arith.constant 0 : index
    %32 = vector.load %arg2[%c4, %c0_38, %c0_39] : memref<9x128x128xbf16, #tpu.memory_space<vmem>>, vector<1x128x128xbf16>
    %33 = vector.shape_cast %32 : vector<1x128x128xbf16> to vector<128x128xbf16>
    %cst_40 = arith.constant dense<0.000000e+00> : vector<256x128xf32>
    %34 = tpu.matmul %31, %33, %cst_40 {dimension_numbers = #tpu.dot_dimension_numbers<[1], [0], [0], [1], [0, 0, 1, 1], [], []>} : vector<256x128xbf16>, vector<128x128xbf16>, vector<256x128xf32> -> vector<256x128xf32>
    %35 = arith.addf %29, %34 : vector<256x128xf32>
    %c1_41 = arith.constant 1 : index
    %c2_42 = arith.constant 2 : index
    %c0_43 = arith.constant 0 : index
    %36 = vector.load %arg5[%c1_41, %c2_42, %c0_43] : memref<18x18x128xbf16, #tpu.memory_space<vmem>>, vector<16x16x128xbf16>
    %37 = vector.shape_cast %36 : vector<16x16x128xbf16> to vector<256x128xbf16>
    %c5 = arith.constant 5 : index
    %c0_44 = arith.constant 0 : index
    %c0_45 = arith.constant 0 : index
    %38 = vector.load %arg2[%c5, %c0_44, %c0_45] : memref<9x128x128xbf16, #tpu.memory_space<vmem>>, vector<1x128x128xbf16>
    %39 = vector.shape_cast %38 : vector<1x128x128xbf16> to vector<128x128xbf16>
    %cst_46 = arith.constant dense<0.000000e+00> : vector<256x128xf32>
    %40 = tpu.matmul %37, %39, %cst_46 {dimension_numbers = #tpu.dot_dimension_numbers<[1], [0], [0], [1], [0, 0, 1, 1], [], []>} : vector<256x128xbf16>, vector<128x128xbf16>, vector<256x128xf32> -> vector<256x128xf32>
    %41 = arith.addf %35, %40 : vector<256x128xf32>
    %c2_47 = arith.constant 2 : index
    %c0_48 = arith.constant 0 : index
    %c0_49 = arith.constant 0 : index
    %42 = vector.load %arg5[%c2_47, %c0_48, %c0_49] : memref<18x18x128xbf16, #tpu.memory_space<vmem>>, vector<16x16x128xbf16>
    %43 = vector.shape_cast %42 : vector<16x16x128xbf16> to vector<256x128xbf16>
    %c6 = arith.constant 6 : index
    %c0_50 = arith.constant 0 : index
    %c0_51 = arith.constant 0 : index
    %44 = vector.load %arg2[%c6, %c0_50, %c0_51] : memref<9x128x128xbf16, #tpu.memory_space<vmem>>, vector<1x128x128xbf16>
    %45 = vector.shape_cast %44 : vector<1x128x128xbf16> to vector<128x128xbf16>
    %cst_52 = arith.constant dense<0.000000e+00> : vector<256x128xf32>
    %46 = tpu.matmul %43, %45, %cst_52 {dimension_numbers = #tpu.dot_dimension_numbers<[1], [0], [0], [1], [0, 0, 1, 1], [], []>} : vector<256x128xbf16>, vector<128x128xbf16>, vector<256x128xf32> -> vector<256x128xf32>
    %47 = arith.addf %41, %46 : vector<256x128xf32>
    %c2_53 = arith.constant 2 : index
    %c1_54 = arith.constant 1 : index
    %c0_55 = arith.constant 0 : index
    %48 = vector.load %arg5[%c2_53, %c1_54, %c0_55] : memref<18x18x128xbf16, #tpu.memory_space<vmem>>, vector<16x16x128xbf16>
    %49 = vector.shape_cast %48 : vector<16x16x128xbf16> to vector<256x128xbf16>
    %c7 = arith.constant 7 : index
    %c0_56 = arith.constant 0 : index
    %c0_57 = arith.constant 0 : index
    %50 = vector.load %arg2[%c7, %c0_56, %c0_57] : memref<9x128x128xbf16, #tpu.memory_space<vmem>>, vector<1x128x128xbf16>
    %51 = vector.shape_cast %50 : vector<1x128x128xbf16> to vector<128x128xbf16>
    %cst_58 = arith.constant dense<0.000000e+00> : vector<256x128xf32>
    %52 = tpu.matmul %49, %51, %cst_58 {dimension_numbers = #tpu.dot_dimension_numbers<[1], [0], [0], [1], [0, 0, 1, 1], [], []>} : vector<256x128xbf16>, vector<128x128xbf16>, vector<256x128xf32> -> vector<256x128xf32>
    %53 = arith.addf %47, %52 : vector<256x128xf32>
    %c2_59 = arith.constant 2 : index
    %c2_60 = arith.constant 2 : index
    %c0_61 = arith.constant 0 : index
    %54 = vector.load %arg5[%c2_59, %c2_60, %c0_61] : memref<18x18x128xbf16, #tpu.memory_space<vmem>>, vector<16x16x128xbf16>
    %55 = vector.shape_cast %54 : vector<16x16x128xbf16> to vector<256x128xbf16>
    %c8 = arith.constant 8 : index
    %c0_62 = arith.constant 0 : index
    %c0_63 = arith.constant 0 : index
    %56 = vector.load %arg2[%c8, %c0_62, %c0_63] : memref<9x128x128xbf16, #tpu.memory_space<vmem>>, vector<1x128x128xbf16>
    %57 = vector.shape_cast %56 : vector<1x128x128xbf16> to vector<128x128xbf16>
    %cst_64 = arith.constant dense<0.000000e+00> : vector<256x128xf32>
    %58 = tpu.matmul %55, %57, %cst_64 {dimension_numbers = #tpu.dot_dimension_numbers<[1], [0], [0], [1], [0, 0, 1, 1], [], []>} : vector<256x128xbf16>, vector<128x128xbf16>, vector<256x128xf32> -> vector<256x128xf32>
    %59 = arith.addf %53, %58 : vector<256x128xf32>
    %60 = vector.shape_cast %59 : vector<256x128xf32> to vector<16x16x128xf32>
    %61 = arith.truncf %60 : vector<16x16x128xf32> to vector<16x16x128xbf16>
    %c0_65 = arith.constant 0 : index
    %c0_66 = arith.constant 0 : index
    %c0_67 = arith.constant 0 : index
    %c0_68 = arith.constant 0 : index
    %62 = vector.load %arg3[%c0_65, %c0_66, %c0_67, %c0_68] : memref<1x16x16x128xbf16, #tpu.memory_space<vmem>>, vector<1x16x16x128xbf16>
    %63 = vector.shape_cast %62 : vector<1x16x16x128xbf16> to vector<16x16x128xbf16>
    %64 = vector.shape_cast %61 : vector<16x16x128xbf16> to vector<1x16x16x128xbf16>
    tpu.vector_store %arg3[%c0_65, %c0_66, %c0_67, %c0_68], %64 {strides = array<i32>} : memref<1x16x16x128xbf16, #tpu.memory_space<vmem>>, vector<1x16x16x128xbf16>,
    %cst_69 = arith.constant dense<0.000000e+00> : vector<128xf32>
    %65 = vector.multi_reduction <add>, %59, %cst_69 [0] : vector<256x128xf32> to vector<128xf32>
    %66 = vector.shape_cast %65 : vector<128xf32> to vector<1x128xf32>
    %cst_70 = arith.constant 3.906250e-03 : f32
    %67 = vector.broadcast %cst_70 : f32 to vector<1x128xf32>
    %68 = arith.mulf %66, %67 : vector<1x128xf32>
    %69 = vector.broadcast %68 : vector<1x128xf32> to vector<256x128xf32>
    %70 = arith.subf %59, %69 : vector<256x128xf32>
    %71 = arith.mulf %70, %70 : vector<256x128xf32>
    %cst_71 = arith.constant dense<0.000000e+00> : vector<128xf32>
    %72 = vector.multi_reduction <add>, %71, %cst_71 [0] : vector<256x128xf32> to vector<128xf32>
    %73 = vector.shape_cast %72 : vector<128xf32> to vector<1x128xf32>
    %74 = tpu.concatenate %66, %73 in 0 : vector<1x128xf32>, vector<1x128xf32> -> vector<2x128xf32>
    %c0_72 = arith.constant 0 : index
    %c0_73 = arith.constant 0 : index
    %c0_74 = arith.constant 0 : index
    %75 = vector.load %arg4[%c0_72, %c0_73, %c0_74] : memref<1x2x128xf32, #tpu.memory_space<vmem>>, vector<1x2x128xf32>
    %76 = vector.shape_cast %75 : vector<1x2x128xf32> to vector<2x128xf32>
    %77 = vector.shape_cast %74 : vector<2x128xf32> to vector<1x2x128xf32>
    tpu.vector_store %arg4[%c0_72, %c0_73, %c0_74], %77 {strides = array<i32>} : memref<1x2x128xf32, #tpu.memory_space<vmem>>, vector<1x2x128xf32>,
    return
  }
  func.func @transform_0(%arg0: i32) -> (i32, i32, i32, i32) {
    %c0_i32 = arith.constant 0 : i32
    %c0_i32_0 = arith.constant 0 : i32
    %c0_i32_1 = arith.constant 0 : i32
    %c0_i32_2 = arith.constant 0 : i32
    return %arg0, %c0_i32, %c0_i32_0, %c0_i32_1 : i32, i32, i32, i32
  }
  func.func @transform_1(%arg0: i32) -> (i32, i32, i32) {
    %c0_i32 = arith.constant 0 : i32
    %c0_i32_0 = arith.constant 0 : i32
    %c0_i32_1 = arith.constant 0 : i32
    %c0_i32_2 = arith.constant 0 : i32
    return %c0_i32, %c0_i32_0, %c0_i32_1 : i32, i32, i32
  }
  func.func @transform_2(%arg0: i32) -> (i32, i32, i32, i32) {
    %c0_i32 = arith.constant 0 : i32
    %c0_i32_0 = arith.constant 0 : i32
    %c0_i32_1 = arith.constant 0 : i32
    %c0_i32_2 = arith.constant 0 : i32
    return %arg0, %c0_i32, %c0_i32_0, %c0_i32_1 : i32, i32, i32, i32
  }
  func.func @transform_3(%arg0: i32) -> (i32, i32, i32) {
    %c0_i32 = arith.constant 0 : i32
    %c0_i32_0 = arith.constant 0 : i32
    %c0_i32_1 = arith.constant 0 : i32
    return %arg0, %c0_i32, %c0_i32_0 : i32, i32, i32
  }
}

module attributes {stable_mosaic.version = 11 : i64} {
  func.func @_bn_add_relu_kernel(%arg0: i32, %arg1: memref<1x16x16x128xbf16, #tpu.memory_space<vmem>>, %arg2: memref<1x128xf32, #tpu.memory_space<vmem>>, %arg3: memref<1x128xf32, #tpu.memory_space<vmem>>, %arg4: memref<1x16x16x128xbf16, #tpu.memory_space<vmem>>, %arg5: memref<1x16x16x128xf32, #tpu.memory_space<vmem>>) attributes {dimension_semantics = [#tpu.dimension_semantics<parallel>], iteration_bounds = array<i64: 2>, scalar_prefetch = 0 : i64, scratch_operands = 0 : i64, tpu.core_type = #tpu.core_type<tc>, window_params = [{transform_indices = @transform_0, window_bounds = array<i64: 1, 16, 16, 128>}, {pipeline_mode = #tpu.pipeline_mode<synchronous>, transform_indices = @transform_1, window_bounds = array<i64: 1, 128>}, {pipeline_mode = #tpu.pipeline_mode<synchronous>, transform_indices = @transform_2, window_bounds = array<i64: 1, 128>}, {transform_indices = @transform_3, window_bounds = array<i64: 1, 16, 16, 128>}, {transform_indices = @transform_4, window_bounds = array<i64: 1, 16, 16, 128>}]} {
    %c0 = arith.constant 0 : index
    %c0_0 = arith.constant 0 : index
    %c0_1 = arith.constant 0 : index
    %c0_2 = arith.constant 0 : index
    %0 = vector.load %arg1[%c0, %c0_0, %c0_1, %c0_2] : memref<1x16x16x128xbf16, #tpu.memory_space<vmem>>, vector<1x16x16x128xbf16>
    %1 = vector.shape_cast %0 : vector<1x16x16x128xbf16> to vector<16x16x128xbf16>
    %2 = arith.extf %1 : vector<16x16x128xbf16> to vector<16x16x128xf32>
    %c0_3 = arith.constant 0 : index
    %c0_4 = arith.constant 0 : index
    %3 = vector.load %arg2[%c0_3, %c0_4] : memref<1x128xf32, #tpu.memory_space<vmem>>, vector<1x128xf32>
    %4 = vector.shape_cast %3 : vector<1x128xf32> to vector<128xf32>
    %5 = vector.shape_cast %4 : vector<128xf32> to vector<1x1x128xf32>
    %6 = vector.broadcast %5 : vector<1x1x128xf32> to vector<16x16x128xf32>
    %7 = arith.mulf %2, %6 : vector<16x16x128xf32>
    %c0_5 = arith.constant 0 : index
    %c0_6 = arith.constant 0 : index
    %8 = vector.load %arg3[%c0_5, %c0_6] : memref<1x128xf32, #tpu.memory_space<vmem>>, vector<1x128xf32>
    %9 = vector.shape_cast %8 : vector<1x128xf32> to vector<128xf32>
    %10 = vector.shape_cast %9 : vector<128xf32> to vector<1x1x128xf32>
    %11 = vector.broadcast %10 : vector<1x1x128xf32> to vector<16x16x128xf32>
    %12 = arith.addf %7, %11 : vector<16x16x128xf32>
    %c0_7 = arith.constant 0 : index
    %c0_8 = arith.constant 0 : index
    %c0_9 = arith.constant 0 : index
    %c0_10 = arith.constant 0 : index
    %13 = vector.load %arg4[%c0_7, %c0_8, %c0_9, %c0_10] : memref<1x16x16x128xbf16, #tpu.memory_space<vmem>>, vector<1x16x16x128xbf16>
    %14 = vector.shape_cast %13 : vector<1x16x16x128xbf16> to vector<16x16x128xbf16>
    %15 = arith.extf %14 : vector<16x16x128xbf16> to vector<16x16x128xf32>
    %16 = arith.addf %12, %15 : vector<16x16x128xf32>
    %cst = arith.constant 0.000000e+00 : f32
    %17 = vector.broadcast %cst : f32 to vector<16x16x128xf32>
    %18 = arith.maximumf %16, %17 : vector<16x16x128xf32>
    %c0_11 = arith.constant 0 : index
    %c0_12 = arith.constant 0 : index
    %c0_13 = arith.constant 0 : index
    %c0_14 = arith.constant 0 : index
    %19 = vector.load %arg5[%c0_11, %c0_12, %c0_13, %c0_14] : memref<1x16x16x128xf32, #tpu.memory_space<vmem>>, vector<1x16x16x128xf32>
    %20 = vector.shape_cast %19 : vector<1x16x16x128xf32> to vector<16x16x128xf32>
    %21 = vector.shape_cast %18 : vector<16x16x128xf32> to vector<1x16x16x128xf32>
    tpu.vector_store %arg5[%c0_11, %c0_12, %c0_13, %c0_14], %21 {strides = array<i32>} : memref<1x16x16x128xf32, #tpu.memory_space<vmem>>, vector<1x16x16x128xf32>,
    return
  }
  func.func @transform_0(%arg0: i32) -> (i32, i32, i32, i32) {
    %c0_i32 = arith.constant 0 : i32
    %c0_i32_0 = arith.constant 0 : i32
    %c0_i32_1 = arith.constant 0 : i32
    %c0_i32_2 = arith.constant 0 : i32
    return %arg0, %c0_i32, %c0_i32_0, %c0_i32_1 : i32, i32, i32, i32
  }
  func.func @transform_1(%arg0: i32) -> (i32, i32) {
    %c0_i32 = arith.constant 0 : i32
    %c0_i32_0 = arith.constant 0 : i32
    %c0_i32_1 = arith.constant 0 : i32
    return %c0_i32, %c0_i32_0 : i32, i32
  }
  func.func @transform_2(%arg0: i32) -> (i32, i32) {
    %c0_i32 = arith.constant 0 : i32
    %c0_i32_0 = arith.constant 0 : i32
    %c0_i32_1 = arith.constant 0 : i32
    return %c0_i32, %c0_i32_0 : i32, i32
  }
  func.func @transform_3(%arg0: i32) -> (i32, i32, i32, i32) {
    %c0_i32 = arith.constant 0 : i32
    %c0_i32_0 = arith.constant 0 : i32
    %c0_i32_1 = arith.constant 0 : i32
    %c0_i32_2 = arith.constant 0 : i32
    return %arg0, %c0_i32, %c0_i32_0, %c0_i32_1 : i32, i32, i32, i32
  }
  func.func @transform_4(%arg0: i32) -> (i32, i32, i32, i32) {
    %c0_i32 = arith.constant 0 : i32
    %c0_i32_0 = arith.constant 0 : i32
    %c0_i32_1 = arith.constant 0 : i32
    %c0_i32_2 = arith.constant 0 : i32
    return %arg0, %c0_i32, %c0_i32_0, %c0_i32_1 : i32, i32, i32, i32
  }
}

module attributes {stable_mosaic.version = 11 : i64} {
  func.func @kernel(%arg0: i32, %arg1: memref<1x16x16x128xbf16, #tpu.memory_space<vmem>>, %arg2: memref<9x128x128xbf16, #tpu.memory_space<vmem>>, %arg3: memref<1x128xf32, #tpu.memory_space<vmem>>, %arg4: memref<1x128xf32, #tpu.memory_space<vmem>>, %arg5: memref<1x16x16x128xbf16, #tpu.memory_space<vmem>>, %arg6: memref<1x2x128xf32, #tpu.memory_space<vmem>>, %arg7: memref<18x18x128xbf16, #tpu.memory_space<vmem>>) attributes {dimension_semantics = [#tpu.dimension_semantics<parallel>], iteration_bounds = array<i64: 2>, scalar_prefetch = 0 : i64, scratch_operands = 1 : i64, tpu.core_type = #tpu.core_type<tc>, window_params = [{transform_indices = @transform_0, window_bounds = array<i64: 1, 16, 16, 128>}, {pipeline_mode = #tpu.pipeline_mode<synchronous>, transform_indices = @transform_1, window_bounds = array<i64: 9, 128, 128>}, {pipeline_mode = #tpu.pipeline_mode<synchronous>, transform_indices = @transform_2, window_bounds = array<i64: 1, 128>}, {pipeline_mode = #tpu.pipeline_mode<synchronous>, transform_indices = @transform_3, window_bounds = array<i64: 1, 128>}, {transform_indices = @transform_4, window_bounds = array<i64: 1, 16, 16, 128>}, {transform_indices = @transform_5, window_bounds = array<i64: 1, 2, 128>}]} {
    %cst = arith.constant 0.000000e+00 : bf16
    %0 = vector.broadcast %cst : bf16 to vector<18x18x128xbf16>
    %c0 = arith.constant 0 : index
    %c0_0 = arith.constant 0 : index
    %c0_1 = arith.constant 0 : index
    %1 = vector.load %arg7[%c0, %c0_0, %c0_1] : memref<18x18x128xbf16, #tpu.memory_space<vmem>>, vector<18x18x128xbf16>
    tpu.vector_store %arg7[%c0, %c0_0, %c0_1], %0 {strides = array<i32>} : memref<18x18x128xbf16, #tpu.memory_space<vmem>>, vector<18x18x128xbf16>,
    %c0_2 = arith.constant 0 : index
    %c0_3 = arith.constant 0 : index
    %c0_4 = arith.constant 0 : index
    %c0_5 = arith.constant 0 : index
    %2 = vector.load %arg1[%c0_2, %c0_3, %c0_4, %c0_5] : memref<1x16x16x128xbf16, #tpu.memory_space<vmem>>, vector<1x16x16x128xbf16>
    %3 = vector.shape_cast %2 : vector<1x16x16x128xbf16> to vector<16x16x128xbf16>
    %4 = arith.extf %3 : vector<16x16x128xbf16> to vector<16x16x128xf32>
    %c0_6 = arith.constant 0 : index
    %c0_7 = arith.constant 0 : index
    %5 = vector.load %arg3[%c0_6, %c0_7] : memref<1x128xf32, #tpu.memory_space<vmem>>, vector<1x128xf32>
    %6 = vector.shape_cast %5 : vector<1x128xf32> to vector<128xf32>
    %7 = vector.shape_cast %6 : vector<128xf32> to vector<1x1x128xf32>
    %8 = vector.broadcast %7 : vector<1x1x128xf32> to vector<16x16x128xf32>
    %9 = arith.mulf %4, %8 : vector<16x16x128xf32>
    %c0_8 = arith.constant 0 : index
    %c0_9 = arith.constant 0 : index
    %10 = vector.load %arg4[%c0_8, %c0_9] : memref<1x128xf32, #tpu.memory_space<vmem>>, vector<1x128xf32>
    %11 = vector.shape_cast %10 : vector<1x128xf32> to vector<128xf32>
    %12 = vector.shape_cast %11 : vector<128xf32> to vector<1x1x128xf32>
    %13 = vector.broadcast %12 : vector<1x1x128xf32> to vector<16x16x128xf32>
    %14 = arith.addf %9, %13 : vector<16x16x128xf32>
    %cst_10 = arith.constant 0.000000e+00 : f32
    %15 = vector.broadcast %cst_10 : f32 to vector<16x16x128xf32>
    %16 = arith.maximumf %14, %15 : vector<16x16x128xf32>
    %17 = arith.truncf %16 : vector<16x16x128xf32> to vector<16x16x128xbf16>
    %c1 = arith.constant 1 : index
    %c1_11 = arith.constant 1 : index
    %c0_12 = arith.constant 0 : index
    %18 = vector.load %arg7[%c1, %c1_11, %c0_12] : memref<18x18x128xbf16, #tpu.memory_space<vmem>>, vector<16x16x128xbf16>
    tpu.vector_store %arg7[%c1, %c1_11, %c0_12], %17 {strides = array<i32>} : memref<18x18x128xbf16, #tpu.memory_space<vmem>>, vector<16x16x128xbf16>,
    %cst_13 = arith.constant 0.000000e+00 : f32
    %19 = vector.broadcast %cst_13 : f32 to vector<256x128xf32>
    %c0_14 = arith.constant 0 : index
    %c0_15 = arith.constant 0 : index
    %c0_16 = arith.constant 0 : index
    %20 = vector.load %arg7[%c0_14, %c0_15, %c0_16] : memref<18x18x128xbf16, #tpu.memory_space<vmem>>, vector<16x16x128xbf16>
    %21 = vector.shape_cast %20 : vector<16x16x128xbf16> to vector<256x128xbf16>
    %c0_17 = arith.constant 0 : index
    %c0_18 = arith.constant 0 : index
    %c0_19 = arith.constant 0 : index
    %22 = vector.load %arg2[%c0_17, %c0_18, %c0_19] : memref<9x128x128xbf16, #tpu.memory_space<vmem>>, vector<1x128x128xbf16>
    %23 = vector.shape_cast %22 : vector<1x128x128xbf16> to vector<128x128xbf16>
    %cst_20 = arith.constant dense<0.000000e+00> : vector<256x128xf32>
    %24 = tpu.matmul %21, %23, %cst_20 {dimension_numbers = #tpu.dot_dimension_numbers<[1], [0], [0], [1], [0, 0, 1, 1], [], []>} : vector<256x128xbf16>, vector<128x128xbf16>, vector<256x128xf32> -> vector<256x128xf32>
    %25 = arith.addf %19, %24 : vector<256x128xf32>
    %c0_21 = arith.constant 0 : index
    %c1_22 = arith.constant 1 : index
    %c0_23 = arith.constant 0 : index
    %26 = vector.load %arg7[%c0_21, %c1_22, %c0_23] : memref<18x18x128xbf16, #tpu.memory_space<vmem>>, vector<16x16x128xbf16>
    %27 = vector.shape_cast %26 : vector<16x16x128xbf16> to vector<256x128xbf16>
    %c1_24 = arith.constant 1 : index
    %c0_25 = arith.constant 0 : index
    %c0_26 = arith.constant 0 : index
    %28 = vector.load %arg2[%c1_24, %c0_25, %c0_26] : memref<9x128x128xbf16, #tpu.memory_space<vmem>>, vector<1x128x128xbf16>
    %29 = vector.shape_cast %28 : vector<1x128x128xbf16> to vector<128x128xbf16>
    %cst_27 = arith.constant dense<0.000000e+00> : vector<256x128xf32>
    %30 = tpu.matmul %27, %29, %cst_27 {dimension_numbers = #tpu.dot_dimension_numbers<[1], [0], [0], [1], [0, 0, 1, 1], [], []>} : vector<256x128xbf16>, vector<128x128xbf16>, vector<256x128xf32> -> vector<256x128xf32>
    %31 = arith.addf %25, %30 : vector<256x128xf32>
    %c0_28 = arith.constant 0 : index
    %c2 = arith.constant 2 : index
    %c0_29 = arith.constant 0 : index
    %32 = vector.load %arg7[%c0_28, %c2, %c0_29] : memref<18x18x128xbf16, #tpu.memory_space<vmem>>, vector<16x16x128xbf16>
    %33 = vector.shape_cast %32 : vector<16x16x128xbf16> to vector<256x128xbf16>
    %c2_30 = arith.constant 2 : index
    %c0_31 = arith.constant 0 : index
    %c0_32 = arith.constant 0 : index
    %34 = vector.load %arg2[%c2_30, %c0_31, %c0_32] : memref<9x128x128xbf16, #tpu.memory_space<vmem>>, vector<1x128x128xbf16>
    %35 = vector.shape_cast %34 : vector<1x128x128xbf16> to vector<128x128xbf16>
    %cst_33 = arith.constant dense<0.000000e+00> : vector<256x128xf32>
    %36 = tpu.matmul %33, %35, %cst_33 {dimension_numbers = #tpu.dot_dimension_numbers<[1], [0], [0], [1], [0, 0, 1, 1], [], []>} : vector<256x128xbf16>, vector<128x128xbf16>, vector<256x128xf32> -> vector<256x128xf32>
    %37 = arith.addf %31, %36 : vector<256x128xf32>
    %c1_34 = arith.constant 1 : index
    %c0_35 = arith.constant 0 : index
    %c0_36 = arith.constant 0 : index
    %38 = vector.load %arg7[%c1_34, %c0_35, %c0_36] : memref<18x18x128xbf16, #tpu.memory_space<vmem>>, vector<16x16x128xbf16>
    %39 = vector.shape_cast %38 : vector<16x16x128xbf16> to vector<256x128xbf16>
    %c3 = arith.constant 3 : index
    %c0_37 = arith.constant 0 : index
    %c0_38 = arith.constant 0 : index
    %40 = vector.load %arg2[%c3, %c0_37, %c0_38] : memref<9x128x128xbf16, #tpu.memory_space<vmem>>, vector<1x128x128xbf16>
    %41 = vector.shape_cast %40 : vector<1x128x128xbf16> to vector<128x128xbf16>
    %cst_39 = arith.constant dense<0.000000e+00> : vector<256x128xf32>
    %42 = tpu.matmul %39, %41, %cst_39 {dimension_numbers = #tpu.dot_dimension_numbers<[1], [0], [0], [1], [0, 0, 1, 1], [], []>} : vector<256x128xbf16>, vector<128x128xbf16>, vector<256x128xf32> -> vector<256x128xf32>
    %43 = arith.addf %37, %42 : vector<256x128xf32>
    %c1_40 = arith.constant 1 : index
    %c1_41 = arith.constant 1 : index
    %c0_42 = arith.constant 0 : index
    %44 = vector.load %arg7[%c1_40, %c1_41, %c0_42] : memref<18x18x128xbf16, #tpu.memory_space<vmem>>, vector<16x16x128xbf16>
    %45 = vector.shape_cast %44 : vector<16x16x128xbf16> to vector<256x128xbf16>
    %c4 = arith.constant 4 : index
    %c0_43 = arith.constant 0 : index
    %c0_44 = arith.constant 0 : index
    %46 = vector.load %arg2[%c4, %c0_43, %c0_44] : memref<9x128x128xbf16, #tpu.memory_space<vmem>>, vector<1x128x128xbf16>
    %47 = vector.shape_cast %46 : vector<1x128x128xbf16> to vector<128x128xbf16>
    %cst_45 = arith.constant dense<0.000000e+00> : vector<256x128xf32>
    %48 = tpu.matmul %45, %47, %cst_45 {dimension_numbers = #tpu.dot_dimension_numbers<[1], [0], [0], [1], [0, 0, 1, 1], [], []>} : vector<256x128xbf16>, vector<128x128xbf16>, vector<256x128xf32> -> vector<256x128xf32>
    %49 = arith.addf %43, %48 : vector<256x128xf32>
    %c1_46 = arith.constant 1 : index
    %c2_47 = arith.constant 2 : index
    %c0_48 = arith.constant 0 : index
    %50 = vector.load %arg7[%c1_46, %c2_47, %c0_48] : memref<18x18x128xbf16, #tpu.memory_space<vmem>>, vector<16x16x128xbf16>
    %51 = vector.shape_cast %50 : vector<16x16x128xbf16> to vector<256x128xbf16>
    %c5 = arith.constant 5 : index
    %c0_49 = arith.constant 0 : index
    %c0_50 = arith.constant 0 : index
    %52 = vector.load %arg2[%c5, %c0_49, %c0_50] : memref<9x128x128xbf16, #tpu.memory_space<vmem>>, vector<1x128x128xbf16>
    %53 = vector.shape_cast %52 : vector<1x128x128xbf16> to vector<128x128xbf16>
    %cst_51 = arith.constant dense<0.000000e+00> : vector<256x128xf32>
    %54 = tpu.matmul %51, %53, %cst_51 {dimension_numbers = #tpu.dot_dimension_numbers<[1], [0], [0], [1], [0, 0, 1, 1], [], []>} : vector<256x128xbf16>, vector<128x128xbf16>, vector<256x128xf32> -> vector<256x128xf32>
    %55 = arith.addf %49, %54 : vector<256x128xf32>
    %c2_52 = arith.constant 2 : index
    %c0_53 = arith.constant 0 : index
    %c0_54 = arith.constant 0 : index
    %56 = vector.load %arg7[%c2_52, %c0_53, %c0_54] : memref<18x18x128xbf16, #tpu.memory_space<vmem>>, vector<16x16x128xbf16>
    %57 = vector.shape_cast %56 : vector<16x16x128xbf16> to vector<256x128xbf16>
    %c6 = arith.constant 6 : index
    %c0_55 = arith.constant 0 : index
    %c0_56 = arith.constant 0 : index
    %58 = vector.load %arg2[%c6, %c0_55, %c0_56] : memref<9x128x128xbf16, #tpu.memory_space<vmem>>, vector<1x128x128xbf16>
    %59 = vector.shape_cast %58 : vector<1x128x128xbf16> to vector<128x128xbf16>
    %cst_57 = arith.constant dense<0.000000e+00> : vector<256x128xf32>
    %60 = tpu.matmul %57, %59, %cst_57 {dimension_numbers = #tpu.dot_dimension_numbers<[1], [0], [0], [1], [0, 0, 1, 1], [], []>} : vector<256x128xbf16>, vector<128x128xbf16>, vector<256x128xf32> -> vector<256x128xf32>
    %61 = arith.addf %55, %60 : vector<256x128xf32>
    %c2_58 = arith.constant 2 : index
    %c1_59 = arith.constant 1 : index
    %c0_60 = arith.constant 0 : index
    %62 = vector.load %arg7[%c2_58, %c1_59, %c0_60] : memref<18x18x128xbf16, #tpu.memory_space<vmem>>, vector<16x16x128xbf16>
    %63 = vector.shape_cast %62 : vector<16x16x128xbf16> to vector<256x128xbf16>
    %c7 = arith.constant 7 : index
    %c0_61 = arith.constant 0 : index
    %c0_62 = arith.constant 0 : index
    %64 = vector.load %arg2[%c7, %c0_61, %c0_62] : memref<9x128x128xbf16, #tpu.memory_space<vmem>>, vector<1x128x128xbf16>
    %65 = vector.shape_cast %64 : vector<1x128x128xbf16> to vector<128x128xbf16>
    %cst_63 = arith.constant dense<0.000000e+00> : vector<256x128xf32>
    %66 = tpu.matmul %63, %65, %cst_63 {dimension_numbers = #tpu.dot_dimension_numbers<[1], [0], [0], [1], [0, 0, 1, 1], [], []>} : vector<256x128xbf16>, vector<128x128xbf16>, vector<256x128xf32> -> vector<256x128xf32>
    %67 = arith.addf %61, %66 : vector<256x128xf32>
    %c2_64 = arith.constant 2 : index
    %c2_65 = arith.constant 2 : index
    %c0_66 = arith.constant 0 : index
    %68 = vector.load %arg7[%c2_64, %c2_65, %c0_66] : memref<18x18x128xbf16, #tpu.memory_space<vmem>>, vector<16x16x128xbf16>
    %69 = vector.shape_cast %68 : vector<16x16x128xbf16> to vector<256x128xbf16>
    %c8 = arith.constant 8 : index
    %c0_67 = arith.constant 0 : index
    %c0_68 = arith.constant 0 : index
    %70 = vector.load %arg2[%c8, %c0_67, %c0_68] : memref<9x128x128xbf16, #tpu.memory_space<vmem>>, vector<1x128x128xbf16>
    %71 = vector.shape_cast %70 : vector<1x128x128xbf16> to vector<128x128xbf16>
    %cst_69 = arith.constant dense<0.000000e+00> : vector<256x128xf32>
    %72 = tpu.matmul %69, %71, %cst_69 {dimension_numbers = #tpu.dot_dimension_numbers<[1], [0], [0], [1], [0, 0, 1, 1], [], []>} : vector<256x128xbf16>, vector<128x128xbf16>, vector<256x128xf32> -> vector<256x128xf32>
    %73 = arith.addf %67, %72 : vector<256x128xf32>
    %74 = vector.shape_cast %73 : vector<256x128xf32> to vector<16x16x128xf32>
    %75 = arith.truncf %74 : vector<16x16x128xf32> to vector<16x16x128xbf16>
    %c0_70 = arith.constant 0 : index
    %c0_71 = arith.constant 0 : index
    %c0_72 = arith.constant 0 : index
    %c0_73 = arith.constant 0 : index
    %76 = vector.load %arg5[%c0_70, %c0_71, %c0_72, %c0_73] : memref<1x16x16x128xbf16, #tpu.memory_space<vmem>>, vector<1x16x16x128xbf16>
    %77 = vector.shape_cast %76 : vector<1x16x16x128xbf16> to vector<16x16x128xbf16>
    %78 = vector.shape_cast %75 : vector<16x16x128xbf16> to vector<1x16x16x128xbf16>
    tpu.vector_store %arg5[%c0_70, %c0_71, %c0_72, %c0_73], %78 {strides = array<i32>} : memref<1x16x16x128xbf16, #tpu.memory_space<vmem>>, vector<1x16x16x128xbf16>,
    %cst_74 = arith.constant dense<0.000000e+00> : vector<128xf32>
    %79 = vector.multi_reduction <add>, %73, %cst_74 [0] : vector<256x128xf32> to vector<128xf32>
    %80 = vector.shape_cast %79 : vector<128xf32> to vector<1x128xf32>
    %cst_75 = arith.constant 3.906250e-03 : f32
    %81 = vector.broadcast %cst_75 : f32 to vector<1x128xf32>
    %82 = arith.mulf %80, %81 : vector<1x128xf32>
    %83 = vector.broadcast %82 : vector<1x128xf32> to vector<256x128xf32>
    %84 = arith.subf %73, %83 : vector<256x128xf32>
    %85 = arith.mulf %84, %84 : vector<256x128xf32>
    %cst_76 = arith.constant dense<0.000000e+00> : vector<128xf32>
    %86 = vector.multi_reduction <add>, %85, %cst_76 [0] : vector<256x128xf32> to vector<128xf32>
    %87 = vector.shape_cast %86 : vector<128xf32> to vector<1x128xf32>
    %88 = tpu.concatenate %80, %87 in 0 : vector<1x128xf32>, vector<1x128xf32> -> vector<2x128xf32>
    %c0_77 = arith.constant 0 : index
    %c0_78 = arith.constant 0 : index
    %c0_79 = arith.constant 0 : index
    %89 = vector.load %arg6[%c0_77, %c0_78, %c0_79] : memref<1x2x128xf32, #tpu.memory_space<vmem>>, vector<1x2x128xf32>
    %90 = vector.shape_cast %89 : vector<1x2x128xf32> to vector<2x128xf32>
    %91 = vector.shape_cast %88 : vector<2x128xf32> to vector<1x2x128xf32>
    tpu.vector_store %arg6[%c0_77, %c0_78, %c0_79], %91 {strides = array<i32>} : memref<1x2x128xf32, #tpu.memory_space<vmem>>, vector<1x2x128xf32>,
    return
  }
  func.func @transform_0(%arg0: i32) -> (i32, i32, i32, i32) {
    %c0_i32 = arith.constant 0 : i32
    %c0_i32_0 = arith.constant 0 : i32
    %c0_i32_1 = arith.constant 0 : i32
    %c0_i32_2 = arith.constant 0 : i32
    return %arg0, %c0_i32, %c0_i32_0, %c0_i32_1 : i32, i32, i32, i32
  }
  func.func @transform_1(%arg0: i32) -> (i32, i32, i32) {
    %c0_i32 = arith.constant 0 : i32
    %c0_i32_0 = arith.constant 0 : i32
    %c0_i32_1 = arith.constant 0 : i32
    %c0_i32_2 = arith.constant 0 : i32
    return %c0_i32, %c0_i32_0, %c0_i32_1 : i32, i32, i32
  }
  func.func @transform_2(%arg0: i32) -> (i32, i32) {
    %c0_i32 = arith.constant 0 : i32
    %c0_i32_0 = arith.constant 0 : i32
    %c0_i32_1 = arith.constant 0 : i32
    return %c0_i32, %c0_i32_0 : i32, i32
  }
  func.func @transform_3(%arg0: i32) -> (i32, i32) {
    %c0_i32 = arith.constant 0 : i32
    %c0_i32_0 = arith.constant 0 : i32
    %c0_i32_1 = arith.constant 0 : i32
    return %c0_i32, %c0_i32_0 : i32, i32
  }
  func.func @transform_4(%arg0: i32) -> (i32, i32, i32, i32) {
    %c0_i32 = arith.constant 0 : i32
    %c0_i32_0 = arith.constant 0 : i32
    %c0_i32_1 = arith.constant 0 : i32
    %c0_i32_2 = arith.constant 0 : i32
    return %arg0, %c0_i32, %c0_i32_0, %c0_i32_1 : i32, i32, i32, i32
  }
  func.func @transform_5(%arg0: i32) -> (i32, i32, i32) {
    %c0_i32 = arith.constant 0 : i32
    %c0_i32_0 = arith.constant 0 : i32
    %c0_i32_1 = arith.constant 0 : i32
    return %arg0, %c0_i32, %c0_i32_0 : i32, i32, i32
  }
}

</mosaic_0001>

<bundles_post_ra>
// kernel: basic_block_forward.5
= control target key start
LH: loop header
LB: loop body
LE: loop exit
PB: predicated region body
PF: predicated region fallthrough
CT: control target
= control target key end

     0   :  { %s804_s15 = smov 0   ;;  %s972_s0 = inlined_call_operand.vmem [shape: bf16[2,16,16,128], index: 0, kind: input, shape index: {}]   ;;  %s973_s1 = inlined_call_operand.vmem [shape: f32[1,128], index: 1, kind: input, shape index: {}]   ;;  %s974_s2 = inlined_call_operand.vmem [shape: f32[1,128], index: 2, kind: input, shape index: {}]   ;;  %s975_s3 = inlined_call_operand.vmem [shape: bf16[2,16,16,128], index: 3, kind: input, shape index: {}]   ;;  %s976_s4 = inlined_call_operand.vmem [shape: f32[2,16,16,128], index: 4, kind: output, shape index: {}]  }
   0x1 LB: > { %s587_s16 = sadd.s32 4294967295, %s777_s15   ;;  %p591_p0 = scmp.ge.s32.totalorder %s777_s15, 1  ;;  %s777_s15 = sphi %s804_s15, %s14_s15  }
   0x2   : > { %p172_p1 = scmp.lt.s32.totalorder %s777_s15, 3 }
   0x4   : > { %p173_p2 = pnand %p591_p0, %p172_p1 }
   0x5   : > { %p203_p3 = scmp.lt.s32.totalorder (!%p173_p2), %s587_s16, 1 }
   0x6   : > { %176 = sbr.rel (%p173_p2) target bundleno = 69 (0x45), region = 36 }
   0xb   : > { %s978_s16 = smov (!%p203_p3, %s587_s16), 1  ;;  %v828_v0 = vld [vmem:[%s973_s1] ss:$0 sm:$0xff] }
   0xc   : > { %s602_s17 = sshll.u32 %s978_s16, 7  ;;  %v839_v11 = vld [vmem:[%s974_s2] ss:$0 sm:$0xff]  ;;  %s604_s28 = sshll.u32 %s978_s16, 8 }
   0xd   : > { %s818_s20 = scalar_lea.vmem %s972_s0, %s602_s17  ;;  %s823_s23 = scalar_lea.vmem %s975_s3, %s602_s17 }
   0xe   : > { %v606_v1 = vld [vmem:[%s818_s20] sm:$0xff]   ;;  %v733_v3 = vld [vmem:[%s818_s20 + $0x8] sm:$0xff]   ;;  %v734_v9 = vld [vmem:[%s818_s20 + $0x10] sm:$0xff]   ;;  %s859_s5 = scalar_lea.vmem %s976_s4, %s604_s28 }
   0xf   : > { %v670_v2 = vld [vmem:[%s823_s23] sm:$0xff]   ;;  %v607_v4 = vunpack.c.l.bf16 %v606_v1  ;;  %v608_v6 = vunpack.c.h.bf16 %v606_v1  ;;  %v748_v8 = vld [vmem:[%s823_s23 + $0x8] sm:$0xff]   ;;  %v749_v10 = vld [vmem:[%s823_s23 + $0x10] sm:$0xff]   ;;  %v611_v12 = vunpack.c.l.bf16 %v733_v3  ;;  %v612_v14 = vunpack.c.h.bf16 %v733_v3 }
  0x10   : > { %v671_v5 = vunpack.c.l.bf16 %v670_v2  ;;  %v672_v7 = vunpack.c.h.bf16 %v670_v2  ;;  %v675_v13 = vunpack.c.l.bf16 %v748_v8  ;;  %v676_v15 = vunpack.c.h.bf16 %v748_v8  ;;  %v735_v16 = vld [vmem:[%s818_s20 + $0x18] sm:$0xff]   ;;  %v736_v42 = vld [vmem:[%s818_s20 + $0x20] sm:$0xff]   ;;  %v737_v52 = vld [vmem:[%s818_s20 + $0x28] sm:$0xff]  }
  0x11   : > { %v289_v17 = vmul.f32 %v607_v4, %v828_v0  ;;  %v290_v18 = vmul.f32 %v608_v6, %v828_v0  ;;  %v615_v19 = vunpack.c.l.bf16 %v734_v9  ;;  %v679_v20 = vunpack.c.l.bf16 %v749_v10  ;;  %v750_v21 = vld [vmem:[%s823_s23 + $0x18] sm:$0xff]   ;;  %v751_v47 = vld [vmem:[%s823_s23 + $0x20] sm:$0xff]   ;;  %v752_v57 = vld [vmem:[%s823_s23 + $0x28] sm:$0xff]  }
  0x12   : > { %v291_v22 = vmul.f32 %v611_v12, %v828_v0  ;;  %v292_v23 = vmul.f32 %v612_v14, %v828_v0  ;;  %v616_v24 = vunpack.c.h.bf16 %v734_v9  ;;  %v680_v25 = vunpack.c.h.bf16 %v749_v10  ;;  %v738_v62 = vld [vmem:[%s818_s20 + $0x30] sm:$0xff]   ;;  %v739_v14 = vld [vmem:[%s818_s20 + $0x38] sm:$0xff]  }
  0x13   : > { %v328_v26 = vadd.f32 %v839_v11, %v289_v17  ;;  %v329_v27 = vadd.f32 %v839_v11, %v290_v18  ;;  %v293_v28 = vmul.f32 %v615_v19, %v828_v0  ;;  %v619_v29 = vunpack.c.l.bf16 %v735_v16  ;;  %v753_v4 = vld [vmem:[%s823_s23 + $0x30] sm:$0xff]  }
  0x14   : > { %v330_v30 = vadd.f32 %v839_v11, %v291_v22  ;;  %v331_v31 = vadd.f32 %v839_v11, %v292_v23  ;;  %v294_v32 = vmul.f32 %v616_v24, %v828_v0  ;;  %v683_v33 = vunpack.c.l.bf16 %v750_v21  ;;  %v754_v23 = vld [vmem:[%s823_s23 + $0x38] sm:$0xff]  }
  0x15   : > { %v424_v34 = vadd.f32 %v671_v5, %v328_v26  ;;  %v425_v35 = vadd.f32 %v672_v7, %v329_v27  ;;  %v332_v36 = vadd.f32 %v839_v11, %v293_v28  ;;  %v295_v37 = vmul.f32 %v619_v29, %v828_v0 }
  0x16   : > { %v426_v38 = vadd.f32 %v675_v13, %v330_v30  ;;  %v427_v39 = vadd.f32 %v676_v15, %v331_v31  ;;  %v333_v40 = vadd.f32 %v839_v11, %v294_v32  ;;  %v620_v41 = vunpack.c.h.bf16 %v735_v16  ;;  %v740_v32 = vld [vmem:[%s818_s20 + $0x40] sm:$0xff]  }
  0x17   : > { %v456_v43 = vmax.f32 %v424_v34, 0.0  ;;  %v457_v44 = vmax.f32 %v425_v35, 0.0  ;;  %v428_v45 = vadd.f32 %v679_v20, %v332_v36  ;;  %v334_v46 = vadd.f32 %v839_v11, %v295_v37  ;;  %v755_v37 = vld [vmem:[%s823_s23 + $0x40] sm:$0xff]  }
  0x18   : > { %v458_v48 = vmax.f32 %v426_v38, 0.0  ;;  %v459_v49 = vmax.f32 %v427_v39, 0.0  ;;  %v429_v50 = vadd.f32 %v680_v25, %v333_v40  ;;  %v296_v51 = vmul.f32 %v620_v41, %v828_v0 }
  0x19   : > { %488 = vst [vmem:[%s859_s5] sm:$0xff] %v456_v43  ;;  %489 = vst [vmem:[%s859_s5 + $0x8] sm:$0xff] %v457_v44  ;;  %v460_v53 = vmax.f32 %v428_v45, 0.0  ;;  %v430_v54 = vadd.f32 %v683_v33, %v334_v46  ;;  %v684_v55 = vunpack.c.h.bf16 %v750_v21  ;;  %v623_v56 = vunpack.c.l.bf16 %v736_v42  ;;  %v741_v46 = vld [vmem:[%s818_s20 + $0x48] sm:$0xff]  }
  0x1a   : > { %490 = vst [vmem:[%s859_s5 + $0x10] sm:$0xff] %v458_v48  ;;  %491 = vst [vmem:[%s859_s5 + $0x18] sm:$0xff] %v459_v49  ;;  %v461_v58 = vmax.f32 %v429_v50, 0.0  ;;  %v335_v59 = vadd.f32 %v839_v11, %v296_v51  ;;  %v687_v60 = vunpack.c.l.bf16 %v751_v47  ;;  %v624_v61 = vunpack.c.h.bf16 %v736_v42 }
  0x1b   : > { %492 = vst [vmem:[%s859_s5 + $0x20] sm:$0xff] %v460_v53  ;;  %v462_v63 = vmax.f32 %v430_v54, 0.0  ;;  %v297_v1 = vmul.f32 %v623_v56, %v828_v0  ;;  %v688_v2 = vunpack.c.h.bf16 %v751_v47  ;;  %v627_v3 = vunpack.c.l.bf16 %v737_v52  ;;  %v756_v47 = vld [vmem:[%s823_s23 + $0x48] sm:$0xff]   ;;  %v742_v56 = vld [vmem:[%s818_s20 + $0x50] sm:$0xff]  }
  0x1c   : > { %493 = vst [vmem:[%s859_s5 + $0x28] sm:$0xff] %v461_v58  ;;  %v431_v5 = vadd.f32 %v684_v55, %v335_v59  ;;  %v298_v6 = vmul.f32 %v624_v61, %v828_v0  ;;  %v691_v7 = vunpack.c.l.bf16 %v752_v57  ;;  %v628_v8 = vunpack.c.h.bf16 %v737_v52  ;;  %v757_v61 = vld [vmem:[%s823_s23 + $0x50] sm:$0xff]  }
  0x1d   : > { %494 = vst [vmem:[%s859_s5 + $0x30] sm:$0xff] %v462_v63  ;;  %v336_v9 = vadd.f32 %v839_v11, %v297_v1  ;;  %v299_v10 = vmul.f32 %v627_v3, %v828_v0  ;;  %v692_v12 = vunpack.c.h.bf16 %v752_v57  ;;  %v631_v13 = vunpack.c.l.bf16 %v738_v62 }
  0x1e   : > { %v463_v15 = vmax.f32 %v431_v5, 0.0  ;;  %v337_v16 = vadd.f32 %v839_v11, %v298_v6  ;;  %v300_v17 = vmul.f32 %v628_v8, %v828_v0  ;;  %v695_v18 = vunpack.c.l.bf16 %v753_v4 }
  0x1f   : > { %v432_v19 = vadd.f32 %v687_v60, %v336_v9  ;;  %v338_v20 = vadd.f32 %v839_v11, %v299_v10  ;;  %v301_v21 = vmul.f32 %v631_v13, %v828_v0  ;;  %v632_v22 = vunpack.c.h.bf16 %v738_v62 }
  0x20   : > { %495 = vst [vmem:[%s859_s5 + $0x38] sm:$0xff] %v463_v15  ;;  %v433_v24 = vadd.f32 %v688_v2, %v337_v16  ;;  %v339_v25 = vadd.f32 %v839_v11, %v300_v17  ;;  %v696_v26 = vunpack.c.h.bf16 %v753_v4  ;;  %v635_v27 = vunpack.c.l.bf16 %v739_v14  ;;  %v758_v17 = vld [vmem:[%s823_s23 + $0x58] sm:$0xff]  }
  0x21   : > { %v464_v28 = vmax.f32 %v432_v19, 0.0  ;;  %v434_v29 = vadd.f32 %v691_v7, %v338_v20  ;;  %v340_v30 = vadd.f32 %v839_v11, %v301_v21  ;;  %v302_v31 = vmul.f32 %v632_v22, %v828_v0 }
  0x22   : > { %v465_v33 = vmax.f32 %v433_v24, 0.0  ;;  %v435_v34 = vadd.f32 %v692_v12, %v339_v25  ;;  %v303_v35 = vmul.f32 %v635_v27, %v828_v0  ;;  %v699_v36 = vunpack.c.l.bf16 %v754_v23  ;;  %v743_v12 = vld [vmem:[%s818_s20 + $0x58] sm:$0xff]  }
  0x23   : > { %496 = vst [vmem:[%s859_s5 + $0x40] sm:$0xff] %v464_v28  ;;  %v466_v38 = vmax.f32 %v434_v29, 0.0  ;;  %v436_v39 = vadd.f32 %v695_v18, %v340_v30  ;;  %v341_v40 = vadd.f32 %v839_v11, %v302_v31  ;;  %v636_v41 = vunpack.c.h.bf16 %v739_v14  ;;  %v759_v31 = vld [vmem:[%s823_s23 + $0x60] sm:$0xff]  }
  0x24   : > { %497 = vst [vmem:[%s859_s5 + $0x48] sm:$0xff] %v465_v33  ;;  %v467_v42 = vmax.f32 %v435_v34, 0.0  ;;  %v342_v43 = vadd.f32 %v839_v11, %v303_v35  ;;  %v700_v44 = vunpack.c.h.bf16 %v754_v23  ;;  %v639_v45 = vunpack.c.l.bf16 %v740_v32 }
  0x25   : > { %498 = vst [vmem:[%s859_s5 + $0x50] sm:$0xff] %v466_v38  ;;  %v468_v48 = vmax.f32 %v436_v39, 0.0  ;;  %v437_v49 = vadd.f32 %v696_v26, %v341_v40  ;;  %v304_v50 = vmul.f32 %v636_v41, %v828_v0  ;;  %v703_v51 = vunpack.c.l.bf16 %v755_v37  ;;  %v744_v26 = vld [vmem:[%s818_s20 + $0x60] sm:$0xff]   ;;  %v745_v40 = vld [vmem:[%s818_s20 + $0x68] sm:$0xff]  }
  0x26   : > { %499 = vst [vmem:[%s859_s5 + $0x58] sm:$0xff] %v467_v42  ;;  %v438_v52 = vadd.f32 %v699_v36, %v342_v43  ;;  %v305_v53 = vmul.f32 %v639_v45, %v828_v0  ;;  %v640_v54 = vunpack.c.h.bf16 %v740_v32  ;;  %v704_v55 = vunpack.c.h.bf16 %v755_v37  ;;  %v760_v41 = vld [vmem:[%s823_s23 + $0x68] sm:$0xff]  }
  0x27   : > { %500 = vst [vmem:[%s859_s5 + $0x60] sm:$0xff] %v468_v48  ;;  %v469_v57 = vmax.f32 %v437_v49, 0.0  ;;  %v343_v58 = vadd.f32 %v839_v11, %v304_v50  ;;  %v643_v59 = vunpack.c.l.bf16 %v741_v46  ;;  %v707_v60 = vunpack.c.l.bf16 %v756_v47  ;;  %v746_v50 = vld [vmem:[%s818_s20 + $0x70] sm:$0xff]  }
  0x28   : > { %v470_v62 = vmax.f32 %v438_v52, 0.0  ;;  %v344_v63 = vadd.f32 %v839_v11, %v305_v53  ;;  %v306_v1 = vmul.f32 %v640_v54, %v828_v0  ;;  %v644_v2 = vunpack.c.h.bf16 %v741_v46 }
  0x29   : > { %501 = vst [vmem:[%s859_s5 + $0x68] sm:$0xff] %v469_v57  ;;  %v439_v3 = vadd.f32 %v700_v44, %v343_v58  ;;  %v307_v4 = vmul.f32 %v643_v59, %v828_v0  ;;  %v708_v5 = vunpack.c.h.bf16 %v756_v47  ;;  %v647_v6 = vunpack.c.l.bf16 %v742_v56  ;;  %v761_v59 = vld [vmem:[%s823_s23 + $0x70] sm:$0xff]  }
  0x2a   : > { %502 = vst [vmem:[%s859_s5 + $0x70] sm:$0xff] %v470_v62  ;;  %v440_v7 = vadd.f32 %v703_v51, %v344_v63  ;;  %v345_v8 = vadd.f32 %v839_v11, %v306_v1  ;;  %v308_v9 = vmul.f32 %v644_v2, %v828_v0  ;;  %v711_v10 = vunpack.c.l.bf16 %v757_v61 }
  0x2b   : > { %v471_v13 = vmax.f32 %v439_v3, 0.0  ;;  %v346_v14 = vadd.f32 %v839_v11, %v307_v4  ;;  %v309_v15 = vmul.f32 %v647_v6, %v828_v0  ;;  %v648_v16 = vunpack.c.h.bf16 %v742_v56 }
  0x2c   : > { %v472_v18 = vmax.f32 %v440_v7, 0.0  ;;  %v441_v19 = vadd.f32 %v704_v55, %v345_v8  ;;  %v347_v20 = vadd.f32 %v839_v11, %v308_v9  ;;  %v712_v21 = vunpack.c.h.bf16 %v757_v61 }
  0x2d   : > { %503 = vst [vmem:[%s859_s5 + $0x78] sm:$0xff] %v471_v13  ;;  %v442_v22 = vadd.f32 %v707_v60, %v346_v14  ;;  %v348_v23 = vadd.f32 %v839_v11, %v309_v15  ;;  %v310_v24 = vmul.f32 %v648_v16, %v828_v0  ;;  %v651_v25 = vunpack.c.l.bf16 %v743_v12 }
  0x2e   : > { %504 = vst [vmem:[%s859_s5 + $0x80] sm:$0xff] %v472_v18  ;;  %v473_v27 = vmax.f32 %v441_v19, 0.0  ;;  %v443_v28 = vadd.f32 %v708_v5, %v347_v20  ;;  %v715_v29 = vunpack.c.l.bf16 %v758_v17  ;;  %v652_v30 = vunpack.c.h.bf16 %v743_v12  ;;  %v747_v5 = vld [vmem:[%s818_s20 + $0x78] sm:$0xff]  }
  0x2f   : > { %v474_v32 = vmax.f32 %v442_v22, 0.0  ;;  %v444_v33 = vadd.f32 %v711_v10, %v348_v23  ;;  %v349_v34 = vadd.f32 %v839_v11, %v310_v24  ;;  %v311_v35 = vmul.f32 %v651_v25, %v828_v0  ;;  %v762_v10 = vld [vmem:[%s823_s23 + $0x78] sm:$0xff]  }
  0x30   : > { %505 = vst [vmem:[%s859_s5 + $0x88] sm:$0xff] %v473_v27  ;;  %v475_v36 = vmax.f32 %v443_v28, 0.0  ;;  %v312_v37 = vmul.f32 %v652_v30, %v828_v0  ;;  %v716_v38 = vunpack.c.h.bf16 %v758_v17  ;;  %v655_v39 = vunpack.c.l.bf16 %v744_v26 }
  0x31   : > { %506 = vst [vmem:[%s859_s5 + $0x90] sm:$0xff] %v474_v32  ;;  %v476_v42 = vmax.f32 %v444_v33, 0.0  ;;  %v445_v43 = vadd.f32 %v712_v21, %v349_v34  ;;  %v350_v44 = vadd.f32 %v839_v11, %v311_v35  ;;  %v719_v45 = vunpack.c.l.bf16 %v759_v31 }
  0x32   : > { %507 = vst [vmem:[%s859_s5 + $0x98] sm:$0xff] %v475_v36  ;;  %v351_v46 = vadd.f32 %v839_v11, %v312_v37  ;;  %v313_v47 = vmul.f32 %v655_v39, %v828_v0  ;;  %v656_v48 = vunpack.c.h.bf16 %v744_v26  ;;  %v720_v49 = vunpack.c.h.bf16 %v759_v31 }
  0x33   : > { %508 = vst [vmem:[%s859_s5 + $0xa0] sm:$0xff] %v476_v42  ;;  %v477_v51 = vmax.f32 %v445_v43, 0.0  ;;  %v446_v52 = vadd.f32 %v715_v29, %v350_v44  ;;  %v659_v53 = vunpack.c.l.bf16 %v745_v40  ;;  %v723_v54 = vunpack.c.l.bf16 %v760_v41 }
  0x34   : > { %v447_v55 = vadd.f32 %v716_v38, %v351_v46  ;;  %v352_v56 = vadd.f32 %v839_v11, %v313_v47  ;;  %v314_v57 = vmul.f32 %v656_v48, %v828_v0  ;;  %v660_v58 = vunpack.c.h.bf16 %v745_v40 }
  0x35   : > { %509 = vst [vmem:[%s859_s5 + $0xa8] sm:$0xff] %v477_v51  ;;  %v478_v60 = vmax.f32 %v446_v52, 0.0  ;;  %v315_v61 = vmul.f32 %v659_v53, %v828_v0  ;;  %v724_v62 = vunpack.c.h.bf16 %v760_v41  ;;  %v663_v63 = vunpack.c.l.bf16 %v746_v50 }
  0x36   : > { %v479_v1 = vmax.f32 %v447_v55, 0.0  ;;  %v448_v2 = vadd.f32 %v719_v45, %v352_v56  ;;  %v353_v3 = vadd.f32 %v839_v11, %v314_v57  ;;  %v316_v4 = vmul.f32 %v660_v58, %v828_v0 }
  0x37   : > { %510 = vst [vmem:[%s859_s5 + $0xb0] sm:$0xff] %v478_v60  ;;  %v354_v6 = vadd.f32 %v839_v11, %v315_v61  ;;  %v317_v7 = vmul.f32 %v663_v63, %v828_v0  ;;  %v727_v8 = vunpack.c.l.bf16 %v761_v59  ;;  %v664_v9 = vunpack.c.h.bf16 %v746_v50 }
  0x38   : > { %511 = vst [vmem:[%s859_s5 + $0xb8] sm:$0xff] %v479_v1  ;;  %v480_v12 = vmax.f32 %v448_v2, 0.0  ;;  %v449_v13 = vadd.f32 %v720_v49, %v353_v3  ;;  %v355_v14 = vadd.f32 %v839_v11, %v316_v4  ;;  %v728_v15 = vunpack.c.h.bf16 %v761_v59 }
  0x39   : > { %v450_v16 = vadd.f32 %v723_v54, %v354_v6  ;;  %v356_v17 = vadd.f32 %v839_v11, %v317_v7  ;;  %v318_v18 = vmul.f32 %v664_v9, %v828_v0  ;;  %v667_v19 = vunpack.c.l.bf16 %v747_v5 }
  0x3a   : > { %512 = vst [vmem:[%s859_s5 + $0xc0] sm:$0xff] %v480_v12  ;;  %v481_v20 = vmax.f32 %v449_v13, 0.0  ;;  %v451_v21 = vadd.f32 %v724_v62, %v355_v14  ;;  %v731_v22 = vunpack.c.l.bf16 %v762_v10  ;;  %v668_v23 = vunpack.c.h.bf16 %v747_v5 }
  0x3b   : > { %v482_v24 = vmax.f32 %v450_v16, 0.0  ;;  %v452_v25 = vadd.f32 %v727_v8, %v356_v17  ;;  %v357_v26 = vadd.f32 %v839_v11, %v318_v18  ;;  %v319_v27 = vmul.f32 %v667_v19, %v828_v0 }
  0x3c   : > { %513 = vst [vmem:[%s859_s5 + $0xc8] sm:$0xff] %v481_v20  ;;  %v483_v28 = vmax.f32 %v451_v21, 0.0  ;;  %v320_v29 = vmul.f32 %v668_v23, %v828_v0  ;;  %v732_v30 = vunpack.c.h.bf16 %v762_v10 }
  0x3d   : > { %514 = vst [vmem:[%s859_s5 + $0xd0] sm:$0xff] %v482_v24  ;;  %v484_v31 = vmax.f32 %v452_v25, 0.0  ;;  %v453_v32 = vadd.f32 %v728_v15, %v357_v26  ;;  %v358_v33 = vadd.f32 %v839_v11, %v319_v27 }
  0x3e   : > { %515 = vst [vmem:[%s859_s5 + $0xd8] sm:$0xff] %v483_v28  ;;  %v359_v34 = vadd.f32 %v839_v11, %v320_v29 }
  0x3f   : > { %516 = vst [vmem:[%s859_s5 + $0xe0] sm:$0xff] %v484_v31  ;;  %v485_v35 = vmax.f32 %v453_v32, 0.0  ;;  %v454_v36 = vadd.f32 %v731_v22, %v358_v33 }
  0x40   : > { %v455_v37 = vadd.f32 %v732_v30, %v359_v34 }
  0x41   : > { %517 = vst [vmem:[%s859_s5 + $0xe8] sm:$0xff] %v485_v35  ;;  %v486_v38 = vmax.f32 %v454_v36, 0.0 }
  0x42   : > { %v487_v39 = vmax.f32 %v455_v37, 0.0 }
  0x43   : > { %518 = vst [vmem:[%s859_s5 + $0xf0] sm:$0xff] %v486_v38 }
  0x44   : > { %519 = vst [vmem:[%s859_s5 + $0xf8] sm:$0xff] %v487_v39 }
  0x45 PF: > { %s14_s15 = sadd.s32 1, %s777_s15  }
  0x46   : > { %p11_p4 = scmp.ge.s32.totalorder %s14_s15, 4  }
  0x48   :  { %13 = sbr.rel (!%p11_p4) target bundleno = 1 (0x1), region = 69 }

// kernel: basic_block_forward.3
= control target key start
LH: loop header
LB: loop body
LE: loop exit
PB: predicated region body
PF: predicated region fallthrough
CT: control target
= control target key end

     0   :  { %s7322_s12 = smov 0   ;;  %s10139_s0 = inlined_call_operand.vmem [shape: bf16[2,16,16,128], index: 0, kind: input, shape index: {}]   ;;  %s10140_s1 = inlined_call_operand.vmem [shape: bf16[9,128,128], index: 1, kind: input, shape index: {}]   ;;  %s10141_s2 = inlined_call_operand.vmem [shape: bf16[2,16,16,128], index: 2, kind: output, shape index: {0}]   ;;  %s10142_s3 = inlined_call_operand.vmem [shape: f32[2,2,128], index: 3, kind: output, shape index: {1}]  }
   0x1 LB: > { %s5906_s13 = sadd.s32 4294967295, %s7299_s12   ;;  %p5910_p0 = scmp.ge.s32.totalorder %s7299_s12, 1  ;;  %s7299_s12 = sphi %s7322_s12, %s14_s12  }
   0x2   : > { %p140_p1 = scmp.lt.s32.totalorder %s7299_s12, 3 }
   0x4   : > { %p141_p2 = pnand %p5910_p0, %p140_p1 }
   0x6   : > { %144 = sbr.rel (%p141_p2) target bundleno = 733 (0x2dd), region = 28 }
   0xb   : > { %v7144_v0 = vld [vmem:[%s10140_s1 + $0x78] sm:$0xff]   ;;  %v7336_v1 = vld [vmem:[%s10140_s1 + $0x70] sm:$0xff]   ;;  %v7301_v2 = vmov 0   ;;  %p168_p3 = scmp.lt.s32.totalorder %s5906_s13, 1  ;;  %v7146_v3 = vld [vmem:[%s10140_s1 + $0x68] sm:$0xff]   ;;  %vm593_vm1 = vcmask 1043456  }
   0xc   : > { %183 = vst [vmem:[#allocation2] sm:$0xf] %v7301_v2  ;;  %184 = vst [vmem:[#allocation2 + $0x4] sm:$0xf] %v7301_v2  ;;  %6687 = vmatprep.subr.bf16.mxu0 %v7144_v0  ;;  %7119 = vmatprep.subr.bf16.mxu1 %v7144_v0  ;;  %v7147_v4 = vld [vmem:[%s10140_s1 + $0x60] sm:$0xff]   ;;  %v7148_v10 = vld [vmem:[%s10140_s1 + $0x58] sm:$0xff]  }
   0xd   : > { %185 = vst [vmem:[#allocation2 + $0x8] sm:$0x1] %v7301_v2  ;;  %186 = vst [vmem:[#allocation2 + $0xc] sm:$0xf] %v7301_v2  ;;  %6688 = vmatpush3.bf16.msra.mxu0 %v7144_v0  ;;  %7127 = vmatpush3.bf16.msra.mxu1 %v7144_v0  ;;  %s10368_s13 = smov (!%p168_p3, %s5906_s13), 1  ;;  %vm600_vm2 = vcmask 1040384  }
   0xe   : > { %187 = vst [vmem:[#allocation2 + $0x10] sm:$0xf] %v7301_v2  ;;  %188 = vst [vmem:[#allocation2 + $0x14] sm:$0x1] %v7301_v2  ;;  %6689 = vmatprep.subr.bf16.mxu0 %v7336_v1  ;;  %7120 = vmatprep.subr.bf16.mxu1 %v7336_v1  ;;  %s6342_s20 = sshll.u32 %s10368_s13, 7  ;;  %v10168_v30 = vmov 0 }
   0xf   : > { %189 = vst [vmem:[#allocation2 + $0x18] sm:$0xf] %v7301_v2  ;;  %190 = vst [vmem:[#allocation2 + $0x1c] sm:$0xf] %v7301_v2  ;;  %s7360_s25 = scalar_lea.vmem %s10139_s0, %s6342_s20  ;;  %vm774_vm0 = vsmask.f32 3328 }
  0x10   : > { %191 = vst [vmem:[#allocation2 + $0x20] sm:$0x1] %v7301_v2  ;;  %192 = vst [vmem:[#allocation2 + $0x24] sm:$0xf] %v7301_v2  ;;  %v251_v14 = vld [vmem:[%s7360_s25 + $0x38] sm:$0xf] }
  0x11   : > { %193 = vst [vmem:[#allocation2 + $0x28] sm:$0xf] %v7301_v2  ;;  %194 = vst [vmem:[#allocation2 + $0x2c] sm:$0x1] %v7301_v2  ;;  %6690 = vmatpush3.bf16.msra.mxu0 %v7336_v1  ;;  %7128 = vmatpush3.bf16.msra.mxu1 %v7336_v1  ;;  %vm775_vm3 = vsmask.f32 7440 }
  0x12   : > { %195 = vst [vmem:[#allocation2 + $0x30] sm:$0xf] %v7301_v2  ;;  %196 = vst [vmem:[#allocation2 + $0x34] sm:$0xf] %v7301_v2  ;;  %6691 = vmatprep.subr.bf16.mxu0 %v7146_v3  ;;  %7121 = vmatprep.subr.bf16.mxu1 %v7146_v3  ;;  %v252_v17 = vld [vmem:[%s7360_s25 + $0x3c] sm:$0xf] }
  0x13   : > { %197 = vst [vmem:[#allocation2 + $0x38] sm:$0x1] %v7301_v2  ;;  %198 = vst [vmem:[#allocation2 + $0x3c] sm:$0xf] %v7301_v2  ;;  %v710_v5 = vld [vmem:[#allocation2] sm:$0xf] }
  0x14   : > { %199 = vst [vmem:[#allocation2 + $0x40] sm:$0xf] %v7301_v2  ;;  %200 = vst [vmem:[#allocation2 + $0x44] sm:$0x1] %v7301_v2  ;;  %v711_v6 = vld [vmem:[#allocation2 + $0x4] sm:$0xf] }
  0x15   : > { %201 = vst [vmem:[#allocation2 + $0x48] sm:$0xf] %v7301_v2  ;;  %202 = vst [vmem:[#allocation2 + $0x4c] sm:$0xf] %v7301_v2  ;;  %v758_v7 = vld [vmem:[#allocation2 + $0x8] sm:$0x1]  ;;  %6692 = vmatpush3.bf16.msra.mxu0 %v7146_v3  ;;  %7129 = vmatpush3.bf16.msra.mxu1 %v7146_v3 }
  0x16   : > { %203 = vst [vmem:[#allocation2 + $0x50] sm:$0x1] %v7301_v2  ;;  %204 = vst [vmem:[#allocation2 + $0x54] sm:$0xf] %v7301_v2  ;;  %v778_v8 = vshrl.u32 %v710_v5, 16  ;;  %v781_v9 = vshll.u32 %v710_v5, 16  ;;  %6693 = vmatprep.subr.bf16.mxu0 %v7147_v4  ;;  %7122 = vmatprep.subr.bf16.mxu1 %v7147_v4 }
  0x17   : > { %205 = vst [vmem:[#allocation2 + $0x58] sm:$0xf] %v7301_v2  ;;  %206 = vst [vmem:[#allocation2 + $0x5c] sm:$0x1] %v7301_v2  ;;  %v787_v11 = vshll.u32 %v711_v6, 16  ;;  %v791_v12 = vshrl.u32 %v711_v6, 16 }
  0x18   : > { %207 = vst [vmem:[#allocation2 + $0x60] sm:$0xf] %v7301_v2  ;;  %208 = vst [vmem:[#allocation2 + $0x64] sm:$0xf] %v7301_v2  ;;  %v797_v13 = vshll.u32 %v758_v7, 16  ;;  %v780_v15 = vrot.slane %v778_v8, 4 }
  0x19   : > { %209 = vst [vmem:[#allocation2 + $0x68] sm:$0x1] %v7301_v2  ;;  %210 = vst [vmem:[#allocation2 + $0x6c] sm:$0xf] %v7301_v2  ;;  %v783_v16 = vrot.slane %v781_v9, 5  ;;  %v789_v18 = vrot.slane %v787_v11, 5  ;;  %6694 = vmatpush3.bf16.msra.mxu0 %v7147_v4  ;;  %7130 = vmatpush3.bf16.msra.mxu1 %v7147_v4 }
  0x1a   : > { %211 = vst [vmem:[#allocation2 + $0x70] sm:$0xf] %v7301_v2  ;;  %212 = vst [vmem:[#allocation2 + $0x74] sm:$0x1] %v7301_v2  ;;  %v793_v19 = vrot.slane %v791_v12, 4  ;;  %v392_v21 = vshrl.u32 %v251_v14, 16  ;;  %6695 = vmatprep.subr.bf16.mxu0 %v7148_v10  ;;  %7123 = vmatprep.subr.bf16.mxu1 %v7148_v10 }
  0x1b   : > { %213 = vst [vmem:[#allocation2 + $0x78] sm:$0xf] %v7301_v2  ;;  %214 = vst [vmem:[#allocation2 + $0x7c] sm:$0xf] %v7301_v2  ;;  %vm269_vm4 = vsmask.f32 256  ;;  %v784_v20 = vor.u32 %v783_v16, %v780_v15 }
  0x1c   : > { %215 = vst [vmem:[#allocation2 + $0x80] sm:$0x1] %v7301_v2  ;;  %216 = vst [vmem:[#allocation2 + $0x84] sm:$0xf] %v7301_v2  ;;  %vm270_vm5 = vsmask.f32 4368  ;;  %v794_v25 = vor.u32 %v793_v19, %v789_v18 }
  0x1d   : > { %217 = vst [vmem:[#allocation2 + $0x88] sm:$0xf] %v7301_v2  ;;  %218 = vst [vmem:[#allocation2 + $0x8c] sm:$0x1] %v7301_v2  ;;  %v395_v22 = vshll.u32 %v251_v14, 16  ;;  %v400_v23 = vshrl.u32 %v252_v17, 16  ;;  %6696 = vmatpush3.bf16.msra.mxu0 %v7148_v10  ;;  %7131 = vmatpush3.bf16.msra.mxu1 %v7148_v10 }
  0x1e   : > { %219 = vst [vmem:[#allocation2 + $0x90] sm:$0xf] %v7301_v2  ;;  %220 = vst [vmem:[#allocation2 + $0x94] sm:$0xf] %v7301_v2  ;;  %v799_v26 = vrot.slane %v797_v13, 5  ;;  %v403_v27 = vshll.u32 %v252_v17, 16 }
  0x1f   : > { %221 = vst [vmem:[#allocation2 + $0x98] sm:$0x1] %v7301_v2  ;;  %222 = vst [vmem:[#allocation2 + $0x9c] sm:$0xf] %v7301_v2  ;;  %vm594_vm7 = vsmask.f32 7938 }
  0x20   : > { %223 = vst [vmem:[#allocation2 + $0xa0] sm:$0xf] %v7301_v2  ;;  %224 = vst [vmem:[#allocation2 + $0xa4] sm:$0x1] %v7301_v2  ;;  %v647_v28 = vld [vmem:[#allocation2 + $0x60] sm:$0xf] }
  0x21   : > { %225 = vst [vmem:[#allocation2 + $0xa8] sm:$0xf] %v7301_v2  ;;  %226 = vst [vmem:[#allocation2 + $0xac] sm:$0xf] %v7301_v2  ;;  %v785_v29 = vrot.slane %v784_v20, 4  ;;  %v394_v31 = vrot.slane %v392_v21, 7 }
  0x22   : > { %227 = vst [vmem:[#allocation2 + $0xb0] sm:$0x1] %v7301_v2  ;;  %228 = vst [vmem:[#allocation2 + $0xb4] sm:$0xf] %v7301_v2  ;;  %v402_v32 = vrot.slane %v400_v23, 7  ;;  %v7149_v34 = vld [vmem:[%s10140_s1 + $0x50] sm:$0xff]  }
  0x23   : > { %229 = vst [vmem:[#allocation2 + $0xb8] sm:$0xf] %v7301_v2  ;;  %230 = vst [vmem:[#allocation2 + $0xbc] sm:$0x1] %v7301_v2  ;;  %v237_v33 = vld [vmem:[%s7360_s25] sm:$0xf]  ;;  %v397_v41 = vor.u32 %v395_v22, %v394_v31  ;;  %6697 = vmatprep.subr.bf16.mxu0 %v7149_v34  ;;  %7124 = vmatprep.subr.bf16.mxu1 %v7149_v34 }
  0x24   : > { %231 = vst [vmem:[#allocation2 + $0xc0] sm:$0xf] %v7301_v2  ;;  %232 = vst [vmem:[#allocation2 + $0xc4] sm:$0xf] %v7301_v2  ;;  %v795_v35 = vrot.slane %v794_v25, 4  ;;  %v10171_v36 = vmov 0  ;;  %v405_v43 = vor.u32 %v403_v27, %v402_v32  ;;  %6698 = vmatpush3.bf16.msra.mxu0 %v7149_v34  ;;  %7132 = vmatpush3.bf16.msra.mxu1 %v7149_v34 }
  0x25   : > { %233 = vst [vmem:[#allocation2 + $0xc8] sm:$0x1] %v7301_v2  ;;  %234 = vst [vmem:[#allocation2 + $0xcc] sm:$0xf] %v7301_v2  ;;  %v238_v37 = vld [vmem:[%s7360_s25 + $0x4] sm:$0xf] }
  0x26   : > { %235 = vst [vmem:[#allocation2 + $0xd0] sm:$0xf] %v7301_v2  ;;  %236 = vst [vmem:[#allocation2 + $0xd4] sm:$0x1] %v7301_v2  ;;  %v273_v38 = vshrl.u32 %v237_v33, 16  ;;  %v276_v39 = vshll.u32 %v237_v33, 16 }
  0x27   : > { %vm7368_vm6 = vmor %vm774_vm0, %vm775_vm3  ;;  %v398_v42 = vrot.slane %v394_v31, 4  ;;  %v10174_v44 = vmov 0  ;;  %v651_v45 = vld [vmem:[#allocation2 + $0x68] sm:$0x1]  ;;  %v407_v47 = vrot.slane %v402_v32, 4  ;;  %v281_v49 = vshrl.u32 %v238_v37, 16 }
  0x28   : > { %vm7373_vm8 = vmor %vm269_vm4, %vm270_vm5  ;;  %v790_v40 = vsel %vm7368_vm6, %v785_v29, %v789_v18  ;;  %v800_v46 = vsel %vm7368_vm6, %v795_v35, %v799_v26  ;;  %v275_v48 = vrot.slane %v273_v38, 7  ;;  %v253_v50 = vld [vmem:[%s7360_s25 + $0x40] sm:$0xf]  ;;  %v7150_v51 = vld [vmem:[%s10140_s1 + $0x48] sm:$0xff]   ;;  %v284_v55 = vshll.u32 %v238_v37, 16 }
  0x29   : > { %v10169_v30 = vsel %vm7373_vm8, 4294967295, %v10168_v30  ;;  %vm7382_vm9 = vmand %vm593_vm1, %vm594_vm7  ;;  %v5932_v52 = vcombine.low %v790_v40, %v800_v46  ;;  %v406_v53 = vsel %vm7373_vm8, %v398_v42, %v405_v43  ;;  %v596_v56 = vld [vmem:[#allocation2 + $0xc] sm:$0xf]  ;;  %v254_v57 = vld [vmem:[%s7360_s25 + $0x44] sm:$0xf]  ;;  %v283_v61 = vrot.slane %v281_v49, 7  ;;  %6699 = vmatprep.subr.bf16.mxu0 %v7150_v51  ;;  %7125 = vmatprep.subr.bf16.mxu1 %v7150_v51 }
  0x2a   : > { %10170 = vst [vmem:[#allocation3_spill] sm:$0xff] %v10169_v30  ;;  %v10172_v36 = vsel %vm7382_vm9, 4294967295, %v10171_v36  ;;  %vm7391_vm10 = vmand %vm600_vm2, %vm269_vm4  ;;  %v648_v54 = vsel %vm7382_vm9, %v397_v41, %v647_v28  ;;  %v278_v59 = vor.u32 %v276_v39, %v275_v48  ;;  %v279_v60 = vrot.slane %v275_v48, 4  ;;  %v602_v62 = vld [vmem:[#allocation2 + $0x14] sm:$0x1]  ;;  %v7151_v3 = vld [vmem:[%s10140_s1 + $0x40] sm:$0xff]   ;;  %6700 = vmatpush3.bf16.msra.mxu0 %v7150_v51  ;;  %7133 = vmatpush3.bf16.msra.mxu1 %v7150_v51 }
  0x2b   : > { %10173 = vst [vmem:[#allocation4_spill] sm:$0xff] %v10172_v36  ;;  %v10175_v44 = vsel %vm7391_vm10, 4294967295, %v10174_v44  ;;  %649 = vst [vmem:[#allocation2 + $0x60] sm:$0xf] %v648_v54  ;;  %v652_v58 = vsel %vm7391_vm10, %v407_v47, %v651_v45  ;;  %6703 = vmatprep.mubr.bf16.mxu0 %v5932_v52  ;;  %v409_v63 = vshrl.u32 %v253_v50, 16  ;;  %v412_v0 = vshll.u32 %v253_v50, 16  ;;  %6701 = vmatprep.subr.bf16.mxu0 %v7151_v3 }
  0x2c   : > { %10176 = vst [vmem:[#allocation5_spill] sm:$0xff] %v10175_v44  ;;  %650 = vst [vmem:[#allocation2 + $0x64] sm:$0xf] %v406_v53  ;;  %v417_v1 = vshrl.u32 %v254_v57, 16  ;;  %v420_v2 = vshll.u32 %v254_v57, 16  ;;  %v286_v4 = vor.u32 %v284_v55, %v283_v61  ;;  %v288_v5 = vrot.slane %v283_v61, 4  ;;  %7126 = vmatprep.subr.bf16.mxu1 %v7151_v3 }
  0x2d   : > { %653 = vst [vmem:[#allocation2 + $0x68] sm:$0x1] %v652_v58  ;;  %v597_v6 = vsel %vm7382_vm9, %v278_v59, %v596_v56  ;;  %v654_v7 = vld [vmem:[#allocation2 + $0x6c] sm:$0xf]  ;;  %v658_v8 = vld [vmem:[#allocation2 + $0x74] sm:$0x1] }
  0x2e   : > { %598 = vst [vmem:[#allocation2 + $0xc] sm:$0xf] %v597_v6  ;;  %v411_v9 = vrot.slane %v409_v63, 7  ;;  %v419_v10 = vrot.slane %v417_v1, 7  ;;  %v287_v11 = vsel %vm7373_vm8, %v279_v60, %v286_v4  ;;  %v603_v12 = vsel %vm7391_vm10, %v288_v5, %v602_v62  ;;  %v239_v13 = vld [vmem:[%s7360_s25 + $0x8] sm:$0xf]  ;;  %6702 = vmatpush3.bf16.msra.mxu0 %v7151_v3  ;;  %7134 = vmatpush3.bf16.msra.mxu1 %v7151_v3 }
  0x2f   : > { %599 = vst [vmem:[#allocation2 + $0x10] sm:$0xf] %v287_v11  ;;  %604 = vst [vmem:[#allocation2 + $0x14] sm:$0x1] %v603_v12  ;;  %v240_v18 = vld [vmem:[%s7360_s25 + $0xc] sm:$0xf] }
  0x30   : > { %v414_v14 = vor.u32 %v412_v0, %v411_v9  ;;  %v415_v15 = vrot.slane %v411_v9, 4  ;;  %v422_v16 = vor.u32 %v420_v2, %v419_v10  ;;  %v424_v17 = vrot.slane %v419_v10, 4  ;;  %v7422_v19 = vld [vmem:[%s10140_s1 + $0x38] sm:$0xff]  }
  0x31   : > { %v290_v20 = vshrl.u32 %v239_v13, 16  ;;  %v298_v21 = vshrl.u32 %v240_v18, 16  ;;  %v7433_v28 = vld [vmem:[%s10140_s1 + $0xb8] sm:$0xff]   ;;  %v301_v29 = vshll.u32 %v240_v18, 16  ;;  %v293_v39 = vshll.u32 %v239_v13, 16  ;;  %6735 = vmatprep.subr.bf16.mxu1 %v7422_v19 }
  0x32   : > { %v726_v22 = vld [vmem:[#allocation2 + $0x60] sm:$0xf]  ;;  %v423_v25 = vsel %vm7373_vm8, %v415_v15, %v422_v16  ;;  %v655_v26 = vsel %vm7382_vm9, %v414_v14, %v654_v7  ;;  %v659_v27 = vsel %vm7391_vm10, %v424_v17, %v658_v8  ;;  %6783 = vmatprep.subr.bf16.mxu0 %v7433_v28  ;;  %v605_v15 = vld [vmem:[#allocation2 + $0x18] sm:$0xf]  ;;  %vm1804_vm11 = vcmask 1042432  }
  0x33   : > { %v727_v23 = vld [vmem:[#allocation2 + $0x64] sm:$0xf]  ;;  %v970_v32 = vshrl.u32 %v726_v22, 16  ;;  %v973_v33 = vshll.u32 %v726_v22, 16  ;;  %656 = vst [vmem:[#allocation2 + $0x6c] sm:$0xf] %v655_v26 }
  0x34   : > { %v766_v31 = vld [vmem:[#allocation2 + $0x68] sm:$0x1]  ;;  %v979_v34 = vshll.u32 %v727_v23, 16  ;;  %v983_v35 = vshrl.u32 %v727_v23, 16  ;;  %657 = vst [vmem:[#allocation2 + $0x70] sm:$0xf] %v423_v25 }
  0x35   : > { %660 = vst [vmem:[#allocation2 + $0x74] sm:$0x1] %v659_v27  ;;  %v989_v37 = vshll.u32 %v766_v31, 16  ;;  %v292_v38 = vrot.slane %v290_v20, 7  ;;  %v7435_v40 = vrot.slane %v298_v21, 7  ;;  %v972_v41 = vrot.slane %v970_v32, 4 }
  0x36   : > { %v975_v42 = vrot.slane %v973_v33, 5  ;;  %v981_v43 = vrot.slane %v979_v34, 5  ;;  %v985_v45 = vrot.slane %v983_v35, 4  ;;  %v712_v46 = vld [vmem:[#allocation2 + $0xc] sm:$0xf]  ;;  %vm1805_vm12 = vcmask 1046532  }
  0x37   : > { %v991_v47 = vrot.slane %v989_v37, 5  ;;  %v802_v48 = vshrl.u32 %v712_v46, 16  ;;  %v805_v49 = vshll.u32 %v712_v46, 16  ;;  %v713_v52 = vld [vmem:[#allocation2 + $0x10] sm:$0xf]  ;;  %v296_v54 = vrot.slane %v292_v38, 4  ;;  %vm7763_vm13 = vmor %vm1804_vm11, %vm1805_vm12 }
  0x38   : > { %v976_v50 = vor.u32 %v975_v42, %v972_v41  ;;  %v986_v51 = vor.u32 %v985_v45, %v981_v43  ;;  %v759_v53 = vld [vmem:[#allocation2 + $0x14] sm:$0x1]  ;;  %v303_v55 = vor.u32 %v301_v29, %v7435_v40  ;;  %v811_v58 = vshll.u32 %v713_v52, 16  ;;  %v609_v16 = vld [vmem:[#allocation2 + $0x20] sm:$0x1] }
  0x39   : > { %v804_v56 = vrot.slane %v802_v48, 4  ;;  %v807_v57 = vrot.slane %v805_v49, 5  ;;  %v815_v59 = vshrl.u32 %v713_v52, 16  ;;  %v821_v62 = vshll.u32 %v759_v53, 16  ;;  %v255_v22 = vld [vmem:[%s7360_s25 + $0x48] sm:$0xf] }
  0x3a   : > { %v977_v60 = vrot.slane %v976_v50, 4  ;;  %v987_v61 = vrot.slane %v986_v51, 4  ;;  %v295_v63 = vor.u32 %v293_v39, %v292_v38  ;;  %v813_v1 = vrot.slane %v811_v58, 5  ;;  %v728_v3 = vld [vmem:[#allocation2 + $0x6c] sm:$0xf]  ;;  %v7155_v39 = vld [vmem:[%s10140_s1 + $0xb0] sm:$0xff]  }
  0x3b   : > { %v808_v0 = vor.u32 %v807_v57, %v804_v56  ;;  %v817_v2 = vrot.slane %v815_v59, 4  ;;  %v729_v4 = vld [vmem:[#allocation2 + $0x70] sm:$0xf]  ;;  %v304_v5 = vsel %vm7373_vm8, %v296_v54, %v303_v55  ;;  %v823_v8 = vrot.slane %v821_v62, 5  ;;  %v256_v29 = vld [vmem:[%s7360_s25 + $0x4c] sm:$0xf] }
  0x3c   : > { %v982_v6 = vsel %vm7368_vm6, %v977_v60, %v981_v43  ;;  %v992_v7 = vsel %vm7368_vm6, %v987_v61, %v991_v47  ;;  %v767_v9 = vld [vmem:[#allocation2 + $0x74] sm:$0x1]  ;;  %v994_v10 = vshrl.u32 %v728_v3, 16  ;;  %608 = vst [vmem:[#allocation2 + $0x1c] sm:$0xf] %v304_v5  ;;  %v997_v14 = vshll.u32 %v728_v3, 16 }
  0x3d   : > { %v5940_v11 = vcombine.low %v982_v6, %v992_v7  ;;  %v809_v12 = vrot.slane %v808_v0, 4  ;;  %v818_v13 = vor.u32 %v817_v2, %v813_v1  ;;  %v1003_v18 = vshll.u32 %v729_v4, 16  ;;  %v241_v35 = vld [vmem:[%s7360_s25 + $0x10] sm:$0xf]  ;;  %v661_v47 = vld [vmem:[#allocation2 + $0x78] sm:$0xf] }
  0x3e   : > { %v996_v17 = vrot.slane %v994_v10, 4  ;;  %v1007_v20 = vshrl.u32 %v729_v4, 16  ;;  %v1013_v21 = vshll.u32 %v767_v9, 16  ;;  %v999_v26 = vrot.slane %v997_v14, 5  ;;  %v242_v52 = vld [vmem:[%s7360_s25 + $0x14] sm:$0xf] }
  0x3f   : > { %6719 = vmatprep.mubr.bf16.mxu1 %v5940_v11  ;;  %v814_v23 = vsel %vm7368_vm6, %v809_v12, %v813_v1  ;;  %v819_v25 = vrot.slane %v818_v13, 4  ;;  %v305_v27 = vrot.slane %v7435_v40, 4  ;;  %v1005_v31 = vrot.slane %v1003_v18, 5  ;;  %v665_v58 = vld [vmem:[#allocation2 + $0x80] sm:$0x1]  ;;  %v7157_v59 = vld [vmem:[%s10140_s1 + $0xa8] sm:$0xff]  }
  0x40   : > { %v1009_v32 = vrot.slane %v1007_v20, 4  ;;  %v1015_v33 = vrot.slane %v1013_v21, 5  ;;  %v606_v34 = vsel %vm7382_vm9, %v295_v63, %v605_v15  ;;  %v1000_v38 = vor.u32 %v999_v26, %v996_v17  ;;  %v7154_v5 = vld [vmem:[%s10140_s1 + $0x30] sm:$0xff]   ;;  %v7159_v15 = vld [vmem:[%s10140_s1 + $0xa0] sm:$0xff]  }
  0x41   : > { %v824_v37 = vsel %vm7368_vm6, %v819_v25, %v823_v8  ;;  %607 = vst [vmem:[#allocation2 + $0x18] sm:$0xf] %v606_v34  ;;  %v610_v40 = vsel %vm7391_vm10, %v305_v27, %v609_v16  ;;  %v426_v41 = vshrl.u32 %v255_v22, 16  ;;  %v429_v45 = vshll.u32 %v255_v22, 16  ;;  %v612_v8 = vld [vmem:[#allocation2 + $0x24] sm:$0xf] }
  0x42   : > { %v5933_v42 = vcombine.low %v814_v23, %v824_v37  ;;  %v1010_v43 = vor.u32 %v1009_v32, %v1005_v31  ;;  %611 = vst [vmem:[#allocation2 + $0x20] sm:$0x1] %v610_v40  ;;  %v434_v46 = vshrl.u32 %v256_v29, 16  ;;  %v1001_v48 = vrot.slane %v1000_v38, 4  ;;  %v257_v14 = vld [vmem:[%s7360_s25 + $0x50] sm:$0xf] }
  0x43   : > { %v715_v49 = vld [vmem:[#allocation2 + $0x1c] sm:$0xf]  ;;  %v428_v50 = vrot.slane %v426_v41, 7  ;;  %v437_v51 = vshll.u32 %v256_v29, 16  ;;  %v307_v53 = vshrl.u32 %v241_v35, 16  ;;  %v310_v7 = vshll.u32 %v241_v35, 16 }
  0x44   : > { %6704 = vmatmul.mubr.bf16.vlgmr.msra.gmra.mxu0 %v5933_v42  ;;  %v1011_v54 = vrot.slane %v1010_v43, 4  ;;  %v835_v55 = vshll.u32 %v715_v49, 16  ;;  %v839_v56 = vshrl.u32 %v715_v49, 16  ;;  %v436_v57 = vrot.slane %v434_v46, 7  ;;  %v616_v22 = vld [vmem:[#allocation2 + $0x2c] sm:$0x1] }
  0x45   : > { %v1006_v60 = vsel %vm7368_vm6, %v1001_v48, %v1005_v31  ;;  %6784 = vmatpush3.bf16.msra.mxu0 %v7433_v28  ;;  %v431_v61 = vor.u32 %v429_v45, %v428_v50  ;;  %v432_v62 = vrot.slane %v428_v50, 4  ;;  %v309_v63 = vrot.slane %v307_v53, 7  ;;  %v258_v29 = vld [vmem:[%s7360_s25 + $0x54] sm:$0xf]  ;;  %v7156_v35 = vld [vmem:[%s10140_s1 + $0x28] sm:$0xff]   ;;  %v7161_v50 = vld [vmem:[%s10140_s1 + $0x98] sm:$0xff]  }
  0x46   : > { %v1016_v0 = vsel %vm7368_vm6, %v1011_v54, %v1015_v33  ;;  %6785 = vmatprep.subr.bf16.mxu0 %v7155_v39  ;;  %v7470_v1 = vrot.slane %v835_v55, 5  ;;  %v841_v2 = vrot.slane %v839_v56, 4  ;;  %v439_v3 = vor.u32 %v437_v51, %v436_v57  ;;  %v7494_v37 = vld [vmem:[%s7360_s25 + $0x18] sm:$0xf]  ;;  %v7158_v56 = vld [vmem:[%s10140_s1 + $0x20] sm:$0xff]  }
  0x47   : > { %v5941_v4 = vcombine.low %v1006_v60, %v1016_v0  ;;  %v441_v6 = vrot.slane %v436_v57, 4  ;;  %v662_v28 = vsel %vm7382_vm9, %v431_v61, %v661_v47  ;;  %v313_v12 = vrot.slane %v309_v63, 4 }
  0x48   : > { %v714_v9 = vld [vmem:[#allocation2 + $0x18] sm:$0xf]  ;;  %v842_v10 = vor.u32 %v841_v2, %v7470_v1  ;;  %v440_v11 = vsel %vm7373_vm8, %v432_v62, %v439_v3  ;;  %663 = vst [vmem:[#allocation2 + $0x78] sm:$0xf] %v662_v28  ;;  %v315_v13 = vshrl.u32 %v242_v52, 16  ;;  %v312_v21 = vor.u32 %v310_v7, %v309_v63 }
  0x49   : > { %6720 = vmatmul.mubr.bf16.vlgmr.msra.gmra.mxu1 %v5941_v4  ;;  %6786 = vmatpush3.bf16.msra.mxu0 %v7155_v39  ;;  %v760_v16 = vld [vmem:[#allocation2 + $0x20] sm:$0x1]  ;;  %v826_v17 = vshrl.u32 %v714_v9, 16  ;;  %v829_v18 = vshll.u32 %v714_v9, 16  ;;  %664 = vst [vmem:[#allocation2 + $0x7c] sm:$0xf] %v440_v11  ;;  %v666_v20 = vsel %vm7391_vm10, %v441_v6, %v665_v58 }
  0x4a   : > { %6736 = vmatpush3.bf16.msra.mxu1 %v7422_v19  ;;  %v843_v23 = vrot.slane %v842_v10, 4  ;;  %v845_v25 = vshll.u32 %v760_v16, 16  ;;  %667 = vst [vmem:[#allocation2 + $0x80] sm:$0x1] %v666_v20  ;;  %v317_v26 = vrot.slane %v315_v13, 7  ;;  %v318_v27 = vshll.u32 %v242_v52, 16  ;;  %6787 = vmatprep.subr.bf16.mxu0 %v7157_v59 }
  0x4b   : > { %6737 = vmatprep.subr.bf16.mxu1 %v7154_v5  ;;  %v828_v31 = vrot.slane %v826_v17, 4  ;;  %v831_v32 = vrot.slane %v829_v18, 5  ;;  %v613_v33 = vsel %vm7382_vm9, %v312_v21, %v612_v8  ;;  %v443_v34 = vshrl.u32 %v257_v14, 16  ;;  %v668_v4 = vld [vmem:[#allocation2 + $0x84] sm:$0xf]  ;;  %v7163_v9 = vld [vmem:[%s10140_s1 + $0x90] sm:$0xff]  }
  0x4c   : > { %v847_v19 = vrot.slane %v845_v25, 5  ;;  %v320_v38 = vor.u32 %v318_v27, %v317_v26  ;;  %v322_v39 = vrot.slane %v317_v26, 4  ;;  %614 = vst [vmem:[#allocation2 + $0x24] sm:$0xf] %v613_v33  ;;  %v446_v40 = vshll.u32 %v257_v14, 16  ;;  %v7160_v14 = vld [vmem:[%s10140_s1 + $0x18] sm:$0xff]  }
  0x4d   : > { %v832_v41 = vor.u32 %v831_v32, %v828_v31  ;;  %v445_v42 = vrot.slane %v443_v34, 7  ;;  %v451_v43 = vshrl.u32 %v258_v29, 16  ;;  %v454_v45 = vshll.u32 %v258_v29, 16  ;;  %6788 = vmatpush3.bf16.msra.mxu0 %v7157_v59  ;;  %v672_v8 = vld [vmem:[#allocation2 + $0x8c] sm:$0x1]  ;;  %v7162_v25 = vld [vmem:[%s10140_s1 + $0x10] sm:$0xff]  }
  0x4e   : > { %6738 = vmatpush3.bf16.msra.mxu1 %v7154_v5  ;;  %v848_v46 = vsel %vm7368_vm6, %v843_v23, %v847_v19  ;;  %v321_v47 = vsel %vm7373_vm8, %v313_v12, %v320_v38  ;;  %v617_v48 = vsel %vm7391_vm10, %v322_v39, %v616_v22  ;;  %6789 = vmatprep.subr.bf16.mxu0 %v7159_v15  ;;  %v324_v49 = vshrl.u32 %v7494_v37, 16  ;;  %v244_v23 = vld [vmem:[%s7360_s25 + $0x1c] sm:$0xf]  ;;  %v7165_v26 = vld [vmem:[%s10140_s1 + $0x88] sm:$0xff]   ;;  %v619_v34 = vld [vmem:[#allocation2 + $0x30] sm:$0xf] }
  0x4f   : > { %v833_v51 = vrot.slane %v832_v41, 4  ;;  %v730_v52 = vld [vmem:[#allocation2 + $0x78] sm:$0xf]  ;;  %615 = vst [vmem:[#allocation2 + $0x28] sm:$0xf] %v321_v47  ;;  %v448_v53 = vor.u32 %v446_v40, %v445_v42  ;;  %v449_v54 = vrot.slane %v445_v42, 4  ;;  %6739 = vmatprep.subr.bf16.mxu1 %v7156_v35 }
  0x50   : > { %618 = vst [vmem:[#allocation2 + $0x2c] sm:$0x1] %v617_v48  ;;  %v453_v55 = vrot.slane %v451_v43, 7  ;;  %v731_v57 = vld [vmem:[#allocation2 + $0x7c] sm:$0xf]  ;;  %v1018_v58 = vshrl.u32 %v730_v52, 16 }
  0x51   : > { %v1021_v59 = vshll.u32 %v730_v52, 16  ;;  %v7509_v60 = vrot.slane %v324_v49, 7  ;;  %v327_v61 = vshll.u32 %v7494_v37, 16  ;;  %v838_v62 = vsel %vm7368_vm6, %v833_v51, %v7470_v1  ;;  %v768_v63 = vld [vmem:[#allocation2 + $0x80] sm:$0x1]  ;;  %6790 = vmatpush3.bf16.msra.mxu0 %v7159_v15  ;;  %v7164_v49 = vld [vmem:[%s10140_s1 + $0x8] sm:$0xff]  }
  0x52   : > { %v1027_v0 = vshll.u32 %v731_v57, 16  ;;  %v1031_v2 = vshrl.u32 %v731_v57, 16  ;;  %v456_v3 = vor.u32 %v454_v45, %v453_v55  ;;  %v5934_v5 = vcombine.low %v838_v62, %v848_v46  ;;  %6740 = vmatpush3.bf16.msra.mxu1 %v7156_v35  ;;  %6791 = vmatprep.subr.bf16.mxu0 %v7161_v50  ;;  %v7540_v35 = vld [vmem:[%s7360_s25 + $0x58] sm:$0xf] }
  0x53   : > { %v1020_v6 = vrot.slane %v1018_v58, 4  ;;  %v1023_v28 = vrot.slane %v1021_v59, 5  ;;  %v1037_v7 = vshll.u32 %v768_v63, 16  ;;  %v716_v11 = vld [vmem:[#allocation2 + $0x24] sm:$0xf]  ;;  %v458_v13 = vrot.slane %v453_v55, 4  ;;  %6741 = vmatprep.subr.bf16.mxu1 %v7158_v56 }
  0x54   : > { %v1029_v10 = vrot.slane %v1027_v0, 5  ;;  %v1033_v1 = vrot.slane %v1031_v2, 4  ;;  %v457_v12 = vsel %vm7373_vm8, %v449_v54, %v456_v3  ;;  %6707 = vmatprep.mubr.bf16.mxu0 %v5934_v5  ;;  %v850_v16 = vshrl.u32 %v716_v11, 16  ;;  %v623_v54 = vld [vmem:[#allocation2 + $0x38] sm:$0x1]  ;;  %v7167_v55 = vld [vmem:[%s10140_s1 + $0x80] sm:$0xff]  }
  0x55   : > { %v1024_v15 = vor.u32 %v1023_v28, %v1020_v6  ;;  %v853_v17 = vshll.u32 %v716_v11, 16  ;;  %671 = vst [vmem:[#allocation2 + $0x88] sm:$0xf] %v457_v12  ;;  %v1039_v20 = vrot.slane %v1037_v7, 5  ;;  %v669_v21 = vsel %vm7382_vm9, %v448_v53, %v668_v4  ;;  %6792 = vmatpush3.bf16.msra.mxu0 %v7161_v50  ;;  %v260_v2 = vld [vmem:[%s7360_s25 + $0x5c] sm:$0xf] }
  0x56   : > { %v1034_v18 = vor.u32 %v1033_v1, %v1029_v10  ;;  %v673_v22 = vsel %vm7391_vm10, %v458_v13, %v672_v8  ;;  %v7534_v29 = vld [vmem:[#allocation2 + $0x28] sm:$0xf]  ;;  %v852_v32 = vrot.slane %v850_v16, 4  ;;  %670 = vst [vmem:[#allocation2 + $0x84] sm:$0xf] %v669_v21  ;;  %6742 = vmatpush3.bf16.msra.mxu1 %v7158_v56  ;;  %v329_v33 = vor.u32 %v327_v61, %v7509_v60  ;;  %v7577_v16 = vld [vmem:[%s10140_s1 + $0x138] sm:$0xff]  }
  0x57   : > { %v1025_v27 = vrot.slane %v1024_v15, 4  ;;  %v7536_v31 = vld [vmem:[#allocation2 + $0x2c] sm:$0x1]  ;;  %674 = vst [vmem:[#allocation2 + $0x8c] sm:$0x1] %v673_v22  ;;  %6793 = vmatprep.subr.bf16.mxu0 %v7163_v9  ;;  %v855_v19 = vrot.slane %v853_v17, 5  ;;  %6743 = vmatprep.subr.bf16.mxu1 %v7160_v14 }
  0x58   : > { %v1035_v37 = vrot.slane %v1034_v18, 4  ;;  %v859_v38 = vshll.u32 %v7534_v29, 16  ;;  %v863_v39 = vshrl.u32 %v7534_v29, 16  ;;  %v869_v41 = vshll.u32 %v7536_v31, 16  ;;  %v7166_v15 = vld [vmem:[%s10140_s1] sm:$0xff]  }
  0x59   : > { %v1030_v40 = vsel %vm7368_vm6, %v1025_v27, %v1029_v10  ;;  %v330_v42 = vrot.slane %v7509_v60, 4  ;;  %v332_v43 = vshrl.u32 %v244_v23, 16  ;;  %v856_v46 = vor.u32 %v855_v19, %v852_v32  ;;  %6794 = vmatpush3.bf16.msra.mxu0 %v7163_v9  ;;  %v7580_v22 = vld [vmem:[%s7360_s25 + $0x24] sm:$0xf] }
  0x5a   : > { %v1040_v45 = vsel %vm7368_vm6, %v1035_v37, %v1039_v20  ;;  %v861_v47 = vrot.slane %v859_v38, 5  ;;  %v865_v48 = vrot.slane %v863_v39, 4  ;;  %v871_v51 = vrot.slane %v869_v41, 5  ;;  %6744 = vmatpush3.bf16.msra.mxu1 %v7160_v14  ;;  %6795 = vmatprep.subr.bf16.mxu0 %v7165_v26  ;;  %v245_v14 = vld [vmem:[%s7360_s25 + $0x20] sm:$0xf] }
  0x5b   : > { %v5942_v50 = vcombine.low %v1030_v40, %v1040_v45  ;;  %v334_v52 = vrot.slane %v332_v43, 7  ;;  %v335_v53 = vshll.u32 %v244_v23, 16  ;;  %v857_v56 = vrot.slane %v856_v46, 4  ;;  %6745 = vmatprep.subr.bf16.mxu1 %v7162_v25  ;;  %v675_v37 = vld [vmem:[#allocation2 + $0x90] sm:$0xf] }
  0x5c   : > { %v866_v57 = vor.u32 %v865_v48, %v861_v47  ;;  %v733_v58 = vld [vmem:[#allocation2 + $0x88] sm:$0xf]  ;;  %v620_v59 = vsel %vm7382_vm9, %v329_v33, %v619_v34  ;;  %v460_v60 = vshrl.u32 %v7540_v35, 16  ;;  %v468_v27 = vshrl.u32 %v260_v2, 16  ;;  %v679_v48 = vld [vmem:[#allocation2 + $0x98] sm:$0x1] }
  0x5d   : > { %6723 = vmatprep.mubr.bf16.mxu1 %v5942_v50  ;;  %v1051_v61 = vshll.u32 %v733_v58, 16  ;;  %v1055_v62 = vshrl.u32 %v733_v58, 16  ;;  %v337_v63 = vor.u32 %v335_v53, %v334_v52  ;;  %v339_v0 = vrot.slane %v334_v52, 4  ;;  %621 = vst [vmem:[#allocation2 + $0x30] sm:$0xf] %v620_v59  ;;  %6796 = vmatpush3.bf16.msra.mxu0 %v7165_v26 }
  0x5e   : > { %v862_v3 = vsel %vm7368_vm6, %v857_v56, %v861_v47  ;;  %v867_v4 = vrot.slane %v866_v57, 4  ;;  %v732_v5 = vld [vmem:[#allocation2 + $0x84] sm:$0xf]  ;;  %v769_v6 = vld [vmem:[#allocation2 + $0x8c] sm:$0x1]  ;;  %v7562_v28 = vrot.slane %v460_v60, 7  ;;  %6746 = vmatpush3.bf16.msra.mxu1 %v7162_v25  ;;  %6797 = vmatprep.subr.bf16.mxu0 %v7167_v55 }
  0x5f   : > { %v1042_v7 = vshrl.u32 %v732_v5, 16  ;;  %v1045_v8 = vshll.u32 %v732_v5, 16  ;;  %v1053_v9 = vrot.slane %v1051_v61, 5  ;;  %v1057_v10 = vrot.slane %v1055_v62, 4  ;;  %6747 = vmatprep.subr.bf16.mxu1 %v7164_v49  ;;  %v626_v57 = vld [vmem:[#allocation2 + $0x3c] sm:$0xf] }
  0x60   : > { %v872_v1 = vsel %vm7368_vm6, %v867_v4, %v871_v51  ;;  %v1061_v11 = vshll.u32 %v769_v6, 16  ;;  %v338_v12 = vsel %vm7373_vm8, %v330_v42, %v337_v63  ;;  %v624_v13 = vsel %vm7391_vm10, %v339_v0, %v623_v54  ;;  %v630_v0 = vld [vmem:[#allocation2 + $0x44] sm:$0x1]  ;;  %v261_v6 = vld [vmem:[%s7360_s25 + $0x60] sm:$0xf] }
  0x61   : > { %v5935_v17 = vcombine.low %v862_v3, %v872_v1  ;;  %v1044_v18 = vrot.slane %v1042_v7, 4  ;;  %v1047_v20 = vrot.slane %v1045_v8, 5  ;;  %v1058_v21 = vor.u32 %v1057_v10, %v1053_v9  ;;  %622 = vst [vmem:[#allocation2 + $0x34] sm:$0xf] %v338_v12  ;;  %625 = vst [vmem:[#allocation2 + $0x38] sm:$0x1] %v624_v13  ;;  %6798 = vmatpush3.bf16.msra.mxu0 %v7167_v55 }
  0x62   : > { %v1063_v23 = vrot.slane %v1061_v11, 5  ;;  %v463_v25 = vshll.u32 %v7540_v35, 16  ;;  %v466_v26 = vrot.slane %v7562_v28, 4  ;;  %v471_v34 = vshll.u32 %v260_v2, 16  ;;  %6748 = vmatpush3.bf16.msra.mxu1 %v7164_v49  ;;  %v7591_v35 = vld [vmem:[%s10140_s1 + $0xf8] sm:$0xff]   ;;  %6879 = vmatprep.subr.bf16.mxu0 %v7577_v16 }
  0x63   : > { %6708 = vmatmul.mubr.bf16.gmra.mxu0 %v5935_v17  ;;  %v1048_v32 = vor.u32 %v1047_v20, %v1044_v18  ;;  %v1059_v33 = vrot.slane %v1058_v21, 4  ;;  %v341_v19 = vshrl.u32 %v245_v14, 16  ;;  %v470_v40 = vrot.slane %v468_v27, 7  ;;  %6749 = vmatprep.subr.bf16.mxu1 %v7166_v15  ;;  %v262_v10 = vld [vmem:[%s7360_s25 + $0x64] sm:$0xf] }
  0x64   : > { %v7584_v38 = vld [vmem:[#allocation2 + $0x30] sm:$0xf]  ;;  %v465_v39 = vor.u32 %v463_v25, %v7562_v28  ;;  %v344_v41 = vshll.u32 %v245_v14, 16  ;;  %v349_v42 = vshrl.u32 %v7580_v22, 16  ;;  %v352_v7 = vshll.u32 %v7580_v22, 16 }
  0x65   : > { %v1049_v43 = vrot.slane %v1048_v32, 4  ;;  %v1064_v45 = vsel %vm7368_vm6, %v1059_v33, %v1063_v23  ;;  %v874_v46 = vshrl.u32 %v7584_v38, 16  ;;  %v877_v47 = vshll.u32 %v7584_v38, 16  ;;  %v247_v14 = vld [vmem:[%s7360_s25 + $0x28] sm:$0xf] }
  0x66   : > { %v473_v49 = vor.u32 %v471_v34, %v470_v40  ;;  %v475_v50 = vrot.slane %v470_v40, 4  ;;  %v676_v51 = vsel %vm7382_vm9, %v465_v39, %v675_v37  ;;  %v343_v52 = vrot.slane %v341_v19, 7  ;;  %6750 = vmatpush3.bf16.msra.mxu1 %v7166_v15  ;;  %v8021_v30 = vld [vmem:[#allocation2 + $0x24] sm:$0xf] }
  0x67   : > { %v1054_v53 = vsel %vm7368_vm6, %v1049_v43, %v1053_v9  ;;  %v876_v54 = vrot.slane %v874_v46, 4  ;;  %v879_v55 = vrot.slane %v877_v47, 5  ;;  %677 = vst [vmem:[#allocation2 + $0x90] sm:$0xf] %v676_v51  ;;  %v351_v56 = vrot.slane %v349_v42, 7  ;;  %6831 = vmatprep.subr.bf16.mxu1 %v7591_v35 }
  0x68   : > { %v5943_v58 = vcombine.low %v1054_v53, %v1064_v45  ;;  %v7602_v59 = vld [vmem:[#allocation2 + $0x34] sm:$0xf]  ;;  %v7604_v60 = vld [vmem:[#allocation2 + $0x38] sm:$0x1]  ;;  %v474_v61 = vsel %vm7373_vm8, %v466_v26, %v473_v49  ;;  %v680_v62 = vsel %vm7391_vm10, %v475_v50, %v679_v48  ;;  %v346_v63 = vor.u32 %v344_v41, %v343_v52  ;;  %v686_v53 = vld [vmem:[#allocation2 + $0xa4] sm:$0x1] }
  0x69   : > { %v880_v2 = vor.u32 %v879_v55, %v876_v54  ;;  %v883_v3 = vshll.u32 %v7602_v59, 16  ;;  %v887_v4 = vshrl.u32 %v7602_v59, 16  ;;  %v893_v5 = vshll.u32 %v7604_v60, 16  ;;  %678 = vst [vmem:[#allocation2 + $0x94] sm:$0xf] %v474_v61 }
  0x6a   : > { %681 = vst [vmem:[#allocation2 + $0x98] sm:$0x1] %v680_v62  ;;  %6724 = vmatmul.mubr.bf16.gmra.mxu1 %v5943_v58  ;;  %v347_v28 = vrot.slane %v343_v52, 4  ;;  %v356_v8 = vrot.slane %v351_v56, 4  ;;  %v627_v9 = vsel %vm7382_vm9, %v346_v63, %v626_v57  ;;  %v354_v15 = vor.u32 %v352_v7, %v351_v56  ;;  %v682_v52 = vld [vmem:[#allocation2 + $0x9c] sm:$0xf] }
  0x6b   : > { %v881_v1 = vrot.slane %v880_v2, 4  ;;  %v885_v11 = vrot.slane %v883_v3, 5  ;;  %v889_v12 = vrot.slane %v887_v4, 4  ;;  %v895_v13 = vrot.slane %v893_v5, 5  ;;  %628 = vst [vmem:[#allocation2 + $0x3c] sm:$0xf] %v627_v9 }
  0x6c   : > { %v631_v17 = vsel %vm7391_vm10, %v356_v8, %v630_v0  ;;  %v477_v18 = vshrl.u32 %v261_v6, 16  ;;  %v480_v20 = vshll.u32 %v261_v6, 16  ;;  %v485_v23 = vshrl.u32 %v262_v10, 16  ;;  %v248_v2 = vld [vmem:[%s7360_s25 + $0x2c] sm:$0xf] }
  0x6d   : > { %v886_v21 = vsel %vm7368_vm6, %v881_v1, %v885_v11  ;;  %v890_v22 = vor.u32 %v889_v12, %v885_v11  ;;  %632 = vst [vmem:[#allocation2 + $0x44] sm:$0x1] %v631_v17  ;;  %v488_v25 = vshll.u32 %v262_v10, 16  ;;  %v355_v27 = vsel %vm7373_vm8, %v347_v28, %v354_v15  ;;  %v633_v1 = vld [vmem:[#allocation2 + $0x48] sm:$0xf] }
  0x6e   : > { %v734_v26 = vld [vmem:[#allocation2 + $0x90] sm:$0xf]  ;;  %v479_v32 = vrot.slane %v477_v18, 7  ;;  %v358_v33 = vshrl.u32 %v247_v14, 16  ;;  %v361_v34 = vshll.u32 %v247_v14, 16  ;;  %v487_v40 = vrot.slane %v485_v23, 7 }
  0x6f   : > { %v891_v37 = vrot.slane %v890_v22, 4  ;;  %v1066_v19 = vshrl.u32 %v734_v26, 16  ;;  %v1069_v39 = vshll.u32 %v734_v26, 16  ;;  %629 = vst [vmem:[#allocation2 + $0x40] sm:$0xf] %v355_v27 }
  0x70   : > { %v7626_v41 = vld [vmem:[#allocation2 + $0x94] sm:$0xf]  ;;  %v482_v43 = vor.u32 %v480_v20, %v479_v32  ;;  %v483_v45 = vrot.slane %v479_v32, 4  ;;  %v7630_v46 = vrot.slane %v358_v33, 7  ;;  %v490_v58 = vor.u32 %v488_v25, %v487_v40  ;;  %v263_v17 = vld [vmem:[%s7360_s25 + $0x68] sm:$0xf] }
  0x71   : > { %v7628_v42 = vld [vmem:[#allocation2 + $0x98] sm:$0x1]  ;;  %v896_v48 = vsel %vm7368_vm6, %v891_v37, %v895_v13  ;;  %v1068_v49 = vrot.slane %v1066_v19, 4  ;;  %v1071_v50 = vrot.slane %v1069_v39, 5  ;;  %v1075_v51 = vshll.u32 %v7626_v41, 16 }
  0x72   : > { %v5936_v54 = vcombine.low %v886_v21, %v896_v48  ;;  %v1079_v55 = vshrl.u32 %v7626_v41, 16  ;;  %v1085_v56 = vshll.u32 %v7628_v42, 16  ;;  %v7639_v57 = vld [vmem:[#allocation2 + $0x3c] sm:$0xf]  ;;  %v491_v6 = vsel %vm7373_vm8, %v483_v45, %v490_v58  ;;  %v264_v23 = vld [vmem:[%s7360_s25 + $0x6c] sm:$0xf] }
  0x73   : > { %v1072_v61 = vor.u32 %v1071_v50, %v1068_v49  ;;  %v1077_v62 = vrot.slane %v1075_v51, 5  ;;  %v898_v63 = vshrl.u32 %v7639_v57, 16  ;;  %v901_v0 = vshll.u32 %v7639_v57, 16  ;;  %685 = vst [vmem:[#allocation2 + $0xa0] sm:$0xf] %v491_v6 }
  0x74   : > { %6711 = vmatprep.mubr.bf16.mxu0 %v5936_v54  ;;  %v1081_v3 = vrot.slane %v1079_v55, 4  ;;  %v1087_v4 = vrot.slane %v1085_v56, 5  ;;  %v7644_v5 = vld [vmem:[#allocation2 + $0x44] sm:$0x1]  ;;  %v492_v28 = vrot.slane %v487_v40, 4  ;;  %v683_v13 = vsel %vm7382_vm9, %v482_v43, %v682_v52 }
  0x75   : > { %v1073_v7 = vrot.slane %v1072_v61, 4  ;;  %v900_v8 = vrot.slane %v898_v63, 4  ;;  %v903_v9 = vrot.slane %v901_v0, 5  ;;  %v917_v10 = vshll.u32 %v7644_v5, 16  ;;  %684 = vst [vmem:[#allocation2 + $0x9c] sm:$0xf] %v683_v13 }
  0x76   : > { %v1082_v11 = vor.u32 %v1081_v3, %v1077_v62  ;;  %v7649_v12 = vld [vmem:[#allocation2 + $0x40] sm:$0xf]  ;;  %v687_v14 = vsel %vm7391_vm10, %v492_v28, %v686_v53  ;;  %v363_v15 = vor.u32 %v361_v34, %v7630_v46  ;;  %v364_v27 = vrot.slane %v7630_v46, 4  ;;  %v637_v46 = vld [vmem:[#allocation2 + $0x50] sm:$0x1] }
  0x77   : > { %v1078_v18 = vsel %vm7368_vm6, %v1073_v7, %v1077_v62  ;;  %v904_v20 = vor.u32 %v903_v9, %v900_v8  ;;  %v907_v21 = vshll.u32 %v7649_v12, 16  ;;  %v911_v22 = vshrl.u32 %v7649_v12, 16  ;;  %688 = vst [vmem:[#allocation2 + $0xa4] sm:$0x1] %v687_v14  ;;  %v689_v58 = vld [vmem:[#allocation2 + $0xa8] sm:$0xf] }
  0x78   : > { %v1083_v25 = vrot.slane %v1082_v11, 4  ;;  %v919_v26 = vrot.slane %v917_v10, 5  ;;  %v366_v32 = vshrl.u32 %v248_v2, 16  ;;  %v369_v19 = vshll.u32 %v248_v2, 16  ;;  %v249_v61 = vld [vmem:[%s7360_s25 + $0x30] sm:$0xf] }
  0x79   : > { %v905_v33 = vrot.slane %v904_v20, 4  ;;  %v909_v37 = vrot.slane %v907_v21, 5  ;;  %v913_v34 = vrot.slane %v911_v22, 4  ;;  %v634_v43 = vsel %vm7382_vm9, %v363_v15, %v633_v1  ;;  %v693_v22 = vld [vmem:[#allocation2 + $0xb0] sm:$0x1] }
  0x7a   : > { %v1088_v39 = vsel %vm7368_vm6, %v1083_v25, %v1087_v4  ;;  %v368_v40 = vrot.slane %v366_v32, 7  ;;  %v494_v45 = vshrl.u32 %v263_v17, 16  ;;  %635 = vst [vmem:[#allocation2 + $0x48] sm:$0xf] %v634_v43  ;;  %v497_v51 = vshll.u32 %v263_v17, 16 }
  0x7b   : > { %v5944_v48 = vcombine.low %v1078_v18, %v1088_v39  ;;  %v910_v49 = vsel %vm7368_vm6, %v905_v33, %v909_v37  ;;  %v914_v50 = vor.u32 %v913_v34, %v909_v37  ;;  %v7669_v52 = vld [vmem:[#allocation2 + $0xa0] sm:$0xf]  ;;  %v502_v56 = vshrl.u32 %v264_v23, 16  ;;  %v250_v37 = vld [vmem:[%s7360_s25 + $0x34] sm:$0xf] }
  0x7c   : > { %v371_v53 = vor.u32 %v369_v19, %v368_v40  ;;  %v373_v54 = vrot.slane %v368_v40, 4  ;;  %v496_v55 = vrot.slane %v494_v45, 7  ;;  %v1099_v63 = vshll.u32 %v7669_v52, 16  ;;  %v7674_v3 = vld [vmem:[#allocation2 + $0x9c] sm:$0xf] }
  0x7d   : > { %6727 = vmatprep.mubr.bf16.mxu1 %v5944_v48  ;;  %v915_v62 = vrot.slane %v914_v50, 4  ;;  %v1103_v0 = vshrl.u32 %v7669_v52, 16  ;;  %v505_v2 = vshll.u32 %v264_v23, 16  ;;  %v1090_v10 = vshrl.u32 %v7674_v3, 16  ;;  %v640_v43 = vld [vmem:[#allocation2 + $0x54] sm:$0xf] }
  0x7e   : > { %v7676_v4 = vld [vmem:[#allocation2 + $0xa4] sm:$0x1]  ;;  %v372_v6 = vsel %vm7373_vm8, %v364_v27, %v371_v53  ;;  %v638_v28 = vsel %vm7391_vm10, %v373_v54, %v637_v46  ;;  %v499_v7 = vor.u32 %v497_v51, %v496_v55  ;;  %v500_v8 = vrot.slane %v496_v55, 4  ;;  %v7699_v46 = vld [vmem:[%s7360_s25 + $0x70] sm:$0xf] }
  0x7f   : > { %v920_v9 = vsel %vm7368_vm6, %v915_v62, %v919_v26  ;;  %v1093_v1 = vshll.u32 %v7674_v3, 16  ;;  %v1101_v11 = vrot.slane %v1099_v63, 5  ;;  %636 = vst [vmem:[#allocation2 + $0x4c] sm:$0xf] %v372_v6  ;;  %639 = vst [vmem:[#allocation2 + $0x50] sm:$0x1] %v638_v28 }
  0x80   : > { %v5937_v13 = vcombine.low %v910_v49, %v920_v9  ;;  %v1105_v14 = vrot.slane %v1103_v0, 4  ;;  %v1109_v15 = vshll.u32 %v7676_v4, 16  ;;  %v504_v17 = vrot.slane %v502_v56, 7  ;;  %v7900_v47 = vld [vmem:[#allocation2 + $0x78] sm:$0xf] }
  0x81   : > { %v1092_v18 = vrot.slane %v1090_v10, 4  ;;  %v1095_v20 = vrot.slane %v1093_v1, 5  ;;  %v690_v21 = vsel %vm7382_vm9, %v499_v7, %v689_v58  ;;  %v375_v23 = vshrl.u32 %v249_v61, 16  ;;  %v7689_v27 = vld [vmem:[#allocation2 + $0x48] sm:$0xf] }
  0x82   : > { %6712 = vmatmul.mubr.bf16.gmra.mxu0 %v5937_v13  ;;  %v1106_v25 = vor.u32 %v1105_v14, %v1101_v11  ;;  %v1111_v26 = vrot.slane %v1109_v15, 5  ;;  %v507_v32 = vor.u32 %v505_v2, %v504_v17  ;;  %v509_v33 = vrot.slane %v504_v17, 4  ;;  %691 = vst [vmem:[#allocation2 + $0xa8] sm:$0xf] %v690_v21 }
  0x83   : > { %v1096_v34 = vor.u32 %v1095_v20, %v1092_v18  ;;  %v922_v19 = vshrl.u32 %v7689_v27, 16  ;;  %v925_v39 = vshll.u32 %v7689_v27, 16  ;;  %v377_v40 = vrot.slane %v375_v23, 7 }
  0x84   : > { %v1107_v45 = vrot.slane %v1106_v25, 4  ;;  %v508_v48 = vsel %vm7373_vm8, %v500_v8, %v507_v32  ;;  %v694_v49 = vsel %vm7391_vm10, %v509_v33, %v693_v22  ;;  %v378_v50 = vshll.u32 %v249_v61, 16  ;;  %v644_v32 = vld [vmem:[#allocation2 + $0x5c] sm:$0x1]  ;;  %v266_v33 = vld [vmem:[%s7360_s25 + $0x74] sm:$0xf] }
  0x85   : > { %v1097_v51 = vrot.slane %v1096_v34, 4  ;;  %v924_v53 = vrot.slane %v922_v19, 4  ;;  %v927_v54 = vrot.slane %v925_v39, 5  ;;  %692 = vst [vmem:[#allocation2 + $0xac] sm:$0xf] %v508_v48  ;;  %v381_v55 = vrot.slane %v377_v40, 4 }
  0x86   : > { %695 = vst [vmem:[#allocation2 + $0xb0] sm:$0x1] %v694_v49  ;;  %v1112_v56 = vsel %vm7368_vm6, %v1107_v45, %v1111_v26  ;;  %v7703_v58 = vld [vmem:[#allocation2 + $0x4c] sm:$0xf]  ;;  %v7705_v62 = vld [vmem:[#allocation2 + $0x50] sm:$0x1]  ;;  %v380_v63 = vor.u32 %v378_v50, %v377_v40 }
  0x87   : > { %v383_v0 = vshrl.u32 %v250_v37, 16  ;;  %v386_v2 = vshll.u32 %v250_v37, 16  ;;  %v1102_v61 = vsel %vm7368_vm6, %v1097_v51, %v1101_v11  ;;  %v928_v6 = vor.u32 %v927_v54, %v924_v53  ;;  %v696_v53 = vld [vmem:[#allocation2 + $0xb4] sm:$0xf] }
  0x88   : > { %v931_v28 = vshll.u32 %v7703_v58, 16  ;;  %v935_v7 = vshrl.u32 %v7703_v58, 16  ;;  %v5945_v8 = vcombine.low %v1102_v61, %v1112_v56  ;;  %v941_v9 = vshll.u32 %v7705_v62, 16 }
  0x89   : > { %v385_v10 = vrot.slane %v383_v0, 7  ;;  %v641_v1 = vsel %vm7382_vm9, %v380_v63, %v640_v43  ;;  %v929_v13 = vrot.slane %v928_v6, 4  ;;  %v7714_v17 = vld [vmem:[#allocation2 + $0xa8] sm:$0xf]  ;;  %v511_v11 = vshrl.u32 %v7699_v46, 16 }
  0x8a   : > { %v933_v14 = vrot.slane %v931_v28, 5  ;;  %v937_v15 = vrot.slane %v935_v7, 4  ;;  %642 = vst [vmem:[#allocation2 + $0x54] sm:$0xf] %v641_v1  ;;  %6728 = vmatmul.mubr.bf16.gmra.mxu1 %v5945_v8  ;;  %v943_v18 = vrot.slane %v941_v9, 5  ;;  %v1114_v20 = vshrl.u32 %v7714_v17, 16 }
  0x8b   : > { %v1117_v21 = vshll.u32 %v7714_v17, 16  ;;  %v388_v22 = vor.u32 %v386_v2, %v385_v10  ;;  %v390_v26 = vrot.slane %v385_v10, 4  ;;  %v513_v37 = vrot.slane %v511_v11, 7 }
  0x8c   : > { %v934_v23 = vsel %vm7368_vm6, %v929_v13, %v933_v14  ;;  %v938_v25 = vor.u32 %v937_v15, %v933_v14  ;;  %v7722_v34 = vld [vmem:[#allocation2 + $0xac] sm:$0xf]  ;;  %v1116_v39 = vrot.slane %v1114_v20, 4  ;;  %v514_v63 = vshll.u32 %v7699_v46, 16  ;;  %v1756_v15 = vld [vmem:[#allocation2] sm:$0xe] }
  0x8d   : > { %10177 = vst [vmem:[#allocation6_spill] sm:$0xff] %v7722_v34  ;;  %v7724_v19 = vld [vmem:[#allocation2 + $0xb0] sm:$0x1]  ;;  %v1119_v40 = vrot.slane %v1117_v21, 5  ;;  %v389_v43 = vsel %vm7373_vm8, %v381_v55, %v388_v22  ;;  %v1123_v49 = vshll.u32 %v7722_v34, 16  ;;  %v1127_v50 = vshrl.u32 %v7722_v34, 16 }
  0x8e   : > { %v939_v48 = vrot.slane %v938_v25, 4  ;;  %v1133_v51 = vshll.u32 %v7724_v19, 16  ;;  %643 = vst [vmem:[#allocation2 + $0x58] sm:$0xf] %v389_v43  ;;  %v645_v56 = vsel %vm7391_vm10, %v390_v26, %v644_v32  ;;  %v517_v0 = vrot.slane %v513_v37, 4 }
  0x8f   : > { %v1120_v54 = vor.u32 %v1119_v40, %v1116_v39  ;;  %v1125_v2 = vrot.slane %v1123_v49, 5  ;;  %v1129_v61 = vrot.slane %v1127_v50, 4  ;;  %646 = vst [vmem:[#allocation2 + $0x5c] sm:$0x1] %v645_v56  ;;  %v516_v9 = vor.u32 %v514_v63, %v513_v37  ;;  %v700_v21 = vld [vmem:[#allocation2 + $0xbc] sm:$0x1] }
  0x90   : > { %v944_v55 = vsel %vm7368_vm6, %v939_v48, %v943_v18  ;;  %v1135_v6 = vrot.slane %v1133_v51, 5  ;;  %v519_v10 = vshrl.u32 %v266_v33, 16  ;;  %v522_v46 = vshll.u32 %v266_v33, 16  ;;  %v7748_v39 = vld [vmem:[#allocation2 + $0x4] sm:$0xf] }
  0x91   : > { %v5938_v28 = vcombine.low %v934_v23, %v944_v55  ;;  %v1121_v7 = vrot.slane %v1120_v54, 4  ;;  %v7738_v8 = vld [vmem:[#allocation2 + $0x54] sm:$0xf]  ;;  %v1130_v1 = vor.u32 %v1129_v61, %v1125_v2  ;;  %v697_v20 = vsel %vm7382_vm9, %v516_v9, %v696_v53  ;;  %v1757_v51 = vld [vmem:[#allocation2 + $0xc] sm:$0xe] }
  0x92   : > { %v946_v13 = vshrl.u32 %v7738_v8, 16  ;;  %v949_v14 = vshll.u32 %v7738_v8, 16  ;;  %v521_v18 = vrot.slane %v519_v10, 7  ;;  %698 = vst [vmem:[#allocation2 + $0xb4] sm:$0xf] %v697_v20  ;;  %v5980_v37 = vrot.slane %v1756_v15, 9 }
  0x93   : > { %6715 = vmatprep.mubr.bf16.mxu0 %v5938_v28  ;;  %v1126_v11 = vsel %vm7368_vm6, %v1121_v7, %v1125_v2  ;;  %v1131_v22 = vrot.slane %v1130_v1, 4  ;;  %v1809_v40 = vrot.slane %v7748_v39, 5  ;;  %v7265_v53 = vld [vmem:[#allocation2 + $0x8] sm:$0x1]  ;;  %v10178_v61 = vmov 0 }
  0x94   : > { %v948_v23 = vrot.slane %v946_v13, 4  ;;  %v951_v25 = vrot.slane %v949_v14, 5  ;;  %v524_v32 = vor.u32 %v522_v46, %v521_v18  ;;  %v526_v33 = vrot.slane %v521_v18, 4  ;;  %v7266_v1 = vld [vmem:[#allocation2 + $0x14] sm:$0x1] }
  0x95   : > { %v7746_v26 = vld [vmem:[#allocation2 + $0x58] sm:$0xf]  ;;  %v1136_v43 = vsel %vm7368_vm6, %v1131_v22, %v1135_v6  ;;  %v1812_v54 = vrot.slane %v7265_v53, 5  ;;  %v10179_v61 = vsel %vm7763_vm13, 4294967295, %v10178_v61  ;;  %v1819_v13 = vrot.slane %v7266_v1, 5 }
  0x96   : > { %v952_v48 = vor.u32 %v951_v25, %v948_v23  ;;  %v955_v49 = vshll.u32 %v7746_v26, 16  ;;  %v959_v50 = vshrl.u32 %v7746_v26, 16  ;;  %v5946_v56 = vcombine.low %v1126_v11, %v1136_v43  ;;  %v7755_v63 = vld [vmem:[#allocation2 + $0x5c] sm:$0x1]  ;;  %10180 = vst [vmem:[#allocation7_spill] sm:$0xff] %v10179_v61 }
  0x97   : > { %v525_v55 = vsel %vm7373_vm8, %v517_v0, %v524_v32  ;;  %v701_v2 = vsel %vm7391_vm10, %v526_v33, %v700_v21  ;;  %v1758_v6 = vld [vmem:[#allocation2 + $0x18] sm:$0xe]  ;;  %v965_v10 = vshll.u32 %v7755_v63, 16  ;;  %v1811_v0 = vrot.slane %v1809_v40, 4  ;;  %v7768_v14 = vld [vmem:[#allocation2 + $0x10] sm:$0xf] }
  0x98   : > { %v953_v28 = vrot.slane %v952_v48, 4  ;;  %v957_v7 = vrot.slane %v955_v49, 5  ;;  %v961_v9 = vrot.slane %v959_v50, 4  ;;  %699 = vst [vmem:[#allocation2 + $0xb8] sm:$0xf] %v525_v55  ;;  %6731 = vmatprep.mubr.bf16.mxu1 %v5946_v56  ;;  %v1816_v46 = vrot.slane %v7768_v14, 5 }
  0x99   : > { %702 = vst [vmem:[#allocation2 + $0xbc] sm:$0x1] %v701_v2  ;;  %v967_v11 = vrot.slane %v965_v10, 5  ;;  %v1810_v18 = vsel %vm7763_vm13, %v5980_v37, %v1809_v40  ;;  %v7773_v20 = vld [vmem:[#allocation2 + $0x1c] sm:$0xf]  ;;  %v1813_v25 = vsel %vm7763_vm13, %v1811_v0, %v1812_v54  ;;  %v5981_v32 = vrot.slane %v1757_v51, 9 }
  0x9a   : > { %v962_v15 = vor.u32 %v961_v9, %v957_v7  ;;  %v1823_v21 = vrot.slane %v7773_v20, 5  ;;  %v958_v22 = vsel %vm7368_vm6, %v953_v28, %v957_v7  ;;  %v7778_v23 = vld [vmem:[#allocation2 + $0xb4] sm:$0xf]  ;;  %v5982_v33 = vrot.slane %v1758_v6, 9  ;;  %v7269_v50 = vld [vmem:[#allocation2 + $0x20] sm:$0x1] }
  0x9b   : > { %10181 = vst [vmem:[#allocation8_spill] sm:$0xff] %v7778_v23  ;;  %v1138_v48 = vshrl.u32 %v7778_v23, 16  ;;  %v1141_v49 = vshll.u32 %v7778_v23, 16  ;;  %v1818_v37 = vrot.slane %v1816_v46, 4  ;;  %v1826_v53 = vrot.slane %v7269_v50, 5 }
  0x9c   : > { %v963_v43 = vrot.slane %v962_v15, 4  ;;  %v1825_v40 = vrot.slane %v1823_v21, 4  ;;  %v6012_v28 = vcombine.low %v1810_v18, %v1813_v25  ;;  %v1759_v7 = vld [vmem:[#allocation2 + $0x24] sm:$0xe]  ;;  %v1830_v6 = vrot.slane %v7534_v29, 5 }
  0x9d   : > { %v1140_v55 = vrot.slane %v1138_v48, 4  ;;  %v1143_v2 = vrot.slane %v1141_v49, 5  ;;  %v1820_v18 = vsel %vm7763_vm13, %v1818_v37, %v1819_v13  ;;  %v1760_v49 = vld [vmem:[#allocation2 + $0x30] sm:$0xe]  ;;  %v5983_v50 = vrot.slane %v1759_v7, 9 }
  0x9e   : > { %v968_v56 = vsel %vm7368_vm6, %v963_v43, %v967_v11  ;;  %v1817_v11 = vsel %vm7763_vm13, %v5981_v32, %v1816_v46  ;;  %v1827_v48 = vsel %vm7763_vm13, %v1825_v40, %v1826_v53  ;;  %v1837_v46 = vrot.slane %v7602_v59, 5  ;;  %v1761_v32 = vld [vmem:[#allocation2 + $0x3c] sm:$0xe] }
  0x9f   : > { %v5939_v9 = vcombine.low %v958_v22, %v968_v56  ;;  %v7786_v54 = vld [vmem:[#allocation2 + $0xb8] sm:$0xf]  ;;  %v1144_v10 = vor.u32 %v1143_v2, %v1140_v55  ;;  %v1824_v22 = vsel %vm7763_vm13, %v5982_v33, %v1823_v21  ;;  %v1832_v56 = vrot.slane %v1830_v6, 4 }
  0xa0   : > { %10182 = vst [vmem:[#allocation9_spill] sm:$0xff] %v7786_v54  ;;  %v7788_v51 = vld [vmem:[#allocation2 + $0xbc] sm:$0x1]  ;;  %v1147_v1 = vshll.u32 %v7786_v54, 16  ;;  %v1151_v0 = vshrl.u32 %v7786_v54, 16  ;;  %v1833_v55 = vrot.slane %v7536_v31, 5  ;;  %v6013_v21 = vcombine.low %v1817_v11, %v1820_v18 }
  0xa1   : > { %v1157_v15 = vshll.u32 %v7788_v51, 16  ;;  %6716 = vmatmul.mubr.bf16.gmra.mxu0 %v5939_v9  ;;  %v1145_v25 = vrot.slane %v1144_v10, 4  ;;  %v1844_v37 = vrot.slane %v7649_v12, 5  ;;  %v6014_v33 = vcombine.low %v1824_v22, %v1827_v48  ;;  %v1762_v10 = vld [vmem:[#allocation2 + $0x48] sm:$0xe]  ;;  %v7175_v31 = vld [vmem:[%s10140_s1 + $0x130] sm:$0xff]  }
  0xa2   : > { %v1149_v43 = vrot.slane %v1147_v1, 5  ;;  %v1153_v29 = vrot.slane %v1151_v0, 4  ;;  %6799 = vmatprep.mubr.bf16.mxu0 %v6012_v28  ;;  %v5984_v9 = vrot.slane %v1760_v49, 9  ;;  %v1840_v28 = vrot.slane %v7604_v60, 5  ;;  %v1763_v18 = vld [vmem:[#allocation2 + $0x54] sm:$0xe] }
  0xa3   : > { %v1159_v13 = vrot.slane %v1157_v15, 5  ;;  %v1839_v7 = vrot.slane %v1837_v46, 4  ;;  %v5985_v1 = vrot.slane %v1761_v32, 9  ;;  %v1831_v0 = vsel %vm7763_vm13, %v5983_v50, %v1830_v6 }
  0xa4   : > { %v1154_v2 = vor.u32 %v1153_v29, %v1149_v43  ;;  %v1150_v40 = vsel %vm7368_vm6, %v1145_v25, %v1149_v43  ;;  %v1834_v15 = vsel %vm7763_vm13, %v1832_v56, %v1833_v55  ;;  %v1847_v11 = vrot.slane %v7644_v5, 5  ;;  %v7270_v25 = vld [vmem:[#allocation2] sm:$0xf]  ;;  %v7823_v55 = vld [vmem:[#allocation2 + $0x68] sm:$0x1] }
  0xa5   : > { %v1851_v60 = vrot.slane %v7703_v58, 5  ;;  %v5956_v43 = vcombine.low %v7270_v25, %v7748_v39  ;;  %v1846_v29 = vrot.slane %v1844_v37, 4  ;;  %v5986_v48 = vrot.slane %v1762_v10, 9  ;;  %v1764_v56 = vld [vmem:[#allocation2 + $0x60] sm:$0xe] }
  0xa6   : > { %v1155_v53 = vrot.slane %v1154_v2, 4  ;;  %v1854_v6 = vrot.slane %v7705_v62, 5  ;;  %v6015_v5 = vcombine.low %v1831_v0, %v1834_v15  ;;  %v1858_v50 = vrot.slane %v7746_v26, 5  ;;  %v7179_v62 = vld [vmem:[%s10140_s1 + $0x128] sm:$0xff]   ;;  %v7274_v15 = vld [vmem:[#allocation2 + $0x18] sm:$0xf] }
  0xa7   : > { %v1853_v32 = vrot.slane %v1851_v60, 4  ;;  %v1868_v2 = vrot.slane %v7823_v55, 5  ;;  %v1838_v39 = vsel %vm7763_vm13, %v5984_v9, %v1837_v46  ;;  %v7843_v46 = vsel %vm7763_vm13, %v5986_v48, %v1851_v60  ;;  %v7855_v60 = vld [vmem:[#allocation2 + $0x24] sm:$0xf]  ;;  %v7868_v48 = vld [vmem:[#allocation2 + $0x70] sm:$0xf] }
  0xa8   : > { %v1160_v22 = vsel %vm7368_vm6, %v1155_v53, %v1159_v13  ;;  %v1841_v13 = vsel %vm7763_vm13, %v1839_v7, %v1840_v28  ;;  %v5987_v9 = vrot.slane %v1763_v18, 9  ;;  %v1861_v28 = vrot.slane %v7755_v63, 5  ;;  %v7850_v53 = vld [vmem:[#allocation2 + $0x64] sm:$0xf]  ;;  %v7857_v18 = vld [vmem:[#allocation2 + $0x28] sm:$0xf] }
  0xa9   : > { %v5947_v49 = vcombine.low %v1150_v40, %v1160_v22  ;;  %6800 = vmatmul.mubr.bf16.vlgmr.msra.gmra.mxu0 %v6013_v21  ;;  %v1765_v21 = vld [vmem:[#allocation2 + $0x6c] sm:$0xe]  ;;  %v1860_v10 = vrot.slane %v1858_v50, 4  ;;  %v5988_v40 = vrot.slane %v1764_v56, 9  ;;  %v1865_v7 = vrot.slane %v7850_v53, 5  ;;  %v7183_v25 = vld [vmem:[%s10140_s1 + $0x120] sm:$0xff]  }
  0xaa   : > { %6880 = vmatpush3.bf16.msra.mxu0 %v7577_v16  ;;  %6803 = vmatprep.mubr.bf16.mxu0 %v6014_v33  ;;  %v7832_v16 = vsel %vm7763_vm13, %v5985_v1, %v1844_v37  ;;  %v7839_v33 = vsel %vm7763_vm13, %v1846_v29, %v1847_v11  ;;  %v7848_v37 = vsel %vm7763_vm13, %v1853_v32, %v1854_v6  ;;  %v7273_v1 = vld [vmem:[#allocation2 + $0xc] sm:$0xf]  ;;  %v5989_v29 = vrot.slane %v1765_v21, 9  ;;  %v7875_v6 = vld [vmem:[#allocation2 + $0x60] sm:$0xf] }
  0xab   : > { %6732 = vmatmul.mubr.bf16.gmra.mxu1 %v5947_v49  ;;  %6881 = vmatprep.subr.bf16.mxu0 %v7175_v31  ;;  %v5957_v0 = vcombine.low %v7273_v1, %v7768_v14  ;;  %v5958_v11 = vcombine.low %v7274_v15, %v7773_v20  ;;  %v6016_v22 = vcombine.low %v1838_v39, %v1841_v13  ;;  %v1872_v49 = vrot.slane %v7868_v48, 5  ;;  %v7879_v39 = vld [vmem:[#allocation2 + $0x6c] sm:$0xf]  ;;  %v7883_v21 = vld [vmem:[#allocation2 + $0x78] sm:$0xe]  ;;  %v7174_v1 = vld [vmem:[%s10140_s1 + $0xf0] sm:$0xff]  }
  0xac   : > { %6751 = vmatprep.mubr.bf16.mxu1 %v5956_v43  ;;  %v1768_v43 = vld [vmem:[#allocation2 + $0x90] sm:$0xe]  ;;  %v7890_v15 = vsel %vm7763_vm13, %v5987_v9, %v1858_v50  ;;  %v7894_v20 = vsel %vm7763_vm13, %v1860_v10, %v1861_v28  ;;  %v7898_v56 = vsel %vm7763_vm13, %v5988_v40, %v1865_v7  ;;  %v1867_v13 = vrot.slane %v1865_v7, 4  ;;  %v1769_v14 = vld [vmem:[#allocation2 + $0x9c] sm:$0xe] }
  0xad   : > { %v7902_v63 = vld [vmem:[#allocation2 + $0x7c] sm:$0xf]  ;;  %v5992_v9 = vrot.slane %v1768_v43, 9  ;;  %v1893_v28 = vrot.slane %v7626_v41, 5  ;;  %v1770_v10 = vld [vmem:[#allocation2 + $0xa8] sm:$0xe]  ;;  %v7909_v40 = vsel %vm7763_vm13, %v5989_v29, %v1872_v49 }
  0xae   : > { %6882 = vmatpush3.bf16.msra.mxu0 %v7175_v31  ;;  %v6017_v31 = vcombine.low %v7832_v16, %v7839_v33  ;;  %v7187_v7 = vld [vmem:[%s10140_s1 + $0x118] sm:$0xff]   ;;  %v7951_v41 = vld [vmem:[#allocation2 + $0x84] sm:$0xe]  ;;  %v7283_v55 = vld [vmem:[#allocation2 + $0x80] sm:$0x1]  ;;  %v1910_v29 = vrot.slane %v7724_v19, 5 }
  0xaf   : > { %6883 = vmatprep.subr.bf16.mxu0 %v7179_v62  ;;  %v1895_v43 = vrot.slane %v1893_v28, 4  ;;  %v7986_v33 = vld [vmem:[#allocation2 + $0x84] sm:$0xf]  ;;  %v10188_v36 = vrot.slane %v7883_v21, 9 }
  0xb1   : > { %6804 = vmatmul.mubr.bf16.gmra.mxu0 %v6015_v5  ;;  %v7280_v5 = vld [vmem:[#allocation2 + $0x74] sm:$0x1] }
  0xb2   : > { %6807 = vmatprep.mubr.bf16.mxu0 %v6016_v22  ;;  %6884 = vmatpush3.bf16.msra.mxu0 %v7179_v62  ;;  %v1875_v45 = vrot.slane %v7280_v5, 5  ;;  %v1874_v62 = vrot.slane %v1872_v49, 4  ;;  %v1896_v5 = vrot.slane %v7628_v42, 5  ;;  %v7178_v49 = vld [vmem:[%s10140_s1 + $0xe8] sm:$0xff]   ;;  %v7191_v42 = vld [vmem:[%s10140_s1 + $0x110] sm:$0xff]   ;;  %v1882_v22 = vrot.slane %v7283_v55, 5 }
  0xb3   : > { %6752 = vmatmul.mubr.bf16.vlgmr.msra.gmra.mxu1 %v5957_v0  ;;  %6885 = vmatprep.subr.bf16.mxu0 %v7183_v25  ;;  %v7921_v0 = vsel %vm7763_vm13, %v5992_v9, %v1893_v28  ;;  %v1900_v9 = vrot.slane %v7669_v52, 5  ;;  %v1903_v28 = vrot.slane %v7676_v4, 5  ;;  %v2628_v4 = vld [vmem:[#allocation2 + $0x10] sm:$0xf] }
  0xb4   : > { %6832 = vmatpush3.bf16.msra.mxu1 %v7591_v35  ;;  %6755 = vmatprep.mubr.bf16.mxu1 %v5958_v11  ;;  %v7932_v35 = vsel %vm7763_vm13, %v1867_v13, %v1868_v2  ;;  %v5993_v11 = vrot.slane %v1769_v14, 9  ;;  %v7942_v50 = vsel %vm7763_vm13, %v1895_v43, %v1896_v5  ;;  %v5994_v2 = vrot.slane %v1770_v10, 9  ;;  %v2627_v13 = vld [vmem:[#allocation2 + $0xc] sm:$0xf]  ;;  %v7949_v14 = vld [vmem:[%s10140_s1 + $0xe0] sm:$0xff]  }
  0xb5   : > { %6833 = vmatprep.subr.bf16.mxu1 %v7174_v1  ;;  %v1902_v5 = vrot.slane %v1900_v9, 4  ;;  %v1907_v43 = vrot.slane %v7722_v34, 5  ;;  %v7962_v10 = vsel %vm7763_vm13, %v1874_v62, %v1875_v45  ;;  %v6020_v16 = vcombine.low %v7898_v56, %v7932_v35  ;;  %v8047_v34 = vld [vmem:[#allocation2 + $0x30] sm:$0xf] }
  0xb6   : > { %6886 = vmatpush3.bf16.msra.mxu0 %v7183_v25  ;;  %v7957_v25 = vsel %vm7763_vm13, %v5993_v11, %v1900_v9  ;;  %v7970_v11 = vld [vmem:[#allocation2 + $0x88] sm:$0xf]  ;;  %v10183_v9 = vcombine.low %v7843_v46, %v7848_v37  ;;  %v2676_v55 = vshrl.u32 %v2627_v13, 16  ;;  %v7998_v46 = vld [vmem:[%s10140_s1 + $0xd8] sm:$0xff]   ;;  %v2685_v35 = vshll.u32 %v2628_v4, 16 }
  0xb7   : > { %6887 = vmatprep.subr.bf16.mxu0 %v7187_v7  ;;  %v7975_v45 = vsel %vm7763_vm13, %v1902_v5, %v1903_v28  ;;  %v7979_v19 = vsel %vm7763_vm13, %v5994_v2, %v1907_v43  ;;  %v1909_v62 = vrot.slane %v1907_v43, 4  ;;  %v2630_v2 = vld [vmem:[#allocation2 + $0x18] sm:$0xf]  ;;  %v10184_v5 = vcombine.low %v7855_v60, %v7857_v18  ;;  %v7195_v37 = vld [vmem:[%s10140_s1 + $0x108] sm:$0xff]  }
  0xb8   : > { %6834 = vmatpush3.bf16.msra.mxu1 %v7174_v1  ;;  %v1886_v1 = vrot.slane %v7970_v11, 5  ;;  %v2689_v43 = vshrl.u32 %v2628_v4, 16  ;;  %v10185_v60 = vcombine.low %v7584_v38, %v7602_v59  ;;  %v1914_v38 = vrot.slane %v7786_v54, 5  ;;  %v2629_v59 = vld [vmem:[#allocation2 + $0x14] sm:$0x1] }
  0xb9   : > { %6808 = vmatmul.mubr.bf16.gmra.mxu0 %v6017_v31  ;;  %6835 = vmatprep.subr.bf16.mxu1 %v7178_v49  ;;  %v8005_v56 = vsel %vm7763_vm13, %v1909_v62, %v1910_v29  ;;  %v5991_v31 = vrot.slane %v7951_v41, 9  ;;  %v7286_v62 = vld [vmem:[#allocation2 + $0x8c] sm:$0x1]  ;;  %v2703_v44 = vshll.u32 %v2630_v2, 16  ;;  %v10187_v29 = vrot.slane %v7902_v63, 5 }
  0xba   : > { %6811 = vmatprep.mubr.bf16.mxu0 %v10183_v9  ;;  %6888 = vmatpush3.bf16.msra.mxu0 %v7187_v7  ;;  %v2679_v7 = vshll.u32 %v2627_v13, 16  ;;  %v2631_v9 = vld [vmem:[#allocation2 + $0x1c] sm:$0xf]  ;;  %v1771_v13 = vld [vmem:[#allocation2 + $0xb4] sm:$0xe]  ;;  %v1888_v4 = vrot.slane %v1886_v1, 4 }
  0xbb   : > { %6756 = vmatmul.mubr.bf16.gmra.mxu1 %v10184_v5  ;;  %6889 = vmatprep.subr.bf16.mxu0 %v7191_v42  ;;  %v10186_v5 = vrot.slane %v7902_v63, 5  ;;  %v1889_v28 = vrot.slane %v7286_v62, 5  ;;  %v2709_v41 = vshll.u32 %v2631_v9, 16  ;;  %v8029_v62 = vsel %vm7763_vm13, %v10188_v36, %v10187_v29  ;;  %v8036_v54 = vld [vmem:[#allocation2 + $0x28] sm:$0xf] }
  0xbc   : > { %6759 = vmatprep.mubr.bf16.mxu1 %v10185_v60  ;;  %6836 = vmatpush3.bf16.msra.mxu1 %v7178_v49  ;;  %v2678_v49 = vrot.slane %v2676_v55, 4  ;;  %v8019_v60 = vld [vmem:[#allocation2 + $0x20] sm:$0x1]  ;;  %v2681_v18 = vrot.slane %v2679_v7, 5  ;;  %v2691_v7 = vrot.slane %v2689_v43, 4  ;;  %v8045_v36 = vsel %vm7763_vm13, %v5991_v31, %v1886_v1 }
  0xbd   : > { %v1881_v32 = vrot.slane %v10186_v5, 4  ;;  %6837 = vmatprep.subr.bf16.mxu1 %v7949_v14  ;;  %v2700_v5 = vshrl.u32 %v2630_v2, 16  ;;  %v7199_v55 = vld [vmem:[%s10140_s1 + $0x100] sm:$0xff]   ;;  %v2713_v2 = vshrl.u32 %v2631_v9, 16  ;;  %v2705_v23 = vrot.slane %v2703_v44, 5 }
  0xbe   : > { %6890 = vmatpush3.bf16.msra.mxu0 %v7191_v42  ;;  %v8034_v42 = vrot.slane %v2685_v35, 5  ;;  %v10189_v35 = vcombine.low %v7890_v15, %v7894_v20  ;;  %v1916_v1 = vrot.slane %v1914_v38, 4  ;;  %v1917_v44 = vrot.slane %v7788_v51, 5  ;;  %v8074_v51 = vld [vmem:[#allocation2 + $0x94] sm:$0xf] }
  0xbf   : > { %6891 = vmatprep.subr.bf16.mxu0 %v7195_v37  ;;  %v8041_v21 = vsel %vm7763_vm13, %v1881_v32, %v1882_v22  ;;  %v2702_v29 = vrot.slane %v2700_v5, 4  ;;  %v7190_v32 = vld [vmem:[%s10140_s1 + $0xd0] sm:$0xff]   ;;  %v5995_v22 = vrot.slane %v1771_v13, 9  ;;  %v2682_v31 = vor.u32 %v2681_v18, %v2678_v49 }
  0xc0   : > { %6838 = vmatpush3.bf16.msra.mxu1 %v7949_v14  ;;  %v8055_v14 = vsel %vm7763_vm13, %v1888_v4, %v1889_v28  ;;  %v2695_v43 = vshll.u32 %v2629_v59, 16  ;;  %v8061_v20 = vrot.slane %v2709_v41, 5  ;;  %v2719_v15 = vshll.u32 %v8019_v60, 16  ;;  %v8067_v28 = vld [vmem:[%s10140_s1 + $0x1b8] sm:$0xff]   ;;  %v8072_v13 = vld [vmem:[#allocation2 + $0x90] sm:$0xf] }
  0xc1   : > { %6812 = vmatmul.mubr.bf16.gmra.mxu0 %v10189_v35  ;;  %6839 = vmatprep.subr.bf16.mxu1 %v7998_v46  ;;  %v10190_v9 = vcombine.low %v7639_v57, %v7649_v12  ;;  %v2715_v18 = vrot.slane %v2713_v2, 4  ;;  %v2724_v4 = vshrl.u32 %v8021_v30, 16  ;;  %v10191_v59 = vcombine.low %v7689_v27, %v7703_v58  ;;  %v7194_v12 = vld [vmem:[%s10140_s1 + $0xc8] sm:$0xff]  }
  0xc2   : > { %6815 = vmatprep.mubr.bf16.mxu0 %v6020_v16  ;;  %6892 = vmatpush3.bf16.msra.mxu0 %v7195_v37  ;;  %v2692_v37 = vor.u32 %v2691_v7, %v8034_v42  ;;  %v6022_v57 = vcombine.low %v8029_v62, %v8041_v21  ;;  %v2706_v49 = vor.u32 %v2705_v23, %v2702_v29  ;;  %v2727_v60 = vshll.u32 %v8021_v30, 16  ;;  %v2639_v7 = vld [vmem:[#allocation2 + $0x3c] sm:$0xf]  ;;  %v8109_v21 = vld [vmem:[#allocation2 + $0x2c] sm:$0x1]  ;;  %v7198_v29 = vld [vmem:[%s10140_s1 + $0xc0] sm:$0xff]  }
  0xc3   : > { %6760 = vmatmul.mubr.bf16.gmra.mxu1 %v10190_v9  ;;  %6893 = vmatprep.subr.bf16.mxu0 %v7199_v55  ;;  %v2733_v5 = vshll.u32 %v8036_v54, 16  ;;  %v8095_v27 = vsel %vm7763_vm13, %v5995_v22, %v1914_v38  ;;  %v2737_v58 = vshrl.u32 %v8036_v54, 16  ;;  %v2748_v62 = vshrl.u32 %v8047_v34, 16  ;;  %10193 = vst [vmem:[#allocation11_spill] sm:$0xff] %v8109_v21  ;;  %v8152_v16 = vld [vmem:[#allocation2 + $0x44] sm:$0x1] }
  0xc4   : > { %6763 = vmatprep.mubr.bf16.mxu1 %v10191_v59  ;;  %6840 = vmatpush3.bf16.msra.mxu1 %v7998_v46  ;;  %v8098_v46 = vld [vmem:[#allocation2 + $0x34] sm:$0xf]  ;;  %v8103_v30 = vsel %vm7763_vm13, %v1916_v1, %v1917_v44  ;;  %v8105_v23 = vrot.slane %v2682_v31, 4  ;;  %v8107_v2 = vrot.slane %v2695_v43, 5  ;;  %v2751_v38 = vshll.u32 %v8047_v34, 16  ;;  %10197 = vst [vmem:[#allocation13_spill] sm:$0xff] %v8152_v16 }
  0xc5   : > { %6841 = vmatprep.subr.bf16.mxu1 %v7190_v32  ;;  %10192 = vst [vmem:[#allocation10_spill] sm:$0xff] %v8098_v46  ;;  %v8115_v35 = vrot.slane %v2692_v37, 4  ;;  %v2716_v22 = vor.u32 %v2715_v18, %v8061_v20  ;;  %v8118_v9 = vrot.slane %v2719_v15, 5  ;;  %v8121_v1 = vrot.slane %v2706_v49, 4  ;;  %v8126_v43 = vld [vmem:[#allocation2 + $0x40] sm:$0xf] }
  0xc6   : > { %6894 = vmatpush3.bf16.msra.mxu0 %v7199_v55  ;;  %v2726_v55 = vrot.slane %v2724_v4, 4  ;;  %v2729_v44 = vrot.slane %v2727_v60, 5  ;;  %v8123_v31 = vrot.slane %v2733_v5, 5  ;;  %v2757_v34 = vshll.u32 %v8098_v46, 16  ;;  %v8131_v18 = vld [vmem:[#allocation2 + $0x38] sm:$0x1] }
  0xc7   : > { %6975 = vmatprep.subr.bf16.mxu0 %v8067_v28  ;;  %v10194_v37 = vcombine.low %v7909_v40, %v7962_v10  ;;  %v2739_v15 = vrot.slane %v2737_v58, 4  ;;  %v2750_v59 = vrot.slane %v2748_v62, 4  ;;  %v2772_v4 = vshrl.u32 %v2639_v7, 16  ;;  %v2642_v49 = vld [vmem:[#allocation2 + $0x48] sm:$0xf] }
  0xc8   : > { %6842 = vmatpush3.bf16.msra.mxu1 %v7190_v32  ;;  %v2761_v32 = vshrl.u32 %v8098_v46, 16  ;;  %v2753_v40 = vrot.slane %v2751_v38, 5  ;;  %v2775_v10 = vshll.u32 %v2639_v7, 16  ;;  %v10196_v58 = vcombine.low %v7738_v8, %v7746_v26  ;;  %v2645_v5 = vld [vmem:[#allocation2 + $0x54] sm:$0xf] }
  0xc9   : > { %6816 = vmatmul.mubr.bf16.gmra.mxu0 %v10194_v37  ;;  %6843 = vmatprep.subr.bf16.mxu1 %v7194_v12  ;;  %v8140_v37 = vld [vmem:[#allocation2 + $0x4c] sm:$0xf]  ;;  %v8149_v62 = vrot.slane %v2716_v22, 4  ;;  %v2743_v60 = vshll.u32 %v8109_v21, 16  ;;  %v2781_v38 = vshll.u32 %v8126_v43, 16  ;;  %v10198_v7 = vcombine.low %v7875_v6, %v7850_v53 }
  0xca   : > { %6819 = vmatprep.mubr.bf16.mxu0 %v6022_v57  ;;  %10195 = vst [vmem:[#allocation12_spill] sm:$0xff] %v8140_v37  ;;  %v2730_v26 = vor.u32 %v2729_v44, %v2726_v55  ;;  %v2763_v22 = vrot.slane %v2761_v32, 4  ;;  %v8167_v57 = vld [vmem:[%s10140_s1 + $0x178] sm:$0xff]   ;;  %v2740_v53 = vor.u32 %v2739_v15, %v8123_v31  ;;  %v2774_v6 = vrot.slane %v2772_v4, 4 }
  0xcb   : > { %6764 = vmatmul.mubr.bf16.gmra.mxu1 %v10196_v58  ;;  %v8162_v58 = vrot.slane %v2757_v34, 5  ;;  %v2754_v41 = vor.u32 %v2753_v40, %v2750_v59  ;;  %v2767_v8 = vshll.u32 %v8131_v18, 16  ;;  %v2796_v55 = vshrl.u32 %v2642_v49, 16  ;;  %v8184_v40 = vld [vmem:[#allocation2 + $0x58] sm:$0xf] }
  0xcc   : > { %6767 = vmatprep.mubr.bf16.mxu1 %v10198_v7  ;;  %6844 = vmatpush3.bf16.msra.mxu1 %v7194_v12  ;;  %v2777_v12 = vrot.slane %v2775_v10, 5  ;;  %v2785_v7 = vshrl.u32 %v8126_v43, 16  ;;  %v2799_v44 = vshll.u32 %v2642_v49, 16  ;;  %v8172_v34 = vrot.slane %v2743_v60, 5  ;;  %v8181_v10 = vld [vmem:[#allocation2 + $0x50] sm:$0x1] }
  0xcd   : > { %6845 = vmatprep.subr.bf16.mxu1 %v7198_v29  ;;  %v8174_v32 = vrot.slane %v2781_v38, 5  ;;  %v2805_v46 = vshll.u32 %v8140_v37, 16  ;;  %v8177_v21 = vrot.slane %v2730_v26, 4  ;;  %v2764_v15 = vor.u32 %v2763_v22, %v8162_v58 }
  0xce   : > { %v2787_v61 = vrot.slane %v2785_v7, 4  ;;  %v2791_v4 = vshll.u32 %v8152_v16, 16  ;;  %v2809_v59 = vshrl.u32 %v8140_v37, 16  ;;  %v10199_v49 = vcombine.low %v8045_v36, %v8055_v14  ;;  %v2648_v16 = vld [vmem:[#allocation2 + $0x60] sm:$0xf] }
  0xcf   : > { %v8194_v60 = vrot.slane %v2740_v53, 4  ;;  %v2778_v38 = vor.u32 %v2777_v12, %v2774_v6  ;;  %v2820_v26 = vshrl.u32 %v2645_v5, 16  ;;  %v10200_v22 = vcombine.low %v7921_v0, %v7942_v50  ;;  %v8211_v0 = vld [vmem:[#allocation2 + $0x64] sm:$0xf] }
  0xd0   : > { %6846 = vmatpush3.bf16.msra.mxu1 %v7198_v29  ;;  %v8199_v7 = vrot.slane %v2754_v41, 4  ;;  %v8201_v37 = vrot.slane %v2767_v8, 5  ;;  %v2798_v36 = vrot.slane %v2796_v55, 4  ;;  %v2801_v14 = vrot.slane %v2799_v44, 5 }
  0xd1   : > { %6820 = vmatmul.mubr.bf16.gmra.mxu0 %v10199_v49  ;;  %6927 = vmatprep.subr.bf16.mxu1 %v8167_v57  ;;  %v8203_v49 = vld [vmem:[#allocation2 + $0x5c] sm:$0x1]  ;;  %v10201_v29 = vcombine.low %v7879_v39, %v7868_v48  ;;  %v2788_v53 = vor.u32 %v2787_v61, %v8174_v32  ;;  %v8209_v6 = vrot.slane %v2805_v46, 5  ;;  %v2811_v12 = vrot.slane %v2809_v59, 4 }
  0xd2   : > { %6823 = vmatprep.mubr.bf16.mxu0 %v10200_v22  ;;  %v2823_v50 = vshll.u32 %v2645_v5, 16  ;;  %v10202_v41 = vcombine.low %v7900_v47, %v7902_v63  ;;  %v2765_v8 = vrot.slane %v2764_v15, 4  ;;  %v2793_v55 = vrot.slane %v2791_v4, 5 }
  0xd3   : > { %6768 = vmatmul.mubr.bf16.gmra.mxu1 %v10201_v29  ;;  %v2829_v44 = vshll.u32 %v8184_v40, 16  ;;  %v2833_v22 = vshrl.u32 %v8184_v40, 16  ;;  %v2779_v48 = vrot.slane %v2778_v38, 4  ;;  %v2815_v39 = vshll.u32 %v8181_v10, 16 }
  0xd4   : > { %6771 = vmatprep.mubr.bf16.mxu1 %v10202_v41  ;;  %v2822_v61 = vrot.slane %v2820_v26, 4  ;;  %v2825_v46 = vrot.slane %v2823_v50, 5  ;;  %v2736_v5 = vsel %vm7368_vm6, %v8177_v21, %v8123_v31  ;;  %v2802_v59 = vor.u32 %v2801_v14, %v2798_v36 }
  0xd5   : > { %v8223_v29 = vrot.slane %v2829_v44, 5  ;;  %v2844_v47 = vshrl.u32 %v2648_v16, 16  ;;  %v2789_v63 = vrot.slane %v2788_v53, 4  ;;  %v2812_v15 = vor.u32 %v2811_v12, %v8209_v6  ;;  %v8250_v12 = vld [vmem:[#allocation2 + $0x68] sm:$0x1] }
  0xd6   : > { %v2835_v4 = vrot.slane %v2833_v22, 4  ;;  %v2839_v41 = vshll.u32 %v8203_v49, 16  ;;  %v2746_v38 = vsel %vm7368_vm6, %v8194_v60, %v8172_v34  ;;  %v2847_v26 = vshll.u32 %v2648_v16, 16  ;;  %v2651_v34 = vld [vmem:[#allocation2 + $0x6c] sm:$0xf] }
  0xd7   : > { %v2853_v50 = vshll.u32 %v8211_v0, 16  ;;  %v2857_v21 = vshrl.u32 %v8211_v0, 16  ;;  %v10203_v31 = vcombine.low %v7957_v25, %v7975_v45  ;;  %v2760_v36 = vsel %vm7368_vm6, %v8199_v7, %v8162_v58  ;;  %v8252_v44 = vld [vmem:[#allocation2 + $0x70] sm:$0xf] }
  0xd8   : > { %v2770_v14 = vsel %vm7368_vm6, %v2765_v8, %v8201_v37  ;;  %v2826_v53 = vor.u32 %v2825_v46, %v2822_v61  ;;  %v2836_v16 = vor.u32 %v2835_v4, %v8223_v29  ;;  %v10204_v60 = vcombine.low %v7979_v19, %v8005_v56 }
  0xd9   : > { %6824 = vmatmul.mubr.bf16.gmra.mxu0 %v10203_v31  ;;  %v2784_v25 = vsel %vm7368_vm6, %v2779_v48, %v8174_v32  ;;  %v2817_v45 = vrot.slane %v2815_v39, 5  ;;  %v2846_v58 = vrot.slane %v2844_v47, 4  ;;  %v2849_v7 = vrot.slane %v2847_v26, 5  ;;  %v2654_v26 = vld [vmem:[#allocation2 + $0x78] sm:$0xf] }
  0xda   : > { %6827 = vmatprep.mubr.bf16.mxu0 %v10204_v60  ;;  %v10205_v37 = vcombine.low %v7986_v33, %v7970_v11  ;;  %v2794_v8 = vsel %vm7368_vm6, %v2789_v63, %v2793_v55  ;;  %v2803_v19 = vrot.slane %v2802_v59, 4  ;;  %v2813_v56 = vrot.slane %v2812_v15, 4  ;;  %v8303_v31 = vld [vmem:[#allocation2 + $0x88] sm:$0xf] }
  0xdb   : > { %v2841_v22 = vrot.slane %v2839_v41, 5  ;;  %v10206_v32 = vcombine.low %v8072_v13, %v8074_v51  ;;  %v8262_v48 = vrot.slane %v2853_v50, 5  ;;  %v2859_v39 = vrot.slane %v2857_v21, 4  ;;  %v8290_v50 = vld [vmem:[#allocation2 + $0x7c] sm:$0xf]  ;;  %10211 = vst [vmem:[#allocation14_spill] sm:$0xff] %v8303_v31 }
  0xdc   : > { %6772 = vmatmul.mubr.bf16.gmra.mxu1 %v10205_v37  ;;  %v2868_v61 = vshrl.u32 %v2651_v34, 16  ;;  %v2871_v46 = vshll.u32 %v2651_v34, 16  ;;  %v2827_v47 = vrot.slane %v2826_v53, 4  ;;  %v2837_v4 = vrot.slane %v2836_v16, 4 }
  0xdd   : > { %6775 = vmatprep.mubr.bf16.mxu1 %v10206_v32  ;;  %v2877_v11 = vshll.u32 %v8252_v44, 16  ;;  %v2881_v33 = vshrl.u32 %v8252_v44, 16  ;;  %v10207_v55 = vsel %vm7368_vm6, %v8115_v35, %v8107_v2  ;;  %v10208_v13 = vsel %vm7368_vm6, %v8105_v23, %v8034_v42  ;;  %v8288_v35 = vld [vmem:[#allocation2 + $0x74] sm:$0x1]  ;;  %v2660_v32 = vld [vmem:[#allocation2 + $0x90] sm:$0xf] }
  0xde   : > { %v6092_v51 = vcombine.low %v10208_v13, %v10207_v55  ;;  %v10209_v59 = vsel %vm7368_vm6, %v8149_v62, %v8118_v9  ;;  %v10210_v63 = vsel %vm7368_vm6, %v8121_v1, %v8061_v20  ;;  %v8286_v41 = vcombine.low %v2736_v5, %v2746_v38  ;;  %v2657_v20 = vld [vmem:[#allocation2 + $0x84] sm:$0xf] }
  0xdf   : > { %v6093_v15 = vcombine.low %v10210_v63, %v10209_v59  ;;  %v2850_v2 = vor.u32 %v2849_v7, %v2846_v58  ;;  %v8292_v42 = vcombine.low %v2760_v36, %v2770_v14  ;;  %v8294_v23 = vcombine.low %v2784_v25, %v2794_v8  ;;  %v8325_v58 = vld [vmem:[#allocation2 + $0x80] sm:$0x1]  ;;  %v10215_v8 = vld [vmem:[#allocation6_spill] sm:$0xff] }
  0xe0   : > { %v2808_v9 = vsel %vm7368_vm6, %v2803_v19, %v8209_v6  ;;  %v2863_v62 = vshll.u32 %v8250_v12, 16  ;;  %v2818_v1 = vsel %vm7368_vm6, %v2813_v56, %v2817_v45  ;;  %v2860_v5 = vor.u32 %v2859_v39, %v8262_v48  ;;  %10214 = vst [vmem:[#allocation15_spill] sm:$0xff] %v8325_v58 }
  0xe1   : > { %v2870_v38 = vrot.slane %v2868_v61, 4  ;;  %v2873_v21 = vrot.slane %v2871_v46, 5  ;;  %v10212_v36 = vcombine.low %v8095_v27, %v8103_v30  ;;  %v2832_v6 = vsel %vm7368_vm6, %v2827_v47, %v8223_v29 }
  0xe2   : > { %v2842_v14 = vsel %vm7368_vm6, %v2837_v4, %v2841_v22  ;;  %v8313_v53 = vrot.slane %v2877_v11, 5  ;;  %v2883_v16 = vrot.slane %v2881_v33, 4  ;;  %v8315_v34 = vrot.slane %v2850_v2, 4  ;;  %v8339_v4 = vld [vmem:[#allocation2 + $0x94] sm:$0xf]  ;;  %v7200_v11 = vld [vmem:[#allocation2 + $0xc] sm:$0xff]  }
  0xe3   : > { %6828 = vmatmul.mubr.bf16.gmra.mxu0 %v10212_v36  ;;  %v2887_v60 = vshll.u32 %v8288_v35, 16  ;;  %v2892_v25 = vshrl.u32 %v2654_v26, 16  ;;  %v2895_v45 = vshll.u32 %v2654_v26, 16  ;;  %v10213_v27 = vcombine.low %v7674_v3, %v7669_v52  ;;  %10217 = vst [vmem:[#allocation6_spill] sm:$0xff] %v8339_v4 }
  0xe4   : > { %6895 = vmatprep.mubr.bf16.mxu0 %v6092_v51  ;;  %v8321_v30 = vcombine.low %v2808_v9, %v2818_v1  ;;  %v8323_v29 = vrot.slane %v2863_v62, 5  ;;  %v2901_v7 = vshll.u32 %v8290_v50, 16  ;;  %v2905_v37 = vshrl.u32 %v8290_v50, 16  ;;  %v2663_v9 = vld [vmem:[#allocation2 + $0x9c] sm:$0xf] }
  0xe5   : > { %6776 = vmatmul.mubr.bf16.gmra.mxu1 %v10213_v27  ;;  %v10216_v19 = vcombine.low %v7714_v17, %v10215_v8  ;;  %v8332_v56 = vcombine.low %v2832_v6, %v2842_v14  ;;  %v8334_v22 = vrot.slane %v2860_v5, 4  ;;  %v2916_v52 = vshrl.u32 %v2657_v20, 16  ;;  %v7207_v17 = vld [vmem:[%s10140_s1 + $0x1b0] sm:$0xff]   ;;  %v8353_v62 = vld [vmem:[#allocation2 + $0x8c] sm:$0x1] }
  0xe6   : > { %v2919_v3 = vshll.u32 %v2657_v20, 16  ;;  %v2874_v39 = vor.u32 %v2873_v21, %v2870_v38  ;;  %v2884_v61 = vor.u32 %v2883_v16, %v8313_v53  ;;  %v2925_v46 = vshll.u32 %v8303_v31, 16  ;;  %10218 = vst [vmem:[#allocation16_spill] sm:$0xff] %v8353_v62  ;;  %v8356_v21 = vld [vmem:[#allocation2 + $0xa0] sm:$0xf]  ;;  %v10222_v8 = vld [vmem:[#allocation9_spill] sm:$0xff] }
  0xe7   : > { %6779 = vmatprep.mubr.bf16.mxu1 %v10216_v19  ;;  %v2929_v47 = vshrl.u32 %v8303_v31, 16  ;;  %v2856_v33 = vsel %vm7368_vm6, %v8315_v34, %v8262_v48  ;;  %v8348_v55 = vrot.slane %v2887_v60, 5  ;;  %v2894_v13 = vrot.slane %v2892_v25, 4  ;;  %10219 = vst [vmem:[#allocation17_spill] sm:$0xff] %v8356_v21  ;;  %v8364_v60 = vld [vmem:[#allocation2 + $0x98] sm:$0x1] }
  0xe8   : > { %v2897_v51 = vrot.slane %v2895_v45, 5  ;;  %v8350_v59 = vrot.slane %v2901_v7, 5  ;;  %v2907_v63 = vrot.slane %v2905_v37, 4  ;;  %v2911_v2 = vshll.u32 %v8325_v58, 16  ;;  %10220 = vst [vmem:[#allocation18_spill] sm:$0xff] %v8364_v60  ;;  %v7211_v25 = vld [vmem:[%s10140_s1 + $0x1a8] sm:$0xff]  }
  0xe9   : > { %v2940_v26 = vshrl.u32 %v2660_v32, 16  ;;  %v2918_v20 = vrot.slane %v2916_v52, 4  ;;  %v2921_v1 = vrot.slane %v2919_v3, 5  ;;  %v2943_v5 = vshll.u32 %v2660_v32, 16  ;;  %v10221_v37 = vld [vmem:[#allocation8_spill] sm:$0xff]  ;;  %v7219_v34 = vld [vmem:[%s10140_s1 + $0x198] sm:$0xff]  }
  0xea   : > { %v2949_v38 = vshll.u32 %v8339_v4, 16  ;;  %v8358_v36 = vrot.slane %v2874_v39, 4  ;;  %v8360_v6 = vrot.slane %v2884_v61, 4  ;;  %v8362_v14 = vrot.slane %v2925_v46, 5 }
  0xeb   : > { %6896 = vmatmul.mubr.bf16.vlgmr.msra.gmra.mxu0 %v6093_v15  ;;  %v2931_v16 = vrot.slane %v2929_v47, 4  ;;  %v2898_v45 = vor.u32 %v2897_v51, %v2894_v13  ;;  %v2942_v27 = vrot.slane %v2940_v26, 4  ;;  %v2945_v15 = vrot.slane %v2943_v5, 5  ;;  %v2666_v47 = vld [vmem:[#allocation2 + $0xa8] sm:$0xf]  ;;  %v7201_v13 = vld [vmem:[#allocation2 + $0x18] sm:$0xff]  }
  0xec   : > { %6976 = vmatpush3.bf16.msra.mxu0 %v8067_v28  ;;  %6899 = vmatprep.mubr.bf16.mxu0 %v8286_v41  ;;  %v2953_v7 = vshrl.u32 %v8339_v4, 16  ;;  %v10223_v19 = vcombine.low %v10221_v37, %v10222_v8  ;;  %v2866_v28 = vsel %vm7368_vm6, %v8334_v22, %v8323_v29  ;;  %v2908_v41 = vor.u32 %v2907_v63, %v8350_v59  ;;  %v8386_v5 = vld [vmem:[#allocation2 + $0xa4] sm:$0x1] }
  0xed   : > { %6977 = vmatprep.subr.bf16.mxu0 %v7207_v17  ;;  %v8380_v52 = vrot.slane %v2911_v2, 5  ;;  %v8382_v3 = vrot.slane %v2949_v38, 5  ;;  %v2922_v32 = vor.u32 %v2921_v1, %v2918_v20  ;;  %v2964_v61 = vshrl.u32 %v2663_v9, 16  ;;  %10224 = vst [vmem:[#allocation8_spill] sm:$0xff] %v8386_v5  ;;  %v7204_v63 = vld [vmem:[#allocation2 + $0x24] sm:$0xff]   ;;  %v7206_v38 = vld [vmem:[%s10140_s1 + $0x170] sm:$0xff]  }
  0xee   : > { %6780 = vmatmul.mubr.bf16.gmra.mxu1 %v10223_v19  ;;  %v2955_v39 = vrot.slane %v2953_v7, 4  ;;  %v2967_v46 = vshll.u32 %v2663_v9, 16  ;;  %v2932_v51 = vor.u32 %v2931_v16, %v8362_v14  ;;  %v2935_v26 = vshll.u32 %v8353_v62, 16  ;;  %v8393_v1 = vld [vmem:[#allocation2 + $0xac] sm:$0xf]  ;;  %v7215_v16 = vld [vmem:[%s10140_s1 + $0x1a0] sm:$0xff]  }
  0xef   : > { %6847 = vmatprep.mubr.bf16.mxu1 %v7200_v11  ;;  %v2973_v29 = vshll.u32 %v8356_v21, 16  ;;  %v2977_v22 = vshrl.u32 %v8356_v21, 16  ;;  %v8390_v2 = vrot.slane %v2898_v45, 4  ;;  %v2946_v11 = vor.u32 %v2945_v15, %v2942_v27  ;;  %10225 = vst [vmem:[#allocation9_spill] sm:$0xff] %v8393_v1  ;;  %v707_v62 = vld [vmem:[#allocation2 + $0xc8] sm:$0x1] }
  0xf0   : > { %6978 = vmatpush3.bf16.msra.mxu0 %v7207_v17  ;;  %v2959_v20 = vshll.u32 %v8364_v60, 16  ;;  %v2966_v9 = vrot.slane %v2964_v61, 4  ;;  %v2956_v7 = vor.u32 %v2955_v39, %v8382_v3  ;;  %v2969_v17 = vrot.slane %v2967_v46, 5  ;;  %v8493_v60 = vld [vmem:[#allocation2 + $0xbc] sm:$0x1] }
  0xf1   : > { %6979 = vmatprep.subr.bf16.mxu0 %v7211_v25  ;;  %v8402_v45 = vrot.slane %v2973_v29, 5  ;;  %v2979_v27 = vrot.slane %v2977_v22, 4  ;;  %v8404_v15 = vrot.slane %v2908_v41, 4  ;;  %v8406_v37 = vrot.slane %v2922_v32, 4  ;;  %v2669_v41 = vld [vmem:[#allocation2 + $0xb4] sm:$0xf] }
  0xf2   : > { %v2988_v8 = vshrl.u32 %v2666_v47, 16  ;;  %v2991_v19 = vshll.u32 %v2666_v47, 16  ;;  %v8414_v61 = vcombine.low %v2856_v33, %v2866_v28  ;;  %v8416_v39 = vrot.slane %v2932_v51, 4  ;;  %10228 = vst [vmem:[#allocation21_spill] sm:$0xff] %v8493_v60 }
  0xf3   : > { %6900 = vmatmul.mubr.bf16.gmra.mxu0 %v8292_v42  ;;  %v8418_v46 = vrot.slane %v2935_v26, 5  ;;  %v2970_v29 = vor.u32 %v2969_v17, %v2966_v9  ;;  %v8425_v32 = vrot.slane %v2946_v11, 4  ;;  %v8427_v47 = vrot.slane %v2959_v20, 5  ;;  %v8450_v9 = vld [vmem:[#allocation2 + $0xb8] sm:$0xf]  ;;  %v7205_v17 = vld [vmem:[#allocation2 + $0x30] sm:$0xff]  }
  0xf4   : > { %6903 = vmatprep.mubr.bf16.mxu0 %v8294_v23  ;;  %6980 = vmatpush3.bf16.msra.mxu0 %v7211_v25  ;;  %v2983_v48 = vshll.u32 %v8386_v5, 16  ;;  %v8433_v23 = vrot.slane %v2956_v7, 4  ;;  %v2980_v33 = vor.u32 %v2979_v27, %v8402_v45  ;;  %v8436_v25 = vld [vmem:[#allocation2 + $0xb0] sm:$0x1]  ;;  %v2997_v28 = vshll.u32 %v8393_v1, 16  ;;  %10227 = vst [vmem:[#allocation20_spill] sm:$0xff] %v8450_v9 }
  0xf5   : > { %6981 = vmatprep.subr.bf16.mxu0 %v7215_v16  ;;  %10226 = vst [vmem:[#allocation19_spill] sm:$0xff] %v8436_v25  ;;  %v3001_v51 = vshrl.u32 %v8393_v1, 16  ;;  %v8448_v22 = vrot.slane %v2970_v29, 4  ;;  %v2990_v11 = vrot.slane %v2988_v8, 4  ;;  %v2993_v20 = vrot.slane %v2991_v19, 5  ;;  %v7208_v29 = vld [vmem:[#allocation2 + $0x3c] sm:$0xff]  }
  0xf6   : > { %6848 = vmatmul.mubr.bf16.vlgmr.msra.gmra.mxu1 %v7201_v13  ;;  %v7210_v13 = vld [vmem:[%s10140_s1 + $0x168] sm:$0xff]   ;;  %v267_v7 = vld [vmem:[%s7360_s25 + $0x78] sm:$0xf]  ;;  %v268_v19 = vld [vmem:[%s7360_s25 + $0x7c] sm:$0xf]  ;;  %v8474_v42 = vrot.slane %v2983_v48, 5  ;;  %v2962_v8 = vsel %vm7368_vm6, %v8433_v23, %v8427_v47  ;;  %v10236_v31 = vsel %vm7368_vm6, %v8416_v39, %v8418_v46  ;;  %s9865_s25 = scalar_lea.vmem %s10141_s2, %s6342_s20 }
  0xf7   : > { %6928 = vmatpush3.bf16.msra.mxu1 %v8167_v57  ;;  %6851 = vmatprep.mubr.bf16.mxu1 %v7204_v63  ;;  %v3012_v63 = vshrl.u32 %v2669_v41, 16  ;;  %v3015_v26 = vshll.u32 %v2669_v41, 16  ;;  %v7214_v27 = vld [vmem:[%s10140_s1 + $0x160] sm:$0xff]   ;;  %v2981_v1 = vrot.slane %v2980_v33, 4  ;;  %v8486_v57 = vrot.slane %v2997_v28, 5  ;;  %v7227_v23 = vld [vmem:[%s10140_s1 + $0x188] sm:$0xff]  }
  0xf8   : > { %6929 = vmatprep.subr.bf16.mxu1 %v7206_v38  ;;  %6982 = vmatpush3.bf16.msra.mxu0 %v7215_v16  ;;  %v7223_v16 = vld [vmem:[%s10140_s1 + $0x190] sm:$0xff]   ;;  %v3003_v48 = vrot.slane %v3001_v51, 4  ;;  %v2976_v41 = vsel %vm7368_vm6, %v8448_v22, %v8402_v45  ;;  %v2994_v5 = vor.u32 %v2993_v20, %v2990_v11  ;;  %v3007_v21 = vshll.u32 %v8436_v25, 16  ;;  %v703_v45 = vld [vmem:[#allocation2 + $0xc0] sm:$0xf]  ;;  %s5915_s20 = sshll.u32 %s10368_s13, 1 }
  0xf9   : > { %6983 = vmatprep.subr.bf16.mxu0 %v7219_v34  ;;  %v528_v47 = vshrl.u32 %v267_v7, 16  ;;  %v3025_v33 = vshrl.u32 %v8450_v9, 16  ;;  %v531_v28 = vshll.u32 %v267_v7, 16  ;;  %v536_v51 = vshrl.u32 %v268_v19, 16  ;;  %s181_s26 = scalar_lea.vmem %s10142_s3, %s5915_s20 }
  0xfa   : > { %v3014_v22 = vrot.slane %v3012_v63, 4  ;;  %v3017_v11 = vrot.slane %v3015_v26, 5  ;;  %v539_v25 = vshll.u32 %v268_v19, 16  ;;  %v3004_v4 = vor.u32 %v3003_v48, %v8486_v57  ;;  %v3383_v19 = vld [vmem:[#allocation2 + $0x24] sm:$0xe] }
  0xfb   : > { %6930 = vmatpush3.bf16.msra.mxu1 %v7206_v38  ;;  %6904 = vmatmul.mubr.bf16.gmra.mxu0 %v8321_v30  ;;  %v3021_v38 = vshll.u32 %v8450_v9, 16  ;;  %v530_v20 = vrot.slane %v528_v47, 7  ;;  %v2986_v30 = vsel %vm7368_vm6, %v2981_v1, %v8474_v42  ;;  %v3031_v9 = vshll.u32 %v8493_v60, 16  ;;  %v7209_v1 = vld [vmem:[#allocation2 + $0x48] sm:$0xff]  }
  0xfc   : > { %6931 = vmatprep.subr.bf16.mxu1 %v7210_v13  ;;  %6907 = vmatprep.mubr.bf16.mxu0 %v8332_v56  ;;  %v538_v7 = vrot.slane %v536_v51, 7  ;;  %v7218_v56 = vld [vmem:[%s10140_s1 + $0x158] sm:$0xff]   ;;  %v8512_v26 = vrot.slane %v3007_v21, 5  ;;  %v3027_v48 = vrot.slane %v3025_v33, 4  ;;  %v10229_v21 = vsel %vm7368_vm6, %v8360_v6, %v8348_v55 }
  0xfd   : > { %6984 = vmatpush3.bf16.msra.mxu0 %v7219_v34  ;;  %v8510_v34 = vrot.slane %v2994_v5, 4  ;;  %v534_v63 = vrot.slane %v530_v20, 4  ;;  %v8514_v42 = vrot.slane %v3021_v38, 5  ;;  %v10230_v5 = vsel %vm7368_vm6, %v8358_v36, %v8313_v53 }
  0xfe   : > { %6852 = vmatmul.mubr.bf16.gmra.mxu1 %v7205_v17  ;;  %6985 = vmatprep.subr.bf16.mxu0 %v7223_v16  ;;  %v533_v17 = vor.u32 %v531_v28, %v530_v20  ;;  %v541_v47 = vor.u32 %v539_v25, %v538_v7  ;;  %v543_v51 = vrot.slane %v538_v7, 4  ;;  %v6100_v38 = vcombine.low %v10230_v5, %v10229_v21  ;;  %v3384_v20 = vld [vmem:[#allocation2 + $0x30] sm:$0xe]  ;;  %v7213_v5 = vld [vmem:[#allocation2 + $0x60] sm:$0xff]  }
  0xff   : > { %6855 = vmatprep.mubr.bf16.mxu1 %v7208_v29  ;;  %6932 = vmatpush3.bf16.msra.mxu1 %v7210_v13  ;;  %v7231_v13 = vld [vmem:[%s10140_s1 + $0x180] sm:$0xff]   ;;  %v7212_v29 = vld [vmem:[#allocation2 + $0x54] sm:$0xff]   ;;  %v3018_v33 = vor.u32 %v3017_v11, %v3014_v22  ;;  %v8531_v7 = vrot.slane %v3004_v4, 4  ;;  %v8533_v60 = vrot.slane %v3031_v9, 5  ;;  %v10234_v53 = vsel %vm7368_vm6, %v8404_v15, %v8380_v52  ;;  %v3385_v15 = vld [vmem:[#allocation2 + $0x3c] sm:$0xe] }
 0x100   : > { %6933 = vmatprep.subr.bf16.mxu1 %v7214_v27  ;;  %v704_v28 = vsel %vm7382_vm9, %v533_v17, %v703_v45  ;;  %v542_v55 = vsel %vm7373_vm8, %v534_v63, %v541_v47  ;;  %v708_v58 = vsel %vm7391_vm10, %v543_v51, %v707_v62  ;;  %v10235_v4 = vsel %vm7368_vm6, %v8390_v2, %v8350_v59  ;;  %v7226_v45 = vld [vmem:[%s10140_s1 + $0x148] sm:$0xff]  }
 0x101   : > { %6986 = vmatpush3.bf16.msra.mxu0 %v7223_v16  ;;  %705 = vst [vmem:[#allocation2 + $0xc0] sm:$0xf] %v704_v28  ;;  %v8549_v36 = vcombine.low %v10235_v4, %v10234_v53  ;;  %v10237_v62 = vsel %vm7368_vm6, %v8406_v37, %v8362_v14  ;;  %v10238_v52 = vsel %vm7368_vm6, %v8425_v32, %v8382_v3  ;;  %706 = vst [vmem:[#allocation2 + $0xc4] sm:$0xf] %v542_v55  ;;  %v7222_v14 = vld [vmem:[%s10140_s1 + $0x150] sm:$0xff]   ;;  %v10239_v3 = vld [vmem:[#allocation11_spill] sm:$0xff] }
 0x102   : > { %6987 = vmatprep.subr.bf16.mxu0 %v7227_v23  ;;  %v8561_v9 = vcombine.low %v10237_v62, %v10236_v31  ;;  %v8568_v59 = vcombine.low %v10238_v52, %v2962_v8  ;;  %v8570_v2 = vcombine.low %v2976_v41, %v2986_v30  ;;  %709 = vst [vmem:[#allocation2 + $0xc8] sm:$0x1] %v708_v58  ;;  %v6118_v39 = vrot.slane %v3383_v19, 9  ;;  %v8581_v58 = vld [vmem:[#allocation2 + $0x10] sm:$0xf] }
 0x103   : > { %6934 = vmatpush3.bf16.msra.mxu1 %v7214_v27  ;;  %6908 = vmatmul.mubr.bf16.gmra.mxu0 %v8414_v61  ;;  %v3028_v37 = vor.u32 %v3027_v48, %v8514_v42  ;;  %v3461_v46 = vrot.slane %v8036_v54, 5  ;;  %v3464_v32 = vrot.slane %v10239_v3, 5  ;;  %v8579_v27 = vrot.slane %v3018_v33, 4  ;;  %v10240_v16 = vld [vmem:[#allocation10_spill] sm:$0xff]  ;;  %v8591_v54 = vld [vmem:[%s10140_s1 + $0x238] sm:$0xff]  }
 0x104   : > { %6935 = vmatprep.subr.bf16.mxu1 %v7218_v56  ;;  %6911 = vmatprep.mubr.bf16.mxu0 %v6100_v38  ;;  %v3447_v61 = vrot.slane %v8581_v58, 5  ;;  %v6119_v8 = vrot.slane %v3384_v20, 9  ;;  %v3468_v41 = vrot.slane %v10240_v16, 5  ;;  %v3471_v30 = vrot.slane %v8131_v18, 5  ;;  %v3386_v47 = vld [vmem:[#allocation2 + $0x48] sm:$0xe] }
 0x105   : > { %6988 = vmatpush3.bf16.msra.mxu0 %v7227_v23  ;;  %v8595_v22 = vsel %vm7763_vm13, %v6118_v39, %v3461_v46  ;;  %v3463_v11 = vrot.slane %v3461_v46, 4  ;;  %v6120_v17 = vrot.slane %v3385_v15, 9  ;;  %v3000_v63 = vsel %vm7368_vm6, %v8510_v34, %v8486_v57  ;;  %v3387_v20 = vld [vmem:[#allocation2 + $0x54] sm:$0xe]  ;;  %v7216_v31 = vld [vmem:[#allocation2 + $0x6c] sm:$0xff]  }
 0x106   : > { %6856 = vmatmul.mubr.bf16.gmra.mxu1 %v7209_v1  ;;  %6989 = vmatprep.subr.bf16.mxu0 %v7231_v13  ;;  %v8604_v19 = vsel %vm7763_vm13, %v6119_v8, %v3468_v41  ;;  %v3470_v1 = vrot.slane %v3468_v41, 4  ;;  %v3475_v48 = vrot.slane %v8126_v43, 5  ;;  %v3010_v18 = vsel %vm7368_vm6, %v8531_v7, %v8512_v26  ;;  %v3388_v39 = vld [vmem:[#allocation2 + $0x60] sm:$0xe]  ;;  %v7243_v58 = vld [vmem:[%s10140_s1 + $0x228] sm:$0xff]  }
 0x107   : > { %6859 = vmatprep.mubr.bf16.mxu1 %v7212_v29  ;;  %6936 = vmatpush3.bf16.msra.mxu1 %v7218_v56  ;;  %v8611_v56 = vrot.slane %v3028_v37, 4  ;;  %v8615_v51 = vsel %vm7763_vm13, %v3463_v11, %v3464_v32  ;;  %v10242_v29 = vld [vmem:[#allocation13_spill] sm:$0xff]  ;;  %v3024_v55 = vsel %vm7368_vm6, %v8579_v27, %v8514_v42  ;;  %v6121_v4 = vrot.slane %v3386_v47, 9  ;;  %v10243_v27 = vld [vmem:[#allocation12_spill] sm:$0xff] }
 0x108   : > { %6937 = vmatprep.subr.bf16.mxu1 %v7222_v14  ;;  %v3478_v21 = vrot.slane %v10242_v29, 5  ;;  %v2672_v38 = vld [vmem:[#allocation2 + $0xc0] sm:$0xf]  ;;  %v6150_v43 = vcombine.low %v8595_v22, %v8615_v51  ;;  %v8622_v33 = vsel %vm7763_vm13, %v3470_v1, %v3471_v30  ;;  %v8626_v25 = vsel %vm7763_vm13, %v6120_v17, %v3475_v48  ;;  %v8632_v6 = vld [vmem:[#allocation2 + $0xc4] sm:$0xf] }
 0x109   : > { %6990 = vmatpush3.bf16.msra.mxu0 %v7231_v13  ;;  %v3477_v28 = vrot.slane %v3475_v48, 4  ;;  %v3036_v13 = vshrl.u32 %v2672_v38, 16  ;;  %v6151_v53 = vcombine.low %v8604_v19, %v8622_v33  ;;  %v8637_v62 = vld [vmem:[#allocation2 + $0xc8] sm:$0x1]  ;;  %v3039_v52 = vshll.u32 %v2672_v38, 16 }
 0x10a   : > { %7071 = vmatprep.subr.bf16.mxu0 %v8591_v54  ;;  %v3045_v15 = vshll.u32 %v8632_v6, 16  ;;  %v3049_v37 = vshrl.u32 %v8632_v6, 16  ;;  %v3055_v3 = vshll.u32 %v8637_v62, 16  ;;  %v3482_v8 = vrot.slane %v10243_v27, 5  ;;  %v8886_v32 = vld [vmem:[#allocation2 + $0x2c] sm:$0x1] }
 0x10b   : > { %6938 = vmatpush3.bf16.msra.mxu1 %v7222_v14  ;;  %v8643_v42 = vsel %vm7763_vm13, %v3477_v28, %v3478_v21  ;;  %6912 = vmatmul.mubr.bf16.gmra.mxu0 %v8549_v36  ;;  %v3038_v46 = vrot.slane %v3036_v13, 4  ;;  %v7230_v14 = vld [vmem:[%s10140_s1 + $0x140] sm:$0xff]   ;;  %v3041_v16 = vrot.slane %v3039_v52, 5  ;;  %v3485_v36 = vrot.slane %v8181_v10, 5  ;;  %v3389_v21 = vld [vmem:[#allocation2 + $0x6c] sm:$0xe] }
 0x10c   : > { %6939 = vmatprep.subr.bf16.mxu1 %v7226_v45  ;;  %6915 = vmatprep.mubr.bf16.mxu0 %v8561_v9  ;;  %v8654_v41 = vrot.slane %v3045_v15, 5  ;;  %v3051_v11 = vrot.slane %v3049_v37, 4  ;;  %v3034_v30 = vsel %vm7368_vm6, %v8611_v56, %v8533_v60  ;;  %v8663_v17 = vsel %vm7763_vm13, %v6121_v4, %v3482_v8  ;;  %v8671_v60 = vld [vmem:[%s10140_s1 + $0x1f8] sm:$0xff]  }
 0x10d   : > { %v3484_v1 = vrot.slane %v3482_v8, 4  ;;  %v6122_v48 = vrot.slane %v3387_v20, 9  ;;  %v3042_v9 = vor.u32 %v3041_v16, %v3038_v46  ;;  %v3489_v29 = vrot.slane %v8184_v40, 5  ;;  %v3390_v4 = vld [vmem:[#allocation2 + $0x78] sm:$0xe]  ;;  %v10245_v16 = vld [vmem:[#allocation14_spill] sm:$0xff] }
 0x10e   : > { %6860 = vmatmul.mubr.bf16.gmra.mxu1 %v7213_v5  ;;  %v3052_v47 = vor.u32 %v3051_v11, %v8654_v41  ;;  %v3492_v10 = vrot.slane %v8203_v49, 5  ;;  %v7217_v5 = vld [vmem:[#allocation2 + $0x78] sm:$0xff]   ;;  %v3496_v38 = vrot.slane %v8211_v0, 5  ;;  %v3499_v28 = vrot.slane %v8250_v12, 5 }
 0x10f   : > { %6863 = vmatprep.mubr.bf16.mxu1 %v7216_v31  ;;  %6940 = vmatpush3.bf16.msra.mxu1 %v7226_v45  ;;  %v8675_v56 = vsel %vm7763_vm13, %v3484_v1, %v3485_v36  ;;  %v6123_v45 = vrot.slane %v3388_v39, 9  ;;  %v8679_v40 = vrot.slane %v3042_v9, 4  ;;  %v8681_v49 = vrot.slane %v3055_v3, 5  ;;  %v7220_v31 = vld [vmem:[#allocation2 + $0x84] sm:$0xff]   ;;  %v3392_v1 = vld [vmem:[#allocation2 + $0x90] sm:$0xe] }
 0x110   : > { %6941 = vmatprep.subr.bf16.mxu1 %v7230_v14  ;;  %v8687_v13 = vsel %vm7763_vm13, %v6122_v48, %v3489_v29  ;;  %v3491_v52 = vrot.slane %v3489_v29, 4  ;;  %v3498_v0 = vrot.slane %v3496_v38, 4  ;;  %v6124_v12 = vrot.slane %v3389_v21, 9  ;;  %v10246_v36 = vld [vmem:[#allocation16_spill] sm:$0xff]  ;;  %v10247_v48 = vld [vmem:[#allocation6_spill] sm:$0xff] }
 0x111   : > { %v8691_v15 = vsel %vm7763_vm13, %v6123_v45, %v3496_v38  ;;  %v6105_v37 = vcombine.low %v3000_v63, %v3010_v18  ;;  %v6106_v39 = vcombine.low %v3024_v55, %v3034_v30  ;;  %v3503_v46 = vrot.slane %v8252_v44, 5  ;;  %v3391_v63 = vld [vmem:[#allocation2 + $0x84] sm:$0xe]  ;;  %v10244_v55 = vld [vmem:[#allocation15_spill] sm:$0xff] }
 0x112   : > { %v3506_v3 = vrot.slane %v8288_v35, 5  ;;  %v3053_v27 = vrot.slane %v3052_v47, 4  ;;  %v8709_v26 = vsel %vm7763_vm13, %v3491_v52, %v3492_v10  ;;  %v8713_v7 = vsel %vm7763_vm13, %v3498_v0, %v3499_v28  ;;  %v10248_v47 = vld [vmem:[#allocation18_spill] sm:$0xff]  ;;  %v7224_v38 = vld [vmem:[#allocation2 + $0x9c] sm:$0xff]   ;;  %v10249_v52 = vld [vmem:[#allocation17_spill] sm:$0xff] }
 0x113   : > { %6942 = vmatpush3.bf16.msra.mxu1 %v7230_v14  ;;  %6916 = vmatmul.mubr.bf16.gmra.mxu0 %v8568_v59  ;;  %v6125_v57 = vrot.slane %v3390_v4, 9  ;;  %v8722_v34 = vsel %vm7763_vm13, %v6124_v12, %v3503_v46  ;;  %v3505_v59 = vrot.slane %v3503_v46, 4  ;;  %v3510_v18 = vrot.slane %v8290_v50, 5  ;;  %v7221_v10 = vld [vmem:[#allocation2 + $0x90] sm:$0xff]   ;;  %v8912_v33 = vld [vmem:[#allocation2 + $0x38] sm:$0x1] }
 0x114   : > { %7023 = vmatprep.subr.bf16.mxu1 %v8671_v60  ;;  %6919 = vmatprep.mubr.bf16.mxu0 %v8570_v2  ;;  %v3513_v14 = vrot.slane %v10244_v55, 5  ;;  %v6126_v8 = vrot.slane %v3391_v63, 9  ;;  %v3517_v2 = vrot.slane %v10245_v16, 5  ;;  %v3520_v30 = vrot.slane %v10246_v36, 5  ;;  %v10251_v36 = vld [vmem:[#allocation9_spill] sm:$0xff]  ;;  %v7255_v50 = vld [vmem:[%s10140_s1 + $0x210] sm:$0xff]  }
 0x115   : > { %v8729_v11 = vsel %vm7763_vm13, %v3505_v59, %v3506_v3  ;;  %v3524_v9 = vrot.slane %v10247_v48, 5  ;;  %v3527_v29 = vrot.slane %v10248_v47, 5  ;;  %v8738_v21 = vsel %vm7763_vm13, %v6125_v57, %v3510_v18 }
 0x116   : > { %6864 = vmatmul.mubr.bf16.gmra.mxu1 %v7217_v5  ;;  %v3512_v5 = vrot.slane %v3510_v18, 4  ;;  %v8742_v45 = vsel %vm7763_vm13, %v6126_v8, %v3517_v2  ;;  %v3519_v28 = vrot.slane %v3517_v2, 4  ;;  %v6127_v4 = vrot.slane %v3392_v1, 9  ;;  %v10250_v8 = vld [vmem:[#allocation8_spill] sm:$0xff]  ;;  %v10252_v1 = vld [vmem:[#allocation19_spill] sm:$0xff] }
 0x117   : > { %6867 = vmatprep.mubr.bf16.mxu1 %v7220_v31  ;;  %v3526_v31 = vrot.slane %v3524_v9, 4  ;;  %v3531_v0 = vrot.slane %v10249_v52, 5  ;;  %v3048_v12 = vsel %vm7368_vm6, %v8679_v40, %v8654_v41  ;;  %v3058_v46 = vsel %vm7368_vm6, %v3053_v27, %v8681_v49  ;;  %v3393_v40 = vld [vmem:[#allocation2 + $0x9c] sm:$0xe]  ;;  %v7244_v49 = vld [vmem:[#allocation2 + $0x60] sm:$0xff]  }
 0x118   : > { %v8754_v3 = vsel %vm7763_vm13, %v3512_v5, %v3513_v14  ;;  %v8760_v59 = vsel %vm7763_vm13, %v3519_v28, %v3520_v30  ;;  %v8764_v63 = vsel %vm7763_vm13, %v6127_v4, %v3524_v9  ;;  %v6128_v18 = vrot.slane %v3393_v40, 9  ;;  %v3394_v14 = vld [vmem:[#allocation2 + $0xa8] sm:$0xe]  ;;  %v3381_v9 = vld [vmem:[#allocation2 + $0xc] sm:$0xe]  ;;  %v10253_v28 = vld [vmem:[#allocation20_spill] sm:$0xff] }
 0x119   : > { %v8768_v41 = vsel %vm7763_vm13, %v3526_v31, %v3527_v29  ;;  %v3533_v55 = vrot.slane %v3531_v0, 4  ;;  %v3534_v16 = vrot.slane %v10250_v8, 5  ;;  %v6129_v2 = vrot.slane %v3394_v14, 9  ;;  %v3395_v5 = vld [vmem:[#allocation2 + $0xb4] sm:$0xe]  ;;  %v7225_v31 = vld [vmem:[#allocation2 + $0xa8] sm:$0xff]  }
 0x11a   : > { %v3538_v30 = vrot.slane %v10251_v36, 5  ;;  %v3541_v48 = vrot.slane %v10252_v1, 5  ;;  %v3545_v4 = vrot.slane %v10253_v28, 5  ;;  %v10254_v40 = vld [vmem:[#allocation21_spill] sm:$0xff]  ;;  %v3396_v8 = vld [vmem:[#allocation2 + $0xc0] sm:$0xe] }
 0x11b   : > { %6920 = vmatmul.mubr.bf16.gmra.mxu0 %v6105_v37  ;;  %v8779_v37 = vsel %vm7763_vm13, %v6128_v18, %v3531_v0  ;;  %v8783_v47 = vsel %vm7763_vm13, %v3533_v55, %v3534_v16  ;;  %v6130_v0 = vrot.slane %v3395_v5, 9  ;;  %v7232_v18 = vld [vmem:[#allocation2 + $0x18] sm:$0xff]   ;;  %v3552_v16 = vrot.slane %v8632_v6, 5 }
 0x11c   : > { %6923 = vmatprep.mubr.bf16.mxu0 %v6106_v39  ;;  %v8787_v39 = vsel %vm7763_vm13, %v6129_v2, %v3538_v30  ;;  %v3540_v29 = vrot.slane %v3538_v30, 4  ;;  %v3547_v14 = vrot.slane %v3545_v4, 4  ;;  %v3555_v2 = vrot.slane %v8637_v62, 5  ;;  %v7228_v36 = vld [vmem:[#allocation2 + $0xb4] sm:$0xff]  }
 0x11d   : > { %v6131_v30 = vrot.slane %v3396_v8, 9  ;;  %v6116_v1 = vrot.slane %v3381_v9, 9  ;;  %v3449_v6 = vrot.slane %v3447_v61, 4  ;;  %v7290_v62 = vld [vmem:[#allocation2 + $0x14] sm:$0x1]  ;;  %v7233_v8 = vld [vmem:[#allocation2 + $0x24] sm:$0xff]  }
 0x11e   : > { %6868 = vmatmul.mubr.bf16.gmra.mxu1 %v7221_v10  ;;  %v6107_v10 = vcombine.low %v3048_v12, %v3058_v46  ;;  %v8795_v55 = vsel %vm7763_vm13, %v3540_v29, %v3541_v48  ;;  %v8803_v46 = vsel %vm7763_vm13, %v6130_v0, %v3545_v4  ;;  %v3554_v29 = vrot.slane %v3552_v16, 4  ;;  %v7291_v0 = vld [vmem:[#allocation2 + $0x1c] sm:$0xf]  ;;  %v4268_v12 = vld [vmem:[#allocation2 + $0x20] sm:$0x1] }
 0x11f   : > { %6871 = vmatprep.mubr.bf16.mxu1 %v7224_v38  ;;  %v3548_v38 = vrot.slane %v10254_v40, 5  ;;  %v3450_v5 = vrot.slane %v7290_v62, 5  ;;  %v8815_v4 = vsel %vm7763_vm13, %v6131_v30, %v3552_v16  ;;  %v3454_v40 = vrot.slane %v7291_v0, 5  ;;  %v7236_v16 = vld [vmem:[#allocation2 + $0x30] sm:$0xff]   ;;  %v7292_v62 = vld [vmem:[#allocation2 + $0x20] sm:$0x1] }
 0x120   : > { %v8819_v9 = vsel %vm7763_vm13, %v3554_v29, %v3555_v2  ;;  %v7229_v2 = vld [vmem:[#allocation2 + $0xc0] sm:$0xff]   ;;  %v3457_v0 = vrot.slane %v7292_v62, 5  ;;  %v5020_v62 = vld [vmem:[#allocation2 + $0x18] sm:$0xe]  ;;  %v5089_v51 = vrot.slane %v4268_v12, 5 }
 0x121   : > { %v8807_v48 = vsel %vm7763_vm13, %v3547_v14, %v3548_v38  ;;  %v3448_v38 = vsel %vm7763_vm13, %v6116_v1, %v3447_v61  ;;  %v3451_v14 = vsel %vm7763_vm13, %v3449_v6, %v3450_v5  ;;  %v3456_v29 = vrot.slane %v3454_v40, 4  ;;  %v4266_v6 = vld [vmem:[#allocation2 + $0x18] sm:$0xf]  ;;  %v7237_v5 = vld [vmem:[#allocation2 + $0x3c] sm:$0xff]  }
 0x122   : > { %v6148_v30 = vcombine.low %v3448_v38, %v3451_v14  ;;  %v7240_v38 = vld [vmem:[#allocation2 + $0x48] sm:$0xff]   ;;  %v8840_v14 = vld [vmem:[#allocation2 + $0x1c] sm:$0xf] }
 0x123   : > { %6924 = vmatmul.mubr.bf16.gmra.mxu0 %v6107_v10  ;;  %v3458_v1 = vsel %vm7763_vm13, %v3456_v29, %v3457_v0  ;;  %v8852_v29 = vld [vmem:[#allocation2 + $0x28] sm:$0xf]  ;;  %v5086_v0 = vrot.slane %v8840_v14, 5 }
 0x124   : > { %6991 = vmatprep.mubr.bf16.mxu0 %v7232_v18  ;;  %v3382_v18 = vld [vmem:[#allocation2 + $0x18] sm:$0xe]  ;;  %v7242_v10 = vld [vmem:[%s10140_s1 + $0x1e8] sm:$0xff]   ;;  %v5093_v19 = vrot.slane %v8852_v29, 5 }
 0x125   : > { %v5088_v22 = vrot.slane %v5086_v0, 4 }
 0x126   : > { %6872 = vmatmul.mubr.bf16.gmra.mxu1 %v7225_v31  ;;  %v7239_v31 = vld [vmem:[%s10140_s1 + $0x230] sm:$0xff]  }
 0x127   : > { %6875 = vmatprep.mubr.bf16.mxu1 %v7228_v36  ;;  %v6117_v36 = vrot.slane %v3382_v18, 9  ;;  %v7247_v18 = vld [vmem:[%s10140_s1 + $0x220] sm:$0xff]  }
 0x129   : > { %v3455_v61 = vsel %vm7763_vm13, %v6117_v36, %v3454_v40  ;;  %v7238_v40 = vld [vmem:[%s10140_s1 + $0x1f0] sm:$0xff]   ;;  %v4328_v36 = vshrl.u32 %v8840_v14, 16 }
 0x12b   : > { %6992 = vmatmul.mubr.bf16.vlgmr.msra.gmra.mxu0 %v7233_v8  ;;  %v4315_v8 = vshrl.u32 %v4266_v6, 16 }
 0x12c   : > { %7072 = vmatpush3.bf16.msra.mxu0 %v8591_v54  ;;  %6995 = vmatprep.mubr.bf16.mxu0 %v7236_v16  ;;  %v6149_v54 = vcombine.low %v3455_v61, %v3458_v1  ;;  %v4269_v16 = vld [vmem:[#allocation2 + $0x24] sm:$0xf] }
 0x12d   : > { %7073 = vmatprep.subr.bf16.mxu0 %v7239_v31  ;;  %v4339_v61 = vshrl.u32 %v4269_v16, 16  ;;  %v4342_v1 = vshll.u32 %v4269_v16, 16  ;;  %v4317_v28 = vrot.slane %v4315_v8, 4  ;;  %v4330_v8 = vrot.slane %v4328_v36, 4 }
 0x12e   : > { %6876 = vmatmul.mubr.bf16.gmra.mxu1 %v7229_v2  ;;  %v8848_v2 = vpop.f32.mrf.mxu0 }
 0x12f   : > { %6943 = vmatprep.mubr.bf16.mxu1 %v6148_v30  ;;  %v4318_v30 = vshll.u32 %v4266_v6, 16  ;;  %v7251_v6 = vld [vmem:[%s10140_s1 + $0x218] sm:$0xff]   ;;  %v4344_v57 = vrot.slane %v4342_v1, 5 }
 0x130   : > { %7074 = vmatpush3.bf16.msra.mxu0 %v7239_v31  ;;  %v4324_v31 = vshll.u32 %v8840_v14, 16  ;;  %v4272_v14 = vld [vmem:[#allocation2 + $0x30] sm:$0xf]  ;;  %v8869_v16 = vpop.f32.mrf.mxu0 }
 0x131   : > { %7075 = vmatprep.subr.bf16.mxu0 %v7243_v58  ;;  %10255 = vst [vmem:[#allocation4_spill] sm:$0xff] %v8869_v16  ;;  %v4320_v52 = vrot.slane %v4318_v30, 5  ;;  %v4363_v35 = vshrl.u32 %v4272_v14, 16  ;;  %v4366_v44 = vshll.u32 %v4272_v14, 16  ;;  %v4334_v14 = vshll.u32 %v4268_v12, 16  ;;  %v8902_v12 = vpop.f32.mrf.mxu1 }
 0x132   : > { %v8871_v27 = vrot.slane %v4324_v31, 5  ;;  %10257 = vst [vmem:[#allocation5_spill] sm:$0xff] %v8902_v12  ;;  %v5096_v12 = vrot.slane %v8886_v32, 5 }
 0x133   : > { %6996 = vmatmul.mubr.bf16.gmra.mxu0 %v7237_v5  ;;  %v7241_v5 = vld [vmem:[#allocation2 + $0x54] sm:$0xff]  }
 0x134   : > { %6999 = vmatprep.mubr.bf16.mxu0 %v7240_v38  ;;  %7076 = vmatpush3.bf16.msra.mxu0 %v7243_v58  ;;  %v4348_v58 = vshll.u32 %v8852_v29, 16  ;;  %v4352_v38 = vshrl.u32 %v8852_v29, 16  ;;  %v4331_v1 = vor.u32 %v4330_v8, %v8871_v27 }
 0x135   : > { %7077 = vmatprep.subr.bf16.mxu0 %v7247_v18 }
 0x136   : > { %6944 = vmatmul.mubr.bf16.vlgmr.msra.gmra.mxu1 %v6149_v54  ;;  %v8867_v54 = vld [vmem:[#allocation2 + $0x34] sm:$0xf]  ;;  %v8878_v31 = vrot.slane %v4348_v58, 5  ;;  %v4354_v36 = vrot.slane %v4352_v38, 4  ;;  %v8897_v58 = vsel %vm7763_vm13, %v5088_v22, %v5089_v51 }
 0x137   : > { %7024 = vmatpush3.bf16.msra.mxu1 %v8671_v60  ;;  %6947 = vmatprep.mubr.bf16.mxu1 %v6150_v43  ;;  %v6252_v60 = vrot.slane %v5020_v62, 9  ;;  %v4341_v43 = vrot.slane %v4339_v61, 4  ;;  %v4372_v20 = vshll.u32 %v8867_v54, 16  ;;  %v4376_v30 = vshrl.u32 %v8867_v54, 16  ;;  %v8883_v62 = vpop.f32.mrf.mxu0 }
 0x138   : > { %7025 = vmatprep.subr.bf16.mxu1 %v7238_v40  ;;  %7078 = vmatpush3.bf16.msra.mxu0 %v7247_v18  ;;  %v7246_v18 = vld [vmem:[%s10140_s1 + $0x1e0] sm:$0xff]   ;;  %10256 = vst [vmem:[#allocation3_spill] sm:$0xff] %v8883_v62  ;;  %v4321_v61 = vor.u32 %v4320_v52, %v4317_v28  ;;  %v4365_v28 = vrot.slane %v4363_v35, 4  ;;  %v5100_v51 = vrot.slane %v8867_v54, 5  ;;  %v5095_v54 = vrot.slane %v5093_v19, 4 }
 0x139   : > { %7079 = vmatprep.subr.bf16.mxu0 %v7251_v6  ;;  %v4345_v52 = vor.u32 %v4344_v57, %v4341_v43  ;;  %v8904_v38 = vrot.slane %v4372_v20, 5  ;;  %v4378_v8 = vrot.slane %v4376_v30, 4  ;;  %v4355_v57 = vor.u32 %v4354_v36, %v8878_v31  ;;  %v7250_v20 = vld [vmem:[%s10140_s1 + $0x1d8] sm:$0xff]   ;;  %v8928_v30 = vpop.f32.mrf.mxu1  ;;  %v7263_v36 = vld [vmem:[%s10140_s1 + $0x200] sm:$0xff]  }
 0x13a   : > { %v8919_v35 = vrot.slane %v4321_v61, 4  ;;  %v4275_v43 = vld [vmem:[#allocation2 + $0x3c] sm:$0xf]  ;;  %10260 = vst [vmem:[#allocation10_spill] sm:$0xff] %v8928_v30 }
 0x13b   : > { %7026 = vmatpush3.bf16.msra.mxu1 %v7238_v40  ;;  %7000 = vmatmul.mubr.bf16.gmra.mxu0 %v7241_v5  ;;  %v7259_v40 = vld [vmem:[%s10140_s1 + $0x208] sm:$0xff]   ;;  %v8893_v5 = vsel %vm7763_vm13, %v6252_v60, %v5086_v0  ;;  %v10258_v0 = vcombine.low %v8626_v25, %v8643_v42  ;;  %v4358_v60 = vshll.u32 %v8886_v32, 16  ;;  %v8921_v25 = vrot.slane %v4331_v1, 4 }
 0x13c   : > { %7027 = vmatprep.subr.bf16.mxu1 %v7242_v10  ;;  %7003 = vmatprep.mubr.bf16.mxu0 %v7244_v49  ;;  %v5021_v49 = vld [vmem:[#allocation2 + $0x24] sm:$0xe]  ;;  %v8923_v42 = vrot.slane %v4334_v14, 5  ;;  %v8933_v61 = vrot.slane %v4345_v52, 4  ;;  %v4379_v14 = vor.u32 %v4378_v8, %v8904_v38  ;;  %v7254_v52 = vld [vmem:[%s10140_s1 + $0x1d0] sm:$0xff]   ;;  %v4387_v32 = vshrl.u32 %v4275_v43, 16 }
 0x13d   : > { %7080 = vmatpush3.bf16.msra.mxu0 %v7251_v6  ;;  %v4368_v6 = vrot.slane %v4366_v44, 5  ;;  %v8917_v44 = vpop.f32.mrf.mxu0  ;;  %v6253_v22 = vrot.slane %v5021_v49, 9  ;;  %v4356_v49 = vrot.slane %v4355_v57, 4  ;;  %v4360_v29 = vrot.slane %v4358_v60, 5 }
 0x13e   : > { %6948 = vmatmul.mubr.bf16.gmra.mxu1 %v6151_v53  ;;  %7081 = vmatprep.subr.bf16.mxu0 %v7255_v50  ;;  %v7245_v53 = vld [vmem:[#allocation2 + $0x6c] sm:$0xff]   ;;  %10259 = vst [vmem:[#allocation11_spill] sm:$0xff] %v8917_v44  ;;  %v4390_v8 = vshll.u32 %v4275_v43, 16  ;;  %v7249_v43 = vld [vmem:[#allocation2 + $0x84] sm:$0xff]  }
 0x13f   : > { %6951 = vmatprep.mubr.bf16.mxu1 %v10258_v0  ;;  %7028 = vmatpush3.bf16.msra.mxu1 %v7242_v10  ;;  %v7248_v10 = vld [vmem:[#allocation2 + $0x78] sm:$0xff]   ;;  %v4369_v1 = vor.u32 %v4368_v6, %v4365_v28  ;;  %v5022_v0 = vld [vmem:[#allocation2 + $0x30] sm:$0xe]  ;;  %v8938_v30 = vpop.f32.mrf.mxu0  ;;  %v4327_v28 = vsel %vm7368_vm6, %v8919_v35, %v8871_v27  ;;  %v8951_v6 = vld [vmem:[#allocation2 + $0x40] sm:$0xf]  ;;  %v8955_v57 = vsel %vm7763_vm13, %v6253_v22, %v5093_v19  ;;  %v4380_v19 = vrot.slane %v4379_v14, 4 }
 0x140   : > { %7029 = vmatprep.subr.bf16.mxu1 %v7246_v18  ;;  %10261 = vst [vmem:[#allocation7_spill] sm:$0xff] %v8938_v30  ;;  %v6254_v60 = vrot.slane %v5022_v0, 9  ;;  %v5103_v30 = vrot.slane %v8912_v33, 5  ;;  %v4278_v27 = vld [vmem:[#allocation2 + $0x48] sm:$0xf]  ;;  %v10262_v35 = vcombine.low %v8663_v17, %v8675_v56  ;;  %v4361_v56 = vsel %vm7368_vm6, %v4356_v49, %v4360_v29 }
 0x141   : > { %7082 = vmatpush3.bf16.msra.mxu0 %v7255_v50  ;;  %v4382_v50 = vshll.u32 %v8912_v33, 16  ;;  %v8967_v22 = vld [vmem:[#allocation2 + $0x4c] sm:$0xf]  ;;  %v10264_v33 = vcombine.low %v8687_v13, %v8709_v26  ;;  %v8983_v13 = vpop.f32.mrf.mxu0  ;;  %v8985_v26 = vld [vmem:[#allocation2 + $0x44] sm:$0x1]  ;;  %v4392_v14 = vrot.slane %v4390_v8, 5 }
 0x142   : > { %7083 = vmatprep.subr.bf16.mxu0 %v7259_v40  ;;  %v7258_v17 = vld [vmem:[%s10140_s1 + $0x1c8] sm:$0xff]   ;;  %10265 = vst [vmem:[#allocation12_spill] sm:$0xff] %v8983_v13  ;;  %v4414_v0 = vshll.u32 %v4278_v27, 16  ;;  %v8989_v29 = vsel %vm7763_vm13, %v6254_v60, %v5100_v51  ;;  %v4420_v49 = vshll.u32 %v8967_v22, 16  ;;  %v4281_v60 = vld [vmem:[#allocation2 + $0x54] sm:$0xf] }
 0x143   : > { %7030 = vmatpush3.bf16.msra.mxu1 %v7246_v18  ;;  %7004 = vmatmul.mubr.bf16.gmra.mxu0 %v7245_v53  ;;  %v4337_v18 = vsel %vm7368_vm6, %v8921_v25, %v8923_v42  ;;  %v5102_v53 = vrot.slane %v5100_v51, 4  ;;  %v8961_v25 = vpop.f32.mrf.mxu1  ;;  %v4370_v42 = vrot.slane %v4369_v1, 4  ;;  %v4400_v1 = vshrl.u32 %v8951_v6, 16  ;;  %v9015_v8 = vpop.f32.mrf.mxu0 }
 0x144   : > { %7031 = vmatprep.subr.bf16.mxu1 %v7250_v20  ;;  %7007 = vmatprep.mubr.bf16.mxu0 %v7248_v10  ;;  %10263 = vst [vmem:[#allocation13_spill] sm:$0xff] %v8961_v25  ;;  %v4384_v10 = vrot.slane %v4382_v50, 5  ;;  %v4411_v50 = vshrl.u32 %v4278_v27, 16  ;;  %10267 = vst [vmem:[#allocation14_spill] sm:$0xff] %v9015_v8  ;;  %v10268_v25 = vcombine.low %v8691_v15, %v8713_v7  ;;  %v4435_v13 = vshrl.u32 %v4281_v60, 16 }
 0x145   : > { %7084 = vmatpush3.bf16.msra.mxu0 %v7259_v40  ;;  %v4351_v40 = vsel %vm7368_vm6, %v8933_v61, %v8878_v31  ;;  %v8979_v31 = vsel %vm7763_vm13, %v5095_v54, %v5096_v12  ;;  %v4396_v61 = vshll.u32 %v8951_v6, 16  ;;  %v8993_v12 = vsel %vm7763_vm13, %v5102_v53, %v5103_v30  ;;  %v5023_v30 = vld [vmem:[#allocation2 + $0x3c] sm:$0xe] }
 0x146   : > { %6952 = vmatmul.mubr.bf16.gmra.mxu1 %v10262_v35  ;;  %7085 = vmatprep.subr.bf16.mxu0 %v7263_v36  ;;  %v7252_v35 = vld [vmem:[#allocation2 + $0x90] sm:$0xff]   ;;  %v4424_v54 = vshrl.u32 %v8967_v22, 16  ;;  %v4375_v51 = vsel %vm7368_vm6, %v4370_v42, %v8904_v38  ;;  %v9008_v53 = vcombine.low %v4351_v40, %v4361_v56  ;;  %v7262_v38 = vld [vmem:[%s10140_s1 + $0x1c0] sm:$0xff]   ;;  %v5107_v15 = vrot.slane %v8951_v6, 5 }
 0x147   : > { %6955 = vmatprep.mubr.bf16.mxu1 %v10264_v33  ;;  %7032 = vmatpush3.bf16.msra.mxu1 %v7250_v20  ;;  %v4389_v20 = vrot.slane %v4387_v32, 4  ;;  %v8997_v33 = vpop.f32.mrf.mxu1  ;;  %v8999_v32 = vcombine.low %v4327_v28, %v4337_v18  ;;  %v9010_v27 = vrot.slane %v4396_v61, 5  ;;  %v4406_v28 = vshll.u32 %v8985_v26, 16  ;;  %v9013_v18 = vld [vmem:[#allocation2 + $0x58] sm:$0xf] }
 0x148   : > { %7033 = vmatprep.subr.bf16.mxu1 %v7254_v52  ;;  %10266 = vst [vmem:[#allocation15_spill] sm:$0xff] %v8997_v33  ;;  %v4402_v33 = vrot.slane %v4400_v1, 4  ;;  %v9022_v42 = vld [vmem:[#allocation2 + $0x50] sm:$0x1]  ;;  %v6255_v61 = vrot.slane %v5023_v30, 9  ;;  %v4426_v1 = vrot.slane %v4424_v54, 4  ;;  %v9043_v54 = vpop.f32.mrf.mxu0 }
 0x149   : > { %7086 = vmatpush3.bf16.msra.mxu0 %v7263_v36  ;;  %v4385_v36 = vsel %vm7368_vm6, %v4380_v19, %v4384_v10  ;;  %v4393_v40 = vor.u32 %v4392_v14, %v4389_v20  ;;  %v4413_v19 = vrot.slane %v4411_v50, 4  ;;  %v4416_v10 = vrot.slane %v4414_v0, 5  ;;  %v9031_v8 = vpop.f32.mrf.mxu1  ;;  %v4284_v50 = vld [vmem:[#allocation2 + $0x60] sm:$0xf]  ;;  %10271 = vst [vmem:[#allocation6_spill] sm:$0xff] %v9043_v54 }
 0x14a   : > { %v9024_v56 = vcombine.low %v4375_v51, %v4385_v36  ;;  %10269 = vst [vmem:[#allocation16_spill] sm:$0xff] %v9031_v8  ;;  %v4444_v20 = vshll.u32 %v9013_v18, 16  ;;  %v4448_v14 = vshrl.u32 %v9013_v18, 16  ;;  %v10270_v0 = vcombine.low %v8722_v34, %v8729_v11  ;;  %v7256_v11 = vld [vmem:[#allocation2 + $0xa8] sm:$0xff]   ;;  %v9063_v62 = vpop.f32.mrf.mxu0 }
 0x14b   : > { %7034 = vmatpush3.bf16.msra.mxu1 %v7254_v52  ;;  %7008 = vmatmul.mubr.bf16.gmra.mxu0 %v7249_v43  ;;  %v9026_v43 = vrot.slane %v4420_v49, 5  ;;  %v4438_v52 = vshll.u32 %v4281_v60, 16  ;;  %v9039_v49 = vrot.slane %v4406_v28, 5  ;;  %v4430_v7 = vshll.u32 %v9022_v42, 16 }
 0x14c   : > { %7035 = vmatprep.subr.bf16.mxu1 %v7258_v17  ;;  %7011 = vmatprep.mubr.bf16.mxu0 %v7252_v35  ;;  %v4403_v35 = vor.u32 %v4402_v33, %v9010_v27  ;;  %v9045_v51 = vrot.slane %v4393_v40, 4  ;;  %v5110_v36 = vrot.slane %v8985_v26, 5  ;;  %v4417_v30 = vor.u32 %v4416_v10, %v4413_v19  ;;  %v5024_v33 = vld [vmem:[#allocation2 + $0x48] sm:$0xe]  ;;  %v9058_v19 = vld [vmem:[#allocation2 + $0x64] sm:$0xf] }
 0x14d   : > { %v5114_v34 = vrot.slane %v8967_v22, 5  ;;  %v4427_v6 = vor.u32 %v4426_v1, %v9026_v43  ;;  %v4459_v60 = vshrl.u32 %v4284_v50, 16  ;;  %v4462_v28 = vshll.u32 %v4284_v50, 16 }
 0x14e   : > { %6956 = vmatmul.mubr.bf16.gmra.mxu1 %v10268_v25  ;;  %v7253_v25 = vld [vmem:[#allocation2 + $0x9c] sm:$0xff]   ;;  %v4437_v8 = vrot.slane %v4435_v13, 4  ;;  %v4440_v40 = vrot.slane %v4438_v52, 5  ;;  %v9056_v54 = vrot.slane %v4444_v20, 5  ;;  %v4450_v26 = vrot.slane %v4448_v14, 4 }
 0x14f   : > { %6959 = vmatprep.mubr.bf16.mxu1 %v10270_v0  ;;  %7036 = vmatpush3.bf16.msra.mxu1 %v7258_v17  ;;  %v9051_v17 = vsel %vm7763_vm13, %v6255_v61, %v5107_v15  ;;  %v9054_v0 = vpop.f32.mrf.mxu1  ;;  %v4404_v22 = vrot.slane %v4403_v35, 4  ;;  %v5109_v10 = vrot.slane %v5107_v15, 4  ;;  %v9060_v44 = vrot.slane %v4430_v7, 5  ;;  %v4283_v61 = vld [vmem:[#allocation2 + $0x5c] sm:$0x1] }
 0x150   : > { %7037 = vmatprep.subr.bf16.mxu1 %v7262_v38  ;;  %10272 = vst [vmem:[#allocation18_spill] sm:$0xff] %v9054_v0  ;;  %v5121_v1 = vrot.slane %v9013_v18, 5  ;;  %v4418_v50 = vrot.slane %v4417_v30, 4  ;;  %v6256_v0 = vrot.slane %v5024_v33, 9  ;;  %v5116_v13 = vrot.slane %v5114_v34, 4 }
 0x151   : > { %v5117_v52 = vrot.slane %v9022_v42, 5  ;;  %v5025_v20 = vld [vmem:[#allocation2 + $0x54] sm:$0xe]  ;;  %v4461_v14 = vrot.slane %v4459_v60, 4  ;;  %v4464_v16 = vrot.slane %v4462_v28, 5  ;;  %v4472_v35 = vshrl.u32 %v9058_v19, 16  ;;  %v9071_v18 = vpop.f32.mrf.mxu1 }
 0x152   : > { %v10273_v15 = vcombine.low %v8738_v21, %v8754_v3  ;;  %10274 = vst [vmem:[#allocation17_spill] sm:$0xff] %v9071_v18  ;;  %v4428_v7 = vrot.slane %v4427_v6, 4  ;;  %v4451_v30 = vor.u32 %v4450_v26, %v9056_v54  ;;  %v4454_v33 = vshll.u32 %v4283_v61, 16  ;;  %v7257_v3 = vld [vmem:[#allocation2 + $0xb4] sm:$0xff]   ;;  %v7260_v6 = vld [vmem:[#allocation2 + $0xc0] sm:$0xff]  }
 0x153   : > { %7038 = vmatpush3.bf16.msra.mxu1 %v7262_v38  ;;  %7012 = vmatmul.mubr.bf16.gmra.mxu0 %v7253_v25  ;;  %v4468_v38 = vshll.u32 %v9058_v19, 16  ;;  %v4441_v25 = vor.u32 %v4440_v40, %v4437_v8  ;;  %v10275_v42 = vcombine.low %v8742_v45, %v8760_v59  ;;  %v6257_v60 = vrot.slane %v5025_v20, 9  ;;  %v9101_v26 = vld [vmem:[#allocation2 + $0x68] sm:$0x1] }
 0x154   : > { %7015 = vmatprep.mubr.bf16.mxu0 %v7256_v11  ;;  %v4399_v11 = vsel %vm7368_vm6, %v9045_v51, %v9010_v27  ;;  %v5123_v28 = vrot.slane %v5121_v1, 4  ;;  %v5124_v21 = vrot.slane %v4283_v61, 5  ;;  %v4409_v8 = vsel %vm7368_vm6, %v4404_v22, %v9039_v49  ;;  %v4287_v51 = vld [vmem:[#allocation2 + $0x6c] sm:$0xf]  ;;  %v9105_v61 = vpop.f32.mrf.mxu1 }
 0x155   : > { %v9088_v45 = vsel %vm7763_vm13, %v5109_v10, %v5110_v36  ;;  %v4423_v59 = vsel %vm7368_vm6, %v4418_v50, %v9026_v43  ;;  %v9095_v27 = vsel %vm7763_vm13, %v6256_v0, %v5114_v34  ;;  %v9099_v40 = vsel %vm7763_vm13, %v5116_v13, %v5117_v52  ;;  %v5026_v10 = vld [vmem:[#allocation2 + $0x60] sm:$0xe]  ;;  %10276 = vst [vmem:[#allocation8_spill] sm:$0xff] %v9105_v61 }
 0x156   : > { %6960 = vmatmul.mubr.bf16.gmra.mxu1 %v10273_v15  ;;  %v9081_v15 = vpop.f32.mrf.mxu0  ;;  %v4465_v49 = vor.u32 %v4464_v16, %v4461_v14  ;;  %v9103_v22 = vrot.slane %v4468_v38, 5  ;;  %v4474_v36 = vrot.slane %v4472_v35, 4  ;;  %v4433_v43 = vsel %vm7368_vm6, %v4428_v7, %v9060_v44 }
 0x157   : > { %6963 = vmatprep.mubr.bf16.mxu1 %v10275_v42  ;;  %v9110_v34 = vrot.slane %v4441_v25, 4  ;;  %v9112_v0 = vrot.slane %v4451_v30, 4  ;;  %v9114_v50 = vrot.slane %v4454_v33, 5  ;;  %v9118_v13 = vsel %vm7763_vm13, %v6257_v60, %v5121_v1  ;;  %v9130_v25 = vld [vmem:[#allocation2 + $0x70] sm:$0xf] }
 0x158   : > { %v9122_v16 = vsel %vm7763_vm13, %v5123_v28, %v5124_v21  ;;  %v4483_v52 = vshrl.u32 %v4287_v51, 16  ;;  %v4486_v20 = vshll.u32 %v4287_v51, 16  ;;  %v9124_v14 = vpop.f32.mrf.mxu0  ;;  %v4478_v38 = vshll.u32 %v9101_v26, 16  ;;  %v9142_v28 = vpop.f32.mrf.mxu1 }
 0x159   : > { %v6258_v35 = vrot.slane %v5026_v10, 9  ;;  %v5128_v7 = vrot.slane %v9058_v19, 5  ;;  %v9132_v1 = vcombine.low %v4399_v11, %v4409_v8  ;;  %v9136_v33 = vrot.slane %v4465_v49, 4  ;;  %10278 = vst [vmem:[#allocation9_spill] sm:$0xff] %v9142_v28  ;;  %v4293_v49 = vld [vmem:[#allocation2 + $0x84] sm:$0xf] }
 0x15a   : > { %v4475_v42 = vor.u32 %v4474_v36, %v9103_v22  ;;  %v10277_v60 = vcombine.low %v8764_v63, %v8768_v41  ;;  %v9144_v21 = vcombine.low %v4423_v59, %v4433_v43  ;;  %v4447_v19 = vsel %vm7368_vm6, %v9110_v34, %v9056_v54  ;;  %v9156_v63 = vld [vmem:[#allocation2 + $0x7c] sm:$0xf]  ;;  %v9163_v36 = vpop.f32.mrf.mxu0  ;;  %v7261_v10 = vld [vmem:[#allocation2 + $0xcc] sm:$0xff]  }
 0x15b   : > { %7016 = vmatmul.mubr.bf16.gmra.mxu0 %v7257_v3  ;;  %v4457_v11 = vsel %vm7368_vm6, %v9112_v0, %v9114_v50  ;;  %v10279_v41 = vcombine.low %v8779_v37, %v8783_v47  ;;  %v4485_v8 = vrot.slane %v4483_v52, 4  ;;  %v4488_v59 = vrot.slane %v4486_v20, 5  ;;  %10280 = vst [vmem:[#allocation19_spill] sm:$0xff] %v9163_v36  ;;  %v4289_v37 = vld [vmem:[#allocation2 + $0x74] sm:$0x1]  ;;  %v9176_v3 = vpop.f32.mrf.mxu1 }
 0x15c   : > { %7019 = vmatprep.mubr.bf16.mxu0 %v7260_v6  ;;  %v4290_v6 = vld [vmem:[#allocation2 + $0x78] sm:$0xf]  ;;  %v4492_v51 = vshll.u32 %v9130_v25, 16  ;;  %v4496_v54 = vshrl.u32 %v9130_v25, 16  ;;  %v4480_v43 = vrot.slane %v4478_v38, 5  ;;  %v9167_v34 = vsel %vm7763_vm13, %v6258_v35, %v5128_v7  ;;  %10281 = vst [vmem:[#allocation20_spill] sm:$0xff] %v9176_v3 }
 0x15d   : > { %v5130_v0 = vrot.slane %v5128_v7, 4  ;;  %v5131_v50 = vrot.slane %v9101_v26, 5  ;;  %v4471_v47 = vsel %vm7368_vm6, %v9136_v33, %v9103_v22  ;;  %v4476_v52 = vrot.slane %v4475_v42, 4  ;;  %v5027_v38 = vld [vmem:[#allocation2 + $0x6c] sm:$0xe] }
 0x15e   : > { %6964 = vmatmul.mubr.bf16.gmra.mxu1 %v10277_v60  ;;  %v4507_v20 = vshrl.u32 %v4290_v6, 16  ;;  %v4510_v60 = vshll.u32 %v4290_v6, 16  ;;  %v4516_v35 = vshll.u32 %v9156_v63, 16  ;;  %v4520_v7 = vshrl.u32 %v9156_v63, 16 }
 0x15f   : > { %6967 = vmatprep.mubr.bf16.mxu1 %v10279_v41  ;;  %v9174_v41 = vld [vmem:[#allocation2 + $0x88] sm:$0xf]  ;;  %v4531_v30 = vshrl.u32 %v4293_v49, 16  ;;  %v4534_v26 = vshll.u32 %v4293_v49, 16  ;;  %v4489_v44 = vor.u32 %v4488_v59, %v4485_v8  ;;  %v9180_v28 = vrot.slane %v4492_v51, 5 }
 0x160   : > { %v4498_v61 = vrot.slane %v4496_v54, 4  ;;  %v5135_v22 = vrot.slane %v9130_v25, 5  ;;  %v9187_v42 = vsel %vm7763_vm13, %v5130_v0, %v5131_v50  ;;  %v4502_v6 = vshll.u32 %v4289_v37, 16 }
 0x161   : > { %v9183_v33 = vpop.f32.mrf.mxu0  ;;  %v4540_v3 = vshll.u32 %v9174_v41, 16  ;;  %v4544_v18 = vshrl.u32 %v9174_v41, 16  ;;  %v10283_v8 = vcombine.low %v8893_v5, %v8897_v58  ;;  %v4481_v59 = vsel %vm7368_vm6, %v4476_v52, %v4480_v43 }
 0x162   : > { %10282 = vst [vmem:[#allocation21_spill] sm:$0xff] %v9183_v33  ;;  %v6259_v25 = vrot.slane %v5027_v38, 9  ;;  %v4509_v51 = vrot.slane %v4507_v20, 4  ;;  %v4512_v54 = vrot.slane %v4510_v60, 5  ;;  %v10284_v49 = vcombine.low %v8787_v39, %v8795_v55  ;;  %v4292_v55 = vld [vmem:[#allocation2 + $0x80] sm:$0x1] }
 0x163   : > { %7020 = vmatmul.mubr.bf16.gmra.mxu0 %v7261_v10  ;;  %v9199_v10 = vpop.f32.mrf.mxu1  ;;  %v9201_v0 = vpop.f32.mrf.mxu0  ;;  %v9203_v50 = vrot.slane %v4516_v35, 5  ;;  %v4522_v33 = vrot.slane %v4520_v7, 4  ;;  %v4533_v36 = vrot.slane %v4531_v30, 4  ;;  %v4536_v5 = vrot.slane %v4534_v26, 5 }
 0x164   : > { %7087 = vmatprep.mubr.bf16.mxu0 %v10283_v8  ;;  %v10285_v58 = vcombine.low %v8803_v46, %v8807_v48  ;;  %v9208_v43 = vrot.slane %v4489_v44, 4  ;;  %v4499_v52 = vor.u32 %v4498_v61, %v9180_v28  ;;  %v5137_v20 = vrot.slane %v5135_v22, 4  ;;  %v4295_v44 = vld [vmem:[#allocation2 + $0x8c] sm:$0x1] }
 0x165   : > { %v5138_v39 = vrot.slane %v4289_v37, 5  ;;  %v9211_v60 = vpop.f32.mrf.mxu0  ;;  %v9213_v38 = vcombine.low %v4447_v19, %v4457_v11  ;;  %v9217_v30 = vrot.slane %v4540_v3, 5  ;;  %v4546_v7 = vrot.slane %v4544_v18, 4  ;;  %v4296_v37 = vld [vmem:[#allocation2 + $0x90] sm:$0xf]  ;;  %v9224_v8 = vpop.f32.mrf.mxu1 }
 0x166   : > { %6968 = vmatmul.mubr.bf16.gmra.mxu1 %v10284_v49  ;;  %v9219_v26 = vcombine.low %v4471_v47, %v4481_v59  ;;  %v9221_v46 = vrot.slane %v4502_v6, 5  ;;  %v4513_v48 = vor.u32 %v4512_v54, %v4509_v51  ;;  %v5142_v61 = vrot.slane %v9156_v63, 5  ;;  %10286 = vst [vmem:[#allocation22_spill] sm:$0xff] %v9224_v8  ;;  %v5028_v3 = vld [vmem:[#allocation2 + $0x78] sm:$0xe] }
 0x167   : > { %6971 = vmatprep.mubr.bf16.mxu1 %v10285_v58  ;;  %v9226_v49 = vpop.f32.mrf.mxu0  ;;  %v9230_v19 = vsel %vm7763_vm13, %v6259_v25, %v5135_v22  ;;  %v4523_v11 = vor.u32 %v4522_v33, %v9203_v50  ;;  %v4526_v18 = vshll.u32 %v4292_v55, 16  ;;  %v4537_v47 = vor.u32 %v4536_v5, %v4533_v36  ;;  %v5029_v51 = vld [vmem:[#allocation2 + $0x84] sm:$0xe]  ;;  %v9258_v8 = vld [vmem:[#allocation2 + $0x94] sm:$0xf] }
 0x168   : > { %v4495_v63 = vsel %vm7368_vm6, %v9208_v43, %v9180_v28  ;;  %v4500_v6 = vrot.slane %v4499_v52, 4  ;;  %v9239_v59 = vsel %vm7763_vm13, %v5137_v20, %v5138_v39  ;;  %v5149_v54 = vrot.slane %v9174_v41, 5 }
 0x169   : > { %v9242_v22 = vpop.f32.mrf.mxu0  ;;  %v10287_v33 = vcombine.low %v8955_v57, %v8979_v31  ;;  %v4547_v36 = vor.u32 %v4546_v7, %v9217_v30  ;;  %v4550_v25 = vshll.u32 %v4295_v44, 16  ;;  %v4555_v5 = vshrl.u32 %v4296_v37, 16 }
 0x16a   : > { %v4558_v58 = vshll.u32 %v4296_v37, 16  ;;  %v10288_v28 = vcombine.low %v8989_v29, %v8993_v12  ;;  %v4514_v43 = vrot.slane %v4513_v48, 4  ;;  %v6260_v52 = vrot.slane %v5028_v3, 9 }
 0x16b   : > { %7088 = vmatmul.mubr.bf16.vlgmr.msra.gmra.mxu0 %v10287_v33  ;;  %v5144_v20 = vrot.slane %v5142_v61, 4  ;;  %v5145_v39 = vrot.slane %v4292_v55, 5  ;;  %v9251_v41 = vpop.f32.mrf.mxu1  ;;  %v10289_v35 = vcombine.low %v8815_v4, %v8819_v9  ;;  %v9256_v57 = vpop.f32.mrf.mxu0  ;;  %v4524_v31 = vrot.slane %v4523_v11, 4  ;;  %v9266_v9 = vld [vmem:[#allocation2 + $0x98] sm:$0x1] }
 0x16c   : > { %7091 = vmatprep.mubr.bf16.mxu0 %v10288_v28  ;;  %v4528_v7 = vrot.slane %v4526_v18, 5  ;;  %v4538_v33 = vrot.slane %v4537_v47, 4  ;;  %v6261_v37 = vrot.slane %v5029_v51, 9  ;;  %v4505_v29 = vsel %vm7368_vm6, %v4500_v6, %v9221_v46  ;;  %v9284_v28 = vld [vmem:[#allocation2 + $0xa0] sm:$0xf] }
 0x16d   : > { %v5151_v55 = vrot.slane %v5149_v54, 4  ;;  %v5152_v4 = vrot.slane %v4295_v44, 5  ;;  %v9270_v48 = vpop.f32.mrf.mxu0  ;;  %v4548_v11 = vrot.slane %v4547_v36, 4  ;;  %v4552_v18 = vrot.slane %v4550_v25, 5 }
 0x16e   : > { %6972 = vmatmul.mubr.bf16.gmra.mxu1 %v10289_v35  ;;  %v9268_v35 = vpop.f32.mrf.mxu1  ;;  %v4557_v3 = vrot.slane %v4555_v5, 4  ;;  %v4560_v47 = vrot.slane %v4558_v58, 5  ;;  %v4519_v46 = vsel %vm7368_vm6, %v4514_v43, %v9203_v50  ;;  %v9277_v6 = vsel %vm7763_vm13, %v6260_v52, %v5142_v61 }
 0x16f   : > { %7039 = vmatprep.mubr.bf16.mxu1 %v8999_v32  ;;  %10290 = vst [vmem:[#allocation23_spill] sm:$0xff] %v9268_v35  ;;  %v4299_v32 = vld [vmem:[#allocation2 + $0x9c] sm:$0xf]  ;;  %v9281_v44 = vsel %vm7763_vm13, %v5144_v20, %v5145_v39  ;;  %v4564_v51 = vshll.u32 %v9258_v8, 16  ;;  %v9288_v25 = vpop.f32.mrf.mxu0  ;;  %v4529_v5 = vsel %vm7368_vm6, %v4524_v31, %v4528_v7  ;;  %v4543_v50 = vsel %vm7368_vm6, %v4538_v33, %v9217_v30  ;;  %v5030_v20 = vld [vmem:[#allocation2 + $0x90] sm:$0xe] }
 0x170   : > { %v9286_v36 = vpop.f32.mrf.mxu1  ;;  %v9297_v61 = vsel %vm7763_vm13, %v6261_v37, %v5149_v54  ;;  %v4568_v58 = vshrl.u32 %v9258_v8, 16  ;;  %v9302_v43 = vsel %vm7763_vm13, %v5151_v55, %v5152_v4  ;;  %v4574_v52 = vshll.u32 %v9266_v9, 16 }
 0x171   : > { %10291 = vst [vmem:[#allocation24_spill] sm:$0xff] %v9286_v36  ;;  %v4579_v39 = vshrl.u32 %v4299_v32, 16  ;;  %v4582_v12 = vshll.u32 %v4299_v32, 16  ;;  %v9307_v7 = vpop.f32.mrf.mxu0  ;;  %v10293_v30 = vcombine.low %v9051_v17, %v9088_v45  ;;  %v4553_v54 = vsel %vm7368_vm6, %v4548_v11, %v4552_v18 }
 0x172   : > { %v9305_v31 = vpop.f32.mrf.mxu1  ;;  %v4561_v33 = vor.u32 %v4560_v47, %v4557_v3  ;;  %v4588_v37 = vshll.u32 %v9284_v28, 16  ;;  %v4592_v55 = vshrl.u32 %v9284_v28, 16  ;;  %v10294_v4 = vcombine.low %v9095_v27, %v9099_v40 }
 0x173   : > { %10292 = vst [vmem:[#allocation25_spill] sm:$0xff] %v9305_v31  ;;  %7092 = vmatmul.mubr.bf16.gmra.mxu0 %v10293_v30  ;;  %v9319_v32 = vcombine.low %v4495_v63, %v4505_v29  ;;  %v9321_v31 = vcombine.low %v4519_v46, %v4529_v5  ;;  %v9325_v45 = vrot.slane %v4564_v51, 5  ;;  %v9328_v11 = vpop.f32.mrf.mxu0  ;;  %v4570_v3 = vrot.slane %v4568_v58, 4  ;;  %v4302_v63 = vld [vmem:[#allocation2 + $0xa8] sm:$0xf] }
 0x174   : > { %7095 = vmatprep.mubr.bf16.mxu0 %v10294_v4  ;;  %v6753_v30 = vpop.f32.mrf.mxu1  ;;  %v6262_v27 = vrot.slane %v5030_v20, 9  ;;  %v5156_v40 = vrot.slane %v9258_v8, 5  ;;  %v9335_v47 = vcombine.low %v4543_v50, %v4553_v54  ;;  %v4581_v46 = vrot.slane %v4579_v39, 4  ;;  %v9349_v50 = vld [vmem:[#allocation2 + $0xac] sm:$0xf] }
 0x175   : > { %v1638_v29 = vadd.f32 %v6753_v30, %v8848_v2  ;;  %v4584_v51 = vrot.slane %v4582_v12, 5  ;;  %v9339_v4 = vrot.slane %v4561_v33, 4  ;;  %v9341_v17 = vrot.slane %v4574_v52, 5  ;;  %v10296_v2 = vld [vmem:[#allocation4_spill] sm:$0xff] }
 0x176   : > { %7040 = vmatmul.mubr.bf16.vlgmr.msra.gmra.mxu1 %v9008_v53  ;;  %v1629_v5 = vpop.f32.mrf.mxu1  ;;  %v9337_v53 = vpop.f32.mrf.mxu0  ;;  %v9343_v58 = vrot.slane %v4588_v37, 5  ;;  %v4594_v20 = vrot.slane %v4592_v55, 4  ;;  %v4603_v39 = vshrl.u32 %v4302_v63, 16  ;;  %v4606_v12 = vshll.u32 %v4302_v63, 16 }
 0x177   : > { %7043 = vmatprep.mubr.bf16.mxu1 %v9024_v56  ;;  %v9346_v8 = vadd.f32 %v9242_v22, %v1638_v29  ;;  %v1630_v30 = vadd.f32 %v1629_v5, %v10296_v2  ;;  %v4301_v56 = vld [vmem:[#allocation2 + $0xa4] sm:$0x1]  ;;  %v4571_v33 = vor.u32 %v4570_v3, %v9325_v45  ;;  %v9356_v52 = vsel %vm7763_vm13, %v6262_v27, %v5156_v40  ;;  %v10297_v29 = vld [vmem:[#allocation3_spill] sm:$0xff] }
 0x178   : > { %v6754_v54 = vpop.f32.mrf.mxu1  ;;  %v9351_v18 = vpop.f32.mrf.mxu0  ;;  %v5158_v37 = vrot.slane %v5156_v40, 4  ;;  %v5159_v22 = vrot.slane %v9266_v9, 5  ;;  %v4585_v2 = vor.u32 %v4584_v51, %v4581_v46  ;;  %v5163_v63 = vrot.slane %v9284_v28, 5  ;;  %v10300_v46 = vld [vmem:[#allocation11_spill] sm:$0xff] }
 0x179   : > { %10295 = vst [vmem:[#allocation26_spill] sm:$0xff] %v9346_v8  ;;  %v9360_v55 = vadd.f32 %v9256_v57, %v1630_v30  ;;  %v1641_v5 = vadd.f32 %v6754_v54, %v10297_v29  ;;  %v5031_v8 = vld [vmem:[#allocation2 + $0x9c] sm:$0xe]  ;;  %v10298_v3 = vcombine.low %v9118_v13, %v9122_v16  ;;  %v4595_v27 = vor.u32 %v4594_v20, %v9343_v58 }
 0x17a   : > { %v1632_v36 = vpop.f32.mrf.mxu1  ;;  %v9364_v35 = vpop.f32.mrf.mxu0  ;;  %v4598_v40 = vshll.u32 %v4301_v56, 16  ;;  %v4612_v9 = vshll.u32 %v9349_v50, 16  ;;  %v4616_v57 = vshrl.u32 %v9349_v50, 16  ;;  %v10301_v28 = vcombine.low %v9167_v34, %v9187_v42 }
 0x17b   : > { %7096 = vmatmul.mubr.bf16.gmra.mxu0 %v10298_v3  ;;  %v9373_v30 = vadd.f32 %v9270_v48, %v1641_v5  ;;  %v1633_v51 = vadd.f32 %v1632_v36, %v10300_v46  ;;  %v4605_v54 = vrot.slane %v4603_v39, 4  ;;  %v4608_v29 = vrot.slane %v4606_v12, 5  ;;  %v10302_v46 = vld [vmem:[#allocation7_spill] sm:$0xff] }
 0x17c   : > { %7099 = vmatprep.mubr.bf16.mxu0 %v10301_v28  ;;  %v6757_v13 = vpop.f32.mrf.mxu1  ;;  %v9380_v16 = vpop.f32.mrf.mxu0  ;;  %v4572_v20 = vrot.slane %v4571_v33, 4  ;;  %v9384_v3 = vsel %vm7763_vm13, %v5158_v37, %v5159_v22  ;;  %v6263_v48 = vrot.slane %v5031_v8, 9  ;;  %v5166_v5 = vrot.slane %v4301_v56, 5  ;;  %v10303_v56 = vld [vmem:[#allocation12_spill] sm:$0xff]  ;;  %v4304_v22 = vld [vmem:[#allocation2 + $0xb0] sm:$0x1] }
 0x17d   : > { %10299 = vst [vmem:[#allocation4_spill] sm:$0xff] %v9373_v30  ;;  %v9387_v36 = vadd.f32 %v9288_v25, %v1633_v51  ;;  %v1654_v34 = vadd.f32 %v6757_v13, %v10302_v46  ;;  %v4586_v42 = vrot.slane %v4585_v2, 4  ;;  %v5165_v39 = vrot.slane %v5163_v63, 4  ;;  %v5032_v51 = vld [vmem:[#allocation2 + $0xa8] sm:$0xe] }
 0x17e   : > { %7044 = vmatmul.mubr.bf16.gmra.mxu1 %v9132_v1  ;;  %v1645_v12 = vpop.f32.mrf.mxu1  ;;  %v9391_v1 = vpop.f32.mrf.mxu0  ;;  %v4596_v28 = vrot.slane %v4595_v27, 4  ;;  %v4600_v33 = vrot.slane %v4598_v40, 5  ;;  %v9393_v30 = vrot.slane %v4612_v9, 5  ;;  %v4618_v37 = vrot.slane %v4616_v57, 4 }
 0x17f   : > { %7047 = vmatprep.mubr.bf16.mxu1 %v9144_v21  ;;  %v9396_v8 = vadd.f32 %v9307_v7, %v1654_v34  ;;  %v1646_v25 = vadd.f32 %v1645_v12, %v10303_v56  ;;  %v4567_v21 = vsel %vm7368_vm6, %v9339_v4, %v9325_v45  ;;  %v4609_v2 = vor.u32 %v4608_v29, %v4605_v54  ;;  %v10304_v4 = vld [vmem:[#allocation14_spill] sm:$0xff] }
 0x180   : > { %v6758_v13 = vpop.f32.mrf.mxu1  ;;  %v9403_v46 = vpop.f32.mrf.mxu0  ;;  %v4577_v27 = vsel %vm7368_vm6, %v4572_v20, %v9341_v17  ;;  %v6294_v7 = vcombine.low %v9356_v52, %v9384_v3  ;;  %v9412_v40 = vsel %vm7763_vm13, %v6263_v48, %v5163_v63  ;;  %v5170_v9 = vrot.slane %v9349_v50, 5  ;;  %v4305_v29 = vld [vmem:[#allocation2 + $0xb4] sm:$0xf]  ;;  %v9426_v20 = vld [vmem:[#allocation2 + $0xb8] sm:$0xf] }
 0x181   : > { %v9416_v45 = vadd.f32 %v9328_v11, %v1646_v25  ;;  %v1657_v57 = vadd.f32 %v6758_v13, %v10304_v4  ;;  %v4591_v54 = vsel %vm7368_vm6, %v4586_v42, %v9343_v58  ;;  %v9424_v17 = vsel %vm7763_vm13, %v5165_v39, %v5166_v5  ;;  %v10306_v39 = vld [vmem:[#allocation6_spill] sm:$0xff] }
 0x182   : > { %v1648_v63 = vpop.f32.mrf.mxu1  ;;  %v9428_v48 = vpop.f32.mrf.mxu0  ;;  %v10305_v11 = vcombine.low %v9230_v19, %v9239_v59  ;;  %v4601_v50 = vsel %vm7368_vm6, %v4596_v28, %v4600_v33  ;;  %v4619_v34 = vor.u32 %v4618_v37, %v9393_v30  ;;  %v4622_v58 = vshll.u32 %v4304_v22, 16 }
 0x183   : > { %v6264_v42 = vrot.slane %v5032_v51, 9  ;;  %v9437_v5 = vadd.f32 %v9337_v53, %v1657_v57  ;;  %v1649_v12 = vadd.f32 %v1648_v63, %v10306_v39  ;;  %v10307_v56 = vcombine.low %v9277_v6, %v9281_v44 }
 0x184   : > { %7100 = vmatmul.mubr.bf16.gmra.mxu0 %v10305_v11  ;;  %v9443_v25 = vrot.slane %v4609_v2, 4  ;;  %v5173_v19 = vrot.slane %v4304_v22, 5  ;;  %v6761_v59 = vpop.f32.mrf.mxu1  ;;  %v9446_v28 = vpop.f32.mrf.mxu0  ;;  %v5172_v33 = vrot.slane %v5170_v9, 4  ;;  %v4627_v37 = vshrl.u32 %v4305_v29, 16 }
 0x185   : > { %7103 = vmatprep.mubr.bf16.mxu0 %v10307_v56  ;;  %v4630_v51 = vshll.u32 %v4305_v29, 16  ;;  %v4636_v53 = vshll.u32 %v9426_v20, 16  ;;  %v9450_v13 = vadd.f32 %v9351_v18, %v1649_v12  ;;  %v1670_v4 = vadd.f32 %v6761_v59, %v9063_v62  ;;  %v9463_v18 = vld [vmem:[#allocation2 + $0xbc] sm:$0x1]  ;;  %v4309_v56 = vld [vmem:[#allocation2 + $0xc4] sm:$0xf] }
 0x186   : > { %7048 = vmatmul.mubr.bf16.gmra.mxu1 %v9213_v38  ;;  %v9454_v6 = vcombine.low %v4567_v21, %v4577_v27  ;;  %v4640_v44 = vshrl.u32 %v9426_v20, 16  ;;  %v1661_v22 = vpop.f32.mrf.mxu1  ;;  %v9457_v38 = vpop.f32.mrf.mxu0  ;;  %v9459_v2 = vcombine.low %v4591_v54, %v4601_v50  ;;  %v6295_v57 = vcombine.low %v9412_v40, %v9424_v17  ;;  %v4308_v54 = vld [vmem:[#allocation2 + $0xc0] sm:$0xf]  ;;  %v5035_v17 = vld [vmem:[#allocation2 + $0xcc] sm:$0xe] }
 0x187   : > { %7051 = vmatprep.mubr.bf16.mxu1 %v9219_v26  ;;  %v4620_v29 = vrot.slane %v4619_v34, 4  ;;  %v4624_v63 = vrot.slane %v4622_v58, 5  ;;  %v9466_v62 = vadd.f32 %v9364_v35, %v1670_v4  ;;  %v1662_v26 = vadd.f32 %v1661_v22, %v9081_v15 }
 0x188   : > { %v4615_v21 = vsel %vm7368_vm6, %v9443_v25, %v9393_v30  ;;  %v9475_v27 = vsel %vm7763_vm13, %v6264_v42, %v5170_v9  ;;  %v6762_v11 = vpop.f32.mrf.mxu1  ;;  %v9477_v50 = vpop.f32.mrf.mxu0  ;;  %v9481_v34 = vsel %vm7763_vm13, %v5172_v33, %v5173_v19  ;;  %v4629_v35 = vrot.slane %v4627_v37, 4  ;;  %v5033_v42 = vld [vmem:[#allocation2 + $0xb4] sm:$0xe] }
 0x189   : > { %v4632_v58 = vrot.slane %v4630_v51, 5  ;;  %v9483_v15 = vrot.slane %v4636_v53, 5  ;;  %v9486_v39 = vadd.f32 %v9380_v16, %v1662_v26  ;;  %v1673_v30 = vadd.f32 %v6762_v11, %v9124_v14  ;;  %v10309_v53 = vld [vmem:[#allocation19_spill] sm:$0xff]  ;;  %v10310_v11 = vld [vmem:[#allocation21_spill] sm:$0xff] }
 0x18a   : > { %v4642_v12 = vrot.slane %v4640_v44, 4  ;;  %v4646_v9 = vshll.u32 %v9463_v18, 16  ;;  %v1664_v25 = vpop.f32.mrf.mxu1  ;;  %v9490_v59 = vpop.f32.mrf.mxu0  ;;  %v10308_v19 = vcombine.low %v9297_v61, %v9302_v43  ;;  %v4625_v33 = vsel %vm7368_vm6, %v4620_v29, %v4624_v63  ;;  %v5034_v43 = vld [vmem:[#allocation2 + $0xc0] sm:$0xe] }
 0x18b   : > { %v5177_v16 = vrot.slane %v9426_v20, 5  ;;  %v4651_v37 = vshrl.u32 %v4308_v54, 16  ;;  %v4654_v51 = vshll.u32 %v4308_v54, 16  ;;  %v9499_v14 = vadd.f32 %v9391_v1, %v1673_v30  ;;  %v4310_v30 = vld [vmem:[#allocation2 + $0xc8] sm:$0x1] }
 0x18c   : > { %7104 = vmatmul.mubr.bf16.gmra.mxu0 %v10308_v19  ;;  %v1665_v4 = vadd.f32 %v1664_v25, %v10309_v53  ;;  %v6296_v61 = vcombine.low %v9475_v27, %v9481_v34  ;;  %v5184_v44 = vrot.slane %v4309_v56, 5  ;;  %v6765_v22 = vpop.f32.mrf.mxu1  ;;  %v9508_v20 = vpop.f32.mrf.mxu0  ;;  %v4633_v29 = vor.u32 %v4632_v58, %v4629_v35 }
 0x18d   : > { %7107 = vmatprep.mubr.bf16.mxu0 %v6294_v7  ;;  %v6265_v63 = vrot.slane %v5033_v42, 9  ;;  %v4660_v1 = vshll.u32 %v4309_v56, 16  ;;  %v4664_v26 = vshrl.u32 %v4309_v56, 16  ;;  %v1686_v52 = vadd.f32 %v6765_v22, %v10310_v11 }
 0x18e   : > { %7052 = vmatmul.mubr.bf16.gmra.mxu1 %v9319_v32  ;;  %v9511_v54 = vadd.f32 %v9403_v46, %v1665_v4  ;;  %v4643_v3 = vor.u32 %v4642_v12, %v9483_v15  ;;  %v5180_v7 = vrot.slane %v9463_v18, 5  ;;  %v1677_v27 = vpop.f32.mrf.mxu1  ;;  %v9517_v34 = vpop.f32.mrf.mxu0  ;;  %v5179_v32 = vrot.slane %v5177_v16, 4 }
 0x18f   : > { %7055 = vmatprep.mubr.bf16.mxu1 %v9321_v31  ;;  %v4653_v35 = vrot.slane %v4651_v37, 4  ;;  %v4656_v58 = vrot.slane %v4654_v51, 5  ;;  %v6266_v42 = vrot.slane %v5034_v43, 9  ;;  %v9520_v56 = vadd.f32 %v9428_v48, %v1686_v52  ;;  %v4311_v43 = vld [vmem:[#allocation2 + $0xcc] sm:$0xf] }
 0x190   : > { %v1678_v46 = vadd.f32 %v1677_v27, %v9201_v0  ;;  %v5186_v25 = vrot.slane %v5184_v44, 4  ;;  %v5187_v19 = vrot.slane %v4310_v30, 5  ;;  %v6766_v31 = vpop.f32.mrf.mxu1  ;;  %v9523_v53 = vpop.f32.mrf.mxu0  ;;  %v9525_v12 = vcombine.low %v4615_v21, %v4625_v33  ;;  %v4312_v33 = vld [vmem:[#allocation2 + $0xd0] sm:$0xf]  ;;  %v10311_v27 = vld [vmem:[#allocation5_spill] sm:$0xff] }
 0x191   : > { %v9527_v18 = vrot.slane %v4646_v9, 5  ;;  %v9529_v4 = vrot.slane %v4660_v1, 5  ;;  %v4666_v22 = vrot.slane %v4664_v26, 4  ;;  %v1689_v48 = vadd.f32 %v6766_v31, %v9211_v60  ;;  %v10312_v31 = vld [vmem:[#allocation10_spill] sm:$0xff] }
 0x192   : > { %v9532_v37 = vadd.f32 %v9446_v28, %v1678_v46  ;;  %v9535_v51 = vrot.slane %v4633_v29, 4  ;;  %v5178_v0 = vsel %vm7763_vm13, %v6265_v63, %v5177_v16  ;;  %v1680_v11 = vpop.f32.mrf.mxu1  ;;  %v9539_v52 = vpop.f32.mrf.mxu0  ;;  %v9544_v21 = vrot.slane %v4643_v3, 4 }
 0x193   : > { %v5181_v28 = vsel %vm7763_vm13, %v5179_v32, %v5180_v7  ;;  %v4657_v9 = vor.u32 %v4656_v58, %v4653_v35  ;;  %v5185_v60 = vsel %vm7763_vm13, %v6266_v42, %v5184_v44  ;;  %v9551_v16 = vadd.f32 %v9457_v38, %v1689_v48 }
 0x194   : > { %7108 = vmatmul.mubr.bf16.gmra.mxu0 %v6295_v57  ;;  %v1681_v29 = vadd.f32 %v1680_v11, %v9226_v49  ;;  %v5188_v40 = vsel %vm7763_vm13, %v5186_v25, %v5187_v19  ;;  %v5191_v57 = vrot.slane %v4312_v33, 5  ;;  %v6769_v63 = vpop.f32.mrf.mxu1  ;;  %v2162_v1 = vpop.f32.mrf.mxu0  ;;  %v4667_v26 = vor.u32 %v4666_v22, %v9529_v4  ;;  %v4313_v25 = vld [vmem:[#allocation2 + $0xd4] sm:$0x1] }
 0x195   : > { %7111 = vmatprep.mubr.bf16.mxu0 %v6296_v61  ;;  %v4670_v3 = vshll.u32 %v4310_v30, 16  ;;  %v4675_v44 = vshrl.u32 %v4311_v43, 16  ;;  %v4678_v7 = vshll.u32 %v4311_v43, 16  ;;  %v1702_v49 = vadd.f32 %v6769_v63, %v10311_v27 }
 0x196   : > { %7056 = vmatmul.mubr.bf16.gmra.mxu1 %v9335_v47  ;;  %v9559_v38 = vadd.f32 %v9477_v50, %v1681_v29  ;;  %v4684_v61 = vshll.u32 %v4312_v33, 16  ;;  %v4688_v32 = vshrl.u32 %v4312_v33, 16  ;;  %v1693_v35 = vpop.f32.mrf.mxu1  ;;  %v6822_v58 = vpop.f32.mrf.mxu0  ;;  %v6297_v42 = vcombine.low %v5178_v0, %v5181_v28  ;;  %v10313_v0 = vld [vmem:[#allocation13_spill] sm:$0xff] }
 0x197   : > { %7059 = vmatprep.mubr.bf16.mxu1 %v9454_v6  ;;  %v4658_v46 = vrot.slane %v4657_v9, 4  ;;  %v6298_v47 = vcombine.low %v5185_v60, %v5188_v40  ;;  %v6267_v19 = vrot.slane %v5035_v17, 9  ;;  %v9564_v30 = vadd.f32 %v9490_v59, %v1702_v49 }
 0x198   : > { %v1694_v22 = vadd.f32 %v1693_v35, %v10312_v31  ;;  %v5193_v50 = vrot.slane %v5191_v57, 4  ;;  %v5194_v48 = vrot.slane %v4313_v25, 5  ;;  %v6770_v43 = vpop.f32.mrf.mxu1  ;;  %v2165_v11 = vpop.f32.mrf.mxu0  ;;  %v4668_v29 = vrot.slane %v4667_v26, 4 }
 0x199   : > { %v4672_v6 = vrot.slane %v4670_v3, 5  ;;  %v4677_v63 = vrot.slane %v4675_v44, 4  ;;  %v4680_v33 = vrot.slane %v4678_v7, 5  ;;  %v1705_v28 = vadd.f32 %v6770_v43, %v10313_v0  ;;  %v10314_v3 = vld [vmem:[#allocation15_spill] sm:$0xff]  ;;  %v10317_v43 = vld [vmem:[#allocation17_spill] sm:$0xff] }
 0x19a   : > { %v9568_v27 = vadd.f32 %v9508_v20, %v1694_v22  ;;  %v4686_v9 = vrot.slane %v4684_v61, 5  ;;  %v4690_v60 = vrot.slane %v4688_v32, 4  ;;  %v1696_v40 = vpop.f32.mrf.mxu1  ;;  %v6825_v59 = vpop.f32.mrf.mxu0  ;;  %v4639_v17 = vsel %vm7368_vm6, %v9535_v51, %v9483_v15  ;;  %v10315_v32 = vld [vmem:[#allocation16_spill] sm:$0xff] }
 0x19b   : > { %v9576_v26 = vadd.f32 %v9517_v34, %v1705_v28  ;;  %v1697_v44 = vadd.f32 %v1696_v40, %v10314_v3  ;;  %v5192_v20 = vsel %vm7763_vm13, %v6267_v19, %v5191_v57  ;;  %v5195_v7 = vsel %vm7763_vm13, %v5193_v50, %v5194_v48  ;;  %v10319_v3 = vld [vmem:[#allocation9_spill] sm:$0xff] }
 0x19c   : > { %7112 = vmatmul.mubr.bf16.gmra.mxu0 %v6297_v42  ;;  %v6773_v49 = vpop.f32.mrf.mxu1  ;;  %v4649_v15 = vsel %vm7368_vm6, %v9544_v21, %v9527_v18  ;;  %v2178_v51 = vpop.f32.mrf.mxu0  ;;  %v4663_v34 = vsel %vm7368_vm6, %v4658_v46, %v9529_v4  ;;  %v4673_v61 = vsel %vm7368_vm6, %v4668_v29, %v4672_v6  ;;  %v4694_v57 = vshll.u32 %v4313_v25, 16  ;;  %v10316_v4 = vld [vmem:[#allocation18_spill] sm:$0xff] }
 0x19d   : > { %7115 = vmatprep.mubr.bf16.mxu0 %v6298_v47  ;;  %v9594_v23 = vadd.f32 %v9523_v53, %v1697_v44  ;;  %v1718_v35 = vadd.f32 %v6773_v49, %v10315_v32  ;;  %v4691_v42 = vor.u32 %v4690_v60, %v4686_v9  ;;  %v6299_v21 = vcombine.low %v5192_v20, %v5195_v7 }
 0x19e   : > { %7060 = vmatmul.mubr.bf16.gmra.mxu1 %v9459_v2  ;;  %v4681_v2 = vor.u32 %v4680_v33, %v4677_v63  ;;  %v1709_v47 = vpop.f32.mrf.mxu1  ;;  %v6826_v18 = vpop.f32.mrf.mxu0  ;;  %v6241_v22 = vcombine.low %v4639_v17, %v4649_v15  ;;  %v6242_v50 = vcombine.low %v4663_v34, %v4673_v61  ;;  %v4696_v53 = vrot.slane %v4694_v57, 5  ;;  %v10320_v15 = vld [vmem:[#allocation20_spill] sm:$0xff] }
 0x19f   : > { %7063 = vmatprep.mubr.bf16.mxu1 %v9525_v12  ;;  %v9599_v19 = vadd.f32 %v9539_v52, %v1718_v35  ;;  %v1710_v46 = vadd.f32 %v1709_v47, %v10316_v4  ;;  %v4692_v6 = vrot.slane %v4691_v42, 4  ;;  %v10318_v52 = vld [vmem:[#allocation8_spill] sm:$0xff] }
 0x1a0   : > { %v6774_v31 = vpop.f32.mrf.mxu1  ;;  %v2181_v25 = vpop.f32.mrf.mxu0  ;;  %v4682_v12 = vrot.slane %v4681_v2, 4 }
 0x1a1   : > { %v9602_v48 = vadd.f32 %v2162_v1, %v1710_v46  ;;  %v1721_v29 = vadd.f32 %v6774_v31, %v10317_v43  ;;  %v4697_v20 = vsel %vm7368_vm6, %v4692_v6, %v4696_v53 }
 0x1a2   : > { %v1712_v63 = vpop.f32.mrf.mxu1  ;;  %v4687_v1 = vsel %vm7368_vm6, %v4682_v12, %v4686_v9  ;;  %v10321_v9 = vld [vmem:[#allocation22_spill] sm:$0xff] }
 0x1a3   : > { %v6829_v33 = vpop.f32.mrf.mxu0  ;;  %v9605_v0 = vadd.f32 %v6822_v58, %v1721_v29  ;;  %v1713_v28 = vadd.f32 %v1712_v63, %v10318_v52  ;;  %v6243_v57 = vcombine.low %v4687_v1, %v4697_v20 }
 0x1a4   : > { %7116 = vmatmul.mubr.bf16.gmra.mxu0 %v6299_v21 }
 0x1a5   : > { %v6777_v60 = vpop.f32.mrf.mxu1  ;;  %v2194_v40 = vpop.f32.mrf.mxu0  ;;  %v9608_v17 = vadd.f32 %v2165_v11, %v1713_v28 }
 0x1a6   : > { %7064 = vmatmul.mubr.bf16.gmra.mxu1 %v6241_v22  ;;  %v1734_v44 = vadd.f32 %v6777_v60, %v10319_v3 }
 0x1a7   : > { %7067 = vmatprep.mubr.bf16.mxu1 %v6242_v50  ;;  %v1725_v7 = vpop.f32.mrf.mxu1  ;;  %v6830_v49 = vpop.f32.mrf.mxu0 }
 0x1a8   : > { %v9615_v58 = vadd.f32 %v6825_v59, %v1734_v44  ;;  %v1726_v34 = vadd.f32 %v1725_v7, %v10320_v15 }
 0x1a9   : > { %v6778_v61 = vpop.f32.mrf.mxu1  ;;  %v2197_v32 = vpop.f32.mrf.mxu0 }
 0x1aa   : > { %v9618_v11 = vadd.f32 %v2178_v51, %v1726_v34  ;;  %v1737_v35 = vadd.f32 %v6778_v61, %v9199_v10  ;;  %v10322_v51 = vld [vmem:[#allocation23_spill] sm:$0xff] }
 0x1ab   : > { %v1728_v2 = vpop.f32.mrf.mxu1  ;;  %v6897_v42 = vpop.f32.mrf.mxu0 }
 0x1ac   : > { %v9621_v47 = vadd.f32 %v6826_v18, %v1737_v35  ;;  %v1729_v24 = vadd.f32 %v1728_v2, %v10321_v9  ;;  %v10323_v18 = vld [vmem:[#allocation24_spill] sm:$0xff] }
 0x1ad   : > { %v3222_v4 = vpop.f32.mrf.mxu0 }
 0x1ae   : > { %v6781_v21 = vpop.f32.mrf.mxu1  ;;  %7068 = vmatmul.mubr.bf16.gmra.mxu1 %v6243_v57  ;;  %v9624_v59 = vadd.f32 %v2181_v25, %v1729_v24  ;;  %v10324_v25 = vld [vmem:[#allocation25_spill] sm:$0xff] }
 0x1af   : > { %v1750_v46 = vadd.f32 %v6781_v21, %v9251_v41  ;;  %v6898_v22 = vpop.f32.mrf.mxu0 }
 0x1b0   : > { %v1741_v31 = vpop.f32.mrf.mxu1 }
 0x1b1   : > { %v9627_v50 = vadd.f32 %v6829_v33, %v1750_v46  ;;  %v1742_v53 = vadd.f32 %v1741_v31, %v10322_v51  ;;  %v3225_v43 = vpop.f32.mrf.mxu0  ;;  %v10325_v33 = vld [vmem:[#allocation26_spill] sm:$0xff] }
 0x1b2   : > { %v6782_v10 = vpop.f32.mrf.mxu1 }
 0x1b3   : > { %v9630_v29 = vadd.f32 %v2194_v40, %v1742_v53  ;;  %v1753_v12 = vadd.f32 %v6782_v10, %v10323_v18  ;;  %v6901_v63 = vpop.f32.mrf.mxu0 }
 0x1b4   : > { %v1744_v6 = vpop.f32.mrf.mxu1 }
 0x1b5   : > { %v9633_v52 = vadd.f32 %v6830_v49, %v1753_v12  ;;  %v1745_v28 = vadd.f32 %v1744_v6, %v10324_v25  ;;  %v3238_v41 = vpop.f32.mrf.mxu0  ;;  %v10326_v49 = vld [vmem:[#allocation4_spill] sm:$0xff] }
 0x1b6   : > { %v6849_v60 = vpop.f32.mrf.mxu1 }
 0x1b7   : > { %v9636_v3 = vadd.f32 %v2197_v32, %v1745_v28  ;;  %v2597_v44 = vadd.f32 %v6849_v60, %v10325_v33  ;;  %v6902_v20 = vpop.f32.mrf.mxu0 }
 0x1b8   : > { %v2468_v1 = vpop.f32.mrf.mxu1 }
 0x1b9   : > { %v9639_v7 = vadd.f32 %v6897_v42, %v2597_v44  ;;  %v2595_v40 = vadd.f32 %v2468_v1, %v9360_v55  ;;  %v3241_v34 = vpop.f32.mrf.mxu0 }
 0x1ba   : > { %v6850_v15 = vpop.f32.mrf.mxu1 }
 0x1bb   : > { %v9642_v61 = vadd.f32 %v3222_v4, %v2595_v40  ;;  %v2598_v57 = vadd.f32 %v6850_v15, %v10326_v49  ;;  %v6905_v2 = vpop.f32.mrf.mxu0 }
 0x1bc   : > { %v2471_v35 = vpop.f32.mrf.mxu1 }
 0x1bd   : > { %v9645_v9 = vadd.f32 %v6898_v22, %v2598_v57  ;;  %v2596_v32 = vadd.f32 %v2471_v35, %v9387_v36  ;;  %v3254_v21 = vpop.f32.mrf.mxu0 }
 0x1be   : > { %v6853_v24 = vpop.f32.mrf.mxu1 }
 0x1bf   : > { %v9648_v46 = vadd.f32 %v3225_v43, %v2596_v32  ;;  %v2601_v42 = vadd.f32 %v6853_v24, %v9396_v8  ;;  %v6906_v55 = vpop.f32.mrf.mxu0 }
 0x1c0   : > { %v2484_v31 = vpop.f32.mrf.mxu1 }
 0x1c1   : > { %v9651_v51 = vadd.f32 %v6901_v63, %v2601_v42  ;;  %v2599_v4 = vadd.f32 %v2484_v31, %v9416_v45  ;;  %v3257_v10 = vpop.f32.mrf.mxu0 }
 0x1c2   : > { %v6854_v53 = vpop.f32.mrf.mxu1 }
 0x1c3   : > { %v9654_v18 = vadd.f32 %v3238_v41, %v2599_v4  ;;  %v2602_v22 = vadd.f32 %v6854_v53, %v9437_v5  ;;  %v6909_v36 = vpop.f32.mrf.mxu0 }
 0x1c4   : > { %v2487_v12 = vpop.f32.mrf.mxu1 }
 0x1c5   : > { %v9657_v6 = vadd.f32 %v6902_v20, %v2602_v22  ;;  %v2600_v43 = vadd.f32 %v2487_v12, %v9450_v13  ;;  %v3270_v8 = vpop.f32.mrf.mxu0 }
 0x1c6   : > { %v6857_v25 = vpop.f32.mrf.mxu1 }
 0x1c7   : > { %v9660_v28 = vadd.f32 %v3241_v34, %v2600_v43  ;;  %v2605_v63 = vadd.f32 %v6857_v25, %v9466_v62  ;;  %v6910_v45 = vpop.f32.mrf.mxu0 }
 0x1c8   : > { %v2500_v60 = vpop.f32.mrf.mxu1 }
 0x1c9   : > { %v9663_v33 = vadd.f32 %v6905_v2, %v2605_v63  ;;  %v2603_v41 = vadd.f32 %v2500_v60, %v9486_v39  ;;  %v3273_v5 = vpop.f32.mrf.mxu0 }
 0x1ca   : > { %v6858_v44 = vpop.f32.mrf.mxu1 }
 0x1cb   : > { %v9666_v1 = vadd.f32 %v3254_v21, %v2603_v41  ;;  %v2606_v20 = vadd.f32 %v6858_v44, %v9499_v14  ;;  %v6913_v13 = vpop.f32.mrf.mxu0 }
 0x1cc   : > { %v2503_v40 = vpop.f32.mrf.mxu1 }
 0x1cd   : > { %v9669_v15 = vadd.f32 %v6906_v55, %v2606_v20  ;;  %v2604_v34 = vadd.f32 %v2503_v40, %v9511_v54  ;;  %v3286_v62 = vpop.f32.mrf.mxu0 }
 0x1ce   : > { %v6861_v49 = vpop.f32.mrf.mxu1 }
 0x1cf   : > { %v9672_v57 = vadd.f32 %v3257_v10, %v2604_v34  ;;  %v2609_v35 = vadd.f32 %v6861_v49, %v9520_v56  ;;  %v6914_v39 = vpop.f32.mrf.mxu0 }
 0x1d0   : > { %v2516_v2 = vpop.f32.mrf.mxu1 }
 0x1d1   : > { %v9675_v32 = vadd.f32 %v6909_v36, %v2609_v35  ;;  %v2607_v24 = vadd.f32 %v2516_v2, %v9532_v37  ;;  %v3289_v14 = vpop.f32.mrf.mxu0 }
 0x1d2   : > { %v6862_v21 = vpop.f32.mrf.mxu1 }
 0x1d3   : > { %v9678_v42 = vadd.f32 %v3270_v8, %v2607_v24  ;;  %v2610_v31 = vadd.f32 %v6862_v21, %v9551_v16  ;;  %v6917_v54 = vpop.f32.mrf.mxu0 }
 0x1d4   : > { %v2519_v55 = vpop.f32.mrf.mxu1 }
 0x1d5   : > { %v9681_v4 = vadd.f32 %v6910_v45, %v2610_v31  ;;  %v2608_v53 = vadd.f32 %v2519_v55, %v9559_v38  ;;  %v3302_v56 = vpop.f32.mrf.mxu0 }
 0x1d6   : > { %v6865_v10 = vpop.f32.mrf.mxu1 }
 0x1d7   : > { %v9684_v22 = vadd.f32 %v3273_v5, %v2608_v53  ;;  %v2613_v12 = vadd.f32 %v6865_v10, %v9564_v30  ;;  %v6918_v37 = vpop.f32.mrf.mxu0 }
 0x1d8   : > { %v2532_v36 = vpop.f32.mrf.mxu1 }
 0x1d9   : > { %v9687_v43 = vadd.f32 %v6913_v13, %v2613_v12  ;;  %v2611_v25 = vadd.f32 %v2532_v36, %v9568_v27  ;;  %v3305_v16 = vpop.f32.mrf.mxu0 }
 0x1da   : > { %v6866_v8 = vpop.f32.mrf.mxu1 }
 0x1db   : > { %v9690_v63 = vadd.f32 %v3286_v62, %v2611_v25  ;;  %v2614_v60 = vadd.f32 %v6866_v8, %v9576_v26  ;;  %v6921_v38 = vpop.f32.mrf.mxu0 }
 0x1dc   : > { %v2535_v45 = vpop.f32.mrf.mxu1 }
 0x1dd   : > { %v9693_v41 = vadd.f32 %v6914_v39, %v2614_v60  ;;  %v2612_v44 = vadd.f32 %v2535_v45, %v9594_v23  ;;  %v3318_v30 = vpop.f32.mrf.mxu0 }
 0x1de   : > { %v6869_v5 = vpop.f32.mrf.mxu1 }
 0x1df   : > { %v9696_v20 = vadd.f32 %v3289_v14, %v2612_v44  ;;  %v2617_v40 = vadd.f32 %v6869_v5, %v9599_v19  ;;  %v6922_v27 = vpop.f32.mrf.mxu0 }
 0x1e0   : > { %v2548_v13 = vpop.f32.mrf.mxu1 }
 0x1e1   : > { %v9699_v34 = vadd.f32 %v6917_v54, %v2617_v40  ;;  %v2615_v49 = vadd.f32 %v2548_v13, %v9602_v48  ;;  %v3321_v26 = vpop.f32.mrf.mxu0 }
 0x1e2   : > { %v6870_v62 = vpop.f32.mrf.mxu1 }
 0x1e3   : > { %v9702_v35 = vadd.f32 %v3302_v56, %v2615_v49  ;;  %v2618_v2 = vadd.f32 %v6870_v62, %v9605_v0  ;;  %v6925_v23 = vpop.f32.mrf.mxu0 }
 0x1e4   : > { %v2551_v39 = vpop.f32.mrf.mxu1 }
 0x1e5   : > { %v9705_v24 = vadd.f32 %v6918_v37, %v2618_v2  ;;  %v2616_v21 = vadd.f32 %v2551_v39, %v9608_v17  ;;  %v3334_v19 = vpop.f32.mrf.mxu0 }
 0x1e6   : > { %v6873_v14 = vpop.f32.mrf.mxu1 }
 0x1e7   : > { %10327 = vst [vmem:[#allocation3_spill] sm:$0xff] %v9705_v24  ;;  %v9708_v31 = vadd.f32 %v3305_v16, %v2616_v21  ;;  %v2621_v55 = vadd.f32 %v6873_v14, %v9615_v58  ;;  %v6926_v48 = vpop.f32.mrf.mxu0 }
 0x1e8   : > { %v2564_v54 = vpop.f32.mrf.mxu1 }
 0x1e9   : > { %10328 = vst [vmem:[#allocation11_spill] sm:$0xff] %v9708_v31  ;;  %v9711_v53 = vadd.f32 %v6921_v38, %v2621_v55  ;;  %v2619_v10 = vadd.f32 %v2564_v54, %v9618_v11  ;;  %v3337_v0 = vpop.f32.mrf.mxu0 }
 0x1ea   : > { %v6874_v56 = vpop.f32.mrf.mxu1 }
 0x1eb   : > { %v9714_v12 = vadd.f32 %v3318_v30, %v2619_v10  ;;  %v2622_v36 = vadd.f32 %v6874_v56, %v9621_v47  ;;  %v6993_v17 = vpop.f32.mrf.mxu0 }
 0x1ec   : > { %v2567_v37 = vpop.f32.mrf.mxu1 }
 0x1ed   : > { %v9717_v25 = vadd.f32 %v6922_v27, %v2622_v36  ;;  %v2620_v8 = vadd.f32 %v2567_v37, %v9624_v59  ;;  %v4107_v58 = vpop.f32.mrf.mxu0 }
 0x1ee   : > { %v6877_v16 = vpop.f32.mrf.mxu1 }
 0x1ef   : > { %10329 = vst [vmem:[#allocation7_spill] sm:$0xff] %v9717_v25  ;;  %v9720_v60 = vadd.f32 %v3321_v26, %v2620_v8  ;;  %v2625_v45 = vadd.f32 %v6877_v16, %v9627_v50  ;;  %v9723_v11 = vpop.f32.mrf.mxu0 }
 0x1f0   : > { %v2580_v38 = vpop.f32.mrf.mxu1 }
 0x1f1   : > { %10330 = vst [vmem:[#allocation12_spill] sm:$0xff] %v9720_v60  ;;  %v9725_v44 = vadd.f32 %v6925_v23, %v2625_v45  ;;  %v2623_v5 = vadd.f32 %v2580_v38, %v9630_v29  ;;  %v9728_v30 = vpop.f32.mrf.mxu0 }
 0x1f2   : > { %v6878_v47 = vpop.f32.mrf.mxu1 }
 0x1f3   : > { %v9730_v40 = vadd.f32 %v3334_v19, %v2623_v5  ;;  %v2626_v59 = vadd.f32 %v6878_v47, %v9633_v52  ;;  %v6997_v27 = vpop.f32.mrf.mxu0 }
 0x1f4   : > { %v2583_v13 = vpop.f32.mrf.mxu1 }
 0x1f5   : > { %v9733_v49 = vadd.f32 %v6926_v48, %v2626_v59  ;;  %v2624_v50 = vadd.f32 %v2583_v13, %v9636_v3  ;;  %v4123_v26 = vpop.f32.mrf.mxu0 }
 0x1f6   : > { %v6945_v62 = vpop.f32.mrf.mxu1 }
 0x1f7   : > { %10331 = vst [vmem:[#allocation14_spill] sm:$0xff] %v9733_v49  ;;  %v9736_v2 = vadd.f32 %v3337_v0, %v2624_v50  ;;  %v3849_v39 = vadd.f32 %v6945_v62, %v9639_v7  ;;  %v9739_v23 = vpop.f32.mrf.mxu0 }
 0x1f8   : > { %v3720_v29 = vpop.f32.mrf.mxu1 }
 0x1f9   : > { %10332 = vst [vmem:[#allocation6_spill] sm:$0xff] %v9736_v2  ;;  %v9741_v21 = vadd.f32 %v6993_v17, %v3849_v39  ;;  %v3847_v14 = vadd.f32 %v3720_v29, %v9642_v61  ;;  %v9746_v19 = vpop.f32.mrf.mxu0 }
 0x1fa   : > { %v9744_v52 = vpop.f32.mrf.mxu1 }
 0x1fb   : > { %v9748_v55 = vadd.f32 %v4107_v58, %v3847_v14  ;;  %v7001_v54 = vpop.f32.mrf.mxu0 }
 0x1fc   : > { %v9750_v3 = vpop.f32.mrf.mxu1 }
 0x1fd   : > { %v4139_v10 = vpop.f32.mrf.mxu0 }
 0x1fe   : > { %v6949_v48 = vpop.f32.mrf.mxu1 }
 0x1ff   : > { %v3853_v7 = vadd.f32 %v6949_v48, %v9651_v51  ;;  %v9753_v0 = vpop.f32.mrf.mxu0 }
 0x200   : > { %v3736_v56 = vpop.f32.mrf.mxu1 }
 0x201   : > { %v9755_v36 = vadd.f32 %v6997_v27, %v3853_v7  ;;  %v3851_v61 = vadd.f32 %v3736_v56, %v9654_v18  ;;  %v9760_v17 = vpop.f32.mrf.mxu0 }
 0x202   : > { %v9758_v37 = vpop.f32.mrf.mxu1 }
 0x203   : > { %v9762_v8 = vadd.f32 %v4123_v26, %v3851_v61  ;;  %v7005_v58 = vpop.f32.mrf.mxu0 }
 0x204   : > { %v9764_v16 = vpop.f32.mrf.mxu1 }
 0x205   : > { %v4155_v38 = vpop.f32.mrf.mxu0 }
 0x206   : > { %v6953_v45 = vpop.f32.mrf.mxu1 }
 0x207   : > { %v3857_v51 = vadd.f32 %v6953_v45, %v9663_v33  ;;  %v9767_v47 = vpop.f32.mrf.mxu0 }
 0x208   : > { %v3752_v5 = vpop.f32.mrf.mxu1 }
 0x209   : > { %v9769_v59 = vadd.f32 %v7001_v54, %v3857_v51  ;;  %v3855_v18 = vadd.f32 %v3752_v5, %v9666_v1  ;;  %v9774_v27 = vpop.f32.mrf.mxu0 }
 0x20a   : > { %v9772_v13 = vpop.f32.mrf.mxu1 }
 0x20b   : > { %v9776_v50 = vadd.f32 %v4139_v10, %v3855_v18  ;;  %v7009_v26 = vpop.f32.mrf.mxu0 }
 0x20c   : > { %v9778_v62 = vpop.f32.mrf.mxu1 }
 0x20d   : > { %v4171_v29 = vpop.f32.mrf.mxu0 }
 0x20e   : > { %v6957_v39 = vpop.f32.mrf.mxu1 }
 0x20f   : > { %v3861_v33 = vadd.f32 %v6957_v39, %v9675_v32  ;;  %v9781_v48 = vpop.f32.mrf.mxu0 }
 0x210   : > { %v3768_v14 = vpop.f32.mrf.mxu1 }
 0x211   : > { %v9783_v54 = vadd.f32 %v7005_v58, %v3861_v33  ;;  %v3859_v1 = vadd.f32 %v3768_v14, %v9678_v42  ;;  %v9788_v56 = vpop.f32.mrf.mxu0 }
 0x212   : > { %v9786_v7 = vpop.f32.mrf.mxu1 }
 0x213   : > { %v9790_v10 = vadd.f32 %v4155_v38, %v3859_v1  ;;  %v7013_v45 = vpop.f32.mrf.mxu0 }
 0x214   : > { %v9792_v61 = vpop.f32.mrf.mxu1 }
 0x215   : > { %v4187_v5 = vpop.f32.mrf.mxu0 }
 0x216   : > { %v6961_v51 = vpop.f32.mrf.mxu1 }
 0x217   : > { %v3865_v32 = vadd.f32 %v6961_v51, %v9687_v43  ;;  %v9795_v39 = vpop.f32.mrf.mxu0 }
 0x218   : > { %v3784_v18 = vpop.f32.mrf.mxu1  ;;  %10333 = vst [vmem:[#allocation19_spill] sm:$0xff] %v9795_v39 }
 0x219   : > { %v9797_v58 = vadd.f32 %v7009_v26, %v3865_v32  ;;  %v3863_v42 = vadd.f32 %v3784_v18, %v9690_v63  ;;  %v9802_v14 = vpop.f32.mrf.mxu0 }
 0x21a   : > { %v9800_v33 = vpop.f32.mrf.mxu1  ;;  %10334 = vst [vmem:[#allocation21_spill] sm:$0xff] %v9802_v14 }
 0x21b   : > { %v9804_v38 = vadd.f32 %v4171_v29, %v3863_v42  ;;  %v7017_v2 = vpop.f32.mrf.mxu0 }
 0x21c   : > { %v9806_v1 = vpop.f32.mrf.mxu1 }
 0x21d   : > { %v4203_v60 = vpop.f32.mrf.mxu0 }
 0x21e   : > { %v6965_v49 = vpop.f32.mrf.mxu1 }
 0x21f   : > { %v3869_v43 = vadd.f32 %v6965_v49, %v9699_v34  ;;  %v9809_v25 = vpop.f32.mrf.mxu0 }
 0x220   : > { %v3800_v51 = vpop.f32.mrf.mxu1  ;;  %10335 = vst [vmem:[#allocation5_spill] sm:$0xff] %v9809_v25 }
 0x221   : > { %v9811_v26 = vadd.f32 %v7013_v45, %v3869_v43  ;;  %v3867_v63 = vadd.f32 %v3800_v51, %v9702_v35  ;;  %v9816_v18 = vpop.f32.mrf.mxu0 }
 0x222   : > { %v9814_v32 = vpop.f32.mrf.mxu1  ;;  %10337 = vst [vmem:[#allocation13_spill] sm:$0xff] %v9816_v18 }
 0x223   : > { %10336 = vst [vmem:[#allocation10_spill] sm:$0xff] %v9811_v26  ;;  %v9818_v29 = vadd.f32 %v4187_v5, %v3867_v63  ;;  %v7021_v14 = vpop.f32.mrf.mxu0 }
 0x224   : > { %v9820_v42 = vpop.f32.mrf.mxu1 }
 0x225   : > { %10338 = vst [vmem:[#allocation15_spill] sm:$0xff] %v9818_v29  ;;  %v4219_v31 = vpop.f32.mrf.mxu0 }
 0x226   : > { %v6969_v39 = vpop.f32.mrf.mxu1 }
 0x227   : > { %v3873_v34 = vadd.f32 %v6969_v39, %v9711_v53  ;;  %v9823_v24 = vpop.f32.mrf.mxu0 }
 0x228   : > { %v3816_v49 = vpop.f32.mrf.mxu1  ;;  %10339 = vst [vmem:[#allocation16_spill] sm:$0xff] %v9823_v24 }
 0x229   : > { %v9825_v45 = vadd.f32 %v7017_v2, %v3873_v34  ;;  %v3871_v35 = vadd.f32 %v3816_v49, %v9714_v12  ;;  %v9830_v51 = vpop.f32.mrf.mxu0 }
 0x22a   : > { %v9828_v43 = vpop.f32.mrf.mxu1  ;;  %10341 = vst [vmem:[#allocation17_spill] sm:$0xff] %v9830_v51  ;;  %v3850_v51 = vadd.f32 %v9744_v52, %v9645_v9 }
 0x22b   : > { %10340 = vst [vmem:[#allocation18_spill] sm:$0xff] %v9825_v45  ;;  %v9832_v5 = vadd.f32 %v4203_v60, %v3871_v35  ;;  %v7089_v18 = vpop.f32.mrf.mxu0 }
 0x22c   : > { %v9834_v63 = vpop.f32.mrf.mxu1 }
 0x22d   : > { %10342 = vst [vmem:[#allocation8_spill] sm:$0xff] %v9832_v5  ;;  %v5359_v29 = vpop.f32.mrf.mxu0 }
 0x22e   : > { %v6973_v25 = vpop.f32.mrf.mxu1 }
 0x22f   : > { %v3877_v53 = vadd.f32 %v6973_v25, %v9725_v44  ;;  %v7090_v26 = vpop.f32.mrf.mxu0  ;;  %v3848_v25 = vadd.f32 %v9750_v3, %v9648_v46 }
 0x230   : > { %v3832_v39 = vpop.f32.mrf.mxu1 }
 0x231   : > { %v9837_v24 = vadd.f32 %v7021_v14, %v3877_v53  ;;  %v3875_v2 = vadd.f32 %v3832_v39, %v9730_v40  ;;  %v5362_v34 = vpop.f32.mrf.mxu0  ;;  %v4237_v40 = vadd.f32 %v9723_v11, %v3850_v51 }
 0x232   : > { %v9840_v12 = vpop.f32.mrf.mxu1 }
 0x233   : > { %10343 = vst [vmem:[#allocation9_spill] sm:$0xff] %v9837_v24  ;;  %10344 = vst [vmem:[#allocation20_spill] sm:$0xff] %v9840_v12  ;;  %v9842_v49 = vadd.f32 %v4219_v31, %v3875_v2  ;;  %v7093_v35 = vpop.f32.mrf.mxu0  ;;  %v4235_v2 = vadd.f32 %v9728_v30, %v3848_v25 }
 0x234   : > { %v9844_v60 = vpop.f32.mrf.mxu1 }
 0x235   : > { %10345 = vst [vmem:[#allocation22_spill] sm:$0xff] %v9842_v49  ;;  %10346 = vst [vmem:[#allocation23_spill] sm:$0xff] %v9844_v60  ;;  %v5375_v45 = vpop.f32.mrf.mxu0  ;;  %v3854_v60 = vadd.f32 %v9758_v37, %v9657_v6 }
 0x236   : > { %v7041_v5 = vpop.f32.mrf.mxu1 }
 0x237   : > { %v7094_v14 = vpop.f32.mrf.mxu0  ;;  %v4990_v53 = vadd.f32 %v7041_v5, %v9741_v21  ;;  %v3852_v21 = vadd.f32 %v9764_v16, %v9660_v28  ;;  %v4241_v51 = vadd.f32 %v9739_v23, %v3854_v60  ;;  %v3858_v23 = vadd.f32 %v9772_v13, %v9669_v15 }
 0x238   : > { %v4861_v44 = vpop.f32.mrf.mxu1 }
 0x239   : > { %v5378_v39 = vpop.f32.mrf.mxu0  ;;  %v4988_v49 = vadd.f32 %v4861_v44, %v9748_v55  ;;  %v9856_v46 = vadd.f32 %v7089_v18, %v4990_v53 }
 0x23a   : > { %v7042_v31 = vpop.f32.mrf.mxu1 }
 0x23b   : > { %v4991_v24 = vadd.f32 %v7042_v31, %v4237_v40  ;;  %v7097_v52 = vpop.f32.mrf.mxu0  ;;  %v9869_v55 = vadd.f32 %v5359_v29, %v4988_v49 }
 0x23c   : > { %v4864_v9 = vpop.f32.mrf.mxu1 }
 0x23d   : > { %v9858_v3 = vadd.f32 %v7090_v26, %v4991_v24  ;;  %v4989_v12 = vadd.f32 %v4864_v9, %v4235_v2  ;;  %v5391_v30 = vpop.f32.mrf.mxu0  ;;  %v3856_v9 = vadd.f32 %v9778_v62, %v9672_v57 }
 0x23e   : > { %v7045_v11 = vpop.f32.mrf.mxu1 }
 0x23f   : > { %v6384_v6 = vpack.c.bf16 %v9858_v3, %v9856_v46  ;;  %v9873_v24 = vadd.f32 %v5362_v34, %v4989_v12  ;;  %v4994_v37 = vadd.f32 %v7045_v11, %v9755_v36  ;;  %v7098_v18 = vpop.f32.mrf.mxu0  ;;  %v4239_v12 = vadd.f32 %v9746_v19, %v3852_v21 }
 0x240   : > { %v4877_v26 = vpop.f32.mrf.mxu1 }
 0x241   : > { %6456 = vst [vmem:[%s9865_s25 + $0x8] sm:$0xff] %v6384_v6   ;;  %v6379_v5 = vpack.c.bf16 %v9873_v24, %v9869_v55  ;;  %v5678_v28 = vadd.f32 %v9873_v24, %v9869_v55  ;;  %v4992_v16 = vadd.f32 %v4877_v26, %v9762_v8  ;;  %v5394_v49 = vpop.f32.mrf.mxu0  ;;  %v9888_v60 = vadd.f32 %v7093_v35, %v4994_v37 }
 0x242   : > { %v7046_v29 = vpop.f32.mrf.mxu1 }
 0x243   : > { %6380 = vst [vmem:[%s9865_s25] sm:$0xff] %v6379_v5   ;;  %v5679_v36 = vadd.f32 %v5678_v28, %v9856_v46  ;;  %v4995_v34 = vadd.f32 %v7046_v29, %v4241_v51  ;;  %v9890_v40 = vadd.f32 %v5375_v45, %v4992_v16  ;;  %v4243_v51 = vadd.f32 %v9760_v17, %v3856_v9 }
 0x244   : > { %v4880_v25 = vpop.f32.mrf.mxu1  ;;  %v7101_v44 = vpop.f32.mrf.mxu0  ;;  %v3862_v5 = vadd.f32 %v9786_v7, %v9681_v4 }
 0x245   : > { %v5680_v8 = vadd.f32 %v5679_v36, %v9858_v3  ;;  %v9893_v53 = vadd.f32 %v7094_v14, %v4995_v34  ;;  %v4993_v31 = vadd.f32 %v4880_v25, %v4239_v12  ;;  %v4245_v14 = vadd.f32 %v9753_v0, %v3858_v23 }
 0x246   : > { %v7049_v19 = vpop.f32.mrf.mxu1  ;;  %v5407_v2 = vpop.f32.mrf.mxu0  ;;  %v3860_v23 = vadd.f32 %v9792_v61, %v9684_v22 }
 0x247   : > { %v5681_v15 = vadd.f32 %v5680_v8, %v9890_v40  ;;  %v6394_v13 = vpack.c.bf16 %v9893_v53, %v9888_v60  ;;  %v9900_v35 = vadd.f32 %v5378_v39, %v4993_v31  ;;  %v4998_v45 = vadd.f32 %v7049_v19, %v9769_v59 }
 0x248   : > { %v4893_v11 = vpop.f32.mrf.mxu1  ;;  %v7102_v21 = vpop.f32.mrf.mxu0 }
 0x249   : > { %6458 = vst [vmem:[%s9865_s25 + $0x18] sm:$0xff] %v6394_v13   ;;  %v6389_v6 = vpack.c.bf16 %v9900_v35, %v9890_v40  ;;  %v5682_v37 = vadd.f32 %v5681_v15, %v9900_v35  ;;  %v4996_v57 = vadd.f32 %v4893_v11, %v9776_v50  ;;  %v9914_v0 = vadd.f32 %v7097_v52, %v4998_v45 }
 0x24a   : > { %v7050_v62 = vpop.f32.mrf.mxu1  ;;  %v5410_v26 = vpop.f32.mrf.mxu0  ;;  %v4247_v15 = vadd.f32 %v9774_v27, %v3860_v23  ;;  %v3866_v13 = vadd.f32 %v9800_v33, %v9693_v41 }
 0x24b   : > { %6457 = vst [vmem:[%s9865_s25 + $0x10] sm:$0xff] %v6389_v6   ;;  %v5683_v39 = vadd.f32 %v5682_v37, %v9888_v60  ;;  %v4999_v59 = vadd.f32 %v7050_v62, %v4245_v14  ;;  %v9916_v29 = vadd.f32 %v5391_v30, %v4996_v57  ;;  %v3864_v62 = vadd.f32 %v9806_v1, %v9696_v20 }
 0x24c   : > { %v4896_v28 = vpop.f32.mrf.mxu1  ;;  %v7105_v16 = vpop.f32.mrf.mxu0 }
 0x24d   : > { %v5684_v50 = vadd.f32 %v5683_v39, %v9893_v53  ;;  %v9919_v12 = vadd.f32 %v7098_v18, %v4999_v59  ;;  %v4997_v36 = vadd.f32 %v4896_v28, %v4243_v51  ;;  %v4249_v18 = vadd.f32 %v9767_v47, %v3862_v5 }
 0x24e   : > { %v7053_v17 = vpop.f32.mrf.mxu1  ;;  %v5423_v34 = vpop.f32.mrf.mxu0 }
 0x24f   : > { %v5685_v4 = vadd.f32 %v5684_v50, %v9916_v29  ;;  %v6404_v7 = vpack.c.bf16 %v9919_v12, %v9914_v0  ;;  %v9926_v52 = vadd.f32 %v5394_v49, %v4997_v36  ;;  %v5002_v30 = vadd.f32 %v7053_v17, %v9783_v54  ;;  %v10347_v36 = vld [vmem:[#allocation3_spill] sm:$0xff] }
 0x250   : > { %v4909_v25 = vpop.f32.mrf.mxu1  ;;  %v7106_v8 = vpop.f32.mrf.mxu0  ;;  %v4251_v50 = vadd.f32 %v9788_v56, %v3864_v62  ;;  %v3870_v17 = vadd.f32 %v9814_v32, %v10347_v36 }
 0x251   : > { %6460 = vst [vmem:[%s9865_s25 + $0x28] sm:$0xff] %v6404_v7   ;;  %v6399_v31 = vpack.c.bf16 %v9926_v52, %v9916_v29  ;;  %v5686_v19 = vadd.f32 %v5685_v4, %v9926_v52  ;;  %v5000_v22 = vadd.f32 %v4909_v25, %v9790_v10  ;;  %v9940_v47 = vadd.f32 %v7101_v44, %v5002_v30 }
 0x252   : > { %v7054_v61 = vpop.f32.mrf.mxu1  ;;  %v5426_v9 = vpop.f32.mrf.mxu0 }
 0x253   : > { %6459 = vst [vmem:[%s9865_s25 + $0x20] sm:$0xff] %v6399_v31   ;;  %v5687_v49 = vadd.f32 %v5686_v19, %v9914_v0  ;;  %v5003_v54 = vadd.f32 %v7054_v61, %v4249_v18  ;;  %v9942_v14 = vadd.f32 %v5407_v2, %v5000_v22  ;;  %v10348_v31 = vld [vmem:[#allocation11_spill] sm:$0xff] }
 0x254   : > { %v4912_v45 = vpop.f32.mrf.mxu1  ;;  %v7109_v11 = vpop.f32.mrf.mxu0  ;;  %v3868_v19 = vadd.f32 %v9820_v42, %v10348_v31 }
 0x255   : > { %v5688_v10 = vadd.f32 %v5687_v49, %v9919_v12  ;;  %v9945_v6 = vadd.f32 %v7102_v21, %v5003_v54  ;;  %v5001_v37 = vadd.f32 %v4912_v45, %v4247_v15  ;;  %v4253_v21 = vadd.f32 %v9781_v48, %v3866_v13  ;;  %v10350_v49 = vld [vmem:[#allocation19_spill] sm:$0xff] }
 0x256   : > { %v7057_v27 = vpop.f32.mrf.mxu1  ;;  %v5439_v57 = vpop.f32.mrf.mxu0  ;;  %v10351_v45 = vld [vmem:[#allocation15_spill] sm:$0xff] }
 0x257   : > { %v5689_v41 = vadd.f32 %v5688_v10, %v9942_v14  ;;  %v6414_v33 = vpack.c.bf16 %v9945_v6, %v9940_v47  ;;  %v9952_v44 = vadd.f32 %v5410_v26, %v5001_v37  ;;  %v5006_v2 = vadd.f32 %v7057_v27, %v9797_v58  ;;  %v10352_v27 = vld [vmem:[#allocation21_spill] sm:$0xff] }
 0x258   : > { %v4925_v51 = vpop.f32.mrf.mxu1  ;;  %v7110_v39 = vpop.f32.mrf.mxu0  ;;  %v4255_v62 = vadd.f32 %v10352_v27, %v3868_v19  ;;  %v10357_v19 = vld [vmem:[#allocation8_spill] sm:$0xff] }
 0x259   : > { %6462 = vst [vmem:[%s9865_s25 + $0x38] sm:$0xff] %v6414_v33   ;;  %v6409_v59 = vpack.c.bf16 %v9952_v44, %v9942_v14  ;;  %v5690_v5 = vadd.f32 %v5689_v41, %v9952_v44  ;;  %v5004_v20 = vadd.f32 %v4925_v51, %v9804_v38  ;;  %v9966_v48 = vadd.f32 %v7105_v16, %v5006_v2  ;;  %v10353_v33 = vld [vmem:[#allocation7_spill] sm:$0xff] }
 0x25a   : > { %v7058_v1 = vpop.f32.mrf.mxu1  ;;  %v5442_v28 = vpop.f32.mrf.mxu0  ;;  %v3874_v2 = vadd.f32 %v9828_v43, %v10353_v33  ;;  %v10361_v33 = vld [vmem:[#allocation6_spill] sm:$0xff] }
 0x25b   : > { %6461 = vst [vmem:[%s9865_s25 + $0x30] sm:$0xff] %v6409_v59   ;;  %v5691_v26 = vadd.f32 %v5690_v5, %v9940_v47  ;;  %v5007_v58 = vadd.f32 %v7058_v1, %v4253_v21  ;;  %v9968_v7 = vadd.f32 %v5423_v34, %v5004_v20  ;;  %v10349_v34 = vld [vmem:[#allocation10_spill] sm:$0xff] }
 0x25c   : > { %v4928_v23 = vpop.f32.mrf.mxu1  ;;  %v7113_v4 = vpop.f32.mrf.mxu0 }
 0x25d   : > { %v5692_v38 = vadd.f32 %v5691_v26, %v9945_v6  ;;  %v9971_v30 = vadd.f32 %v7106_v8, %v5007_v58  ;;  %v5005_v25 = vadd.f32 %v4928_v23, %v4251_v50  ;;  %v4257_v8 = vadd.f32 %v10350_v49, %v3870_v17  ;;  %v10354_v58 = vld [vmem:[#allocation12_spill] sm:$0xff]  ;;  %v10359_v49 = vld [vmem:[#allocation14_spill] sm:$0xff] }
 0x25e   : > { %v7061_v56 = vpop.f32.mrf.mxu1  ;;  %v5455_v18 = vpop.f32.mrf.mxu0  ;;  %v3872_v36 = vadd.f32 %v9834_v63, %v10354_v58 }
 0x25f   : > { %v5693_v32 = vadd.f32 %v5692_v38, %v9968_v7  ;;  %v6424_v16 = vpack.c.bf16 %v9971_v30, %v9966_v48  ;;  %v9978_v22 = vadd.f32 %v5426_v9, %v5005_v25  ;;  %v5010_v61 = vadd.f32 %v7061_v56, %v10349_v34  ;;  %v10356_v25 = vld [vmem:[#allocation5_spill] sm:$0xff] }
 0x260   : > { %v4941_v15 = vpop.f32.mrf.mxu1  ;;  %v7114_v37 = vpop.f32.mrf.mxu0  ;;  %v10358_v34 = vld [vmem:[#allocation13_spill] sm:$0xff] }
 0x261   : > { %6464 = vst [vmem:[%s9865_s25 + $0x48] sm:$0xff] %v6424_v16   ;;  %v6419_v54 = vpack.c.bf16 %v9978_v22, %v9968_v7  ;;  %v5694_v13 = vadd.f32 %v5693_v32, %v9978_v22  ;;  %v5008_v42 = vadd.f32 %v4941_v15, %v10351_v45  ;;  %v9992_v51 = vadd.f32 %v7109_v11, %v5010_v61 }
 0x262   : > { %v7062_v10 = vpop.f32.mrf.mxu1  ;;  %v5458_v26 = vpop.f32.mrf.mxu0  ;;  %v4259_v61 = vadd.f32 %v10358_v34, %v3872_v36  ;;  %v10364_v36 = vld [vmem:[#allocation16_spill] sm:$0xff] }
 0x263   : > { %6463 = vst [vmem:[%s9865_s25 + $0x40] sm:$0xff] %v6419_v54   ;;  %v5695_v9 = vadd.f32 %v5694_v13, %v9966_v48  ;;  %v5011_v41 = vadd.f32 %v7062_v10, %v4257_v8  ;;  %v9994_v59 = vadd.f32 %v5439_v57, %v5008_v42  ;;  %v10355_v57 = vld [vmem:[#allocation18_spill] sm:$0xff]  ;;  %v10360_v8 = vld [vmem:[#allocation20_spill] sm:$0xff] }
 0x264   : > { %v4944_v21 = vpop.f32.mrf.mxu1  ;;  %v7117_v16 = vpop.f32.mrf.mxu0  ;;  %v3878_v54 = vadd.f32 %v10360_v8, %v10359_v49 }
 0x265   : > { %v5696_v5 = vadd.f32 %v5695_v9, %v9971_v30  ;;  %v9997_v20 = vadd.f32 %v7110_v39, %v5011_v41  ;;  %v5009_v1 = vadd.f32 %v4944_v21, %v4255_v62  ;;  %v4261_v39 = vadd.f32 %v10356_v25, %v3874_v2  ;;  %v10362_v2 = vld [vmem:[#allocation23_spill] sm:$0xff] }
 0x266   : > { %v7065_v50 = vpop.f32.mrf.mxu1  ;;  %v5471_v41 = vpop.f32.mrf.mxu0  ;;  %v3876_v21 = vadd.f32 %v10362_v2, %v10361_v33 }
 0x267   : > { %v5697_v17 = vadd.f32 %v5696_v5, %v9994_v59  ;;  %v6434_v43 = vpack.c.bf16 %v9997_v20, %v9992_v51  ;;  %v10004_v11 = vadd.f32 %v5442_v28, %v5009_v1  ;;  %v5014_v23 = vadd.f32 %v7065_v50, %v10355_v57  ;;  %v10365_v57 = vld [vmem:[#allocation22_spill] sm:$0xff] }
 0x268   : > { %v4957_v38 = vpop.f32.mrf.mxu1  ;;  %v7118_v25 = vpop.f32.mrf.mxu0 }
 0x269   : > { %6466 = vst [vmem:[%s9865_s25 + $0x58] sm:$0xff] %v6434_v43   ;;  %v6429_v56 = vpack.c.bf16 %v10004_v11, %v9994_v59  ;;  %v5698_v31 = vadd.f32 %v5697_v17, %v10004_v11  ;;  %v5012_v63 = vadd.f32 %v4957_v38, %v10357_v19  ;;  %v10018_v13 = vadd.f32 %v7113_v4, %v5014_v23 }
 0x26a   : > { %v7066_v32 = vpop.f32.mrf.mxu1 }
 0x26b   : > { %6465 = vst [vmem:[%s9865_s25 + $0x50] sm:$0xff] %v6429_v56   ;;  %v5699_v28 = vadd.f32 %v5698_v31, %v9992_v51  ;;  %v5015_v15 = vadd.f32 %v7066_v32, %v4261_v39  ;;  %v10020_v42 = vadd.f32 %v5455_v18, %v5012_v63  ;;  %v10363_v18 = vld [vmem:[#allocation9_spill] sm:$0xff] }
 0x26c   : > { %v4960_v45 = vpop.f32.mrf.mxu1  ;;  %v10366_v39 = vld [vmem:[#allocation17_spill] sm:$0xff] }
 0x26d   : > { %v5700_v10 = vadd.f32 %v5699_v28, %v9997_v20  ;;  %v10023_v27 = vadd.f32 %v7114_v37, %v5015_v15  ;;  %v5013_v62 = vadd.f32 %v4960_v45, %v4259_v61  ;;  %v4265_v37 = vadd.f32 %v10364_v36, %v3878_v54  ;;  %v5474_v15 = vpop.f32.mrf.mxu0 }
 0x26e   : > { %v7069_v9 = vpop.f32.mrf.mxu1  ;;  %v4263_v56 = vadd.f32 %v10366_v39, %v3876_v21 }
 0x26f   : > { %v5701_v5 = vadd.f32 %v5700_v10, %v10020_v42  ;;  %v6444_v4 = vpack.c.bf16 %v10023_v27, %v10018_v13  ;;  %v10030_v1 = vadd.f32 %v5458_v26, %v5013_v62  ;;  %v5018_v50 = vadd.f32 %v7069_v9, %v10363_v18 }
 0x270   : > { %v4973_v58 = vpop.f32.mrf.mxu1 }
 0x271   : > { %6468 = vst [vmem:[%s9865_s25 + $0x68] sm:$0xff] %v6444_v4   ;;  %v6439_v17 = vpack.c.bf16 %v10030_v1, %v10020_v42  ;;  %v5702_v43 = vadd.f32 %v5701_v5, %v10030_v1  ;;  %v5016_v23 = vadd.f32 %v4973_v58, %v10365_v57  ;;  %v10042_v19 = vadd.f32 %v7117_v16, %v5018_v50 }
 0x272   : > { %v7070_v38 = vpop.f32.mrf.mxu1 }
 0x273   : > { %6467 = vst [vmem:[%s9865_s25 + $0x60] sm:$0xff] %v6439_v17   ;;  %v5703_v26 = vadd.f32 %v5702_v43, %v10018_v13  ;;  %v5019_v31 = vadd.f32 %v7070_v38, %v4265_v37  ;;  %v10044_v32 = vadd.f32 %v5471_v41, %v5016_v23 }
 0x274   : > { %v4976_v63 = vpop.f32.mrf.mxu1 }
 0x275   : > { %v5704_v34 = vadd.f32 %v5703_v26, %v10023_v27  ;;  %v10047_v61 = vadd.f32 %v7118_v25, %v5019_v31  ;;  %v5017_v28 = vadd.f32 %v4976_v63, %v4263_v56 }
 0x277   : > { %v5705_v49 = vadd.f32 %v5704_v34, %v10044_v32  ;;  %v6454_v8 = vpack.c.bf16 %v10047_v61, %v10042_v19  ;;  %v10052_v54 = vadd.f32 %v5474_v15, %v5017_v28 }
 0x279   : > { %6470 = vst [vmem:[%s9865_s25 + $0x78] sm:$0xff] %v6454_v8   ;;  %v6449_v16 = vpack.c.bf16 %v10052_v54, %v10044_v32  ;;  %v5706_v45 = vadd.f32 %v5705_v49, %v10052_v54 }
 0x27b   : > { %6469 = vst [vmem:[%s9865_s25 + $0x70] sm:$0xff] %v6449_v16   ;;  %v5707_v10 = vadd.f32 %v5706_v45, %v10042_v19 }
 0x27d   : > { %v5708_v62 = vadd.f32 %v5707_v10, %v10047_v61 }
 0x27f   : > { %v5709_v9 = vrot.slane %v5708_v62, 4 }
 0x281   : > { %v5710_v41 = vadd.f32 %v5709_v9, %v5708_v62 }
 0x283   : > { %v5711_v33 = vrot.slane %v5710_v41, 2 }
 0x285   : > { %v5712_v2 = vadd.f32 %v5711_v33, %v5710_v41 }
 0x287   : > { %v5713_v21 = vrot.slane %v5712_v2, 1 }
 0x289   : > { %v10061_v5 = vadd.f32 %v5713_v21, %v5712_v2 }
 0x28b   : > { %v10064_v4 = vmul.f32 0.00390625, %v10061_v5 }
 0x28d   : > { %v5716_v18 = vsub.f32 %v9869_v55, %v10064_v4  ;;  %v5717_v50 = vsub.f32 %v9873_v24, %v10064_v4  ;;  %v5718_v58 = vsub.f32 %v9856_v46, %v10064_v4  ;;  %v5719_v17 = vsub.f32 %v9858_v3, %v10064_v4 }
 0x28e   : > { %v5720_v43 = vsub.f32 %v9890_v40, %v10064_v4  ;;  %v5721_v38 = vsub.f32 %v9900_v35, %v10064_v4  ;;  %v5722_v24 = vsub.f32 %v9888_v60, %v10064_v4  ;;  %v5723_v56 = vsub.f32 %v9893_v53, %v10064_v4 }
 0x28f   : > { %v5748_v36 = vmul.f32 %v5716_v18, %v5716_v18  ;;  %v5749_v37 = vmul.f32 %v5717_v50, %v5717_v50  ;;  %v5750_v57 = vmul.f32 %v5718_v58, %v5718_v58  ;;  %v5751_v55 = vmul.f32 %v5719_v17, %v5719_v17 }
 0x290   : > { %v5752_v39 = vmul.f32 %v5720_v43, %v5720_v43  ;;  %v5753_v26 = vmul.f32 %v5721_v38, %v5721_v38  ;;  %v5724_v40 = vsub.f32 %v9916_v29, %v10064_v4  ;;  %v5754_v31 = vmul.f32 %v5722_v24, %v5722_v24 }
 0x291   : > { %v5780_v23 = vadd.f32 %v5749_v37, %v5748_v36  ;;  %v5725_v35 = vsub.f32 %v9926_v52, %v10064_v4  ;;  %v5755_v34 = vmul.f32 %v5723_v56, %v5723_v56  ;;  %v5726_v60 = vsub.f32 %v9914_v0, %v10064_v4 }
 0x292   : > { %v5756_v15 = vmul.f32 %v5724_v40, %v5724_v40  ;;  %v5727_v53 = vsub.f32 %v9919_v12, %v10064_v4  ;;  %v5728_v29 = vsub.f32 %v9942_v14, %v10064_v4  ;;  %v5729_v52 = vsub.f32 %v9952_v44, %v10064_v4 }
 0x293   : > { %v5781_v25 = vadd.f32 %v5780_v23, %v5750_v57  ;;  %v5757_v8 = vmul.f32 %v5725_v35, %v5725_v35  ;;  %v5758_v45 = vmul.f32 %v5726_v60, %v5726_v60  ;;  %v5730_v0 = vsub.f32 %v9940_v47, %v10064_v4 }
 0x294   : > { %v5759_v62 = vmul.f32 %v5727_v53, %v5727_v53  ;;  %v5760_v41 = vmul.f32 %v5728_v29, %v5728_v29  ;;  %v5731_v12 = vsub.f32 %v9945_v6, %v10064_v4  ;;  %v5761_v2 = vmul.f32 %v5729_v52, %v5729_v52 }
 0x295   : > { %v5782_v46 = vadd.f32 %v5781_v25, %v5751_v55  ;;  %v5732_v14 = vsub.f32 %v9968_v7, %v10064_v4  ;;  %v5762_v18 = vmul.f32 %v5730_v0, %v5730_v0  ;;  %v5733_v44 = vsub.f32 %v9978_v22, %v10064_v4 }
 0x296   : > { %v5763_v58 = vmul.f32 %v5731_v12, %v5731_v12  ;;  %v5734_v47 = vsub.f32 %v9966_v48, %v10064_v4  ;;  %v5735_v6 = vsub.f32 %v9971_v30, %v10064_v4  ;;  %v5736_v7 = vsub.f32 %v9994_v59, %v10064_v4 }
 0x297   : > { %v5783_v3 = vadd.f32 %v5782_v46, %v5752_v39  ;;  %v5764_v37 = vmul.f32 %v5732_v14, %v5732_v14  ;;  %v5765_v43 = vmul.f32 %v5733_v44, %v5733_v44  ;;  %v5737_v22 = vsub.f32 %v10004_v11, %v10064_v4 }
 0x298   : > { %v5766_v23 = vmul.f32 %v5734_v47, %v5734_v47  ;;  %v5767_v55 = vmul.f32 %v5735_v6, %v5735_v6  ;;  %v5738_v48 = vsub.f32 %v9992_v51, %v10064_v4  ;;  %v5768_v24 = vmul.f32 %v5736_v7, %v5736_v7 }
 0x299   : > { %v5784_v63 = vadd.f32 %v5783_v3, %v5753_v26  ;;  %v5739_v30 = vsub.f32 %v9997_v20, %v10064_v4  ;;  %v5769_v46 = vmul.f32 %v5737_v22, %v5737_v22  ;;  %v5740_v59 = vsub.f32 %v10020_v42, %v10064_v4 }
 0x29a   : > { %v5770_v26 = vmul.f32 %v5738_v48, %v5738_v48  ;;  %v5741_v11 = vsub.f32 %v10030_v1, %v10064_v4  ;;  %v5742_v51 = vsub.f32 %v10018_v13, %v10064_v4  ;;  %v5743_v20 = vsub.f32 %v10023_v27, %v10064_v4 }
 0x29b   : > { %v5785_v28 = vadd.f32 %v5784_v63, %v5754_v31  ;;  %v5771_v40 = vmul.f32 %v5739_v30, %v5739_v30  ;;  %v5772_v63 = vmul.f32 %v5740_v59, %v5740_v59  ;;  %v5744_v42 = vsub.f32 %v10044_v32, %v10064_v4 }
 0x29c   : > { %v5774_v60 = vmul.f32 %v5742_v51, %v5742_v51  ;;  %v5745_v1 = vsub.f32 %v10052_v54, %v10064_v4  ;;  %v5746_v13 = vsub.f32 %v10042_v19, %v10064_v4  ;;  %v5747_v27 = vsub.f32 %v10047_v61, %v10064_v4 }
 0x29d   : > { %v5786_v49 = vadd.f32 %v5785_v28, %v5755_v34  ;;  %v5773_v34 = vmul.f32 %v5741_v11, %v5741_v11 }
 0x29e   : > { %v5777_v29 = vmul.f32 %v5745_v1, %v5745_v1  ;;  %v5779_v52 = vmul.f32 %v5747_v27, %v5747_v27 }
 0x29f   : > { %v5787_v16 = vadd.f32 %v5786_v49, %v5756_v15  ;;  %v5775_v49 = vmul.f32 %v5743_v20, %v5743_v20 }
 0x2a1   : > { %v5788_v10 = vadd.f32 %v5787_v16, %v5757_v8  ;;  %v5776_v8 = vmul.f32 %v5744_v42, %v5744_v42 }
 0x2a3   : > { %v5789_v9 = vadd.f32 %v5788_v10, %v5758_v45  ;;  %v5778_v10 = vmul.f32 %v5746_v13, %v5746_v13 }
 0x2a5   : > { %v5790_v33 = vadd.f32 %v5789_v9, %v5759_v62 }
 0x2a7   : > { %v5791_v21 = vadd.f32 %v5790_v33, %v5760_v41 }
 0x2a9   : > { %v5792_v50 = vadd.f32 %v5791_v21, %v5761_v2 }
 0x2ab   : > { %v5793_v36 = vadd.f32 %v5792_v50, %v5762_v18 }
 0x2ad   : > { %v5794_v17 = vadd.f32 %v5793_v36, %v5763_v58 }
 0x2af   : > { %v5795_v57 = vadd.f32 %v5794_v17, %v5764_v37 }
 0x2b1   : > { %v5796_v38 = vadd.f32 %v5795_v57, %v5765_v43 }
 0x2b3   : > { %v5797_v25 = vadd.f32 %v5796_v38, %v5766_v23 }
 0x2b5   : > { %v5798_v39 = vadd.f32 %v5797_v25, %v5767_v55 }
 0x2b7   : > { %v5799_v56 = vadd.f32 %v5798_v39, %v5768_v24 }
 0x2b9   : > { %v5800_v3 = vadd.f32 %v5799_v56, %v5769_v46 }
 0x2bb   : > { %v5801_v31 = vadd.f32 %v5800_v3, %v5770_v26 }
 0x2bd   : > { %v5802_v35 = vadd.f32 %v5801_v31, %v5771_v40 }
 0x2bf   : > { %v5803_v28 = vadd.f32 %v5802_v35, %v5772_v63 }
 0x2c1   : > { %v5804_v15 = vadd.f32 %v5803_v28, %v5773_v34 }
 0x2c3   : > { %v5805_v53 = vadd.f32 %v5804_v15, %v5774_v60 }
 0x2c5   : > { %v5806_v16 = vadd.f32 %v5805_v53, %v5775_v49 }
 0x2c7   : > { %v5807_v45 = vadd.f32 %v5806_v16, %v5776_v8 }
 0x2c9   : > { %v5808_v32 = vadd.f32 %v5807_v45, %v5777_v29 }
 0x2cb   : > { %v5809_v62 = vadd.f32 %v5808_v32, %v5778_v10 }
 0x2cd   : > { %v5810_v9 = vadd.f32 %v5809_v62, %v5779_v52 }
 0x2cf   : > { %v5811_v0 = vrot.slane %v5810_v9, 4 }
 0x2d1   : > { %v5812_v54 = vadd.f32 %v5811_v0, %v5810_v9 }
 0x2d3   : > { %v5813_v41 = vrot.slane %v5812_v54, 2 }
 0x2d5   : > { %v5814_v33 = vadd.f32 %v5813_v41, %v5812_v54 }
 0x2d7   : > { %v5815_v12 = vrot.slane %v5814_v33, 1 }
 0x2d9   : > { %v5816_v19 = vadd.f32 %v5815_v12, %v5814_v33 }
 0x2db   : > { %v5818_v61 = vsel %vm600_vm2, %v10061_v5, %v5816_v19 }
 0x2dc   : > { %5819 = vst [vmem:[%s181_s26] sm:$0x3] %v5818_v61 }
 0x2dd PF: > { %s14_s12 = sadd.s32 1, %s7299_s12  }
 0x2de   : > { %p11_p4 = scmp.ge.s32.totalorder %s14_s12, 4  }
 0x2e0   :  { %13 = sbr.rel (!%p11_p4) target bundleno = 1 (0x1), region = 80 }

// kernel: basic_block_forward.4
= control target key start
LH: loop header
LB: loop body
LE: loop exit
PB: predicated region body
PF: predicated region fallthrough
CT: control target
= control target key end

     0   :  { %s7769_s18 = smov 0   ;;  %s10544_s0 = inlined_call_operand.vmem [shape: bf16[2,16,16,128], index: 0, kind: input, shape index: {}]   ;;  %s10545_s1 = inlined_call_operand.vmem [shape: bf16[9,128,128], index: 1, kind: input, shape index: {}]   ;;  %s10546_s2 = inlined_call_operand.vmem [shape: f32[1,128], index: 2, kind: input, shape index: {}]   ;;  %s10547_s3 = inlined_call_operand.vmem [shape: f32[1,128], index: 3, kind: input, shape index: {}]   ;;  %s10548_s4 = inlined_call_operand.vmem [shape: bf16[2,16,16,128], index: 4, kind: output, shape index: {0}]   ;;  %s10549_s5 = inlined_call_operand.vmem [shape: f32[2,2,128], index: 5, kind: output, shape index: {1}]  }
   0x1 LB: > { %s6198_s19 = sadd.s32 4294967295, %s7736_s18   ;;  %p6202_p0 = scmp.ge.s32.totalorder %s7736_s18, 1  ;;  %s7736_s18 = sphi %s7769_s18, %s16_s18  }
   0x2   : > { %p190_p1 = scmp.lt.s32.totalorder %s7736_s18, 3 }
   0x4   : > { %p191_p2 = pnand %p6202_p0, %p190_p1 }
   0x6   : > { %194 = sbr.rel (%p191_p2) target bundleno = 765 (0x2fd), region = 36 }
   0xb   : > { %v7581_v0 = vld [vmem:[%s10545_s1 + $0x78] sm:$0xff]   ;;  %v7783_v1 = vld [vmem:[%s10545_s1 + $0x70] sm:$0xff]   ;;  %v7738_v2 = vmov 0   ;;  %p222_p3 = scmp.lt.s32.totalorder %s6198_s19, 1  ;;  %v7583_v3 = vld [vmem:[%s10545_s1 + $0x68] sm:$0xff]   ;;  %vm885_vm2 = vcmask 1043456  }
   0xc   : > { %237 = vst [vmem:[#allocation2] sm:$0xf] %v7738_v2  ;;  %238 = vst [vmem:[#allocation2 + $0x4] sm:$0xf] %v7738_v2  ;;  %7124 = vmatprep.subr.bf16.mxu0 %v7581_v0  ;;  %7556 = vmatprep.subr.bf16.mxu1 %v7581_v0  ;;  %v7584_v4 = vld [vmem:[%s10545_s1 + $0x60] sm:$0xff]   ;;  %v7585_v20 = vld [vmem:[%s10545_s1 + $0x58] sm:$0xff]  }
   0xd   : > { %239 = vst [vmem:[#allocation2 + $0x8] sm:$0x1] %v7738_v2  ;;  %240 = vst [vmem:[#allocation2 + $0xc] sm:$0xf] %v7738_v2  ;;  %7125 = vmatpush3.bf16.msra.mxu0 %v7581_v0  ;;  %7564 = vmatpush3.bf16.msra.mxu1 %v7581_v0  ;;  %s10769_s19 = smov (!%p222_p3, %s6198_s19), 1  ;;  %vm892_vm5 = vcmask 1040384  }
   0xe   : > { %241 = vst [vmem:[#allocation2 + $0x10] sm:$0xf] %v7738_v2  ;;  %242 = vst [vmem:[#allocation2 + $0x14] sm:$0x1] %v7738_v2  ;;  %7126 = vmatprep.subr.bf16.mxu0 %v7783_v1  ;;  %7557 = vmatprep.subr.bf16.mxu1 %v7783_v1  ;;  %s6668_s26 = sshll.u32 %s10769_s19, 7  ;;  %v7586_v35 = vld [vmem:[%s10545_s1 + $0x50] sm:$0xff]  }
   0xf   : > { %243 = vst [vmem:[#allocation2 + $0x18] sm:$0xf] %v7738_v2  ;;  %244 = vst [vmem:[#allocation2 + $0x1c] sm:$0xf] %v7738_v2  ;;  %s7807_s6 = scalar_lea.vmem %s10544_s0, %s6668_s26  ;;  %vm1066_vm0 = vsmask.f32 3328  ;;  %s10236_s11 = scalar_lea.vmem %s10548_s4, %s6668_s26 }
  0x10   : > { %245 = vst [vmem:[#allocation2 + $0x20] sm:$0x1] %v7738_v2  ;;  %246 = vst [vmem:[#allocation2 + $0x24] sm:$0xf] %v7738_v2  ;;  %vm1067_vm1 = vsmask.f32 7440 }
  0x11   : > { %247 = vst [vmem:[#allocation2 + $0x28] sm:$0xf] %v7738_v2  ;;  %248 = vst [vmem:[#allocation2 + $0x2c] sm:$0x1] %v7738_v2  ;;  %7127 = vmatpush3.bf16.msra.mxu0 %v7783_v1  ;;  %7565 = vmatpush3.bf16.msra.mxu1 %v7783_v1  ;;  %v6735_v13 = vld [vmem:[%s7807_s6] sm:$0xff]   ;;  %v6884_v19 = vld [vmem:[%s7807_s6 + $0x38] sm:$0xff]  }
  0x12   : > { %249 = vst [vmem:[#allocation2 + $0x30] sm:$0xf] %v7738_v2  ;;  %250 = vst [vmem:[#allocation2 + $0x34] sm:$0xf] %v7738_v2  ;;  %7128 = vmatprep.subr.bf16.mxu0 %v7583_v3  ;;  %7558 = vmatprep.subr.bf16.mxu1 %v7583_v3  ;;  %v6736_v16 = vunpack.c.l.bf16 %v6735_v13  ;;  %v6737_v17 = vunpack.c.h.bf16 %v6735_v13  ;;  %v7816_v18 = vld [vmem:[%s10546_s2] ss:$0 sm:$0xff]  ;;  %v6764_v30 = vunpack.c.l.bf16 %v6884_v19  ;;  %v6765_v31 = vunpack.c.h.bf16 %v6884_v19 }
  0x13   : > { %251 = vst [vmem:[#allocation2 + $0x38] sm:$0x1] %v7738_v2  ;;  %252 = vst [vmem:[#allocation2 + $0x3c] sm:$0xf] %v7738_v2  ;;  %v1002_v5 = vld [vmem:[#allocation2] sm:$0xf] }
  0x14   : > { %253 = vst [vmem:[#allocation2 + $0x40] sm:$0xf] %v7738_v2  ;;  %254 = vst [vmem:[#allocation2 + $0x44] sm:$0x1] %v7738_v2  ;;  %v1003_v6 = vld [vmem:[#allocation2 + $0x4] sm:$0xf]  ;;  %v362_v26 = vmul.f32 %v6736_v16, %v7816_v18  ;;  %v363_v27 = vmul.f32 %v6737_v17, %v7816_v18  ;;  %v376_v37 = vmul.f32 %v6764_v30, %v7816_v18 }
  0x15   : > { %255 = vst [vmem:[#allocation2 + $0x48] sm:$0xf] %v7738_v2  ;;  %256 = vst [vmem:[#allocation2 + $0x4c] sm:$0xf] %v7738_v2  ;;  %v7809_v7 = vld [vmem:[#allocation2 + $0x8] sm:$0x1]  ;;  %7129 = vmatpush3.bf16.msra.mxu0 %v7583_v3  ;;  %7566 = vmatpush3.bf16.msra.mxu1 %v7583_v3  ;;  %v377_v38 = vmul.f32 %v6765_v31, %v7816_v18 }
  0x16   : > { %257 = vst [vmem:[#allocation2 + $0x50] sm:$0x1] %v7738_v2  ;;  %258 = vst [vmem:[#allocation2 + $0x54] sm:$0xf] %v7738_v2  ;;  %v1070_v8 = vshrl.u32 %v1002_v5, 16  ;;  %v1073_v9 = vshll.u32 %v1002_v5, 16  ;;  %7130 = vmatprep.subr.bf16.mxu0 %v7584_v4  ;;  %7559 = vmatprep.subr.bf16.mxu1 %v7584_v4 }
  0x17   : > { %259 = vst [vmem:[#allocation2 + $0x58] sm:$0xf] %v7738_v2  ;;  %260 = vst [vmem:[#allocation2 + $0x5c] sm:$0x1] %v7738_v2  ;;  %v1079_v10 = vshll.u32 %v1003_v6, 16  ;;  %v1083_v11 = vshrl.u32 %v1003_v6, 16 }
  0x18   : > { %261 = vst [vmem:[#allocation2 + $0x60] sm:$0xf] %v7738_v2  ;;  %262 = vst [vmem:[#allocation2 + $0x64] sm:$0xf] %v7738_v2  ;;  %v1089_v12 = vshll.u32 %v7809_v7, 16  ;;  %v1072_v14 = vrot.slane %v1070_v8, 4 }
  0x19   : > { %263 = vst [vmem:[#allocation2 + $0x68] sm:$0x1] %v7738_v2  ;;  %264 = vst [vmem:[#allocation2 + $0x6c] sm:$0xf] %v7738_v2  ;;  %v1075_v15 = vrot.slane %v1073_v9, 5  ;;  %v1081_v21 = vrot.slane %v1079_v10, 5  ;;  %7131 = vmatpush3.bf16.msra.mxu0 %v7584_v4  ;;  %7567 = vmatpush3.bf16.msra.mxu1 %v7584_v4 }
  0x1a   : > { %265 = vst [vmem:[#allocation2 + $0x70] sm:$0xf] %v7738_v2  ;;  %266 = vst [vmem:[#allocation2 + $0x74] sm:$0x1] %v7738_v2  ;;  %v1085_v22 = vrot.slane %v1083_v11, 4  ;;  %v1091_v25 = vrot.slane %v1089_v12, 5  ;;  %7132 = vmatprep.subr.bf16.mxu0 %v7585_v20  ;;  %7560 = vmatprep.subr.bf16.mxu1 %v7585_v20 }
  0x1b   : > { %267 = vst [vmem:[#allocation2 + $0x78] sm:$0xf] %v7738_v2  ;;  %268 = vst [vmem:[#allocation2 + $0x7c] sm:$0xf] %v7738_v2  ;;  %v7825_v23 = vld [vmem:[%s10547_s3] ss:$0 sm:$0xff]  ;;  %v1076_v24 = vor.u32 %v1075_v15, %v1072_v14 }
  0x1c   : > { %269 = vst [vmem:[#allocation2 + $0x80] sm:$0x1] %v7738_v2  ;;  %270 = vst [vmem:[#allocation2 + $0x84] sm:$0xf] %v7738_v2  ;;  %v1086_v29 = vor.u32 %v1085_v22, %v1081_v21  ;;  %vm561_vm4 = vsmask.f32 256  ;;  %v401_v33 = vadd.f32 %v7825_v23, %v362_v26  ;;  %v402_v34 = vadd.f32 %v7825_v23, %v363_v27 }
  0x1d   : > { %271 = vst [vmem:[#allocation2 + $0x88] sm:$0xf] %v7738_v2  ;;  %272 = vst [vmem:[#allocation2 + $0x8c] sm:$0x1] %v7738_v2  ;;  %v1077_v32 = vrot.slane %v1076_v24, 4  ;;  %v6885_v42 = vld [vmem:[%s7807_s6 + $0x40] sm:$0xff]   ;;  %v415_v44 = vadd.f32 %v7825_v23, %v376_v37  ;;  %v416_v45 = vadd.f32 %v7825_v23, %v377_v38  ;;  %7133 = vmatpush3.bf16.msra.mxu0 %v7585_v20  ;;  %7568 = vmatpush3.bf16.msra.mxu1 %v7585_v20 }
  0x1e   : > { %273 = vst [vmem:[#allocation2 + $0x90] sm:$0xf] %v7738_v2  ;;  %274 = vst [vmem:[#allocation2 + $0x94] sm:$0xf] %v7738_v2  ;;  %v1087_v36 = vrot.slane %v1086_v29, 4  ;;  %v433_v40 = vmax.f32 %v401_v33, 0.0  ;;  %v6768_v46 = vunpack.c.l.bf16 %v6885_v42  ;;  %v6769_v50 = vunpack.c.h.bf16 %v6885_v42  ;;  %7134 = vmatprep.subr.bf16.mxu0 %v7586_v35  ;;  %7561 = vmatprep.subr.bf16.mxu1 %v7586_v35 }
  0x1f   : > { %275 = vst [vmem:[#allocation2 + $0x98] sm:$0x1] %v7738_v2  ;;  %276 = vst [vmem:[#allocation2 + $0x9c] sm:$0xf] %v7738_v2  ;;  %v434_v41 = vmax.f32 %v402_v34, 0.0  ;;  %v7587_v51 = vld [vmem:[%s10545_s1 + $0x48] sm:$0xff]  }
  0x20   : > { %277 = vst [vmem:[#allocation2 + $0xa0] sm:$0xf] %v7738_v2  ;;  %278 = vst [vmem:[#allocation2 + $0xa4] sm:$0x1] %v7738_v2  ;;  %vm562_vm6 = vsmask.f32 4368  ;;  %v6670_v48 = vpack.c.bf16 %v433_v40, %v433_v40  ;;  %v378_v54 = vmul.f32 %v6768_v46, %v7816_v18  ;;  %v379_v1 = vmul.f32 %v6769_v50, %v7816_v18 }
  0x21   : > { %279 = vst [vmem:[#allocation2 + $0xa8] sm:$0xf] %v7738_v2  ;;  %280 = vst [vmem:[#allocation2 + $0xac] sm:$0xf] %v7738_v2  ;;  %v6671_v49 = vpack.c.bf16 %v434_v41, %v434_v41  ;;  %vm886_vm7 = vsmask.f32 7938  ;;  %7135 = vmatpush3.bf16.msra.mxu0 %v7586_v35  ;;  %7569 = vmatpush3.bf16.msra.mxu1 %v7586_v35 }
  0x22   : > { %281 = vst [vmem:[#allocation2 + $0xb0] sm:$0x1] %v7738_v2  ;;  %282 = vst [vmem:[#allocation2 + $0xb4] sm:$0xf] %v7738_v2  ;;  %v447_v52 = vmax.f32 %v415_v44, 0.0  ;;  %v448_v53 = vmax.f32 %v416_v45, 0.0  ;;  %7136 = vmatprep.subr.bf16.mxu0 %v7587_v51  ;;  %7562 = vmatprep.subr.bf16.mxu1 %v7587_v51  ;;  %v418_v26 = vadd.f32 %v7825_v23, %v379_v1 }
  0x23   : > { %283 = vst [vmem:[#allocation2 + $0xb8] sm:$0xf] %v7738_v2  ;;  %284 = vst [vmem:[#allocation2 + $0xbc] sm:$0x1] %v7738_v2  ;;  %v6878_v55 = vld [vmem:[%s7807_s6 + $0x8] sm:$0xff]   ;;  %v565_v56 = vshrl.u32 %v6670_v48, 16 }
  0x24   : > { %285 = vst [vmem:[#allocation2 + $0xc0] sm:$0xf] %v7738_v2  ;;  %286 = vst [vmem:[#allocation2 + $0xc4] sm:$0xf] %v7738_v2  ;;  %v568_v57 = vshll.u32 %v6670_v48, 16  ;;  %v573_v58 = vshrl.u32 %v6671_v49, 16  ;;  %v6684_v63 = vpack.c.bf16 %v447_v52, %v447_v52  ;;  %v6685_v0 = vpack.c.bf16 %v448_v53, %v448_v53 }
  0x25   : > { %287 = vst [vmem:[#allocation2 + $0xc8] sm:$0x1] %v7738_v2  ;;  %288 = vst [vmem:[#allocation2 + $0xcc] sm:$0xf] %v7738_v2  ;;  %v576_v59 = vshll.u32 %v6671_v49, 16  ;;  %v7588_v60 = vld [vmem:[%s10545_s1 + $0x40] sm:$0xff]   ;;  %v6740_v8 = vunpack.c.l.bf16 %v6878_v55  ;;  %v6741_v9 = vunpack.c.h.bf16 %v6878_v55  ;;  %7137 = vmatpush3.bf16.msra.mxu0 %v7587_v51  ;;  %7570 = vmatpush3.bf16.msra.mxu1 %v7587_v51 }
  0x26   : > { %289 = vst [vmem:[#allocation2 + $0xd0] sm:$0xf] %v7738_v2  ;;  %290 = vst [vmem:[#allocation2 + $0xd4] sm:$0x1] %v7738_v2  ;;  %v888_v61 = vld [vmem:[#allocation2 + $0xc] sm:$0xf]  ;;  %v417_v2 = vadd.f32 %v7825_v23, %v378_v54  ;;  %7138 = vmatprep.subr.bf16.mxu0 %v7588_v60  ;;  %7563 = vmatprep.subr.bf16.mxu1 %v7588_v60 }
  0x27   : > { %vm7831_vm3 = vmor %vm1066_vm0, %vm1067_vm1  ;;  %v10563_v62 = vmov 0  ;;  %v10566_v3 = vmov 0  ;;  %v567_v4 = vrot.slane %v565_v56, 7  ;;  %v575_v5 = vrot.slane %v573_v58, 7  ;;  %v894_v6 = vld [vmem:[#allocation2 + $0x14] sm:$0x1] }
  0x28   : > { %v1082_v39 = vsel %vm7831_vm3, %v1077_v32, %v1081_v21  ;;  %v1092_v43 = vsel %vm7831_vm3, %v1087_v36, %v1091_v25  ;;  %vm7859_vm8 = vmand %vm892_vm5, %vm561_vm4  ;;  %v6879_v10 = vld [vmem:[%s7807_s6 + $0x10] sm:$0xff]   ;;  %v10569_v11 = vmov 0  ;;  %v684_v12 = vshrl.u32 %v6684_v63, 16  ;;  %v939_v21 = vld [vmem:[#allocation2 + $0x60] sm:$0xf]  ;;  %s6207_s26 = sshll.u32 %s10769_s19, 1 }
  0x29   : > { %v6258_v47 = vcombine.low %v1082_v39, %v1092_v43  ;;  %v10564_v62 = vsel %vm7859_vm8, 4294967295, %v10563_v62  ;;  %vm7867_vm9 = vmor %vm561_vm4, %vm562_vm6  ;;  %v687_v13 = vshll.u32 %v6684_v63, 16  ;;  %v692_v14 = vshrl.u32 %v6685_v0, 16  ;;  %v7881_v25 = vld [vmem:[%s10545_s1 + $0x38] sm:$0xff]   ;;  %v943_v32 = vld [vmem:[#allocation2 + $0x68] sm:$0x1]  ;;  %7139 = vmatpush3.bf16.msra.mxu0 %v7588_v60  ;;  %7571 = vmatpush3.bf16.msra.mxu1 %v7588_v60  ;;  %s235_s14 = scalar_lea.vmem %s10549_s5, %s6207_s26 }
  0x2a   : > { %10565 = vst [vmem:[#allocation3_spill] sm:$0xff] %v10564_v62  ;;  %v10567_v3 = vsel %vm7867_vm9, 4294967295, %v10566_v3  ;;  %vm7874_vm10 = vmand %vm885_vm2, %vm886_vm7  ;;  %v695_v15 = vshll.u32 %v6685_v0, 16  ;;  %v570_v16 = vor.u32 %v568_v57, %v567_v4  ;;  %v571_v17 = vrot.slane %v567_v4, 4  ;;  %v7893_v33 = vld [vmem:[%s10545_s1 + $0xb8] sm:$0xff]   ;;  %7172 = vmatprep.subr.bf16.mxu1 %v7881_v25 }
  0x2b   : > { %7140 = vmatprep.mubr.bf16.mxu0 %v6258_v47  ;;  %10568 = vst [vmem:[#allocation4_spill] sm:$0xff] %v10567_v3  ;;  %v10570_v11 = vsel %vm7874_vm10, 4294967295, %v10569_v11  ;;  %v578_v19 = vor.u32 %v576_v59, %v575_v5  ;;  %v580_v20 = vrot.slane %v575_v5, 4  ;;  %v686_v22 = vrot.slane %v684_v12, 7  ;;  %v7904_v47 = vld [vmem:[%s7807_s6 + $0x48] sm:$0xff]   ;;  %7220 = vmatprep.subr.bf16.mxu0 %v7893_v33 }
  0x2c   : > { %10571 = vst [vmem:[#allocation5_spill] sm:$0xff] %v10570_v11  ;;  %v694_v24 = vrot.slane %v692_v14, 7  ;;  %v449_v27 = vmax.f32 %v417_v2, 0.0  ;;  %v889_v30 = vsel %vm7874_vm10, %v570_v16, %v888_v61  ;;  %v6744_v34 = vunpack.c.l.bf16 %v6879_v10  ;;  %v946_v61 = vld [vmem:[#allocation2 + $0x6c] sm:$0xf] }
  0x2d   : > { %v579_v29 = vsel %vm7867_vm9, %v571_v17, %v578_v19  ;;  %v895_v31 = vsel %vm7859_vm8, %v580_v20, %v894_v6  ;;  %890 = vst [vmem:[#allocation2 + $0xc] sm:$0xf] %v889_v30  ;;  %v689_v35 = vor.u32 %v687_v13, %v686_v22  ;;  %v690_v36 = vrot.slane %v686_v22, 4  ;;  %v7927_v20 = vld [vmem:[%s7807_s6 + $0x50] sm:$0xff]  }
  0x2e   : > { %891 = vst [vmem:[#allocation2 + $0x10] sm:$0xf] %v579_v29  ;;  %896 = vst [vmem:[#allocation2 + $0x14] sm:$0x1] %v895_v31  ;;  %v697_v37 = vor.u32 %v695_v15, %v694_v24  ;;  %v699_v38 = vrot.slane %v694_v24, 4  ;;  %v450_v39 = vmax.f32 %v418_v26, 0.0  ;;  %v6686_v40 = vpack.c.bf16 %v449_v27, %v449_v27 }
  0x2f   : > { %v364_v41 = vmul.f32 %v6740_v8, %v7816_v18  ;;  %v365_v42 = vmul.f32 %v6741_v9, %v7816_v18  ;;  %v940_v44 = vsel %vm7874_vm10, %v689_v35, %v939_v21  ;;  %v6745_v46 = vunpack.c.h.bf16 %v6879_v10 }
  0x30   : > { %v698_v43 = vsel %vm7867_vm9, %v690_v36, %v697_v37  ;;  %v944_v45 = vsel %vm7859_vm8, %v699_v38, %v943_v32  ;;  %941 = vst [vmem:[#allocation2 + $0x60] sm:$0xf] %v940_v44  ;;  %v6687_v48 = vpack.c.bf16 %v450_v39, %v450_v39  ;;  %v701_v49 = vshrl.u32 %v6686_v40, 16 }
  0x31   : > { %942 = vst [vmem:[#allocation2 + $0x64] sm:$0xf] %v698_v43  ;;  %945 = vst [vmem:[#allocation2 + $0x68] sm:$0x1] %v944_v45  ;;  %v704_v50 = vshll.u32 %v6686_v40, 16  ;;  %v403_v51 = vadd.f32 %v7825_v23, %v364_v41  ;;  %v2104_v52 = vrot.slane %v7809_v7, 5  ;;  %v404_v53 = vadd.f32 %v7825_v23, %v365_v42 }
  0x32   : > { %v366_v54 = vmul.f32 %v6744_v34, %v7816_v18  ;;  %v367_v55 = vmul.f32 %v6745_v46, %v7816_v18  ;;  %v703_v56 = vrot.slane %v701_v49, 7  ;;  %v709_v57 = vshrl.u32 %v6687_v48, 16  ;;  %v950_v43 = vld [vmem:[#allocation2 + $0x74] sm:$0x1] }
  0x33   : > { %v435_v58 = vmax.f32 %v403_v51, 0.0  ;;  %v6772_v59 = vunpack.c.l.bf16 %v7904_v47  ;;  %v712_v60 = vshll.u32 %v6687_v48, 16  ;;  %v436_v63 = vmax.f32 %v404_v53, 0.0 }
  0x34   : > { %v7915_v0 = vadd.f32 %v7825_v23, %v366_v54  ;;  %v1004_v1 = vld [vmem:[#allocation2 + $0xc] sm:$0xf]  ;;  %v706_v5 = vor.u32 %v704_v50, %v703_v56  ;;  %v7920_v8 = vadd.f32 %v7825_v23, %v367_v55  ;;  %v6773_v9 = vunpack.c.h.bf16 %v7904_v47 }
  0x35   : > { %v1005_v2 = vld [vmem:[#allocation2 + $0x10] sm:$0xf]  ;;  %v1051_v4 = vld [vmem:[#allocation2 + $0x14] sm:$0x1]  ;;  %v7917_v6 = vpack.c.bf16 %v435_v58, %v435_v58  ;;  %v1094_v10 = vshrl.u32 %v1004_v1, 16  ;;  %v1097_v12 = vshll.u32 %v1004_v1, 16  ;;  %v7924_v19 = vmul.f32 %v6772_v59, %v7816_v18 }
  0x36   : > { %v1103_v13 = vshll.u32 %v1005_v2, 16  ;;  %v1107_v14 = vshrl.u32 %v1005_v2, 16  ;;  %v1113_v15 = vshll.u32 %v1051_v4, 16  ;;  %v707_v16 = vrot.slane %v703_v56, 4  ;;  %v7592_v1 = vld [vmem:[%s10545_s1 + $0xb0] sm:$0xff]  }
  0x37   : > { %v711_v17 = vrot.slane %v709_v57, 7  ;;  %v1096_v21 = vrot.slane %v1094_v10, 4  ;;  %v1099_v22 = vrot.slane %v1097_v12, 5  ;;  %v1018_v27 = vld [vmem:[#allocation2 + $0x60] sm:$0xf]  ;;  %v947_v35 = vsel %vm7874_vm10, %v706_v5, %v946_v61 }
  0x38   : > { %v1105_v24 = vrot.slane %v1103_v13, 5  ;;  %v1109_v26 = vrot.slane %v1107_v14, 4  ;;  %v1115_v29 = vrot.slane %v1113_v15, 5  ;;  %v1019_v30 = vld [vmem:[#allocation2 + $0x64] sm:$0xf]  ;;  %v1262_v32 = vshrl.u32 %v1018_v27, 16 }
  0x39   : > { %v1058_v31 = vld [vmem:[#allocation2 + $0x68] sm:$0x1]  ;;  %v714_v34 = vor.u32 %v712_v60, %v711_v17  ;;  %v1100_v36 = vor.u32 %v1099_v22, %v1096_v21  ;;  %v1265_v38 = vshll.u32 %v1018_v27, 16  ;;  %v1271_v39 = vshll.u32 %v1019_v30, 16  ;;  %948 = vst [vmem:[#allocation2 + $0x6c] sm:$0xf] %v947_v35 }
  0x3a   : > { %v1110_v37 = vor.u32 %v1109_v26, %v1105_v24  ;;  %v1264_v40 = vrot.slane %v1262_v32, 4  ;;  %v1275_v41 = vshrl.u32 %v1019_v30, 16  ;;  %v1281_v42 = vshll.u32 %v1058_v31, 16  ;;  %v897_v26 = vld [vmem:[#allocation2 + $0x18] sm:$0xf] }
  0x3b   : > { %v6776_v44 = vunpack.c.l.bf16 %v7927_v20  ;;  %v1101_v45 = vrot.slane %v1100_v36, 4  ;;  %v1267_v48 = vrot.slane %v1265_v38, 5  ;;  %v1273_v49 = vrot.slane %v1271_v39, 5  ;;  %v901_v35 = vld [vmem:[#allocation2 + $0x20] sm:$0x1] }
  0x3c   : > { %v1111_v46 = vrot.slane %v1110_v37, 4  ;;  %v1277_v50 = vrot.slane %v1275_v41, 4  ;;  %v1283_v51 = vrot.slane %v1281_v42, 5  ;;  %v715_v53 = vsel %vm7867_vm9, %v707_v16, %v714_v34 }
  0x3d   : > { %v716_v54 = vrot.slane %v711_v17, 4  ;;  %v1106_v55 = vsel %vm7831_vm3, %v1101_v45, %v1105_v24  ;;  %v1268_v57 = vor.u32 %v1267_v48, %v1264_v40  ;;  %949 = vst [vmem:[#allocation2 + $0x70] sm:$0xf] %v715_v53  ;;  %v6673_v58 = vpack.c.bf16 %v436_v63, %v436_v63 }
  0x3e   : > { %v1116_v56 = vsel %vm7831_vm3, %v1111_v46, %v1115_v29  ;;  %v1278_v60 = vor.u32 %v1277_v50, %v1273_v49  ;;  %v582_v2 = vshrl.u32 %v7917_v6, 16  ;;  %v585_v5 = vshll.u32 %v7917_v6, 16 }
  0x3f   : > { %v6259_v59 = vcombine.low %v1106_v55, %v1116_v56  ;;  %v951_v61 = vsel %vm7859_vm8, %v716_v54, %v950_v43  ;;  %v1269_v4 = vrot.slane %v1268_v57, 4  ;;  %v590_v10 = vshrl.u32 %v6673_v58, 16  ;;  %v904_v57 = vld [vmem:[#allocation2 + $0x24] sm:$0xf] }
  0x40   : > { %952 = vst [vmem:[#allocation2 + $0x74] sm:$0x1] %v951_v61  ;;  %v593_v12 = vshll.u32 %v6673_v58, 16  ;;  %v1279_v13 = vrot.slane %v1278_v60, 4  ;;  %v1020_v63 = vld [vmem:[#allocation2 + $0x6c] sm:$0xf] }
  0x41   : > { %7141 = vmatmul.mubr.bf16.vlgmr.msra.gmra.mxu0 %v6259_v59  ;;  %v584_v14 = vrot.slane %v582_v2, 7  ;;  %v437_v15 = vmax.f32 %v7915_v0, 0.0  ;;  %v438_v16 = vmax.f32 %v7920_v8, 0.0  ;;  %v1274_v17 = vsel %vm7831_vm3, %v1269_v4, %v1273_v49  ;;  %v7594_v0 = vld [vmem:[%s10545_s1 + $0xa8] sm:$0xff]  }
  0x42   : > { %v1286_v21 = vshrl.u32 %v1020_v63, 16  ;;  %v1289_v22 = vshll.u32 %v1020_v63, 16  ;;  %7221 = vmatpush3.bf16.msra.mxu0 %v7893_v33  ;;  %v592_v24 = vrot.slane %v590_v10, 7  ;;  %v1284_v6 = vsel %vm7831_vm3, %v1279_v13, %v1283_v51  ;;  %v7596_v51 = vld [vmem:[%s10545_s1 + $0xa0] sm:$0xff]  }
  0x43   : > { %7222 = vmatprep.subr.bf16.mxu0 %v7592_v1  ;;  %v587_v27 = vor.u32 %v585_v5, %v584_v14  ;;  %v588_v29 = vrot.slane %v584_v14, 4  ;;  %v6674_v30 = vpack.c.bf16 %v437_v15, %v437_v15  ;;  %v6266_v8 = vcombine.low %v1274_v17, %v1284_v6 }
  0x44   : > { %v1288_v31 = vrot.slane %v1286_v21, 4  ;;  %v1291_v32 = vrot.slane %v1289_v22, 5  ;;  %v595_v34 = vor.u32 %v593_v12, %v592_v24  ;;  %v1021_v36 = vld [vmem:[#allocation2 + $0x70] sm:$0xf]  ;;  %v597_v33 = vrot.slane %v592_v24, 4  ;;  %v7970_v12 = vld [vmem:[%s7807_s6 + $0x18] sm:$0xff]  }
  0x45   : > { %v898_v37 = vsel %vm7874_vm10, %v587_v27, %v897_v26  ;;  %v6675_v38 = vpack.c.bf16 %v438_v16, %v438_v16  ;;  %v599_v39 = vshrl.u32 %v6674_v30, 16  ;;  %7156 = vmatprep.mubr.bf16.mxu1 %v6266_v8  ;;  %v1295_v41 = vshll.u32 %v1021_v36, 16  ;;  %v7598_v16 = vld [vmem:[%s10545_s1 + $0x98] sm:$0xff]   ;;  %v7591_v22 = vld [vmem:[%s10545_s1 + $0x30] sm:$0xff]  }
  0x46   : > { %v1292_v40 = vor.u32 %v1291_v32, %v1288_v31  ;;  %v1299_v42 = vshrl.u32 %v1021_v36, 16  ;;  %7223 = vmatpush3.bf16.msra.mxu0 %v7592_v1  ;;  %v596_v43 = vsel %vm7867_vm9, %v588_v29, %v595_v34  ;;  %899 = vst [vmem:[#allocation2 + $0x18] sm:$0xf] %v898_v37  ;;  %v902_v46 = vsel %vm7859_vm8, %v597_v33, %v901_v35  ;;  %v908_v1 = vld [vmem:[#allocation2 + $0x2c] sm:$0x1]  ;;  %v7600_v8 = vld [vmem:[%s10545_s1 + $0x90] sm:$0xff]  }
  0x47   : > { %v1059_v45 = vld [vmem:[#allocation2 + $0x74] sm:$0x1]  ;;  %900 = vst [vmem:[#allocation2 + $0x1c] sm:$0xf] %v596_v43  ;;  %v601_v48 = vrot.slane %v599_v39, 7  ;;  %v602_v49 = vshll.u32 %v6674_v30, 16  ;;  %7224 = vmatprep.subr.bf16.mxu0 %v7594_v0  ;;  %v381_v10 = vmul.f32 %v6773_v9, %v7816_v18  ;;  %v419_v15 = vadd.f32 %v7825_v23, %v7924_v19 }
  0x48   : > { %v607_v50 = vshrl.u32 %v6675_v38, 16  ;;  %v1293_v53 = vrot.slane %v1292_v40, 4  ;;  %v1297_v54 = vrot.slane %v1295_v41, 5  ;;  %v1301_v55 = vrot.slane %v1299_v42, 4  ;;  %903 = vst [vmem:[#allocation2 + $0x20] sm:$0x1] %v902_v46 }
  0x49   : > { %v1305_v56 = vshll.u32 %v1059_v45, 16  ;;  %v604_v58 = vor.u32 %v602_v49, %v601_v48  ;;  %v605_v59 = vrot.slane %v601_v48, 4  ;;  %v610_v61 = vshll.u32 %v6675_v38, 16 }
  0x4a   : > { %v609_v60 = vrot.slane %v607_v50, 7  ;;  %v1298_v2 = vsel %vm7831_vm3, %v1293_v53, %v1297_v54  ;;  %v1302_v4 = vor.u32 %v1301_v55, %v1297_v54  ;;  %7225 = vmatpush3.bf16.msra.mxu0 %v7594_v0  ;;  %v420_v47 = vadd.f32 %v7825_v23, %v381_v10  ;;  %v7593_v54 = vld [vmem:[%s10545_s1 + $0x28] sm:$0xff]  }
  0x4b   : > { %v1307_v5 = vrot.slane %v1305_v56, 5  ;;  %v905_v14 = vsel %vm7874_vm10, %v604_v58, %v904_v57  ;;  %7226 = vmatprep.subr.bf16.mxu0 %v7596_v51  ;;  %v6777_v9 = vunpack.c.h.bf16 %v7927_v20  ;;  %v382_v21 = vmul.f32 %v6776_v44, %v7816_v18 }
  0x4c   : > { %v612_v13 = vor.u32 %v610_v61, %v609_v60  ;;  %v614_v63 = vrot.slane %v609_v60, 4  ;;  %v1303_v17 = vrot.slane %v1302_v4, 4  ;;  %906 = vst [vmem:[#allocation2 + $0x24] sm:$0xf] %v905_v14  ;;  %v451_v6 = vmax.f32 %v419_v15, 0.0  ;;  %v7595_v14 = vld [vmem:[%s10545_s1 + $0x20] sm:$0xff]  }
  0x4d   : > { %v1006_v19 = vld [vmem:[#allocation2 + $0x18] sm:$0xf]  ;;  %v6748_v27 = vunpack.c.l.bf16 %v7970_v12  ;;  %v452_v0 = vmax.f32 %v420_v47, 0.0  ;;  %v383_v55 = vmul.f32 %v6777_v9, %v7816_v18  ;;  %v421_v56 = vadd.f32 %v7825_v23, %v382_v21  ;;  %v6881_v9 = vld [vmem:[%s7807_s6 + $0x20] sm:$0xff]  }
  0x4e   : > { %v613_v24 = vsel %vm7867_vm9, %v605_v59, %v612_v13  ;;  %v909_v26 = vsel %vm7859_vm8, %v614_v63, %v908_v1  ;;  %v1308_v29 = vsel %vm7831_vm3, %v1303_v17, %v1307_v5  ;;  %v1007_v30 = vld [vmem:[#allocation2 + $0x1c] sm:$0xf]  ;;  %v1118_v20 = vshrl.u32 %v1006_v19, 16  ;;  %7227 = vmatpush3.bf16.msra.mxu0 %v7596_v51  ;;  %v953_v61 = vld [vmem:[#allocation2 + $0x78] sm:$0xf]  ;;  %v7604_v21 = vld [vmem:[%s10545_s1 + $0x80] sm:$0xff]  }
  0x4f   : > { %v1121_v44 = vshll.u32 %v1006_v19, 16  ;;  %907 = vst [vmem:[#allocation2 + $0x28] sm:$0xf] %v613_v24  ;;  %910 = vst [vmem:[#allocation2 + $0x2c] sm:$0x1] %v909_v26  ;;  %v6267_v31 = vcombine.low %v1298_v2, %v1308_v29  ;;  %v1127_v34 = vshll.u32 %v1007_v30, 16  ;;  %v6688_v36 = vpack.c.bf16 %v451_v6, %v451_v6  ;;  %7228 = vmatprep.subr.bf16.mxu0 %v7598_v16 }
  0x50   : > { %v1052_v32 = vld [vmem:[#allocation2 + $0x20] sm:$0x1]  ;;  %v1131_v35 = vshrl.u32 %v1007_v30, 16  ;;  %v1120_v33 = vrot.slane %v1118_v20, 4  ;;  %v6689_v39 = vpack.c.bf16 %v452_v0, %v452_v0  ;;  %v422_v63 = vadd.f32 %v7825_v23, %v383_v55 }
  0x51   : > { %v1123_v37 = vrot.slane %v1121_v44, 5  ;;  %v1137_v38 = vshll.u32 %v1052_v32, 16  ;;  %7157 = vmatmul.mubr.bf16.vlgmr.msra.gmra.mxu1 %v6267_v31  ;;  %v1129_v40 = vrot.slane %v1127_v34, 5  ;;  %v718_v42 = vshrl.u32 %v6688_v36, 16  ;;  %v957_v13 = vld [vmem:[#allocation2 + $0x80] sm:$0x1] }
  0x52   : > { %v1133_v41 = vrot.slane %v1131_v35, 4  ;;  %v721_v43 = vshll.u32 %v6688_v36, 16  ;;  %7173 = vmatpush3.bf16.msra.mxu1 %v7881_v25  ;;  %v726_v48 = vshrl.u32 %v6689_v39, 16  ;;  %v729_v49 = vshll.u32 %v6689_v39, 16  ;;  %7229 = vmatpush3.bf16.msra.mxu0 %v7598_v16  ;;  %v7602_v25 = vld [vmem:[%s10545_s1 + $0x88] sm:$0xff]   ;;  %v7597_v32 = vld [vmem:[%s10545_s1 + $0x18] sm:$0xff]  }
  0x53   : > { %v1124_v45 = vor.u32 %v1123_v37, %v1120_v33  ;;  %v1139_v46 = vrot.slane %v1137_v38, 5  ;;  %7174 = vmatprep.subr.bf16.mxu1 %v7591_v22  ;;  %v1008_v51 = vld [vmem:[#allocation2 + $0x24] sm:$0xf]  ;;  %v720_v53 = vrot.slane %v718_v42, 7  ;;  %7230 = vmatprep.subr.bf16.mxu0 %v7600_v8  ;;  %v453_v36 = vmax.f32 %v421_v56, 0.0  ;;  %v7608_v37 = vld [vmem:[%s10545_s1 + $0x138] sm:$0xff]  }
  0x54   : > { %v1134_v50 = vor.u32 %v1133_v41, %v1129_v40  ;;  %v1142_v58 = vshrl.u32 %v1008_v51, 16  ;;  %v1145_v59 = vshll.u32 %v1008_v51, 16  ;;  %v728_v60 = vrot.slane %v726_v48, 7 }
  0x55   : > { %v1125_v57 = vrot.slane %v1124_v45, 4  ;;  %v723_v5 = vor.u32 %v721_v43, %v720_v53  ;;  %v724_v10 = vrot.slane %v720_v53, 4  ;;  %v454_v33 = vmax.f32 %v422_v63, 0.0  ;;  %v8040_v53 = vld [vmem:[%s7807_s6 + $0x58] sm:$0xff]  }
  0x56   : > { %v1135_v1 = vrot.slane %v1134_v50, 4  ;;  %v1009_v2 = vld [vmem:[#allocation2 + $0x28] sm:$0xf]  ;;  %v1053_v4 = vld [vmem:[#allocation2 + $0x2c] sm:$0x1]  ;;  %7175 = vmatpush3.bf16.msra.mxu1 %v7591_v22  ;;  %v1144_v16 = vrot.slane %v1142_v58, 4  ;;  %7231 = vmatpush3.bf16.msra.mxu0 %v7600_v8  ;;  %v731_v6 = vor.u32 %v729_v49, %v728_v60  ;;  %v6749_v39 = vunpack.c.h.bf16 %v7970_v12 }
  0x57   : > { %v1130_v15 = vsel %vm7831_vm3, %v1125_v57, %v1129_v40  ;;  %v1147_v17 = vrot.slane %v1145_v59, 5  ;;  %v1151_v47 = vshll.u32 %v1009_v2, 16  ;;  %v1155_v24 = vshrl.u32 %v1009_v2, 16  ;;  %7176 = vmatprep.subr.bf16.mxu1 %v7593_v54  ;;  %7232 = vmatprep.subr.bf16.mxu0 %v7602_v25  ;;  %v7599_v59 = vld [vmem:[%s10545_s1 + $0x10] sm:$0xff]   ;;  %v960_v2 = vld [vmem:[#allocation2 + $0x84] sm:$0xf] }
  0x58   : > { %v1140_v19 = vsel %vm7831_vm3, %v1135_v1, %v1139_v46  ;;  %v1161_v26 = vshll.u32 %v1053_v4, 16  ;;  %v733_v20 = vrot.slane %v728_v60, 4  ;;  %v732_v8 = vsel %vm7867_vm9, %v724_v10, %v731_v6 }
  0x59   : > { %v6260_v22 = vcombine.low %v1130_v15, %v1140_v19  ;;  %v1148_v29 = vor.u32 %v1147_v17, %v1144_v16  ;;  %v1153_v30 = vrot.slane %v1151_v47, 5  ;;  %v1157_v44 = vrot.slane %v1155_v24, 4  ;;  %956 = vst [vmem:[#allocation2 + $0x7c] sm:$0xf] %v732_v8 }
  0x5a   : > { %v1163_v0 = vrot.slane %v1161_v26, 5  ;;  %v954_v31 = vsel %vm7874_vm10, %v723_v5, %v953_v61  ;;  %v958_v35 = vsel %vm7859_vm8, %v733_v20, %v957_v13  ;;  %7177 = vmatpush3.bf16.msra.mxu1 %v7593_v54  ;;  %v368_v40 = vmul.f32 %v6748_v27, %v7816_v18  ;;  %7233 = vmatpush3.bf16.msra.mxu0 %v7602_v25 }
  0x5b   : > { %7144 = vmatprep.mubr.bf16.mxu0 %v6260_v22  ;;  %v1149_v34 = vrot.slane %v1148_v29, 4  ;;  %955 = vst [vmem:[#allocation2 + $0x78] sm:$0xf] %v954_v31  ;;  %v1158_v38 = vor.u32 %v1157_v44, %v1153_v30  ;;  %959 = vst [vmem:[#allocation2 + $0x80] sm:$0x1] %v958_v35  ;;  %7178 = vmatprep.subr.bf16.mxu1 %v7595_v14  ;;  %v6752_v41 = vunpack.c.l.bf16 %v6881_v9  ;;  %v6753_v46 = vunpack.c.h.bf16 %v6881_v9  ;;  %v7601_v22 = vld [vmem:[%s10545_s1 + $0x8] sm:$0xff]  }
  0x5c   : > { %v6690_v43 = vpack.c.bf16 %v453_v36, %v453_v36  ;;  %v6691_v45 = vpack.c.bf16 %v454_v33, %v454_v33  ;;  %7234 = vmatprep.subr.bf16.mxu0 %v7604_v21  ;;  %v369_v49 = vmul.f32 %v6749_v39, %v7816_v18  ;;  %v407_v50 = vadd.f32 %v7825_v23, %v368_v40  ;;  %v7603_v40 = vld [vmem:[%s10545_s1] sm:$0xff]  }
  0x5d   : > { %v1154_v42 = vsel %vm7831_vm3, %v1149_v34, %v1153_v30  ;;  %v1159_v48 = vrot.slane %v1158_v38, 4  ;;  %v370_v51 = vmul.f32 %v6752_v41, %v7816_v18  ;;  %v371_v58 = vmul.f32 %v6753_v46, %v7816_v18 }
  0x5e   : > { %v735_v12 = vshrl.u32 %v6690_v43, 16  ;;  %v738_v27 = vshll.u32 %v6690_v43, 16  ;;  %v743_v54 = vshrl.u32 %v6691_v45, 16  ;;  %v746_v55 = vshll.u32 %v6691_v45, 16  ;;  %7179 = vmatpush3.bf16.msra.mxu1 %v7595_v14  ;;  %7235 = vmatpush3.bf16.msra.mxu0 %v7604_v21  ;;  %v964_v21 = vld [vmem:[#allocation2 + $0x8c] sm:$0x1] }
  0x5f   : > { %v1164_v56 = vsel %vm7831_vm3, %v1159_v48, %v1163_v0  ;;  %v408_v25 = vadd.f32 %v7825_v23, %v369_v49  ;;  %v439_v57 = vmax.f32 %v407_v50, 0.0  ;;  %7180 = vmatprep.subr.bf16.mxu1 %v7597_v32  ;;  %v409_v4 = vadd.f32 %v7825_v23, %v370_v51  ;;  %7316 = vmatprep.subr.bf16.mxu0 %v7608_v37  ;;  %v911_v48 = vld [vmem:[#allocation2 + $0x30] sm:$0xf] }
  0x60   : > { %v6261_v60 = vcombine.low %v1154_v42, %v1164_v56  ;;  %v737_v61 = vrot.slane %v735_v12, 7  ;;  %v745_v1 = vrot.slane %v743_v54, 7  ;;  %v1023_v10 = vld [vmem:[#allocation2 + $0x7c] sm:$0xf]  ;;  %v410_v14 = vadd.f32 %v7825_v23, %v371_v58  ;;  %v915_v56 = vld [vmem:[#allocation2 + $0x38] sm:$0x1] }
  0x61   : > { %v440_v13 = vmax.f32 %v408_v25, 0.0  ;;  %v6676_v63 = vpack.c.bf16 %v439_v57, %v439_v57  ;;  %v6780_v18 = vunpack.c.l.bf16 %v8040_v53  ;;  %v1319_v47 = vshll.u32 %v1023_v10, 16 }
  0x62   : > { %v1022_v5 = vld [vmem:[#allocation2 + $0x78] sm:$0xf]  ;;  %7145 = vmatmul.mubr.bf16.gmra.mxu0 %v6261_v60  ;;  %v1060_v15 = vld [vmem:[#allocation2 + $0x80] sm:$0x1]  ;;  %v1323_v9 = vshrl.u32 %v1023_v10, 16  ;;  %7181 = vmatpush3.bf16.msra.mxu1 %v7597_v32  ;;  %v740_v24 = vor.u32 %v738_v27, %v737_v61  ;;  %v741_v26 = vrot.slane %v737_v61, 4  ;;  %v748_v6 = vor.u32 %v746_v55, %v745_v1 }
  0x63   : > { %v1310_v16 = vshrl.u32 %v1022_v5, 16  ;;  %v1313_v17 = vshll.u32 %v1022_v5, 16  ;;  %v1329_v19 = vshll.u32 %v1060_v15, 16  ;;  %7182 = vmatprep.subr.bf16.mxu1 %v7599_v59  ;;  %v1321_v30 = vrot.slane %v1319_v47, 5  ;;  %v7606_v60 = vld [vmem:[%s10545_s1 + $0xf8] sm:$0xff]  }
  0x64   : > { %v1325_v20 = vrot.slane %v1323_v9, 4  ;;  %v749_v0 = vsel %vm7867_vm9, %v741_v26, %v748_v6  ;;  %v750_v8 = vrot.slane %v745_v1, 4  ;;  %v961_v31 = vsel %vm7874_vm10, %v740_v24, %v960_v2  ;;  %v8077_v5 = vld [vmem:[%s10546_s2] ss:$0 sm:$0xff] }
  0x65   : > { %v1312_v23 = vrot.slane %v1310_v16, 4  ;;  %v1315_v29 = vrot.slane %v1313_v17, 5  ;;  %v1331_v44 = vrot.slane %v1329_v19, 5  ;;  %962 = vst [vmem:[#allocation2 + $0x84] sm:$0xf] %v961_v31  ;;  %v6677_v35 = vpack.c.bf16 %v440_v13, %v440_v13 }
  0x66   : > { %v1326_v34 = vor.u32 %v1325_v20, %v1321_v30  ;;  %963 = vst [vmem:[#allocation2 + $0x88] sm:$0xf] %v749_v0  ;;  %v616_v36 = vshrl.u32 %v6676_v63, 16  ;;  %7183 = vmatpush3.bf16.msra.mxu1 %v7599_v59  ;;  %v965_v33 = vsel %vm7859_vm8, %v750_v8, %v964_v21  ;;  %v619_v37 = vshll.u32 %v6676_v63, 16  ;;  %v8095_v31 = vld [vmem:[%s10547_s3] ss:$0 sm:$0xff] }
  0x67   : > { %v1316_v32 = vor.u32 %v1315_v29, %v1312_v23  ;;  %v441_v38 = vmax.f32 %v409_v4, 0.0  ;;  %v442_v39 = vmax.f32 %v410_v14, 0.0  ;;  %7184 = vmatprep.subr.bf16.mxu1 %v7601_v22  ;;  %966 = vst [vmem:[#allocation2 + $0x8c] sm:$0x1] %v965_v33  ;;  %v624_v45 = vshrl.u32 %v6677_v35, 16 }
  0x68   : > { %v1327_v42 = vrot.slane %v1326_v34, 4  ;;  %v618_v43 = vrot.slane %v616_v36, 7  ;;  %v627_v46 = vshll.u32 %v6677_v35, 16  ;;  %v6781_v51 = vunpack.c.h.bf16 %v8040_v53  ;;  %v918_v4 = vld [vmem:[#allocation2 + $0x3c] sm:$0xf] }
  0x69   : > { %v1317_v41 = vrot.slane %v1316_v32, 4  ;;  %v6678_v49 = vpack.c.bf16 %v441_v38, %v441_v38  ;;  %v6679_v50 = vpack.c.bf16 %v442_v39, %v442_v39  ;;  %v626_v57 = vrot.slane %v624_v45, 7  ;;  %v922_v36 = vld [vmem:[#allocation2 + $0x44] sm:$0x1] }
  0x6a   : > { %v1332_v27 = vsel %vm7831_vm3, %v1327_v42, %v1331_v44  ;;  %v621_v54 = vor.u32 %v619_v37, %v618_v43  ;;  %v622_v55 = vrot.slane %v618_v43, 4  ;;  %7185 = vmatpush3.bf16.msra.mxu1 %v7601_v22  ;;  %v384_v10 = vmul.f32 %v8077_v5, %v6780_v18  ;;  %v8088_v22 = vld [vmem:[%s7807_s6 + $0x60] sm:$0xff]  }
  0x6b   : > { %v1322_v12 = vsel %vm7831_vm3, %v1317_v41, %v1321_v30  ;;  %v633_v58 = vshrl.u32 %v6678_v49, 16  ;;  %v636_v59 = vshll.u32 %v6678_v49, 16  ;;  %7186 = vmatprep.subr.bf16.mxu1 %v7603_v40  ;;  %v641_v1 = vshrl.u32 %v6679_v50, 16 }
  0x6c   : > { %v6268_v25 = vcombine.low %v1322_v12, %v1332_v27  ;;  %v912_v61 = vsel %vm7874_vm10, %v621_v54, %v911_v48  ;;  %v644_v2 = vshll.u32 %v6679_v50, 16  ;;  %v1024_v13 = vld [vmem:[#allocation2 + $0x84] sm:$0xf]  ;;  %v629_v14 = vor.u32 %v627_v46, %v626_v57 }
  0x6d   : > { %v1025_v63 = vld [vmem:[#allocation2 + $0x88] sm:$0xf]  ;;  %v631_v15 = vrot.slane %v626_v57, 4  ;;  %913 = vst [vmem:[#allocation2 + $0x30] sm:$0xf] %v912_v61  ;;  %v635_v16 = vrot.slane %v633_v58, 7  ;;  %v385_v17 = vmul.f32 %v8077_v5, %v6781_v51  ;;  %v423_v32 = vadd.f32 %v8095_v31, %v384_v10 }
  0x6e   : > { %7160 = vmatprep.mubr.bf16.mxu1 %v6268_v25  ;;  %v1334_v47 = vshrl.u32 %v1024_v13, 16  ;;  %v1337_v9 = vshll.u32 %v1024_v13, 16  ;;  %v1343_v21 = vshll.u32 %v1025_v63, 16  ;;  %v1347_v19 = vshrl.u32 %v1025_v63, 16  ;;  %7187 = vmatpush3.bf16.msra.mxu1 %v7603_v40  ;;  %v1061_v24 = vld [vmem:[#allocation2 + $0x8c] sm:$0x1] }
  0x6f   : > { %v630_v53 = vsel %vm7867_vm9, %v622_v55, %v629_v14  ;;  %v916_v18 = vsel %vm7859_vm8, %v631_v15, %v915_v56  ;;  %v638_v26 = vor.u32 %v636_v59, %v635_v16  ;;  %v639_v6 = vrot.slane %v635_v16, 4  ;;  %7268 = vmatprep.subr.bf16.mxu1 %v7606_v60 }
  0x70   : > { %v1336_v23 = vrot.slane %v1334_v47, 4  ;;  %v1339_v29 = vrot.slane %v1337_v9, 5  ;;  %v1345_v30 = vrot.slane %v1343_v21, 5  ;;  %v1349_v20 = vrot.slane %v1347_v19, 4  ;;  %914 = vst [vmem:[#allocation2 + $0x34] sm:$0xf] %v630_v53 }
  0x71   : > { %917 = vst [vmem:[#allocation2 + $0x38] sm:$0x1] %v916_v18  ;;  %v1353_v44 = vshll.u32 %v1061_v24, 16  ;;  %v643_v0 = vrot.slane %v641_v1, 7  ;;  %v919_v8 = vsel %vm7874_vm10, %v638_v26, %v918_v4  ;;  %v424_v33 = vadd.f32 %v8095_v31, %v385_v17  ;;  %v967_v26 = vld [vmem:[#allocation2 + $0x90] sm:$0xf] }
  0x72   : > { %v1340_v34 = vor.u32 %v1339_v29, %v1336_v23  ;;  %v1350_v35 = vor.u32 %v1349_v20, %v1345_v30  ;;  %920 = vst [vmem:[#allocation2 + $0x3c] sm:$0xf] %v919_v8  ;;  %v6784_v37 = vunpack.c.l.bf16 %v8088_v22  ;;  %v455_v41 = vmax.f32 %v423_v32, 0.0  ;;  %v971_v23 = vld [vmem:[#allocation2 + $0x98] sm:$0x1] }
  0x73   : > { %v1355_v38 = vrot.slane %v1353_v44, 5  ;;  %v646_v39 = vor.u32 %v644_v2, %v643_v0  ;;  %v648_v40 = vrot.slane %v643_v0, 4  ;;  %v456_v46 = vmax.f32 %v424_v33, 0.0 }
  0x74   : > { %v1341_v42 = vrot.slane %v1340_v34, 4  ;;  %v1351_v43 = vrot.slane %v1350_v35, 4  ;;  %v8100_v45 = vld [vmem:[#allocation2 + $0x30] sm:$0xf]  ;;  %v6785_v48 = vunpack.c.h.bf16 %v8088_v22  ;;  %v6692_v55 = vpack.c.bf16 %v455_v41, %v455_v41 }
  0x75   : > { %v1166_v49 = vshrl.u32 %v8100_v45, 16  ;;  %v1169_v50 = vshll.u32 %v8100_v45, 16  ;;  %v647_v51 = vsel %vm7867_vm9, %v639_v6, %v646_v39  ;;  %v923_v12 = vsel %vm7859_vm8, %v648_v40, %v922_v36 }
  0x76   : > { %v1346_v27 = vsel %vm7831_vm3, %v1341_v42, %v1345_v30  ;;  %v1356_v54 = vsel %vm7831_vm3, %v1351_v43, %v1355_v38  ;;  %921 = vst [vmem:[#allocation2 + $0x40] sm:$0xf] %v647_v51  ;;  %924 = vst [vmem:[#allocation2 + $0x44] sm:$0x1] %v923_v12  ;;  %v6693_v56 = vpack.c.bf16 %v456_v46, %v456_v46  ;;  %v752_v10 = vshrl.u32 %v6692_v55, 16  ;;  %v6882_v42 = vld [vmem:[%s7807_s6 + $0x28] sm:$0xff]  }
  0x77   : > { %v6269_v25 = vcombine.low %v1346_v27, %v1356_v54  ;;  %v8113_v57 = vld [vmem:[#allocation2 + $0x34] sm:$0xf]  ;;  %v1168_v59 = vrot.slane %v1166_v49, 4  ;;  %v1171_v60 = vrot.slane %v1169_v50, 5  ;;  %v386_v61 = vmul.f32 %v8077_v5, %v6784_v37 }
  0x78   : > { %v8115_v58 = vld [vmem:[#allocation2 + $0x38] sm:$0x1]  ;;  %v1175_v1 = vshll.u32 %v8113_v57, 16  ;;  %v1179_v2 = vshrl.u32 %v8113_v57, 16  ;;  %v755_v14 = vshll.u32 %v6692_v55, 16  ;;  %v760_v15 = vshrl.u32 %v6693_v56, 16 }
  0x79   : > { %v1185_v4 = vshll.u32 %v8115_v58, 16  ;;  %7161 = vmatmul.mubr.bf16.gmra.mxu1 %v6269_v25  ;;  %v1172_v13 = vor.u32 %v1171_v60, %v1168_v59  ;;  %v8121_v63 = vld [vmem:[#allocation2 + $0x3c] sm:$0xf]  ;;  %v763_v16 = vshll.u32 %v6693_v56, 16  ;;  %v754_v53 = vrot.slane %v752_v10, 7  ;;  %v6883_v50 = vld [vmem:[%s7807_s6 + $0x30] sm:$0xff]  }
  0x7a   : > { %v1177_v17 = vrot.slane %v1175_v1, 5  ;;  %v1181_v47 = vrot.slane %v1179_v2, 4  ;;  %v1190_v21 = vshrl.u32 %v8121_v63, 16  ;;  %v1193_v24 = vshll.u32 %v8121_v63, 16  ;;  %v8148_v60 = vld [vmem:[%s7807_s6 + $0x68] sm:$0xff]  }
  0x7b   : > { %v1187_v9 = vrot.slane %v1185_v4, 5  ;;  %v1173_v19 = vrot.slane %v1172_v13, 4  ;;  %v762_v18 = vrot.slane %v760_v15, 7  ;;  %v387_v29 = vmul.f32 %v8077_v5, %v6785_v48 }
  0x7c   : > { %v1182_v6 = vor.u32 %v1181_v47, %v1177_v17  ;;  %v1192_v22 = vrot.slane %v1190_v21, 4  ;;  %v425_v30 = vadd.f32 %v8095_v31, %v386_v61  ;;  %v1195_v8 = vrot.slane %v1193_v24, 5 }
  0x7d   : > { %v1178_v20 = vsel %vm7831_vm3, %v1173_v19, %v1177_v17  ;;  %v8129_v44 = vld [vmem:[#allocation2 + $0x40] sm:$0xf]  ;;  %v8131_v0 = vld [vmem:[#allocation2 + $0x44] sm:$0x1]  ;;  %v757_v32 = vor.u32 %v755_v14, %v754_v53  ;;  %v758_v34 = vrot.slane %v754_v53, 4  ;;  %v765_v39 = vor.u32 %v763_v16, %v762_v18 }
  0x7e   : > { %v1183_v35 = vrot.slane %v1182_v6, 4  ;;  %v1199_v36 = vshll.u32 %v8129_v44, 16  ;;  %v1203_v33 = vshrl.u32 %v8129_v44, 16  ;;  %v1209_v37 = vshll.u32 %v8131_v0, 16 }
  0x7f   : > { %v1196_v38 = vor.u32 %v1195_v8, %v1192_v22  ;;  %v767_v40 = vrot.slane %v762_v18, 4  ;;  %v968_v41 = vsel %vm7874_vm10, %v757_v32, %v967_v26  ;;  %v766_v27 = vsel %vm7867_vm9, %v758_v34, %v765_v39 }
  0x80   : > { %v1188_v43 = vsel %vm7831_vm3, %v1183_v35, %v1187_v9  ;;  %v1201_v46 = vrot.slane %v1199_v36, 5  ;;  %v1205_v48 = vrot.slane %v1203_v33, 4  ;;  %v1211_v49 = vrot.slane %v1209_v37, 5  ;;  %969 = vst [vmem:[#allocation2 + $0x90] sm:$0xf] %v968_v41 }
  0x81   : > { %v6262_v51 = vcombine.low %v1178_v20, %v1188_v43  ;;  %v1197_v12 = vrot.slane %v1196_v38, 4  ;;  %v972_v54 = vsel %vm7859_vm8, %v767_v40, %v971_v23  ;;  %970 = vst [vmem:[#allocation2 + $0x94] sm:$0xf] %v766_v27  ;;  %v426_v56 = vadd.f32 %v8095_v31, %v387_v29  ;;  %v978_v27 = vld [vmem:[#allocation2 + $0xa4] sm:$0x1] }
  0x82   : > { %v1206_v55 = vor.u32 %v1205_v48, %v1201_v46  ;;  %973 = vst [vmem:[#allocation2 + $0x98] sm:$0x1] %v972_v54  ;;  %v457_v25 = vmax.f32 %v425_v30, 0.0  ;;  %v6756_v59 = vunpack.c.l.bf16 %v6882_v42  ;;  %v6757_v1 = vunpack.c.h.bf16 %v6882_v42  ;;  %v974_v42 = vld [vmem:[#allocation2 + $0x9c] sm:$0xf] }
  0x83   : > { %7148 = vmatprep.mubr.bf16.mxu0 %v6262_v51  ;;  %v1202_v61 = vsel %vm7831_vm3, %v1197_v12, %v1201_v46  ;;  %v6760_v2 = vunpack.c.l.bf16 %v6883_v50  ;;  %v6761_v4 = vunpack.c.h.bf16 %v6883_v50  ;;  %v458_v13 = vmax.f32 %v426_v56, 0.0 }
  0x84   : > { %v1207_v10 = vrot.slane %v1206_v55, 4  ;;  %v6694_v14 = vpack.c.bf16 %v457_v25, %v457_v25  ;;  %v372_v15 = vmul.f32 %v8077_v5, %v6756_v59  ;;  %v373_v16 = vmul.f32 %v8077_v5, %v6757_v1 }
  0x85   : > { %v374_v17 = vmul.f32 %v8077_v5, %v6760_v2  ;;  %v375_v47 = vmul.f32 %v8077_v5, %v6761_v4  ;;  %v6788_v9 = vunpack.c.l.bf16 %v8148_v60  ;;  %v6695_v19 = vpack.c.bf16 %v458_v13, %v458_v13 }
  0x86   : > { %v1212_v21 = vsel %vm7831_vm3, %v1207_v10, %v1211_v49  ;;  %v769_v24 = vshrl.u32 %v6694_v14, 16  ;;  %v772_v53 = vshll.u32 %v6694_v14, 16  ;;  %v411_v6 = vadd.f32 %v8095_v31, %v372_v15 }
  0x87   : > { %v6263_v18 = vcombine.low %v1202_v61, %v1212_v21  ;;  %v8159_v26 = vld [vmem:[#allocation2 + $0x90] sm:$0xf]  ;;  %v412_v22 = vadd.f32 %v8095_v31, %v373_v16  ;;  %v413_v23 = vadd.f32 %v8095_v31, %v374_v17  ;;  %v777_v8 = vshrl.u32 %v6695_v19, 16 }
  0x88   : > { %v1358_v29 = vshrl.u32 %v8159_v26, 16  ;;  %v1361_v30 = vshll.u32 %v8159_v26, 16  ;;  %v771_v20 = vrot.slane %v769_v24, 7  ;;  %v8166_v32 = vld [vmem:[#allocation2 + $0x94] sm:$0xf]  ;;  %v780_v35 = vshll.u32 %v6695_v19, 16 }
  0x89   : > { %7149 = vmatmul.mubr.bf16.gmra.mxu0 %v6263_v18  ;;  %v8168_v34 = vld [vmem:[#allocation2 + $0x98] sm:$0x1]  ;;  %v443_v36 = vmax.f32 %v411_v6, 0.0  ;;  %v414_v33 = vadd.f32 %v8095_v31, %v375_v47  ;;  %v6789_v37 = vunpack.c.h.bf16 %v8148_v60  ;;  %v1367_v40 = vshll.u32 %v8166_v32, 16 }
  0x8a   : > { %v1360_v38 = vrot.slane %v1358_v29, 4  ;;  %v1363_v39 = vrot.slane %v1361_v30, 5  ;;  %v1371_v41 = vshrl.u32 %v8166_v32, 16  ;;  %v1377_v43 = vshll.u32 %v8168_v34, 16 }
  0x8b   : > { %v774_v46 = vor.u32 %v772_v53, %v771_v20  ;;  %v775_v48 = vrot.slane %v771_v20, 4  ;;  %v779_v49 = vrot.slane %v777_v8, 7  ;;  %v1369_v51 = vrot.slane %v1367_v40, 5  ;;  %v925_v20 = vld [vmem:[#allocation2 + $0x48] sm:$0xf] }
  0x8c   : > { %v1364_v50 = vor.u32 %v1363_v39, %v1360_v38  ;;  %v1373_v12 = vrot.slane %v1371_v41, 4  ;;  %v444_v54 = vmax.f32 %v412_v22, 0.0  ;;  %v1379_v55 = vrot.slane %v1377_v43, 5  ;;  %v929_v38 = vld [vmem:[#allocation2 + $0x50] sm:$0x1] }
  0x8d   : > { %v782_v56 = vor.u32 %v780_v35, %v779_v49  ;;  %v784_v25 = vrot.slane %v779_v49, 4  ;;  %v975_v59 = vsel %vm7874_vm10, %v774_v46, %v974_v42  ;;  %v6680_v1 = vpack.c.bf16 %v443_v36, %v443_v36 }
  0x8e   : > { %v1365_v60 = vrot.slane %v1364_v50, 4  ;;  %v1374_v61 = vor.u32 %v1373_v12, %v1369_v51  ;;  %976 = vst [vmem:[#allocation2 + $0x9c] sm:$0xf] %v975_v59  ;;  %v6681_v2 = vpack.c.bf16 %v444_v54, %v444_v54  ;;  %v445_v13 = vmax.f32 %v413_v23, 0.0 }
  0x8f   : > { %v783_v4 = vsel %vm7867_vm9, %v775_v48, %v782_v56  ;;  %v979_v10 = vsel %vm7859_vm8, %v784_v25, %v978_v27  ;;  %v446_v14 = vmax.f32 %v414_v33, 0.0  ;;  %v650_v17 = vshrl.u32 %v6680_v1, 16  ;;  %v932_v48 = vld [vmem:[#allocation2 + $0x54] sm:$0xf] }
  0x90   : > { %v1370_v15 = vsel %vm7831_vm3, %v1365_v60, %v1369_v51  ;;  %v1375_v16 = vrot.slane %v1374_v61, 4  ;;  %977 = vst [vmem:[#allocation2 + $0xa0] sm:$0xf] %v783_v4  ;;  %980 = vst [vmem:[#allocation2 + $0xa4] sm:$0x1] %v979_v10  ;;  %v653_v47 = vshll.u32 %v6680_v1, 16  ;;  %v6682_v24 = vpack.c.bf16 %v445_v13, %v445_v13 }
  0x91   : > { %v658_v21 = vshrl.u32 %v6681_v2, 16  ;;  %v661_v19 = vshll.u32 %v6681_v2, 16  ;;  %v6683_v53 = vpack.c.bf16 %v446_v14, %v446_v14  ;;  %v652_v6 = vrot.slane %v650_v17, 7  ;;  %v936_v2 = vld [vmem:[#allocation2 + $0x5c] sm:$0x1] }
  0x92   : > { %v1380_v18 = vsel %vm7831_vm3, %v1375_v16, %v1379_v55  ;;  %v388_v22 = vmul.f32 %v8077_v5, %v6788_v9  ;;  %v389_v23 = vmul.f32 %v8077_v5, %v6789_v37  ;;  %v667_v8 = vshrl.u32 %v6682_v24, 16 }
  0x93   : > { %v6270_v29 = vcombine.low %v1370_v15, %v1380_v18  ;;  %v660_v30 = vrot.slane %v658_v21, 7  ;;  %v670_v35 = vshll.u32 %v6682_v24, 16  ;;  %v655_v36 = vor.u32 %v653_v47, %v652_v6  ;;  %v6891_v15 = vld [vmem:[%s7807_s6 + $0x70] sm:$0xff]  }
  0x94   : > { %v656_v33 = vrot.slane %v652_v6, 4  ;;  %v675_v39 = vshrl.u32 %v6683_v53, 16  ;;  %v678_v40 = vshll.u32 %v6683_v53, 16  ;;  %v669_v46 = vrot.slane %v667_v8, 7 }
  0x95   : > { %7164 = vmatprep.mubr.bf16.mxu1 %v6270_v29  ;;  %v8187_v41 = vld [vmem:[#allocation2 + $0x9c] sm:$0xf]  ;;  %v663_v42 = vor.u32 %v661_v19, %v660_v30  ;;  %v665_v43 = vrot.slane %v660_v30, 4  ;;  %v427_v9 = vadd.f32 %v8095_v31, %v388_v22  ;;  %v926_v50 = vsel %vm7874_vm10, %v655_v36, %v925_v20  ;;  %v8213_v20 = vld [vmem:[#allocation2 + $0x14] sm:$0x1] }
  0x96   : > { %v1382_v37 = vshrl.u32 %v8187_v41, 16  ;;  %v1385_v49 = vshll.u32 %v8187_v41, 16  ;;  %v677_v51 = vrot.slane %v675_v39, 7  ;;  %927 = vst [vmem:[#allocation2 + $0x48] sm:$0xf] %v926_v50  ;;  %v672_v56 = vor.u32 %v670_v35, %v669_v46 }
  0x97   : > { %v8194_v12 = vld [vmem:[#allocation2 + $0xa0] sm:$0xf]  ;;  %v8196_v27 = vld [vmem:[#allocation2 + $0xa4] sm:$0x1]  ;;  %v664_v54 = vsel %vm7867_vm9, %v656_v33, %v663_v42  ;;  %v930_v55 = vsel %vm7859_vm8, %v665_v43, %v929_v38  ;;  %v673_v25 = vrot.slane %v669_v46, 4  ;;  %v428_v21 = vadd.f32 %v8095_v31, %v389_v23  ;;  %v7624_v23 = vld [vmem:[%s10545_s1 + $0x118] sm:$0xff]  }
  0x98   : > { %v1384_v59 = vrot.slane %v1382_v37, 4  ;;  %v1387_v60 = vrot.slane %v1385_v49, 5  ;;  %v1391_v61 = vshll.u32 %v8194_v12, 16  ;;  %v1395_v1 = vshrl.u32 %v8194_v12, 16  ;;  %928 = vst [vmem:[#allocation2 + $0x4c] sm:$0xf] %v664_v54 }
  0x99   : > { %931 = vst [vmem:[#allocation2 + $0x50] sm:$0x1] %v930_v55  ;;  %v1401_v4 = vshll.u32 %v8196_v27, 16  ;;  %v680_v10 = vor.u32 %v678_v40, %v677_v51  ;;  %v682_v13 = vrot.slane %v677_v51, 4  ;;  %v933_v14 = vsel %vm7874_vm10, %v672_v56, %v932_v48  ;;  %v8216_v35 = vld [vmem:[#allocation2 + $0x68] sm:$0x1] }
  0x9a   : > { %v1388_v16 = vor.u32 %v1387_v60, %v1384_v59  ;;  %v1393_v17 = vrot.slane %v1391_v61, 5  ;;  %v1397_v47 = vrot.slane %v1395_v1, 4  ;;  %934 = vst [vmem:[#allocation2 + $0x54] sm:$0xf] %v933_v14  ;;  %v459_v18 = vmax.f32 %v427_v9, 0.0 }
  0x9b   : > { %v1403_v19 = vrot.slane %v1401_v4, 5  ;;  %v681_v24 = vsel %vm7867_vm9, %v673_v25, %v680_v10  ;;  %v937_v53 = vsel %vm7859_vm8, %v682_v13, %v936_v2  ;;  %v460_v29 = vmax.f32 %v428_v21, 0.0  ;;  %v8233_v50 = vld [vmem:[#allocation2] sm:$0xf]  ;;  %v8235_v51 = vld [vmem:[#allocation2 + $0x4] sm:$0xf] }
  0x9c   : > { %v1389_v6 = vrot.slane %v1388_v16, 4  ;;  %v1398_v22 = vor.u32 %v1397_v47, %v1393_v17  ;;  %935 = vst [vmem:[#allocation2 + $0x58] sm:$0xf] %v681_v24  ;;  %938 = vst [vmem:[#allocation2 + $0x5c] sm:$0x1] %v937_v53  ;;  %v6792_v30 = vunpack.c.l.bf16 %v6891_v15  ;;  %v2111_v8 = vrot.slane %v8213_v20, 5 }
  0x9d   : > { %v6696_v36 = vpack.c.bf16 %v459_v18, %v459_v18  ;;  %v6793_v33 = vunpack.c.h.bf16 %v6891_v15  ;;  %v8221_v40 = vld [vmem:[#allocation2 + $0x48] sm:$0xf]  ;;  %v8223_v42 = vpack.c.bf16 %v460_v29, %v460_v29  ;;  %vm2096_vm11 = vcmask 1042432  }
  0x9e   : > { %v1394_v38 = vsel %vm7831_vm3, %v1389_v6, %v1393_v17  ;;  %v1399_v39 = vrot.slane %v1398_v22, 4  ;;  %v390_v43 = vmul.f32 %v8077_v5, %v6792_v30  ;;  %v1214_v9 = vshrl.u32 %v8221_v40, 16 }
  0x9f   : > { %v8226_v46 = vld [vmem:[#allocation2 + $0x4c] sm:$0xf]  ;;  %v1217_v37 = vshll.u32 %v8221_v40, 16  ;;  %v391_v49 = vmul.f32 %v8077_v5, %v6793_v33  ;;  %vm2097_vm12 = vcmask 1046532   ;;  %v786_v2 = vshrl.u32 %v6696_v36, 16 }
  0xa0   : > { %v8228_v48 = vld [vmem:[#allocation2 + $0x50] sm:$0x1]  ;;  %v1404_v55 = vsel %vm7831_vm3, %v1399_v39, %v1403_v19  ;;  %v1223_v56 = vshll.u32 %v8226_v46, 16  ;;  %v1227_v25 = vshrl.u32 %v8226_v46, 16  ;;  %v1216_v5 = vrot.slane %v1214_v9, 4  ;;  %vm8267_vm13 = vmor %vm2096_vm11, %vm2097_vm12 }
  0xa1   : > { %v1233_v59 = vshll.u32 %v8228_v48, 16  ;;  %v6271_v60 = vcombine.low %v1394_v38, %v1404_v55  ;;  %v1219_v61 = vrot.slane %v1217_v37, 5  ;;  %v8244_v1 = vld [vmem:[#allocation2 + $0x54] sm:$0xf]  ;;  %v788_v21 = vrot.slane %v786_v2, 7 }
  0xa2   : > { %v1225_v4 = vrot.slane %v1223_v56, 5  ;;  %v1229_v10 = vrot.slane %v1227_v25, 4  ;;  %v1238_v14 = vshrl.u32 %v8244_v1, 16  ;;  %v1241_v47 = vshll.u32 %v8244_v1, 16  ;;  %v981_v38 = vld [vmem:[#allocation2 + $0xa8] sm:$0xf] }
  0xa3   : > { %v1235_v13 = vrot.slane %v1233_v59, 5  ;;  %7165 = vmatmul.mubr.bf16.gmra.mxu1 %v6271_v60  ;;  %v1220_v15 = vor.u32 %v1219_v61, %v1216_v5  ;;  %v8247_v16 = vld [vmem:[#allocation2 + $0x58] sm:$0xf]  ;;  %v8249_v17 = vld [vmem:[#allocation2 + $0x5c] sm:$0x1]  ;;  %v429_v19 = vadd.f32 %v8095_v31, %v390_v43  ;;  %v789_v33 = vshll.u32 %v6696_v36, 16 }
  0xa4   : > { %v1230_v24 = vor.u32 %v1229_v10, %v1225_v4  ;;  %v1240_v53 = vrot.slane %v1238_v14, 4  ;;  %v1247_v18 = vshll.u32 %v8247_v16, 16  ;;  %v1251_v6 = vshrl.u32 %v8247_v16, 16  ;;  %v2048_v60 = vld [vmem:[#allocation2] sm:$0xe] }
  0xa5   : > { %v1221_v22 = vrot.slane %v1220_v15, 4  ;;  %v1243_v29 = vrot.slane %v1241_v47, 5  ;;  %v1257_v30 = vshll.u32 %v8249_v17, 16  ;;  %v792_v55 = vrot.slane %v788_v21, 4  ;;  %v2049_v10 = vld [vmem:[#allocation2 + $0xc] sm:$0xe] }
  0xa6   : > { %v1231_v39 = vrot.slane %v1230_v24, 4  ;;  %v1249_v9 = vrot.slane %v1247_v18, 5  ;;  %v1253_v37 = vrot.slane %v1251_v6, 4  ;;  %v791_v59 = vor.u32 %v789_v33, %v788_v21  ;;  %v985_v6 = vld [vmem:[#allocation2 + $0xb0] sm:$0x1] }
  0xa7   : > { %v1226_v56 = vsel %vm7831_vm3, %v1221_v22, %v1225_v4  ;;  %v1244_v43 = vor.u32 %v1243_v29, %v1240_v53  ;;  %v1259_v25 = vrot.slane %v1257_v30, 5  ;;  %v794_v2 = vshrl.u32 %v8223_v42, 16 }
  0xa8   : > { %v1236_v5 = vsel %vm7831_vm3, %v1231_v39, %v1235_v13  ;;  %v1254_v61 = vor.u32 %v1253_v37, %v1249_v9  ;;  %v797_v36 = vshll.u32 %v8223_v42, 16  ;;  %v982_v47 = vsel %vm7874_vm10, %v791_v59, %v981_v38 }
  0xa9   : > { %v6264_v14 = vcombine.low %v1226_v56, %v1236_v5  ;;  %v1245_v15 = vrot.slane %v1244_v43, 4  ;;  %v430_v4 = vadd.f32 %v8095_v31, %v391_v49  ;;  %v796_v53 = vrot.slane %v794_v2, 7  ;;  %983 = vst [vmem:[#allocation2 + $0xa8] sm:$0xf] %v982_v47  ;;  %v2050_v43 = vld [vmem:[#allocation2 + $0x18] sm:$0xe] }
  0xaa   : > { %v1255_v24 = vrot.slane %v1254_v61, 4  ;;  %v461_v21 = vmax.f32 %v429_v19, 0.0  ;;  %v10572_v13 = vmov 0  ;;  %v6306_v18 = vrot.slane %v2048_v60, 9  ;;  %v8289_v47 = vld [vmem:[#allocation2 + $0xc] sm:$0xf] }
  0xab   : > { %v10573_v13 = vsel %vm8267_vm13, 4294967295, %v10572_v13  ;;  %7152 = vmatprep.mubr.bf16.mxu0 %v6264_v14  ;;  %v1250_v42 = vsel %vm7831_vm3, %v1245_v15, %v1249_v9  ;;  %v462_v22 = vmax.f32 %v430_v4, 0.0  ;;  %v2101_v29 = vrot.slane %v8235_v51, 5  ;;  %v988_v14 = vld [vmem:[#allocation2 + $0xb4] sm:$0xf] }
  0xac   : > { %10574 = vst [vmem:[#allocation6_spill] sm:$0xff] %v10573_v13  ;;  %v6307_v31 = vrot.slane %v2049_v10, 9  ;;  %v1260_v49 = vsel %vm7831_vm3, %v1255_v24, %v1259_v25  ;;  %v799_v19 = vor.u32 %v797_v36, %v796_v53  ;;  %v801_v30 = vrot.slane %v796_v53, 4  ;;  %v8286_v36 = vld [vmem:[#allocation2 + $0x10] sm:$0xf] }
  0xad   : > { %v6698_v33 = vpack.c.bf16 %v461_v21, %v461_v21  ;;  %v6265_v38 = vcombine.low %v1250_v42, %v1260_v49  ;;  %v6699_v39 = vpack.c.bf16 %v462_v22, %v462_v22  ;;  %v2102_v37 = vsel %vm8267_vm13, %v6306_v18, %v2101_v29  ;;  %v8297_v18 = vld [vmem:[#allocation2 + $0x1c] sm:$0xf] }
  0xae   : > { %v2103_v56 = vrot.slane %v2101_v29, 4  ;;  %v800_v9 = vsel %vm7867_vm9, %v792_v55, %v799_v19  ;;  %v986_v59 = vsel %vm7859_vm8, %v801_v30, %v985_v6  ;;  %v2108_v10 = vrot.slane %v8286_v36, 5  ;;  %v992_v19 = vld [vmem:[#allocation2 + $0xbc] sm:$0x1] }
  0xaf   : > { %v803_v60 = vshrl.u32 %v6698_v33, 16  ;;  %v806_v5 = vshll.u32 %v6698_v33, 16  ;;  %7153 = vmatmul.mubr.bf16.gmra.mxu0 %v6265_v38  ;;  %984 = vst [vmem:[#allocation2 + $0xac] sm:$0xf] %v800_v9  ;;  %987 = vst [vmem:[#allocation2 + $0xb0] sm:$0x1] %v986_v59 }
  0xb0   : > { %v811_v25 = vshrl.u32 %v6699_v39, 16  ;;  %v814_v61 = vshll.u32 %v6699_v39, 16  ;;  %v2105_v2 = vsel %vm8267_vm13, %v2103_v56, %v2104_v52  ;;  %v6308_v24 = vrot.slane %v2050_v43, 9  ;;  %v8293_v53 = vld [vmem:[#allocation2 + $0xa8] sm:$0xf] }
  0xb1   : > { %v805_v55 = vrot.slane %v803_v60, 7  ;;  %v6338_v15 = vcombine.low %v2102_v37, %v2105_v2  ;;  %v2109_v7 = vsel %vm8267_vm13, %v6307_v31, %v2108_v10  ;;  %v2110_v52 = vrot.slane %v2108_v10, 4  ;;  %v2051_v39 = vld [vmem:[#allocation2 + $0x24] sm:$0xe] }
  0xb2   : > { %v813_v21 = vrot.slane %v811_v25, 7  ;;  %v2115_v42 = vrot.slane %v8297_v18, 5  ;;  %v1406_v6 = vshrl.u32 %v8293_v53, 16  ;;  %v1409_v22 = vshll.u32 %v8293_v53, 16  ;;  %v7612_v25 = vld [vmem:[%s10545_s1 + $0x130] sm:$0xff]  }
  0xb3   : > { %v808_v29 = vor.u32 %v806_v5, %v805_v55  ;;  %v809_v49 = vrot.slane %v805_v55, 4  ;;  %7236 = vmatprep.mubr.bf16.mxu0 %v6338_v15  ;;  %v2112_v31 = vsel %vm8267_vm13, %v2110_v52, %v2111_v8  ;;  %v7710_v5 = vld [vmem:[#allocation2 + $0x20] sm:$0x1]  ;;  %v8321_v55 = vld [vmem:[#allocation2 + $0x18] sm:$0xf]  ;;  %v6309_v15 = vrot.slane %v2051_v39, 9 }
  0xb4   : > { %v816_v30 = vor.u32 %v814_v61, %v813_v21  ;;  %v818_v33 = vrot.slane %v813_v21, 4  ;;  %v2116_v38 = vsel %vm8267_vm13, %v6308_v24, %v2115_v42  ;;  %v1408_v37 = vrot.slane %v1406_v6, 4  ;;  %v8325_v24 = vld [vmem:[#allocation2 + $0x28] sm:$0xf] }
  0xb5   : > { %v1411_v56 = vrot.slane %v1409_v22, 5  ;;  %v989_v43 = vsel %vm7874_vm10, %v808_v29, %v988_v14  ;;  %v6339_v9 = vcombine.low %v2109_v7, %v2112_v31  ;;  %v2117_v60 = vrot.slane %v2115_v42, 4  ;;  %v2052_v22 = vld [vmem:[#allocation2 + $0x30] sm:$0xe]  ;;  %v7616_v31 = vld [vmem:[%s10545_s1 + $0x128] sm:$0xff]  }
  0xb6   : > { %v817_v59 = vsel %vm7867_vm9, %v809_v49, %v816_v30  ;;  %990 = vst [vmem:[#allocation2 + $0xb4] sm:$0xf] %v989_v43  ;;  %v993_v20 = vsel %vm7859_vm8, %v818_v33, %v992_v19  ;;  %v2118_v8 = vrot.slane %v7710_v5, 5  ;;  %v8317_v61 = vld [vmem:[#allocation2 + $0xac] sm:$0xf]  ;;  %v2122_v21 = vrot.slane %v8325_v24, 5 }
  0xb7   : > { %v8319_v2 = vld [vmem:[#allocation2 + $0xb0] sm:$0x1]  ;;  %v1412_v10 = vor.u32 %v1411_v56, %v1408_v37  ;;  %991 = vst [vmem:[#allocation2 + $0xb8] sm:$0xf] %v817_v59  ;;  %994 = vst [vmem:[#allocation2 + $0xbc] sm:$0x1] %v993_v20  ;;  %7237 = vmatmul.mubr.bf16.vlgmr.msra.gmra.mxu0 %v6339_v9 }
  0xb8   : > { %v1415_v7 = vshll.u32 %v8317_v61, 16  ;;  %v1419_v52 = vshrl.u32 %v8317_v61, 16  ;;  %v1425_v42 = vshll.u32 %v8319_v2, 16  ;;  %v2119_v6 = vsel %vm8267_vm13, %v2117_v60, %v2118_v8  ;;  %v7713_v49 = vld [vmem:[%s10545_s1 + $0x138] sm:$0xff]   ;;  %v7714_v43 = vld [vmem:[#allocation2 + $0x2c] sm:$0x1] }
  0xb9   : > { %v1413_v29 = vrot.slane %v1412_v10, 4  ;;  %7317 = vmatpush3.bf16.msra.mxu0 %v7713_v49  ;;  %v6340_v19 = vcombine.low %v2116_v38, %v2119_v6  ;;  %v2123_v30 = vsel %vm8267_vm13, %v6309_v15, %v2122_v21  ;;  %v2124_v33 = vrot.slane %v2122_v21, 4  ;;  %v2053_v59 = vld [vmem:[#allocation2 + $0x3c] sm:$0xe]  ;;  %v8341_v20 = vld [vmem:[#allocation2 + $0x24] sm:$0xf] }
  0xba   : > { %v1417_v39 = vrot.slane %v1415_v7, 5  ;;  %v1421_v37 = vrot.slane %v1419_v52, 4  ;;  %v1427_v56 = vrot.slane %v1425_v42, 5  ;;  %v2125_v9 = vrot.slane %v7714_v43, 5  ;;  %7318 = vmatprep.subr.bf16.mxu0 %v7612_v25 }
  0xbb   : > { %7240 = vmatprep.mubr.bf16.mxu0 %v6340_v19  ;;  %v6310_v60 = vrot.slane %v2052_v22, 9  ;;  %v2129_v5 = vrot.slane %v8113_v57, 5  ;;  %v2132_v8 = vrot.slane %v8115_v58, 5  ;;  %v6311_v49 = vrot.slane %v2053_v59, 9  ;;  %v7620_v58 = vld [vmem:[%s10545_s1 + $0x120] sm:$0xff]  }
  0xbc   : > { %v1418_v10 = vsel %vm7831_vm3, %v1413_v29, %v1417_v39  ;;  %v1422_v15 = vor.u32 %v1421_v37, %v1417_v39  ;;  %v2126_v21 = vsel %vm8267_vm13, %v2124_v33, %v2125_v9  ;;  %v2136_v7 = vrot.slane %v8129_v44, 5 }
  0xbd   : > { %v8353_v52 = vld [vmem:[#allocation2 + $0xb4] sm:$0xf]  ;;  %v6341_v42 = vcombine.low %v2123_v30, %v2126_v21  ;;  %7319 = vmatpush3.bf16.msra.mxu0 %v7612_v25  ;;  %v2130_v6 = vsel %vm8267_vm13, %v6310_v60, %v2129_v5  ;;  %v2131_v22 = vrot.slane %v2129_v5, 4  ;;  %v2054_v25 = vld [vmem:[#allocation2 + $0x48] sm:$0xe] }
  0xbe   : > { %v1423_v29 = vrot.slane %v1422_v15, 4  ;;  %v8360_v19 = vld [vmem:[#allocation2 + $0xb8] sm:$0xf]  ;;  %v8362_v33 = vld [vmem:[#allocation2 + $0xbc] sm:$0x1]  ;;  %v1430_v39 = vshrl.u32 %v8353_v52, 16  ;;  %7320 = vmatprep.subr.bf16.mxu0 %v7616_v31 }
  0xbf   : > { %v1433_v43 = vshll.u32 %v8353_v52, 16  ;;  %v1439_v9 = vshll.u32 %v8360_v19, 16  ;;  %v1443_v59 = vshrl.u32 %v8360_v19, 16  ;;  %v1449_v60 = vshll.u32 %v8362_v33, 16  ;;  %v2055_v5 = vld [vmem:[#allocation2 + $0x54] sm:$0xe]  ;;  %7241 = vmatmul.mubr.bf16.gmra.mxu0 %v6341_v42 }
  0xc0   : > { %v1428_v15 = vsel %vm7831_vm3, %v1423_v29, %v1427_v56  ;;  %v1432_v21 = vrot.slane %v1430_v39, 4  ;;  %v2133_v30 = vsel %vm8267_vm13, %v2131_v22, %v2132_v8  ;;  %v2137_v56 = vsel %vm8267_vm13, %v6311_v49, %v2136_v7 }
  0xc1   : > { %v6272_v37 = vcombine.low %v1418_v10, %v1428_v15  ;;  %v1435_v38 = vrot.slane %v1433_v43, 5  ;;  %v1441_v14 = vrot.slane %v1439_v9, 5  ;;  %v1445_v4 = vrot.slane %v1443_v59, 4  ;;  %7321 = vmatpush3.bf16.msra.mxu0 %v7616_v31 }
  0xc2   : > { %v1451_v54 = vrot.slane %v1449_v60, 5  ;;  %v6342_v62 = vcombine.low %v2130_v6, %v2133_v30  ;;  %v2138_v42 = vrot.slane %v2136_v7, 4  ;;  %7322 = vmatprep.subr.bf16.mxu0 %v7620_v58  ;;  %v2139_v10 = vrot.slane %v8131_v0, 5  ;;  %v2056_v6 = vld [vmem:[#allocation2 + $0x60] sm:$0xe] }
  0xc3   : > { %7168 = vmatprep.mubr.bf16.mxu1 %v6272_v37  ;;  %v1436_v8 = vor.u32 %v1435_v38, %v1432_v21  ;;  %v1446_v22 = vor.u32 %v1445_v4, %v1441_v14  ;;  %v6312_v29 = vrot.slane %v2054_v25, 9  ;;  %v2143_v31 = vrot.slane %v8226_v46, 5  ;;  %v2057_v4 = vld [vmem:[#allocation2 + $0x6c] sm:$0xe]  ;;  %v7628_v25 = vld [vmem:[%s10545_s1 + $0x110] sm:$0xff]  }
  0xc4   : > { %7244 = vmatprep.mubr.bf16.mxu0 %v6342_v62  ;;  %v2146_v39 = vrot.slane %v8228_v48, 5  ;;  %v6313_v43 = vrot.slane %v2055_v5, 9  ;;  %v2150_v9 = vrot.slane %v8247_v16, 5  ;;  %v2140_v7 = vsel %vm8267_vm13, %v2138_v42, %v2139_v10  ;;  %v2058_v5 = vld [vmem:[#allocation2 + $0x78] sm:$0xe] }
  0xc5   : > { %v1437_v30 = vrot.slane %v1436_v8, 4  ;;  %v1447_v59 = vrot.slane %v1446_v22, 4  ;;  %v2153_v38 = vrot.slane %v8249_v17, 5  ;;  %7323 = vmatpush3.bf16.msra.mxu0 %v7620_v58  ;;  %v6343_v0 = vcombine.low %v2137_v56, %v2140_v7  ;;  %v8407_v42 = vld [vmem:[#allocation2 + $0x64] sm:$0xf] }
  0xc6   : > { %v2144_v62 = vsel %vm8267_vm13, %v6312_v29, %v2143_v31  ;;  %v2145_v49 = vrot.slane %v2143_v31, 4  ;;  %v8394_v48 = vsel %vm8267_vm13, %v6313_v43, %v2150_v9  ;;  %7324 = vmatprep.subr.bf16.mxu0 %v7624_v23  ;;  %v2152_v58 = vrot.slane %v2150_v9, 4  ;;  %v2059_v31 = vld [vmem:[#allocation2 + $0x84] sm:$0xe]  ;;  %v2060_v7 = vld [vmem:[#allocation2 + $0x90] sm:$0xe] }
  0xc7   : > { %v1442_v37 = vsel %vm7831_vm3, %v1437_v30, %v1441_v14  ;;  %v1452_v17 = vsel %vm7831_vm3, %v1447_v59, %v1451_v54  ;;  %7245 = vmatmul.mubr.bf16.gmra.mxu0 %v6343_v0  ;;  %v6314_v56 = vrot.slane %v2056_v6, 9  ;;  %v2157_v8 = vrot.slane %v8407_v42, 5  ;;  %v8412_v54 = vld [vmem:[#allocation2 + $0x60] sm:$0xf]  ;;  %v8422_v30 = vld [vmem:[#allocation2 + $0x70] sm:$0xf] }
  0xc8   : > { %v6273_v15 = vcombine.low %v1442_v37, %v1452_v17  ;;  %v2147_v21 = vsel %vm8267_vm13, %v2145_v49, %v2146_v39  ;;  %v2154_v14 = vsel %vm8267_vm13, %v2152_v58, %v2153_v38  ;;  %v6315_v29 = vrot.slane %v2057_v4, 9  ;;  %v7632_v39 = vld [vmem:[%s10545_s1 + $0x108] sm:$0xff]   ;;  %v7719_v38 = vld [vmem:[#allocation2 + $0x74] sm:$0x1] }
  0xc9   : > { %v6344_v22 = vcombine.low %v2144_v62, %v2147_v21  ;;  %7325 = vmatpush3.bf16.msra.mxu0 %v7624_v23  ;;  %v6345_v43 = vcombine.low %v8394_v48, %v2154_v14  ;;  %v2158_v9 = vsel %vm8267_vm13, %v6314_v56, %v2157_v8  ;;  %v2159_v6 = vrot.slane %v2157_v8, 4  ;;  %v8428_v0 = vld [vmem:[#allocation2 + $0x6c] sm:$0xf]  ;;  %v8432_v48 = vld [vmem:[#allocation2 + $0x7c] sm:$0xf] }
  0xca   : > { %7169 = vmatmul.mubr.bf16.gmra.mxu1 %v6273_v15  ;;  %v2164_v59 = vrot.slane %v8422_v30, 5  ;;  %7326 = vmatprep.subr.bf16.mxu0 %v7628_v25  ;;  %v10575_v23 = vcombine.low %v8233_v50, %v8235_v51  ;;  %v2167_v4 = vrot.slane %v7719_v38, 5  ;;  %v6316_v49 = vrot.slane %v2058_v5, 9  ;;  %v7722_v15 = vld [vmem:[#allocation2 + $0x80] sm:$0x1] }
  0xcb   : > { %7248 = vmatprep.mubr.bf16.mxu0 %v6344_v22  ;;  %v2171_v37 = vrot.slane %v8432_v48, 5  ;;  %v10576_v17 = vrot.slane %v8216_v35, 5  ;;  %v2174_v21 = vrot.slane %v7722_v15, 5  ;;  %v2061_v56 = vld [vmem:[#allocation2 + $0x9c] sm:$0xe]  ;;  %v2206_v35 = vrot.slane %v8360_v19, 5 }
  0xcc   : > { %7188 = vmatprep.mubr.bf16.mxu1 %v10575_v23  ;;  %v8441_v50 = vsel %vm8267_vm13, %v6315_v29, %v2164_v59  ;;  %v2166_v51 = vrot.slane %v2164_v59, 4  ;;  %v8447_v14 = vld [vmem:[#allocation2 + $0x78] sm:$0xf]  ;;  %v8455_v59 = vld [vmem:[#allocation2 + $0x88] sm:$0xf] }
  0xcd   : > { %v2161_v58 = vsel %vm8267_vm13, %v2159_v6, %v10576_v17  ;;  %v8445_v5 = vsel %vm8267_vm13, %v6316_v49, %v2171_v37  ;;  %v2173_v22 = vrot.slane %v2171_v37, 4  ;;  %7327 = vmatpush3.bf16.msra.mxu0 %v7628_v25  ;;  %v6317_v6 = vrot.slane %v2059_v31, 9  ;;  %v7725_v23 = vld [vmem:[#allocation2 + $0x8c] sm:$0x1]  ;;  %v7636_v49 = vld [vmem:[%s10545_s1 + $0x100] sm:$0xff]   ;;  %v7610_v25 = vld [vmem:[%s10545_s1 + $0xf0] sm:$0xff]  }
  0xce   : > { %v6346_v8 = vcombine.low %v2158_v9, %v2161_v58  ;;  %v8453_v29 = vsel %vm8267_vm13, %v2166_v51, %v2167_v4  ;;  %v2178_v9 = vrot.slane %v8455_v59, 5  ;;  %v2181_v38 = vrot.slane %v7725_v23, 5  ;;  %7328 = vmatprep.subr.bf16.mxu0 %v7632_v39  ;;  %v8470_v37 = vld [vmem:[#allocation2 + $0x84] sm:$0xf]  ;;  %v2062_v51 = vld [vmem:[#allocation2 + $0xa8] sm:$0xe] }
  0xcf   : > { %v6347_v4 = vcombine.low %v8441_v50, %v8453_v29  ;;  %v8468_v31 = vsel %vm8267_vm13, %v2173_v22, %v2174_v21  ;;  %v6318_v58 = vrot.slane %v2060_v7, 9  ;;  %7249 = vmatmul.mubr.bf16.gmra.mxu0 %v6345_v43  ;;  %v2185_v29 = vrot.slane %v8166_v32, 5  ;;  %v2063_v21 = vld [vmem:[#allocation2 + $0xb4] sm:$0xe]  ;;  %v8535_v17 = vld [vmem:[#allocation2 + $0x14] sm:$0x1] }
  0xd0   : > { %v6348_v15 = vcombine.low %v8445_v5, %v8468_v31  ;;  %v8478_v23 = vsel %vm8267_vm13, %v6317_v6, %v2178_v9  ;;  %v2180_v50 = vrot.slane %v2178_v9, 4  ;;  %7252 = vmatprep.mubr.bf16.mxu0 %v6346_v8  ;;  %v2188_v22 = vrot.slane %v8168_v34, 5  ;;  %v8488_v5 = vld [vmem:[%s10545_s1 + $0x1b8] sm:$0xff]  }
  0xd1   : > { %v6319_v7 = vrot.slane %v2061_v56, 9  ;;  %v2192_v43 = vrot.slane %v8194_v12, 5  ;;  %7329 = vmatpush3.bf16.msra.mxu0 %v7632_v39  ;;  %v10577_v6 = vcombine.low %v8289_v47, %v8286_v36  ;;  %v8499_v34 = vsel %vm8267_vm13, %v6318_v58, %v2185_v29  ;;  %v7727_v9 = vld [vmem:[%s10545_s1 + $0xf8] sm:$0xff]   ;;  %v2919_v58 = vld [vmem:[#allocation2 + $0xc] sm:$0xf] }
  0xd2   : > { %v8495_v8 = vsel %vm8267_vm13, %v2180_v50, %v2181_v38  ;;  %v2187_v56 = vrot.slane %v2185_v29, 4  ;;  %v2195_v39 = vrot.slane %v8196_v27, 5  ;;  %7330 = vmatprep.subr.bf16.mxu0 %v7636_v49  ;;  %v10578_v36 = vcombine.low %v8321_v55, %v8297_v18  ;;  %v8516_v50 = vld [vmem:[#allocation2 + $0x10] sm:$0xf]  ;;  %v7614_v18 = vld [vmem:[%s10545_s1 + $0xe8] sm:$0xff]  }
  0xd3   : > { %7189 = vmatmul.mubr.bf16.vlgmr.msra.gmra.mxu1 %v10577_v6  ;;  %v8512_v38 = vsel %vm8267_vm13, %v6319_v7, %v2192_v43  ;;  %v2194_v31 = vrot.slane %v2192_v43, 4  ;;  %v6320_v29 = vrot.slane %v2062_v51, 9  ;;  %v2199_v7 = vrot.slane %v8317_v61, 5  ;;  %v8551_v62 = vld [vmem:[#allocation2 + $0x1c] sm:$0xf] }
  0xd4   : > { %7269 = vmatpush3.bf16.msra.mxu1 %v7727_v9  ;;  %7192 = vmatprep.mubr.bf16.mxu1 %v10578_v36  ;;  %v8523_v55 = vsel %vm8267_vm13, %v2187_v56, %v2188_v22  ;;  %v2202_v43 = vrot.slane %v8319_v2, 5  ;;  %v6321_v27 = vrot.slane %v2063_v21, 9  ;;  %v2922_v22 = vld [vmem:[#allocation2 + $0x18] sm:$0xf]  ;;  %v2209_v21 = vrot.slane %v8362_v33, 5  ;;  %10579 = vst [vmem:[#allocation7_spill] sm:$0xff] %v8551_v62 }
  0xd5   : > { %7270 = vmatprep.subr.bf16.mxu1 %v7610_v25  ;;  %v8531_v9 = vsel %vm8267_vm13, %v2194_v31, %v2195_v39  ;;  %7331 = vmatpush3.bf16.msra.mxu0 %v7636_v49  ;;  %v8541_v2 = vsel %vm8267_vm13, %v6320_v29, %v2199_v7  ;;  %v2201_v56 = vrot.slane %v2199_v7, 4  ;;  %v7618_v49 = vld [vmem:[%s10545_s1 + $0xe0] sm:$0xff]   ;;  %v2968_v31 = vshrl.u32 %v2919_v58, 16 }
  0xd6   : > { %7412 = vmatprep.subr.bf16.mxu0 %v8488_v5  ;;  %v2971_v36 = vshll.u32 %v2919_v58, 16  ;;  %v2208_v7 = vrot.slane %v2206_v35, 4  ;;  %v2977_v33 = vshll.u32 %v8516_v50, 16  ;;  %v2981_v60 = vshrl.u32 %v8516_v50, 16  ;;  %v2925_v51 = vld [vmem:[#allocation2 + $0x24] sm:$0xf] }
  0xd7   : > { %7253 = vmatmul.mubr.bf16.gmra.mxu0 %v6347_v4  ;;  %v8555_v29 = vsel %vm8267_vm13, %v2201_v56, %v2202_v43  ;;  %v2970_v58 = vrot.slane %v2968_v31, 4  ;;  %v10580_v4 = vcombine.low %v8341_v20, %v8325_v24  ;;  %v2987_v43 = vshll.u32 %v8535_v17, 16  ;;  %v8576_v56 = vld [vmem:[#allocation2 + $0x20] sm:$0x1] }
  0xd8   : > { %7271 = vmatpush3.bf16.msra.mxu1 %v7610_v25  ;;  %v8559_v25 = vsel %vm8267_vm13, %v6321_v27, %v2206_v35  ;;  %7256 = vmatprep.mubr.bf16.mxu0 %v6348_v15  ;;  %v2973_v10 = vrot.slane %v2971_v36, 5  ;;  %v7622_v27 = vld [vmem:[%s10545_s1 + $0xd8] sm:$0xff]   ;;  %v8573_v35 = vsel %vm8267_vm13, %v2208_v7, %v2209_v21  ;;  %v2979_v15 = vrot.slane %v2977_v33, 5  ;;  %v8583_v21 = vld [vmem:[#allocation2 + $0x28] sm:$0xf] }
  0xd9   : > { %7272 = vmatprep.subr.bf16.mxu1 %v7614_v18  ;;  %v2992_v36 = vshrl.u32 %v2922_v22, 16  ;;  %v10581_v31 = vcombine.low %v8100_v45, %v8113_v57  ;;  %v2995_v39 = vshll.u32 %v2922_v22, 16  ;;  %v2989_v7 = vrot.slane %v2987_v43, 5 }
  0xda   : > { %v2974_v20 = vor.u32 %v2973_v10, %v2970_v58  ;;  %v3001_v6 = vshll.u32 %v8551_v62, 16  ;;  %v3005_v47 = vshrl.u32 %v8551_v62, 16  ;;  %v8588_v10 = vld [vmem:[#allocation2 + $0x2c] sm:$0x1]  ;;  %v3019_v22 = vshll.u32 %v2925_v51, 16 }
  0xdb   : > { %7193 = vmatmul.mubr.bf16.gmra.mxu1 %v10580_v4  ;;  %v2983_v4 = vrot.slane %v2981_v60, 4  ;;  %v2994_v33 = vrot.slane %v2992_v36, 4  ;;  %v2997_v57 = vrot.slane %v2995_v39, 5  ;;  %v3016_v60 = vshrl.u32 %v2925_v51, 16  ;;  %v2928_v58 = vld [vmem:[#allocation2 + $0x30] sm:$0xf] }
  0xdc   : > { %7196 = vmatprep.mubr.bf16.mxu1 %v10581_v31  ;;  %7273 = vmatpush3.bf16.msra.mxu1 %v7614_v18  ;;  %v2975_v3 = vrot.slane %v2974_v20, 4  ;;  %v3011_v18 = vshll.u32 %v8576_v56, 16  ;;  %v3003_v31 = vrot.slane %v3001_v6, 5  ;;  %v3007_v24 = vrot.slane %v3005_v47, 4  ;;  %v8592_v62 = vld [vmem:[#allocation2 + $0x34] sm:$0xf] }
  0xdd   : > { %7274 = vmatprep.subr.bf16.mxu1 %v7618_v49  ;;  %v2984_v45 = vor.u32 %v2983_v4, %v2979_v15  ;;  %v2998_v11 = vor.u32 %v2997_v57, %v2994_v33  ;;  %v10582_v39 = vcombine.low %v8478_v23, %v8495_v8  ;;  %v7626_v47 = vld [vmem:[%s10545_s1 + $0xd0] sm:$0xff]   ;;  %v3018_v51 = vrot.slane %v3016_v60, 4  ;;  %v8613_v60 = vld [vmem:[#allocation2 + $0x38] sm:$0x1] }
  0xde   : > { %v2980_v43 = vsel %vm7831_vm3, %v2975_v3, %v2979_v15  ;;  %v3013_v13 = vrot.slane %v3011_v18, 5  ;;  %v3008_v6 = vor.u32 %v3007_v24, %v3003_v31  ;;  %v3025_v20 = vshll.u32 %v8583_v21, 16 }
  0xdf   : > { %v2985_v36 = vrot.slane %v2984_v45, 4  ;;  %7257 = vmatmul.mubr.bf16.gmra.mxu0 %v10582_v39  ;;  %v10583_v3 = vcombine.low %v8499_v34, %v8523_v55  ;;  %v2999_v4 = vrot.slane %v2998_v11, 4  ;;  %v3029_v23 = vshrl.u32 %v8583_v21, 16  ;;  %v2931_v34 = vld [vmem:[#allocation2 + $0x3c] sm:$0xf] }
  0xe0   : > { %7275 = vmatpush3.bf16.msra.mxu1 %v7618_v49  ;;  %v3021_v49 = vrot.slane %v3019_v22, 5  ;;  %v3035_v8 = vshll.u32 %v8588_v10, 16  ;;  %v10584_v33 = vcombine.low %v8121_v63, %v8129_v44  ;;  %v3009_v45 = vrot.slane %v3008_v6, 4  ;;  %v8620_v44 = vld [vmem:[#allocation2 + $0x40] sm:$0xf] }
  0xe1   : > { %7276 = vmatprep.subr.bf16.mxu1 %v7622_v27  ;;  %7260 = vmatprep.mubr.bf16.mxu0 %v10583_v3  ;;  %v2990_v15 = vsel %vm7831_vm3, %v2985_v36, %v2989_v7  ;;  %v3027_v18 = vrot.slane %v3025_v20, 5  ;;  %v10585_v55 = vcombine.low %v8221_v40, %v8226_v46  ;;  %v3004_v11 = vsel %vm7831_vm3, %v2999_v4, %v3003_v31  ;;  %v8634_v4 = vld [vmem:[#allocation2 + $0x44] sm:$0x1] }
  0xe2   : > { %v8611_v24 = vcombine.low %v2980_v43, %v2990_v15  ;;  %v3022_v57 = vor.u32 %v3021_v49, %v3018_v51  ;;  %v3031_v7 = vrot.slane %v3029_v23, 4  ;;  %v3037_v22 = vrot.slane %v3035_v8, 5  ;;  %v7630_v43 = vld [vmem:[%s10545_s1 + $0xc8] sm:$0xff]  }
  0xe3   : > { %7197 = vmatmul.mubr.bf16.gmra.mxu1 %v10584_v33  ;;  %v3040_v63 = vshrl.u32 %v2928_v58, 16  ;;  %v3014_v36 = vsel %vm7831_vm3, %v3009_v45, %v3013_v13  ;;  %v3043_v40 = vshll.u32 %v2928_v58, 16  ;;  %v3049_v46 = vshll.u32 %v8592_v62, 16  ;;  %v2934_v13 = vld [vmem:[#allocation2 + $0x48] sm:$0xf] }
  0xe4   : > { %7200 = vmatprep.mubr.bf16.mxu1 %v10585_v55  ;;  %7277 = vmatpush3.bf16.msra.mxu1 %v7622_v27  ;;  %v3023_v39 = vrot.slane %v3022_v57, 4  ;;  %v8628_v27 = vcombine.low %v3004_v11, %v3014_v36  ;;  %v3032_v31 = vor.u32 %v3031_v7, %v3027_v18  ;;  %v3053_v51 = vshrl.u32 %v8592_v62, 16  ;;  %v8636_v45 = vld [vmem:[#allocation2 + $0x4c] sm:$0xf] }
  0xe5   : > { %7278 = vmatprep.subr.bf16.mxu1 %v7626_v47  ;;  %v3042_v6 = vrot.slane %v3040_v63, 4  ;;  %v3045_v20 = vrot.slane %v3043_v40, 5  ;;  %v3051_v3 = vrot.slane %v3049_v46, 5  ;;  %v3059_v15 = vshll.u32 %v8613_v60, 16 }
  0xe6   : > { %v3028_v49 = vsel %vm7831_vm3, %v3023_v39, %v3027_v18  ;;  %v3033_v58 = vrot.slane %v3032_v31, 4  ;;  %v3055_v23 = vrot.slane %v3053_v51, 4  ;;  %v3064_v8 = vshrl.u32 %v2931_v34, 16  ;;  %v7634_v18 = vld [vmem:[%s10545_s1 + $0xc0] sm:$0xff]   ;;  %v8656_v51 = vld [vmem:[#allocation2 + $0x50] sm:$0x1] }
  0xe7   : > { %v3067_v33 = vshll.u32 %v2931_v34, 16  ;;  %v10586_v57 = vcombine.low %v8512_v38, %v8531_v9  ;;  %v3046_v55 = vor.u32 %v3045_v20, %v3042_v6  ;;  %v3061_v11 = vrot.slane %v3059_v15, 5  ;;  %v2937_v20 = vld [vmem:[#allocation2 + $0x54] sm:$0xf]  ;;  %v8667_v15 = vld [vmem:[#allocation2 + $0x58] sm:$0xf] }
  0xe8   : > { %7279 = vmatpush3.bf16.msra.mxu1 %v7626_v47  ;;  %v3073_v7 = vshll.u32 %v8620_v44, 16  ;;  %v3077_v47 = vshrl.u32 %v8620_v44, 16  ;;  %v10587_v34 = vcombine.low %v8541_v2, %v8555_v29  ;;  %v3038_v63 = vsel %vm7831_vm3, %v3033_v58, %v3037_v22  ;;  %v8664_v29 = vld [vmem:[%s10545_s1 + $0x178] sm:$0xff]  }
  0xe9   : > { %7261 = vmatmul.mubr.bf16.gmra.mxu0 %v10586_v57  ;;  %7280 = vmatprep.subr.bf16.mxu1 %v7630_v43  ;;  %v3056_v38 = vor.u32 %v3055_v23, %v3051_v3  ;;  %v3066_v9 = vrot.slane %v3064_v8, 4  ;;  %v3069_v36 = vrot.slane %v3067_v33, 5  ;;  %v10588_v39 = vcombine.low %v8244_v1, %v8247_v16 }
  0xea   : > { %7264 = vmatprep.mubr.bf16.mxu0 %v10587_v34  ;;  %v8654_v40 = vcombine.low %v3028_v49, %v3038_v63  ;;  %v3047_v46 = vrot.slane %v3046_v55, 4  ;;  %v3075_v31 = vrot.slane %v3073_v7, 5  ;;  %v3079_v6 = vrot.slane %v3077_v47, 4  ;;  %v2940_v63 = vld [vmem:[#allocation2 + $0x60] sm:$0xf] }
  0xeb   : > { %7201 = vmatmul.mubr.bf16.gmra.mxu1 %v10588_v39  ;;  %v10589_v2 = vcombine.low %v8412_v54, %v8407_v42  ;;  %v3057_v1 = vrot.slane %v3056_v38, 4  ;;  %v3070_v16 = vor.u32 %v3069_v36, %v3066_v9  ;;  %v3083_v22 = vshll.u32 %v8634_v4, 16  ;;  %v8680_v9 = vld [vmem:[#allocation2 + $0x5c] sm:$0x1]  ;;  %v8682_v36 = vld [vmem:[#allocation2 + $0x64] sm:$0xf] }
  0xec   : > { %7281 = vmatpush3.bf16.msra.mxu1 %v7630_v43  ;;  %v3088_v49 = vshrl.u32 %v2934_v13, 16  ;;  %v3052_v58 = vsel %vm7831_vm3, %v3047_v46, %v3051_v3  ;;  %v3080_v23 = vor.u32 %v3079_v6, %v3075_v31  ;;  %v3091_v42 = vshll.u32 %v2934_v13, 16 }
  0xed   : > { %7204 = vmatprep.mubr.bf16.mxu1 %v10589_v2  ;;  %7282 = vmatprep.subr.bf16.mxu1 %v7634_v18  ;;  %v3097_v54 = vshll.u32 %v8636_v45, 16  ;;  %v3062_v43 = vsel %vm7831_vm3, %v3057_v1, %v3061_v11  ;;  %v3071_v8 = vrot.slane %v3070_v16, 4  ;;  %v3085_v33 = vrot.slane %v3083_v22, 5 }
  0xee   : > { %v3090_v57 = vrot.slane %v3088_v49, 4  ;;  %v8674_v55 = vcombine.low %v3052_v58, %v3062_v43  ;;  %v3081_v7 = vrot.slane %v3080_v23, 4  ;;  %v3093_v47 = vrot.slane %v3091_v42, 5  ;;  %v8698_v42 = vld [vmem:[#allocation2 + $0x68] sm:$0x1] }
  0xef   : > { %v3099_v34 = vrot.slane %v3097_v54, 5  ;;  %v3076_v3 = vsel %vm7831_vm3, %v3071_v8, %v3075_v31  ;;  %v3101_v13 = vshrl.u32 %v8636_v45, 16  ;;  %v3107_v38 = vshll.u32 %v8656_v51, 16 }
  0xf0   : > { %7283 = vmatpush3.bf16.msra.mxu1 %v7634_v18  ;;  %v3112_v11 = vshrl.u32 %v2937_v20, 16  ;;  %v10590_v39 = vcombine.low %v8559_v25, %v8573_v35  ;;  %v3086_v18 = vsel %vm7831_vm3, %v3081_v7, %v3085_v33  ;;  %v3094_v46 = vor.u32 %v3093_v47, %v3090_v57  ;;  %v2943_v7 = vld [vmem:[#allocation2 + $0x6c] sm:$0xf] }
  0xf1   : > { %7364 = vmatprep.subr.bf16.mxu1 %v8664_v29  ;;  %v3115_v31 = vshll.u32 %v2937_v20, 16  ;;  %v3121_v6 = vshll.u32 %v8667_v15, 16  ;;  %v8692_v2 = vcombine.low %v3076_v3, %v3086_v18  ;;  %v3103_v1 = vrot.slane %v3101_v13, 4  ;;  %v8713_v18 = vld [vmem:[#allocation2 + $0x74] sm:$0x1] }
  0xf2   : > { %7265 = vmatmul.mubr.bf16.gmra.mxu0 %v10590_v39  ;;  %v3109_v16 = vrot.slane %v3107_v38, 5  ;;  %v3114_v22 = vrot.slane %v3112_v11, 4  ;;  %v10591_v25 = vcombine.low %v8428_v0, %v8422_v30  ;;  %v3095_v35 = vrot.slane %v3094_v46, 4  ;;  %v8707_v11 = vld [vmem:[#allocation2 + $0x70] sm:$0xf] }
  0xf3   : > { %7332 = vmatprep.mubr.bf16.mxu0 %v8611_v24  ;;  %v3117_v49 = vrot.slane %v3115_v31, 5  ;;  %v3123_v58 = vrot.slane %v3121_v6, 5  ;;  %v3125_v23 = vshrl.u32 %v8667_v15, 16  ;;  %v10592_v20 = vcombine.low %v8447_v14, %v8432_v48  ;;  %v7644_v48 = vld [vmem:[%s10545_s1 + $0x1b0] sm:$0xff]  }
  0xf4   : > { %7205 = vmatmul.mubr.bf16.gmra.mxu1 %v10591_v25  ;;  %v3104_v24 = vor.u32 %v3103_v1, %v3099_v34  ;;  %v3131_v54 = vshll.u32 %v8680_v9, 16  ;;  %v3136_v43 = vshrl.u32 %v2940_v63, 16  ;;  %v3139_v8 = vshll.u32 %v2940_v63, 16 }
  0xf5   : > { %7208 = vmatprep.mubr.bf16.mxu1 %v10592_v20  ;;  %v3100_v30 = vsel %vm7831_vm3, %v3095_v35, %v3099_v34  ;;  %v3118_v0 = vor.u32 %v3117_v49, %v3114_v22  ;;  %v3127_v33 = vrot.slane %v3125_v23, 4  ;;  %v3145_v57 = vshll.u32 %v8682_v36, 16  ;;  %v2946_v22 = vld [vmem:[#allocation2 + $0x78] sm:$0xf]  ;;  %v7648_v35 = vld [vmem:[%s10545_s1 + $0x1a8] sm:$0xff]  }
  0xf6   : > { %v3105_v47 = vrot.slane %v3104_v24, 4  ;;  %v3133_v3 = vrot.slane %v3131_v54, 5  ;;  %v3138_v13 = vrot.slane %v3136_v43, 4  ;;  %v3141_v38 = vrot.slane %v3139_v8, 5 }
  0xf7   : > { %v3119_v14 = vrot.slane %v3118_v0, 4  ;;  %v3128_v63 = vor.u32 %v3127_v33, %v3123_v58  ;;  %v3147_v39 = vrot.slane %v3145_v57, 5  ;;  %v3149_v34 = vshrl.u32 %v8682_v36, 16 }
  0xf8   : > { %v3110_v46 = vsel %vm7831_vm3, %v3105_v47, %v3109_v16  ;;  %v3142_v31 = vor.u32 %v3141_v38, %v3138_v13  ;;  %v3155_v6 = vshll.u32 %v8698_v42, 16  ;;  %v3160_v1 = vshrl.u32 %v2943_v7, 16  ;;  %v2949_v47 = vld [vmem:[#allocation2 + $0x84] sm:$0xf] }
  0xf9   : > { %v8719_v25 = vcombine.low %v3100_v30, %v3110_v46  ;;  %v3124_v49 = vsel %vm7831_vm3, %v3119_v14, %v3123_v58  ;;  %v3129_v23 = vrot.slane %v3128_v63, 4  ;;  %v3151_v20 = vrot.slane %v3149_v34, 4 }
  0xfa   : > { %7333 = vmatmul.mubr.bf16.vlgmr.msra.gmra.mxu0 %v8628_v27  ;;  %v3143_v16 = vrot.slane %v3142_v31, 4  ;;  %v3157_v24 = vrot.slane %v3155_v6, 5  ;;  %v3162_v54 = vrot.slane %v3160_v1, 4  ;;  %v3163_v43 = vshll.u32 %v2943_v7, 16  ;;  %v8745_v7 = vld [vmem:[#allocation2 + $0x80] sm:$0x1] }
  0xfb   : > { %7413 = vmatpush3.bf16.msra.mxu0 %v8488_v5  ;;  %7336 = vmatprep.mubr.bf16.mxu0 %v8654_v40  ;;  %v10593_v27 = vcombine.low %v8470_v37, %v8455_v59  ;;  %v3134_v8 = vsel %vm7831_vm3, %v3129_v23, %v3133_v3  ;;  %v3152_v30 = vor.u32 %v3151_v20, %v3147_v39  ;;  %v3169_v58 = vshll.u32 %v8707_v11, 16  ;;  %v8735_v5 = vld [vmem:[#allocation2 + $0x7c] sm:$0xf] }
  0xfc   : > { %7414 = vmatprep.subr.bf16.mxu0 %v7644_v48  ;;  %v3173_v0 = vshrl.u32 %v8707_v11, 16  ;;  %v10594_v40 = vcombine.low %v8159_v26, %v8166_v32  ;;  %v8740_v33 = vcombine.low %v3124_v49, %v3134_v8  ;;  %v3148_v59 = vsel %vm7831_vm3, %v3143_v16, %v3147_v39  ;;  %v7652_v26 = vld [vmem:[%s10545_s1 + $0x1a0] sm:$0xff]   ;;  %v8754_v49 = vld [vmem:[#allocation2 + $0x88] sm:$0xf] }
  0xfd   : > { %7209 = vmatmul.mubr.bf16.gmra.mxu1 %v10593_v27  ;;  %v3165_v37 = vrot.slane %v3163_v43, 5  ;;  %v3179_v57 = vshll.u32 %v8713_v18, 16  ;;  %v3153_v3 = vrot.slane %v3152_v30, 4  ;;  %v3171_v13 = vrot.slane %v3169_v58, 5 }
  0xfe   : > { %7212 = vmatprep.mubr.bf16.mxu1 %v10594_v40  ;;  %v3175_v38 = vrot.slane %v3173_v0, 4  ;;  %v3184_v14 = vshrl.u32 %v2946_v22, 16  ;;  %v3187_v34 = vshll.u32 %v2946_v22, 16  ;;  %v3193_v39 = vshll.u32 %v8735_v5, 16  ;;  %v2952_v22 = vld [vmem:[#allocation2 + $0x90] sm:$0xf] }
  0xff   : > { %7415 = vmatpush3.bf16.msra.mxu0 %v7644_v48  ;;  %v3166_v32 = vor.u32 %v3165_v37, %v3162_v54  ;;  %v3181_v63 = vrot.slane %v3179_v57, 5  ;;  %v3158_v46 = vsel %vm7831_vm3, %v3153_v3, %v3157_v24  ;;  %v3197_v1 = vshrl.u32 %v8735_v5, 16  ;;  %v8758_v54 = vld [vmem:[#allocation2 + $0x8c] sm:$0x1]  ;;  %v8774_v3 = vld [vmem:[#allocation2 + $0x94] sm:$0xf] }
 0x100   : > { %7416 = vmatprep.subr.bf16.mxu0 %v7648_v35  ;;  %v3176_v31 = vor.u32 %v3175_v38, %v3171_v13  ;;  %v3186_v6 = vrot.slane %v3184_v14, 4  ;;  %v8756_v48 = vcombine.low %v3148_v59, %v3158_v46  ;;  %v3189_v20 = vrot.slane %v3187_v34, 5  ;;  %v8781_v14 = vld [vmem:[#allocation2 + $0x98] sm:$0x1] }
 0x101   : > { %v3167_v23 = vrot.slane %v3166_v32, 4  ;;  %v3195_v16 = vrot.slane %v3193_v39, 5  ;;  %v3199_v27 = vrot.slane %v3197_v1, 4  ;;  %v3203_v24 = vshll.u32 %v8745_v7, 16  ;;  %v2955_v32 = vld [vmem:[#allocation2 + $0x9c] sm:$0xf] }
 0x102   : > { %7337 = vmatmul.mubr.bf16.gmra.mxu0 %v8674_v55  ;;  %v3177_v43 = vrot.slane %v3176_v31, 4  ;;  %v3208_v8 = vshrl.u32 %v2949_v47, 16  ;;  %v3190_v58 = vor.u32 %v3189_v20, %v3186_v6  ;;  %v3211_v0 = vshll.u32 %v2949_v47, 16  ;;  %v8788_v1 = vld [vmem:[#allocation2 + $0xa0] sm:$0xf] }
 0x103   : > { %7340 = vmatprep.mubr.bf16.mxu0 %v8692_v2  ;;  %7417 = vmatpush3.bf16.msra.mxu0 %v7648_v35  ;;  %v3172_v30 = vsel %vm7831_vm3, %v3167_v23, %v3171_v13  ;;  %v3217_v40 = vshll.u32 %v8754_v49, 16  ;;  %v10595_v59 = vcombine.low %v8187_v41, %v8194_v12  ;;  %v3200_v37 = vor.u32 %v3199_v27, %v3195_v16  ;;  %v7656_v2 = vld [vmem:[%s10545_s1 + $0x198] sm:$0xff]  }
 0x104   : > { %7418 = vmatprep.subr.bf16.mxu0 %v7652_v26  ;;  %v3182_v55 = vsel %vm7831_vm3, %v3177_v43, %v3181_v63  ;;  %v3205_v57 = vrot.slane %v3203_v24, 5  ;;  %v3210_v35 = vrot.slane %v3208_v8, 4  ;;  %v10596_v47 = vcombine.low %v8293_v53, %v8317_v61  ;;  %v7637_v24 = vld [vmem:[#allocation2 + $0xc] sm:$0xff]  }
 0x105   : > { %7213 = vmatmul.mubr.bf16.gmra.mxu1 %v10595_v59  ;;  %v8779_v13 = vcombine.low %v3172_v30, %v3182_v55  ;;  %v3191_v41 = vrot.slane %v3190_v58, 4  ;;  %v3213_v12 = vrot.slane %v3211_v0, 5  ;;  %v3219_v38 = vrot.slane %v3217_v40, 5 }
 0x106   : > { %7216 = vmatprep.mubr.bf16.mxu1 %v10596_v47  ;;  %v3201_v63 = vrot.slane %v3200_v37, 4  ;;  %v3221_v34 = vshrl.u32 %v8754_v49, 16  ;;  %v3227_v39 = vshll.u32 %v8758_v54, 16  ;;  %v3232_v46 = vshrl.u32 %v2952_v22, 16 }
 0x107   : > { %7419 = vmatpush3.bf16.msra.mxu0 %v7652_v26  ;;  %v3196_v31 = vsel %vm7831_vm3, %v3191_v41, %v3195_v16  ;;  %v3214_v53 = vor.u32 %v3213_v12, %v3210_v35  ;;  %v3235_v61 = vshll.u32 %v2952_v22, 16  ;;  %v3241_v6 = vshll.u32 %v8774_v3, 16  ;;  %v7660_v26 = vld [vmem:[%s10545_s1 + $0x190] sm:$0xff]   ;;  %v2958_v41 = vld [vmem:[#allocation2 + $0xa8] sm:$0xf] }
 0x108   : > { %v3206_v23 = vsel %vm7831_vm3, %v3201_v63, %v3205_v57  ;;  %7420 = vmatprep.subr.bf16.mxu0 %v7656_v2  ;;  %v3223_v20 = vrot.slane %v3221_v34, 4  ;;  %v3229_v43 = vrot.slane %v3227_v39, 5  ;;  %v3234_v27 = vrot.slane %v3232_v46, 4  ;;  %v8803_v57 = vld [vmem:[#allocation2 + $0xa4] sm:$0x1] }
 0x109   : > { %v8795_v8 = vcombine.low %v3196_v31, %v3206_v23  ;;  %v3215_v16 = vrot.slane %v3214_v53, 4  ;;  %v3237_v22 = vrot.slane %v3235_v61, 5  ;;  %v3243_v30 = vrot.slane %v3241_v6, 5  ;;  %v8816_v53 = vld [vmem:[#allocation2 + $0xac] sm:$0xf] }
 0x10a   : > { %7341 = vmatmul.mubr.bf16.gmra.mxu0 %v8719_v25  ;;  %v3224_v58 = vor.u32 %v3223_v20, %v3219_v38  ;;  %v3245_v0 = vshrl.u32 %v8774_v3, 16  ;;  %v3251_v40 = vshll.u32 %v8781_v14, 16  ;;  %v3256_v59 = vshrl.u32 %v2955_v32, 16 }
 0x10b   : > { %7344 = vmatprep.mubr.bf16.mxu0 %v8740_v33  ;;  %7421 = vmatpush3.bf16.msra.mxu0 %v7656_v2  ;;  %v3220_v55 = vsel %vm7831_vm3, %v3215_v16, %v3219_v38  ;;  %v3238_v37 = vor.u32 %v3237_v22, %v3234_v27  ;;  %v3259_v35 = vshll.u32 %v2955_v32, 16  ;;  %v3265_v47 = vshll.u32 %v8788_v1, 16  ;;  %v7664_v2 = vld [vmem:[%s10545_s1 + $0x188] sm:$0xff]   ;;  %v2961_v16 = vld [vmem:[#allocation2 + $0xb4] sm:$0xf]  ;;  %v7639_v22 = vld [vmem:[#allocation2 + $0x18] sm:$0xff]  }
 0x10c   : > { %v10597_v25 = vcombine.low %v8353_v52, %v8360_v19  ;;  %v3225_v12 = vrot.slane %v3224_v58, 4  ;;  %v3247_v63 = vrot.slane %v3245_v0, 4  ;;  %v3253_v34 = vrot.slane %v3251_v40, 5  ;;  %7422 = vmatprep.subr.bf16.mxu0 %v7660_v26 }
 0x10d   : > { %v3258_v33 = vrot.slane %v3256_v59, 4  ;;  %v3239_v38 = vrot.slane %v3238_v37, 4  ;;  %v3261_v39 = vrot.slane %v3259_v35, 5  ;;  %v3267_v32 = vrot.slane %v3265_v47, 5  ;;  %v7668_v59 = vld [vmem:[%s10545_s1 + $0x180] sm:$0xff]   ;;  %v7642_v47 = vld [vmem:[%s10545_s1 + $0x170] sm:$0xff]  }
 0x10e   : > { %7217 = vmatmul.mubr.bf16.gmra.mxu1 %v10597_v25  ;;  %v3269_v46 = vshrl.u32 %v8788_v1, 16  ;;  %v3230_v31 = vsel %vm7831_vm3, %v3225_v12, %v3229_v43  ;;  %v3248_v52 = vor.u32 %v3247_v63, %v3243_v30  ;;  %v3275_v19 = vshll.u32 %v8803_v57, 16  ;;  %v8836_v63 = vld [vmem:[#allocation2 + $0xb8] sm:$0xf] }
 0x10f   : > { %7284 = vmatprep.mubr.bf16.mxu1 %v7637_v24  ;;  %v3280_v61 = vshrl.u32 %v2958_v41, 16  ;;  %v8818_v6 = vcombine.low %v3220_v55, %v3230_v31  ;;  %v3244_v23 = vsel %vm7831_vm3, %v3239_v38, %v3243_v30  ;;  %7423 = vmatpush3.bf16.msra.mxu0 %v7660_v26  ;;  %v3262_v20 = vor.u32 %v3261_v39, %v3258_v33  ;;  %v8822_v24 = vld [vmem:[#allocation2 + $0xb0] sm:$0x1]  ;;  %v7641_v55 = vld [vmem:[#allocation2 + $0x24] sm:$0xff]  }
 0x110   : > { %v3271_v27 = vrot.slane %v3269_v46, 4  ;;  %v3249_v58 = vrot.slane %v3248_v52, 4  ;;  %v3277_v43 = vrot.slane %v3275_v19, 5  ;;  %v3283_v40 = vshll.u32 %v2958_v41, 16  ;;  %7424 = vmatprep.subr.bf16.mxu0 %v7664_v2 }
 0x111   : > { %v3282_v0 = vrot.slane %v3280_v61, 4  ;;  %v3263_v37 = vrot.slane %v3262_v20, 4  ;;  %v3289_v26 = vshll.u32 %v8816_v53, 16  ;;  %v3293_v30 = vshrl.u32 %v8816_v53, 16  ;;  %v6892_v20 = vld [vmem:[%s7807_s6 + $0x78] sm:$0xff]  }
 0x112   : > { %v3272_v35 = vor.u32 %v3271_v27, %v3267_v32  ;;  %7345 = vmatmul.mubr.bf16.gmra.mxu0 %v8756_v48  ;;  %v3254_v41 = vsel %vm7831_vm3, %v3249_v58, %v3253_v34  ;;  %v3285_v25 = vrot.slane %v3283_v40, 5  ;;  %v3299_v12 = vshll.u32 %v8822_v24, 16  ;;  %v8843_v48 = vld [vmem:[#allocation2 + $0xbc] sm:$0x1] }
 0x113   : > { %v3304_v33 = vshrl.u32 %v2961_v16, 16  ;;  %7348 = vmatprep.mubr.bf16.mxu0 %v8779_v13  ;;  %v8839_v38 = vcombine.low %v3244_v23, %v3254_v41  ;;  %v3268_v39 = vsel %vm7831_vm3, %v3263_v37, %v3267_v32  ;;  %v3291_v31 = vrot.slane %v3289_v26, 5  ;;  %7425 = vmatpush3.bf16.msra.mxu0 %v7664_v2  ;;  %v8849_v13 = vld [vmem:[%s10545_s1 + $0x238] sm:$0xff]   ;;  %v7643_v26 = vld [vmem:[#allocation2 + $0x30] sm:$0xff]  }
 0x114   : > { %v3273_v46 = vrot.slane %v3272_v35, 4  ;;  %v3286_v34 = vor.u32 %v3285_v25, %v3282_v0  ;;  %v3295_v52 = vrot.slane %v3293_v30, 4  ;;  %v3301_v19 = vrot.slane %v3299_v12, 5  ;;  %7426 = vmatprep.subr.bf16.mxu0 %v7668_v59 }
 0x115   : > { %v3306_v61 = vrot.slane %v3304_v33, 4  ;;  %v3307_v32 = vshll.u32 %v2961_v16, 16  ;;  %v3313_v23 = vshll.u32 %v8836_v63, 16  ;;  %v3317_v27 = vshrl.u32 %v8836_v63, 16  ;;  %v7645_v33 = vld [vmem:[#allocation2 + $0x3c] sm:$0xff]  }
 0x116   : > { %7285 = vmatmul.mubr.bf16.vlgmr.msra.gmra.mxu1 %v7639_v22  ;;  %v3278_v2 = vsel %vm7831_vm3, %v3273_v46, %v3277_v43  ;;  %v7646_v22 = vld [vmem:[%s10545_s1 + $0x168] sm:$0xff]   ;;  %v3287_v0 = vrot.slane %v3286_v34, 4  ;;  %v3296_v40 = vor.u32 %v3295_v52, %v3291_v31  ;;  %v6796_v16 = vunpack.c.l.bf16 %v6892_v20  ;;  %v7728_v34 = vld [vmem:[%s10546_s2] ss:$0 sm:$0xff] }
 0x117   : > { %7365 = vmatpush3.bf16.msra.mxu1 %v8664_v29  ;;  %7288 = vmatprep.mubr.bf16.mxu1 %v7641_v55  ;;  %v8859_v58 = vcombine.low %v3268_v39, %v3278_v2  ;;  %v3323_v29 = vshll.u32 %v8843_v48, 16  ;;  %v3673_v55 = vld [vmem:[#allocation2 + $0xc] sm:$0xe]  ;;  %v3309_v37 = vrot.slane %v3307_v32, 5  ;;  %v3315_v35 = vrot.slane %v3313_v23, 5 }
 0x118   : > { %7366 = vmatprep.subr.bf16.mxu1 %v7642_v47  ;;  %v3319_v43 = vrot.slane %v3317_v27, 4  ;;  %7427 = vmatpush3.bf16.msra.mxu0 %v7668_v59  ;;  %v3292_v30 = vsel %vm7831_vm3, %v3287_v0, %v3291_v31  ;;  %v3297_v41 = vrot.slane %v3296_v40, 4  ;;  %v6797_v12 = vunpack.c.h.bf16 %v6892_v20  ;;  %v3674_v59 = vld [vmem:[#allocation2 + $0x18] sm:$0xe]  ;;  %v7650_v31 = vld [vmem:[%s10545_s1 + $0x160] sm:$0xff]  }
 0x119   : > { %v3325_v25 = vrot.slane %v3323_v29, 5  ;;  %7508 = vmatprep.subr.bf16.mxu0 %v8849_v13  ;;  %v3310_v39 = vor.u32 %v3309_v37, %v3306_v61  ;;  %v392_v52 = vmul.f32 %v7728_v34, %v6796_v16  ;;  %v6442_v2 = vrot.slane %v3673_v55, 9  ;;  %v7729_v40 = vld [vmem:[%s10547_s3] ss:$0 sm:$0xff]  ;;  %v10599_v16 = vld [vmem:[#allocation7_spill] sm:$0xff] }
 0x11a   : > { %v3320_v46 = vor.u32 %v3319_v43, %v3315_v35  ;;  %7349 = vmatmul.mubr.bf16.gmra.mxu0 %v8795_v8  ;;  %v393_v20 = vmul.f32 %v7728_v34, %v6797_v12  ;;  %v3739_v61 = vrot.slane %v8516_v50, 5  ;;  %v3742_v32 = vrot.slane %v8535_v17, 5 }
 0x11b   : > { %7367 = vmatpush3.bf16.msra.mxu1 %v7642_v47  ;;  %v3302_v47 = vsel %vm7831_vm3, %v3297_v41, %v3301_v19  ;;  %7352 = vmatprep.mubr.bf16.mxu0 %v8818_v6  ;;  %v3311_v27 = vrot.slane %v3310_v39, 4  ;;  %v431_v29 = vadd.f32 %v7729_v40, %v392_v52  ;;  %v6443_v37 = vrot.slane %v3674_v59, 9  ;;  %v3675_v41 = vld [vmem:[#allocation2 + $0x24] sm:$0xe] }
 0x11c   : > { %7368 = vmatprep.subr.bf16.mxu1 %v7646_v22  ;;  %v8877_v23 = vcombine.low %v3292_v30, %v3302_v47  ;;  %v3321_v0 = vrot.slane %v3320_v46, 4  ;;  %v432_v8 = vadd.f32 %v7729_v40, %v393_v20  ;;  %v8884_v19 = vsel %vm8267_vm13, %v6442_v2, %v3739_v61  ;;  %v7647_v2 = vld [vmem:[#allocation2 + $0x48] sm:$0xff]  }
 0x11d   : > { %v3741_v50 = vrot.slane %v3739_v61, 4  ;;  %v3316_v17 = vsel %vm7831_vm3, %v3311_v27, %v3315_v35  ;;  %v463_v43 = vmax.f32 %v431_v29, 0.0  ;;  %v3746_v30 = vrot.slane %v10599_v16, 5  ;;  %v3677_v29 = vld [vmem:[#allocation2 + $0x3c] sm:$0xe] }
 0x11e   : > { %7289 = vmatmul.mubr.bf16.gmra.mxu1 %v7643_v26  ;;  %v3326_v6 = vsel %vm7831_vm3, %v3321_v0, %v3325_v25  ;;  %v7654_v26 = vld [vmem:[%s10545_s1 + $0x158] sm:$0xff]   ;;  %v464_v39 = vmax.f32 %v432_v8, 0.0  ;;  %v3749_v35 = vrot.slane %v8576_v56, 5  ;;  %v6444_v47 = vrot.slane %v3675_v41, 9  ;;  %v7658_v8 = vld [vmem:[%s10545_s1 + $0x150] sm:$0xff]  }
 0x11f   : > { %7292 = vmatprep.mubr.bf16.mxu1 %v7645_v33  ;;  %7369 = vmatpush3.bf16.msra.mxu1 %v7646_v22  ;;  %v8894_v12 = vcombine.low %v3316_v17, %v3326_v6  ;;  %v8898_v22 = vsel %vm8267_vm13, %v3741_v50, %v3742_v32  ;;  %v3676_v33 = vld [vmem:[#allocation2 + $0x30] sm:$0xe]  ;;  %v6700_v25 = vpack.c.bf16 %v463_v43, %v463_v43  ;;  %v3748_v52 = vrot.slane %v3746_v30, 4  ;;  %v7649_v32 = vld [vmem:[#allocation2 + $0x54] sm:$0xff]   ;;  %v995_v17 = vld [vmem:[#allocation2 + $0xc0] sm:$0xf] }
 0x120   : > { %7370 = vmatprep.subr.bf16.mxu1 %v7650_v31  ;;  %v6474_v46 = vcombine.low %v8884_v19, %v8898_v22  ;;  %v8905_v34 = vsel %vm8267_vm13, %v6443_v37, %v3746_v30  ;;  %v6701_v59 = vpack.c.bf16 %v464_v39, %v464_v39  ;;  %v3753_v20 = vrot.slane %v8583_v21, 5  ;;  %v7675_v19 = vld [vmem:[%s10545_s1 + $0x1f0] sm:$0xff]   ;;  %v7681_v22 = vld [vmem:[#allocation2 + $0x60] sm:$0xff]  }
 0x121   : > { %v3756_v61 = vrot.slane %v8588_v10, 5  ;;  %v820_v56 = vshrl.u32 %v6700_v25, 16  ;;  %v823_v27 = vshll.u32 %v6700_v25, 16  ;;  %v8911_v0 = vsel %vm8267_vm13, %v3748_v52, %v3749_v35  ;;  %v3678_v35 = vld [vmem:[#allocation2 + $0x48] sm:$0xe] }
 0x122   : > { %v6445_v40 = vrot.slane %v3676_v33, 9  ;;  %7353 = vmatmul.mubr.bf16.gmra.mxu0 %v8839_v38  ;;  %v828_v21 = vshrl.u32 %v6701_v59, 16  ;;  %v831_v50 = vshll.u32 %v6701_v59, 16  ;;  %v6475_v10 = vcombine.low %v8905_v34, %v8911_v0  ;;  %v3679_v59 = vld [vmem:[#allocation2 + $0x54] sm:$0xe]  ;;  %v7679_v0 = vld [vmem:[%s10545_s1 + $0x1e8] sm:$0xff]  }
 0x123   : > { %7371 = vmatpush3.bf16.msra.mxu1 %v7650_v31  ;;  %v8921_v31 = vsel %vm8267_vm13, %v6444_v47, %v3753_v20  ;;  %7356 = vmatprep.mubr.bf16.mxu0 %v8859_v58  ;;  %v822_v37 = vrot.slane %v820_v56, 7  ;;  %v3755_v6 = vrot.slane %v3753_v20, 4  ;;  %v3760_v38 = vrot.slane %v8592_v62, 5  ;;  %v999_v58 = vld [vmem:[#allocation2 + $0xc8] sm:$0x1] }
 0x124   : > { %7372 = vmatprep.subr.bf16.mxu1 %v7654_v26  ;;  %v3763_v43 = vrot.slane %v8613_v60, 5  ;;  %v830_v16 = vrot.slane %v828_v21, 7  ;;  %v6446_v30 = vrot.slane %v3677_v29, 9  ;;  %v3767_v41 = vrot.slane %v8620_v44, 5  ;;  %v7662_v60 = vld [vmem:[%s10545_s1 + $0x148] sm:$0xff]  }
 0x125   : > { %v3770_v39 = vrot.slane %v8634_v4, 5  ;;  %v825_v33 = vor.u32 %v823_v27, %v822_v37  ;;  %v826_v25 = vrot.slane %v822_v37, 4  ;;  %v8930_v52 = vsel %vm8267_vm13, %v3755_v6, %v3756_v61  ;;  %v7651_v27 = vld [vmem:[#allocation2 + $0x60] sm:$0xff]   ;;  %v4564_v34 = vld [vmem:[#allocation2 + $0x30] sm:$0xf] }
 0x126   : > { %7293 = vmatmul.mubr.bf16.gmra.mxu1 %v7647_v2  ;;  %v8934_v62 = vsel %vm8267_vm13, %v6445_v40, %v3760_v38  ;;  %v833_v44 = vor.u32 %v831_v50, %v830_v16  ;;  %v835_v4 = vrot.slane %v830_v16, 4  ;;  %v3762_v2 = vrot.slane %v3760_v38, 4  ;;  %v3680_v6 = vld [vmem:[#allocation2 + $0x60] sm:$0xe]  ;;  %v7653_v38 = vld [vmem:[#allocation2 + $0x6c] sm:$0xff]   ;;  %v7655_v40 = vld [vmem:[#allocation2 + $0x78] sm:$0xff]  }
 0x127   : > { %7296 = vmatprep.mubr.bf16.mxu1 %v7649_v32  ;;  %7373 = vmatpush3.bf16.msra.mxu1 %v7654_v26  ;;  %v6476_v26 = vcombine.low %v8921_v31, %v8930_v52  ;;  %v996_v20 = vsel %vm7874_vm10, %v825_v33, %v995_v17  ;;  %v8945_v61 = vsel %vm8267_vm13, %v6446_v30, %v3767_v41  ;;  %v3769_v32 = vrot.slane %v3767_v41, 4  ;;  %v3681_v33 = vld [vmem:[#allocation2 + $0x6c] sm:$0xe] }
 0x128   : > { %7374 = vmatprep.subr.bf16.mxu1 %v7658_v8  ;;  %v6447_v56 = vrot.slane %v3678_v35, 9  ;;  %v834_v29 = vsel %vm7867_vm9, %v826_v25, %v833_v44  ;;  %997 = vst [vmem:[#allocation2 + $0xc0] sm:$0xf] %v996_v20  ;;  %v1000_v50 = vsel %vm7859_vm8, %v835_v4, %v999_v58  ;;  %v8953_v37 = vsel %vm8267_vm13, %v3762_v2, %v3763_v43  ;;  %v3682_v4 = vld [vmem:[#allocation2 + $0x78] sm:$0xe] }
 0x129   : > { %v3774_v17 = vrot.slane %v8636_v45, 5  ;;  %998 = vst [vmem:[#allocation2 + $0xc4] sm:$0xf] %v834_v29  ;;  %1001 = vst [vmem:[#allocation2 + $0xc8] sm:$0x1] %v1000_v50  ;;  %v8960_v30 = vsel %vm8267_vm13, %v3769_v32, %v3770_v39  ;;  %v3777_v41 = vrot.slane %v8656_v51, 5 }
 0x12a   : > { %v6448_v35 = vrot.slane %v3679_v59, 9  ;;  %7357 = vmatmul.mubr.bf16.gmra.mxu0 %v8877_v23  ;;  %v7666_v45 = vld [vmem:[%s10545_s1 + $0x140] sm:$0xff]   ;;  %v3781_v25 = vrot.slane %v8667_v15, 5  ;;  %v3784_v51 = vrot.slane %v8680_v9, 5  ;;  %v6449_v23 = vrot.slane %v3680_v6, 9  ;;  %v8996_v20 = vld [vmem:[%s10545_s1 + $0x1f8] sm:$0xff]  }
 0x12b   : > { %7375 = vmatpush3.bf16.msra.mxu1 %v7658_v8  ;;  %v8971_v43 = vsel %vm8267_vm13, %v6447_v56, %v3774_v17  ;;  %v3776_v39 = vrot.slane %v3774_v17, 4  ;;  %7360 = vmatprep.mubr.bf16.mxu0 %v8894_v12  ;;  %v3788_v58 = vrot.slane %v8682_v36, 5  ;;  %v3791_v44 = vrot.slane %v8698_v42, 5  ;;  %v3683_v6 = vld [vmem:[#allocation2 + $0x84] sm:$0xe] }
 0x12c   : > { %7376 = vmatprep.subr.bf16.mxu1 %v7662_v60  ;;  %v8984_v59 = vsel %vm8267_vm13, %v6448_v35, %v3781_v25  ;;  %v3783_v15 = vrot.slane %v3781_v25, 4  ;;  %v6450_v47 = vrot.slane %v3681_v33, 9  ;;  %v3795_v12 = vrot.slane %v8707_v11, 5  ;;  %v7657_v25 = vld [vmem:[#allocation2 + $0x84] sm:$0xff]  }
 0x12d   : > { %v8980_v2 = vsel %vm8267_vm13, %v3776_v39, %v3777_v41  ;;  %v8990_v36 = vsel %vm8267_vm13, %v6449_v23, %v3788_v58  ;;  %v3790_v42 = vrot.slane %v3788_v58, 4  ;;  %v6451_v56 = vrot.slane %v3682_v4, 9  ;;  %v3684_v39 = vld [vmem:[#allocation2 + $0x90] sm:$0xe] }
 0x12e   : > { %7297 = vmatmul.mubr.bf16.gmra.mxu1 %v7651_v27  ;;  %v9000_v32 = vsel %vm8267_vm13, %v3783_v15, %v3784_v51  ;;  %v3802_v27 = vrot.slane %v8735_v5, 5  ;;  %v9012_v50 = vsel %vm8267_vm13, %v6450_v47, %v3795_v12  ;;  %v3797_v17 = vrot.slane %v3795_v12, 4  ;;  %v9159_v47 = vld [vmem:[#allocation2 + $0x2c] sm:$0x1] }
 0x12f   : > { %7300 = vmatprep.mubr.bf16.mxu1 %v7653_v38  ;;  %7377 = vmatpush3.bf16.msra.mxu1 %v7662_v60  ;;  %v3798_v60 = vrot.slane %v8713_v18, 5  ;;  %v2964_v29 = vld [vmem:[#allocation2 + $0xc0] sm:$0xf]  ;;  %v9008_v21 = vsel %vm8267_vm13, %v3790_v42, %v3791_v44  ;;  %v3805_v35 = vrot.slane %v8745_v7, 5  ;;  %v3809_v9 = vrot.slane %v8754_v49, 5 }
 0x130   : > { %7378 = vmatprep.subr.bf16.mxu1 %v7666_v45  ;;  %v9014_v38 = vld [vmem:[#allocation2 + $0xc4] sm:$0xf]  ;;  %v9016_v18 = vld [vmem:[#allocation2 + $0xc8] sm:$0x1]  ;;  %v3328_v5 = vshrl.u32 %v2964_v29, 16  ;;  %v3331_v41 = vshll.u32 %v2964_v29, 16  ;;  %v9022_v33 = vsel %vm8267_vm13, %v6451_v56, %v3802_v27 }
 0x131   : > { %v3337_v51 = vshll.u32 %v9014_v38, 16  ;;  %v3341_v23 = vshrl.u32 %v9014_v38, 16  ;;  %v3347_v58 = vshll.u32 %v9016_v18, 16  ;;  %v9029_v44 = vsel %vm8267_vm13, %v3797_v17, %v3798_v60 }
 0x132   : > { %v3330_v4 = vrot.slane %v3328_v5, 4  ;;  %v3333_v15 = vrot.slane %v3331_v41, 5  ;;  %v3804_v42 = vrot.slane %v3802_v27, 4  ;;  %v3812_v60 = vrot.slane %v8758_v54, 5  ;;  %v7659_v54 = vld [vmem:[#allocation2 + $0x90] sm:$0xff]  }
 0x133   : > { %7379 = vmatpush3.bf16.msra.mxu1 %v7666_v45  ;;  %v3339_v12 = vrot.slane %v3337_v51, 5  ;;  %v3343_v56 = vrot.slane %v3341_v23, 4  ;;  %v3349_v29 = vrot.slane %v3347_v58, 5  ;;  %v6452_v45 = vrot.slane %v3683_v6, 9  ;;  %v3685_v51 = vld [vmem:[#allocation2 + $0x9c] sm:$0xe] }
 0x134   : > { %7460 = vmatprep.subr.bf16.mxu1 %v8996_v20  ;;  %v3334_v11 = vor.u32 %v3333_v15, %v3330_v4  ;;  %v9039_v5 = vsel %vm8267_vm13, %v3804_v42, %v3805_v35  ;;  %v6453_v41 = vrot.slane %v3684_v39, 9  ;;  %v3816_v27 = vrot.slane %v8774_v3, 5  ;;  %v3687_v15 = vld [vmem:[#allocation2 + $0xb4] sm:$0xe]  ;;  %v7661_v42 = vld [vmem:[#allocation2 + $0x9c] sm:$0xff]  }
 0x135   : > { %v3344_v17 = vor.u32 %v3343_v56, %v3339_v12  ;;  %v3811_v49 = vrot.slane %v3809_v9, 4  ;;  %v3819_v39 = vrot.slane %v8781_v14, 5  ;;  %v6454_v58 = vrot.slane %v3685_v51, 9 }
 0x136   : > { %7301 = vmatmul.mubr.bf16.gmra.mxu1 %v7655_v40  ;;  %v3335_v23 = vrot.slane %v3334_v11, 4  ;;  %v9046_v40 = vsel %vm8267_vm13, %v6452_v45, %v3809_v9  ;;  %v3818_v35 = vrot.slane %v3816_v27, 4  ;;  %v3823_v4 = vrot.slane %v8788_v1, 5  ;;  %v3686_v9 = vld [vmem:[#allocation2 + $0xa8] sm:$0xe]  ;;  %v7669_v45 = vld [vmem:[#allocation2 + $0x18] sm:$0xff]  }
 0x137   : > { %7304 = vmatprep.mubr.bf16.mxu1 %v7657_v25  ;;  %v3345_v6 = vrot.slane %v3344_v17, 4  ;;  %v9050_v25 = vsel %vm8267_vm13, %v6453_v41, %v3816_v27  ;;  %v9057_v11 = vsel %vm8267_vm13, %v3811_v49, %v3812_v60  ;;  %v3826_v60 = vrot.slane %v8803_v57, 5  ;;  %v3688_v17 = vld [vmem:[#allocation2 + $0xc0] sm:$0xe]  ;;  %v5313_v1 = vld [vmem:[#allocation2 + $0x24] sm:$0xe] }
 0x138   : > { %v3340_v3 = vsel %vm7831_vm3, %v3335_v23, %v3339_v12  ;;  %v9066_v12 = vsel %vm8267_vm13, %v3818_v35, %v3819_v39  ;;  %v9073_v27 = vsel %vm8267_vm13, %v6454_v58, %v3823_v4  ;;  %v6455_v51 = vrot.slane %v3686_v9, 9  ;;  %v4561_v58 = vld [vmem:[#allocation2 + $0x24] sm:$0xf] }
 0x139   : > { %v3350_v56 = vsel %vm7831_vm3, %v3345_v6, %v3349_v29  ;;  %v3825_v29 = vrot.slane %v3823_v4, 4  ;;  %v3830_v23 = vrot.slane %v8816_v53, 5  ;;  %v3833_v49 = vrot.slane %v8822_v24, 5 }
 0x13a   : > { %v6433_v41 = vcombine.low %v3340_v3, %v3350_v56  ;;  %v6456_v6 = vrot.slane %v3687_v15, 9  ;;  %v3837_v35 = vrot.slane %v8836_v63, 5  ;;  %v3840_v39 = vrot.slane %v8843_v48, 5  ;;  %v7663_v56 = vld [vmem:[#allocation2 + $0xa8] sm:$0xff]  }
 0x13b   : > { %v9079_v57 = vsel %vm8267_vm13, %v3825_v29, %v3826_v60  ;;  %v6457_v3 = vrot.slane %v3688_v17, 9  ;;  %v9087_v53 = vsel %vm8267_vm13, %v6455_v51, %v3830_v23  ;;  %v3832_v24 = vrot.slane %v3830_v23, 4  ;;  %v7665_v17 = vld [vmem:[#allocation2 + $0xb4] sm:$0xff]   ;;  %v9118_v23 = vpop.f32.mrf.mxu0 }
 0x13c   : > { %7361 = vmatmul.mubr.bf16.gmra.mxu0 %v6433_v41  ;;  %v9092_v4 = vsel %vm8267_vm13, %v6456_v6, %v3837_v35  ;;  %v3839_v63 = vrot.slane %v3837_v35, 4  ;;  %v3847_v48 = vrot.slane %v9016_v18, 5  ;;  %v7673_v29 = vld [vmem:[#allocation2 + $0x30] sm:$0xff]   ;;  %10607 = vst [vmem:[#allocation3_spill] sm:$0xff] %v9118_v23  ;;  %v7680_v6 = vld [vmem:[%s10545_s1 + $0x228] sm:$0xff]  }
 0x13d   : > { %7428 = vmatprep.mubr.bf16.mxu0 %v7669_v45  ;;  %10603 = vst [vmem:[#allocation6_spill] sm:$0xff] %v9092_v4  ;;  %v9097_v9 = vsel %vm8267_vm13, %v3832_v24, %v3833_v49  ;;  %v7670_v45 = vld [vmem:[#allocation2 + $0x24] sm:$0xff]   ;;  %v7676_v51 = vld [vmem:[%s10545_s1 + $0x230] sm:$0xff]   ;;  %v9126_v35 = vpop.f32.mrf.mxu0 }
 0x13e   : > { %7305 = vmatmul.mubr.bf16.gmra.mxu1 %v7659_v54  ;;  %v3844_v54 = vrot.slane %v9014_v38, 5  ;;  %v9107_v60 = vsel %vm8267_vm13, %v3839_v63, %v3840_v39  ;;  %10608 = vst [vmem:[#allocation8_spill] sm:$0xff] %v9126_v35  ;;  %v7667_v39 = vld [vmem:[#allocation2 + $0xc0] sm:$0xff]   ;;  %v7677_v24 = vld [vmem:[#allocation2 + $0x48] sm:$0xff]  }
 0x13f   : > { %7308 = vmatprep.mubr.bf16.mxu1 %v7661_v42  ;;  %10605 = vst [vmem:[#allocation5_spill] sm:$0xff] %v9107_v60  ;;  %v7684_v63 = vld [vmem:[%s10545_s1 + $0x220] sm:$0xff]  }
 0x140   : > { %v9101_v15 = vsel %vm8267_vm13, %v6457_v3, %v3844_v54  ;;  %v3846_v42 = vrot.slane %v3844_v54, 4  ;;  %v7674_v3 = vld [vmem:[#allocation2 + $0x3c] sm:$0xff]   ;;  %v9128_v54 = vpop.f32.mrf.mxu0 }
 0x141   : > { %10604 = vst [vmem:[#allocation7_spill] sm:$0xff] %v9101_v15  ;;  %10609 = vst [vmem:[#allocation9_spill] sm:$0xff] %v9128_v54 }
 0x142   : > { %v9113_v41 = vsel %vm8267_vm13, %v3846_v42, %v3847_v48  ;;  %v4559_v48 = vld [vmem:[#allocation2 + $0x1c] sm:$0xf]  ;;  %v4558_v42 = vld [vmem:[#allocation2 + $0x18] sm:$0xf] }
 0x143   : > { %10606 = vst [vmem:[#allocation4_spill] sm:$0xff] %v9113_v41  ;;  %v4616_v38 = vshll.u32 %v4559_v48, 16 }
 0x144   : > { %7429 = vmatmul.mubr.bf16.vlgmr.msra.gmra.mxu0 %v7670_v45  ;;  %v5378_v45 = vrot.slane %v4559_v48, 5 }
 0x145   : > { %7509 = vmatpush3.bf16.msra.mxu0 %v8849_v13  ;;  %7432 = vmatprep.mubr.bf16.mxu0 %v7673_v29  ;;  %v9136_v13 = vpop.f32.mrf.mxu0  ;;  %v9141_v29 = vld [vmem:[#allocation2 + $0x20] sm:$0x1] }
 0x146   : > { %7309 = vmatmul.mubr.bf16.gmra.mxu1 %v7663_v56  ;;  %7510 = vmatprep.subr.bf16.mxu0 %v7676_v51  ;;  %10610 = vst [vmem:[#allocation10_spill] sm:$0xff] %v9136_v13  ;;  %v7688_v56 = vld [vmem:[%s10545_s1 + $0x218] sm:$0xff]   ;;  %v5380_v49 = vrot.slane %v5378_v45, 4  ;;  %v5381_v18 = vrot.slane %v9141_v29, 5 }
 0x147   : > { %7312 = vmatprep.mubr.bf16.mxu1 %v7665_v17  ;;  %v7678_v17 = vld [vmem:[#allocation2 + $0x54] sm:$0xff]   ;;  %v4567_v13 = vld [vmem:[#allocation2 + $0x3c] sm:$0xf] }
 0x148   : > { %v9172_v52 = vsel %vm8267_vm13, %v5380_v49, %v5381_v18  ;;  %v4658_v18 = vshll.u32 %v4564_v34, 16 }
 0x149   : > { %7511 = vmatpush3.bf16.msra.mxu0 %v7676_v51  ;;  %v5312_v51 = vld [vmem:[#allocation2 + $0x18] sm:$0xe] }
 0x14a   : > { %7512 = vmatprep.subr.bf16.mxu0 %v7680_v6 }
 0x14c   : > { %7433 = vmatmul.mubr.bf16.gmra.mxu0 %v7674_v3  ;;  %v4610_v3 = vshll.u32 %v4558_v42, 16 }
 0x14d   : > { %7436 = vmatprep.mubr.bf16.mxu0 %v7677_v24  ;;  %7513 = vmatpush3.bf16.msra.mxu0 %v7680_v6  ;;  %v4562_v6 = vld [vmem:[#allocation2 + $0x28] sm:$0xf]  ;;  %v6578_v24 = vrot.slane %v5312_v51, 9 }
 0x14e   : > { %7313 = vmatmul.mubr.bf16.gmra.mxu1 %v7667_v39  ;;  %7514 = vmatprep.subr.bf16.mxu0 %v7684_v63  ;;  %v4607_v39 = vshrl.u32 %v4558_v42, 16  ;;  %v7692_v42 = vld [vmem:[%s10545_s1 + $0x210] sm:$0xff]   ;;  %v5385_v14 = vrot.slane %v4562_v6, 5  ;;  %v4612_v7 = vrot.slane %v4610_v3, 5  ;;  %v4644_v8 = vshrl.u32 %v4562_v6, 16 }
 0x14f   : > { %7380 = vmatprep.mubr.bf16.mxu1 %v6474_v46  ;;  %v9146_v46 = vpop.f32.mrf.mxu0  ;;  %v9168_v31 = vsel %vm8267_vm13, %v6578_v24, %v5378_v45  ;;  %v7682_v3 = vld [vmem:[#allocation2 + $0x6c] sm:$0xff]   ;;  %v7685_v45 = vld [vmem:[#allocation2 + $0x78] sm:$0xff]   ;;  %v9180_v24 = vld [vmem:[#allocation2 + $0x34] sm:$0xf] }
 0x150   : > { %10611 = vst [vmem:[#allocation11_spill] sm:$0xff] %v9146_v46  ;;  %v4609_v51 = vrot.slane %v4607_v39, 4  ;;  %v6579_v39 = vrot.slane %v5313_v1, 9  ;;  %v5387_v16 = vrot.slane %v5385_v14, 4  ;;  %v4646_v46 = vrot.slane %v4644_v8, 4  ;;  %v9199_v8 = vpop.f32.mrf.mxu1 }
 0x151   : > { %7515 = vmatpush3.bf16.msra.mxu0 %v7684_v63  ;;  %v4620_v63 = vshrl.u32 %v4559_v48, 16  ;;  %v4631_v48 = vshrl.u32 %v4561_v58, 16  ;;  %10615 = vst [vmem:[#allocation14_spill] sm:$0xff] %v9199_v8 }
 0x152   : > { %7516 = vmatprep.subr.bf16.mxu0 %v7688_v56 }
 0x153   : > { %v4633_v1 = vrot.slane %v4631_v48, 4  ;;  %v10614_v48 = vcombine.low %v8934_v62, %v8953_v37  ;;  %v9214_v62 = vld [vmem:[#allocation2 + $0x40] sm:$0xf]  ;;  %v10617_v37 = vcombine.low %v8945_v61, %v8960_v30  ;;  %v4650_v30 = vshll.u32 %v9159_v47, 16 }
 0x154   : > { %7437 = vmatmul.mubr.bf16.gmra.mxu0 %v7678_v17  ;;  %v4634_v17 = vshll.u32 %v4561_v58, 16  ;;  %v5388_v58 = vrot.slane %v9159_v47, 5 }
 0x155   : > { %7440 = vmatprep.mubr.bf16.mxu0 %v7681_v22  ;;  %7517 = vmatpush3.bf16.msra.mxu0 %v7688_v56  ;;  %v4622_v22 = vrot.slane %v4620_v63, 4  ;;  %v7683_v56 = vld [vmem:[%s10545_s1 + $0x1e0] sm:$0xff]  }
 0x156   : > { %7381 = vmatmul.mubr.bf16.vlgmr.msra.gmra.mxu1 %v6475_v10  ;;  %v9164_v10 = vpop.f32.mrf.mxu0  ;;  %7518 = vmatprep.subr.bf16.mxu0 %v7692_v42  ;;  %v4636_v49 = vrot.slane %v4634_v17, 5 }
 0x157   : > { %7461 = vmatpush3.bf16.msra.mxu1 %v8996_v20  ;;  %7384 = vmatprep.mubr.bf16.mxu1 %v6476_v26  ;;  %10612 = vst [vmem:[#allocation12_spill] sm:$0xff] %v9164_v10  ;;  %v4640_v20 = vshll.u32 %v4562_v6, 16  ;;  %v9174_v26 = vrot.slane %v4616_v38, 5  ;;  %v4655_v10 = vshrl.u32 %v4564_v34, 16  ;;  %v4613_v6 = vor.u32 %v4612_v7, %v4609_v51 }
 0x158   : > { %7462 = vmatprep.subr.bf16.mxu1 %v7675_v19  ;;  %v9182_v38 = vpop.f32.mrf.mxu0  ;;  %v4626_v51 = vshll.u32 %v9141_v29, 16  ;;  %v9194_v34 = vsel %vm8267_vm13, %v6579_v39, %v5385_v14  ;;  %v9209_v29 = vsel %vm8267_vm13, %v5387_v16, %v5388_v58  ;;  %v5314_v39 = vld [vmem:[#allocation2 + $0x30] sm:$0xe]  ;;  %v4682_v7 = vshll.u32 %v4567_v13, 16  ;;  %v7687_v16 = vld [vmem:[%s10545_s1 + $0x1d8] sm:$0xff]  }
 0x159   : > { %10613 = vst [vmem:[#allocation13_spill] sm:$0xff] %v9182_v38  ;;  %v9184_v63 = vrot.slane %v4640_v20, 5  ;;  %7519 = vmatpush3.bf16.msra.mxu0 %v7692_v42  ;;  %v9204_v42 = vld [vmem:[%s10545_s1 + $0x200] sm:$0xff]   ;;  %v4623_v17 = vor.u32 %v4622_v22, %v9174_v26  ;;  %10616 = vst [vmem:[#allocation15_spill] sm:$0xff] %v9209_v29  ;;  %v9211_v14 = vrot.slane %v4655_v10, 4  ;;  %v4664_v20 = vshll.u32 %v9180_v24, 16  ;;  %v9234_v38 = vpop.f32.mrf.mxu1 }
 0x15a   : > { %v4679_v22 = vshrl.u32 %v4567_v13, 16  ;;  %v9223_v10 = vpop.f32.mrf.mxu0  ;;  %v9225_v58 = vrot.slane %v4613_v6, 4  ;;  %v4637_v8 = vor.u32 %v4636_v49, %v4633_v1  ;;  %v5392_v13 = vrot.slane %v9180_v24, 5  ;;  %10619 = vst [vmem:[#allocation17_spill] sm:$0xff] %v9234_v38  ;;  %v4566_v1 = vld [vmem:[#allocation2 + $0x38] sm:$0x1] }
 0x15b   : > { %7463 = vmatpush3.bf16.msra.mxu1 %v7675_v19  ;;  %v7696_v19 = vld [vmem:[%s10545_s1 + $0x208] sm:$0xff]   ;;  %10618 = vst [vmem:[#allocation16_spill] sm:$0xff] %v9223_v10  ;;  %v4647_v61 = vor.u32 %v4646_v46, %v9184_v63  ;;  %v9236_v6 = vrot.slane %v4623_v17, 4  ;;  %v6580_v47 = vrot.slane %v5314_v39, 9  ;;  %v9240_v49 = vrot.slane %v4664_v20, 5  ;;  %v7691_v17 = vld [vmem:[%s10545_s1 + $0x1d0] sm:$0xff]   ;;  %v9264_v23 = vpop.f32.mrf.mxu1 }
 0x15c   : > { %7464 = vmatprep.subr.bf16.mxu1 %v7679_v0  ;;  %7441 = vmatmul.mubr.bf16.gmra.mxu0 %v7682_v3  ;;  %v4660_v3 = vrot.slane %v4658_v18, 5  ;;  %v4692_v18 = vshrl.u32 %v9214_v62, 16  ;;  %v5315_v10 = vld [vmem:[#allocation2 + $0x3c] sm:$0xe]  ;;  %v4681_v54 = vrot.slane %v4679_v22, 4  ;;  %v4684_v35 = vrot.slane %v4682_v7, 5  ;;  %v9247_v46 = vpop.f32.mrf.mxu0 }
 0x15d   : > { %7444 = vmatprep.mubr.bf16.mxu0 %v7685_v45  ;;  %7520 = vmatprep.subr.bf16.mxu0 %v7696_v19  ;;  %v4688_v45 = vshll.u32 %v9214_v62, 16  ;;  %10620 = vst [vmem:[#allocation18_spill] sm:$0xff] %v9247_v46  ;;  %v9253_v20 = vrot.slane %v4637_v8, 4  ;;  %v9257_v39 = vrot.slane %v4650_v30, 5  ;;  %v5394_v7 = vrot.slane %v5392_v13, 4  ;;  %10622 = vst [vmem:[#allocation19_spill] sm:$0xff] %v9264_v23 }
 0x15e   : > { %7385 = vmatmul.mubr.bf16.gmra.mxu1 %v10614_v48  ;;  %v4668_v48 = vshrl.u32 %v9180_v24, 16  ;;  %7521 = vmatpush3.bf16.msra.mxu0 %v7696_v19  ;;  %v4661_v24 = vor.u32 %v4660_v3, %v9211_v14  ;;  %v7689_v19 = vld [vmem:[#allocation2 + $0x90] sm:$0xff]   ;;  %v9255_v14 = vrot.slane %v4647_v61, 4  ;;  %v5395_v3 = vrot.slane %v4566_v1, 5  ;;  %v4570_v38 = vld [vmem:[#allocation2 + $0x48] sm:$0xf] }
 0x15f   : > { %7388 = vmatprep.mubr.bf16.mxu1 %v10617_v37  ;;  %7465 = vmatpush3.bf16.msra.mxu1 %v7679_v0  ;;  %v9229_v0 = vrot.slane %v4626_v51, 5  ;;  %v7686_v37 = vld [vmem:[#allocation2 + $0x84] sm:$0xff]   ;;  %v4694_v22 = vrot.slane %v4692_v18, 4  ;;  %v10621_v46 = vcombine.low %v8971_v43, %v8980_v2  ;;  %v4674_v61 = vshll.u32 %v4566_v1, 16 }
 0x160   : > { %7466 = vmatprep.subr.bf16.mxu1 %v7683_v56  ;;  %7522 = vmatprep.subr.bf16.mxu0 %v9204_v42  ;;  %v4670_v51 = vrot.slane %v4668_v48, 4  ;;  %v9259_v48 = vrot.slane %v4688_v45, 5  ;;  %v9270_v30 = vld [vmem:[#allocation2 + $0x44] sm:$0x1]  ;;  %v5399_v45 = vrot.slane %v9214_v62, 5  ;;  %v10623_v18 = vcombine.low %v8984_v59, %v9000_v32  ;;  %v7695_v43 = vld [vmem:[%s10545_s1 + $0x1c8] sm:$0xff]   ;;  %v9286_v62 = vpop.f32.mrf.mxu0 }
 0x161   : > { %v9281_v2 = vsel %vm8267_vm13, %v6580_v47, %v5392_v13  ;;  %10624 = vst [vmem:[#allocation20_spill] sm:$0xff] %v9286_v62  ;;  %v5316_v13 = vld [vmem:[#allocation2 + $0x48] sm:$0xe]  ;;  %v4703_v1 = vshrl.u32 %v4570_v38, 16  ;;  %v4706_v47 = vshll.u32 %v4570_v38, 16  ;;  %v7690_v59 = vld [vmem:[#allocation2 + $0x9c] sm:$0xff]  }
 0x162   : > { %7523 = vmatpush3.bf16.msra.mxu0 %v9204_v42  ;;  %v4676_v32 = vrot.slane %v4674_v61, 5  ;;  %v5401_v42 = vrot.slane %v5399_v45, 4  ;;  %v5402_v8 = vrot.slane %v9270_v30, 5  ;;  %v6582_v62 = vrot.slane %v5316_v13, 9  ;;  %v4573_v61 = vld [vmem:[#allocation2 + $0x54] sm:$0xf]  ;;  %v9318_v41 = vpop.f32.mrf.mxu0 }
 0x163   : > { %7467 = vmatpush3.bf16.msra.mxu1 %v7683_v56  ;;  %v6581_v56 = vrot.slane %v5315_v10, 9  ;;  %v4685_v10 = vor.u32 %v4684_v35, %v4681_v54  ;;  %v9299_v35 = vsel %vm8267_vm13, %v5394_v7, %v5395_v3  ;;  %v4695_v54 = vor.u32 %v4694_v22, %v9259_v48  ;;  %v9312_v7 = vld [vmem:[#allocation2 + $0x50] sm:$0x1]  ;;  %v7693_v3 = vld [vmem:[#allocation2 + $0xa8] sm:$0xff]  }
 0x164   : > { %7468 = vmatprep.subr.bf16.mxu1 %v7687_v16  ;;  %7445 = vmatmul.mubr.bf16.gmra.mxu0 %v7686_v37  ;;  %v9283_v37 = vrot.slane %v4661_v24, 4  ;;  %v4698_v24 = vshll.u32 %v9270_v30, 16  ;;  %v4727_v13 = vshrl.u32 %v4573_v61, 16 }
 0x165   : > { %7448 = vmatprep.mubr.bf16.mxu0 %v7689_v19  ;;  %v9303_v19 = vld [vmem:[#allocation2 + $0x58] sm:$0xf]  ;;  %v9309_v38 = vsel %vm8267_vm13, %v6581_v56, %v5399_v45  ;;  %v4705_v56 = vrot.slane %v4703_v1, 4  ;;  %v4708_v45 = vrot.slane %v4706_v47, 5  ;;  %v4696_v60 = vrot.slane %v4695_v54, 4 }
 0x166   : > { %7389 = vmatmul.mubr.bf16.gmra.mxu1 %v10621_v46  ;;  %v4671_v46 = vor.u32 %v4670_v51, %v9240_v49  ;;  %v4667_v22 = vsel %vm7831_vm3, %v9283_v37, %v9240_v49  ;;  %v4700_v4 = vrot.slane %v4698_v24, 5  ;;  %v5409_v49 = vrot.slane %v9312_v7, 5 }
 0x167   : > { %7392 = vmatprep.mubr.bf16.mxu1 %v10623_v18  ;;  %7469 = vmatpush3.bf16.msra.mxu1 %v7687_v16  ;;  %v4571_v16 = vld [vmem:[#allocation2 + $0x4c] sm:$0xf]  ;;  %v9305_v18 = vpop.f32.mrf.mxu1  ;;  %v10626_v37 = vcombine.low %v8990_v36, %v9008_v21  ;;  %v4730_v1 = vshll.u32 %v4573_v61, 16  ;;  %v4740_v47 = vshrl.u32 %v9303_v19, 16  ;;  %v10628_v54 = vcombine.low %v9012_v50, %v9029_v44 }
 0x168   : > { %7470 = vmatprep.subr.bf16.mxu1 %v7691_v17  ;;  %v5406_v51 = vrot.slane %v4571_v16, 5  ;;  %10625 = vst [vmem:[#allocation21_spill] sm:$0xff] %v9305_v18  ;;  %v4672_v23 = vrot.slane %v4671_v46, 4  ;;  %v4686_v18 = vrot.slane %v4685_v10, 4  ;;  %v4712_v15 = vshll.u32 %v4571_v16, 16 }
 0x169   : > { %v4716_v30 = vshrl.u32 %v4571_v16, 16  ;;  %v9327_v46 = vpop.f32.mrf.mxu1  ;;  %v5317_v10 = vld [vmem:[#allocation2 + $0x54] sm:$0xe]  ;;  %v4736_v16 = vshll.u32 %v9303_v19, 16  ;;  %v9338_v36 = vsel %vm8267_vm13, %v5401_v42, %v5402_v8  ;;  %v4709_v44 = vor.u32 %v4708_v45, %v4705_v56  ;;  %v9360_v42 = vld [vmem:[#allocation2 + $0x5c] sm:$0x1] }
 0x16a   : > { %v5408_v29 = vrot.slane %v5406_v51, 4  ;;  %10627 = vst [vmem:[#allocation22_spill] sm:$0xff] %v9327_v46  ;;  %v4677_v24 = vsel %vm7831_vm3, %v4672_v23, %v4676_v32  ;;  %v9342_v21 = vsel %vm8267_vm13, %v6582_v62, %v5406_v51  ;;  %v4691_v50 = vsel %vm7831_vm3, %v4686_v18, %v9259_v48  ;;  %v7694_v23 = vld [vmem:[#allocation2 + $0xb4] sm:$0xff]   ;;  %v7697_v45 = vld [vmem:[#allocation2 + $0xc0] sm:$0xff]  }
 0x16b   : > { %7471 = vmatpush3.bf16.msra.mxu1 %v7691_v17  ;;  %v7699_v17 = vld [vmem:[%s10545_s1 + $0x1c0] sm:$0xff]   ;;  %v4718_v61 = vrot.slane %v4716_v30, 4  ;;  %v4701_v8 = vsel %vm7831_vm3, %v4696_v60, %v4700_v4  ;;  %v6583_v32 = vrot.slane %v5317_v10, 9  ;;  %v9358_v51 = vpop.f32.mrf.mxu1  ;;  %v4729_v48 = vrot.slane %v4727_v13, 4 }
 0x16c   : > { %7472 = vmatprep.subr.bf16.mxu1 %v7695_v43  ;;  %7449 = vmatmul.mubr.bf16.gmra.mxu0 %v7690_v59  ;;  %v9344_v59 = vpop.f32.mrf.mxu0  ;;  %v9355_v62 = vsel %vm8267_vm13, %v5408_v29, %v5409_v49  ;;  %10629 = vst [vmem:[#allocation23_spill] sm:$0xff] %v9358_v51  ;;  %v9362_v18 = vrot.slane %v4736_v16, 5  ;;  %v4742_v56 = vrot.slane %v4740_v47, 4  ;;  %v10630_v4 = vsel %vm7831_vm3, %v9236_v6, %v9229_v0 }
 0x16d   : > { %7452 = vmatprep.mubr.bf16.mxu0 %v7693_v3  ;;  %v9349_v3 = vrot.slane %v4712_v15, 5  ;;  %v4732_v15 = vrot.slane %v4730_v1, 5  ;;  %v10631_v60 = vsel %vm7831_vm3, %v9225_v58, %v9174_v26  ;;  %v10633_v30 = vsel %vm7831_vm3, %v9253_v20, %v9184_v63  ;;  %v4576_v63 = vld [vmem:[#allocation2 + $0x60] sm:$0xf]  ;;  %v9410_v1 = vpop.f32.mrf.mxu1 }
 0x16e   : > { %7393 = vmatmul.mubr.bf16.gmra.mxu1 %v10626_v37  ;;  %v9374_v29 = vcombine.low %v10631_v60, %v10630_v4  ;;  %v5413_v6 = vrot.slane %v9303_v19, 5  ;;  %v9393_v58 = vcombine.low %v4667_v22, %v4677_v24  ;;  %v9400_v20 = vcombine.low %v4691_v50, %v4701_v8  ;;  %10636 = vst [vmem:[#allocation25_spill] sm:$0xff] %v9410_v1 }
 0x16f   : > { %7396 = vmatprep.mubr.bf16.mxu1 %v10628_v54  ;;  %7473 = vmatpush3.bf16.msra.mxu1 %v7695_v43  ;;  %v4722_v43 = vshll.u32 %v9312_v7, 16  ;;  %v10632_v7 = vsel %vm7831_vm3, %v9255_v14, %v9257_v39  ;;  %v9391_v26 = vpop.f32.mrf.mxu0  ;;  %v9397_v39 = vrot.slane %v4709_v44, 4  ;;  %v4719_v37 = vor.u32 %v4718_v61, %v9349_v3  ;;  %v9420_v44 = vld [vmem:[#allocation2 + $0x70] sm:$0xf]  ;;  %v4579_v61 = vld [vmem:[#allocation2 + $0x6c] sm:$0xf] }
 0x170   : > { %7474 = vmatprep.subr.bf16.mxu1 %v7699_v17  ;;  %v9386_v49 = vcombine.low %v10633_v30, %v10632_v7  ;;  %10634 = vst [vmem:[#allocation24_spill] sm:$0xff] %v9391_v26  ;;  %v5416_v19 = vrot.slane %v9360_v42, 5  ;;  %v10635_v22 = vcombine.low %v9022_v33, %v9039_v5  ;;  %v9416_v47 = vsel %vm8267_vm13, %v6583_v32, %v5413_v6  ;;  %v9433_v30 = vpop.f32.mrf.mxu1 }
 0x171   : > { %v9404_v13 = vrot.slane %v4722_v43, 5  ;;  %v9412_v16 = vpop.f32.mrf.mxu0  ;;  %v4733_v54 = vor.u32 %v4732_v15, %v4729_v48  ;;  %v4743_v24 = vor.u32 %v4742_v56, %v9362_v18  ;;  %v4746_v50 = vshll.u32 %v9360_v42, 16  ;;  %v4578_v15 = vld [vmem:[#allocation2 + $0x68] sm:$0x1]  ;;  %10640 = vst [vmem:[#allocation28_spill] sm:$0xff] %v9433_v30 }
 0x172   : > { %10637 = vst [vmem:[#allocation26_spill] sm:$0xff] %v9412_v16  ;;  %v10638_v33 = vcombine.low %v9046_v40, %v9057_v11  ;;  %v5415_v5 = vrot.slane %v5413_v6, 4  ;;  %v4751_v43 = vshrl.u32 %v4576_v63, 16  ;;  %v4754_v4 = vshll.u32 %v4576_v63, 16  ;;  %v7698_v6 = vld [vmem:[#allocation2 + $0xcc] sm:$0xff]  }
 0x173   : > { %7475 = vmatpush3.bf16.msra.mxu1 %v7699_v17  ;;  %v4577_v17 = vld [vmem:[#allocation2 + $0x64] sm:$0xf]  ;;  %v9425_v32 = vpop.f32.mrf.mxu0  ;;  %v4715_v42 = vsel %vm7831_vm3, %v9397_v39, %v9349_v3  ;;  %v4720_v48 = vrot.slane %v4719_v37, 4  ;;  %v4775_v7 = vshrl.u32 %v4579_v61, 16  ;;  %v4778_v40 = vshll.u32 %v4579_v61, 16 }
 0x174   : > { %7453 = vmatmul.mubr.bf16.gmra.mxu0 %v7694_v23  ;;  %v5318_v23 = vld [vmem:[#allocation2 + $0x60] sm:$0xe]  ;;  %v5420_v8 = vrot.slane %v4577_v17, 5  ;;  %10639 = vst [vmem:[#allocation27_spill] sm:$0xff] %v9425_v32  ;;  %v4760_v56 = vshll.u32 %v4577_v17, 16  ;;  %v4764_v60 = vshrl.u32 %v4577_v17, 16  ;;  %v9444_v30 = vsel %vm8267_vm13, %v5415_v5, %v5416_v19 }
 0x175   : > { %7456 = vmatprep.mubr.bf16.mxu0 %v7697_v45  ;;  %v4784_v11 = vshll.u32 %v9420_v44, 16  ;;  %v4788_v45 = vshrl.u32 %v9420_v44, 16  ;;  %v9435_v63 = vpop.f32.mrf.mxu0  ;;  %v4748_v10 = vrot.slane %v4746_v50, 5  ;;  %v6584_v14 = vrot.slane %v5318_v23, 9  ;;  %v9448_v50 = vld [vmem:[#allocation2 + $0x74] sm:$0x1] }
 0x176   : > { %7397 = vmatmul.mubr.bf16.gmra.mxu1 %v10635_v22  ;;  %10641 = vst [vmem:[#allocation29_spill] sm:$0xff] %v9435_v63  ;;  %v4734_v22 = vrot.slane %v4733_v54, 4  ;;  %v5422_v3 = vrot.slane %v5420_v8, 4  ;;  %v5423_v39 = vrot.slane %v4578_v15, 5  ;;  %v4753_v37 = vrot.slane %v4751_v43, 4 }
 0x177   : > { %7400 = vmatprep.mubr.bf16.mxu1 %v10638_v33  ;;  %v4744_v33 = vrot.slane %v4743_v24, 4  ;;  %v4756_v0 = vrot.slane %v4754_v4, 5  ;;  %v9437_v17 = vpop.f32.mrf.mxu0  ;;  %v4725_v61 = vsel %vm7831_vm3, %v4720_v48, %v9404_v13  ;;  %v9446_v1 = vrot.slane %v4760_v56, 5  ;;  %v5319_v24 = vld [vmem:[#allocation2 + $0x6c] sm:$0xe]  ;;  %v9455_v13 = vpop.f32.mrf.mxu1 }
 0x178   : > { %v4766_v54 = vrot.slane %v4764_v60, 4  ;;  %v4777_v23 = vrot.slane %v4775_v7, 4  ;;  %v4780_v51 = vrot.slane %v4778_v40, 5  ;;  %v9450_v43 = vrot.slane %v4784_v11, 5  ;;  %10643 = vst [vmem:[#allocation30_spill] sm:$0xff] %v9455_v13 }
 0x179   : > { %v4790_v4 = vrot.slane %v4788_v45, 4  ;;  %v10642_v46 = vcombine.low %v9050_v25, %v9066_v12  ;;  %v9457_v19 = vpop.f32.mrf.mxu0  ;;  %v4739_v5 = vsel %vm7831_vm3, %v4734_v22, %v9362_v18  ;;  %v4749_v48 = vsel %vm7831_vm3, %v4744_v33, %v4748_v10  ;;  %v4582_v10 = vld [vmem:[#allocation2 + $0x78] sm:$0xf] }
 0x17a   : > { %v9466_v56 = vsel %vm8267_vm13, %v6584_v14, %v5420_v8  ;;  %v10644_v25 = vcombine.low %v9073_v27, %v9079_v57  ;;  %v10645_v12 = vcombine.low %v9168_v31, %v9172_v52  ;;  %v4757_v18 = vor.u32 %v4756_v0, %v4753_v37  ;;  %v5320_v45 = vld [vmem:[#allocation2 + $0x78] sm:$0xe]  ;;  %v9496_v37 = vld [vmem:[#allocation2 + $0x88] sm:$0xf] }
 0x17b   : > { %v4770_v60 = vshll.u32 %v4578_v15, 16  ;;  %v6585_v7 = vrot.slane %v5319_v24, 9  ;;  %v9478_v40 = vpop.f32.mrf.mxu0  ;;  %v4767_v27 = vor.u32 %v4766_v54, %v9446_v1  ;;  %v5427_v57 = vrot.slane %v9420_v44, 5  ;;  %v4583_v15 = vld [vmem:[#allocation2 + $0x7c] sm:$0xf] }
 0x17c   : > { %7457 = vmatmul.mubr.bf16.gmra.mxu0 %v7698_v6  ;;  %v4794_v31 = vshll.u32 %v9448_v50, 16  ;;  %v9485_v52 = vcombine.low %v4715_v42, %v4725_v61  ;;  %v9487_v8 = vcombine.low %v4739_v5, %v4749_v48  ;;  %v4781_v11 = vor.u32 %v4780_v51, %v4777_v23  ;;  %v9490_v6 = vpop.f32.mrf.mxu1  ;;  %v4584_v24 = vld [vmem:[#allocation2 + $0x80] sm:$0x1] }
 0x17d   : > { %7524 = vmatprep.mubr.bf16.mxu0 %v10645_v12  ;;  %v4791_v0 = vor.u32 %v4790_v4, %v9450_v43  ;;  %10646 = vst [vmem:[#allocation31_spill] sm:$0xff] %v9490_v6  ;;  %v9492_v22 = vpop.f32.mrf.mxu0  ;;  %v4799_v44 = vshrl.u32 %v4582_v10, 16  ;;  %v4758_v42 = vrot.slane %v4757_v18, 4  ;;  %v4772_v61 = vrot.slane %v4770_v60, 5  ;;  %v4585_v12 = vld [vmem:[#allocation2 + $0x84] sm:$0xf] }
 0x17e   : > { %7401 = vmatmul.mubr.bf16.gmra.mxu1 %v10642_v46  ;;  %v9476_v46 = vsel %vm8267_vm13, %v5422_v3, %v5423_v39  ;;  %v5434_v3 = vrot.slane %v4583_v15, 5  ;;  %v4802_v39 = vshll.u32 %v4582_v10, 16  ;;  %v9500_v51 = vsel %vm8267_vm13, %v6585_v7, %v5427_v57  ;;  %v9508_v60 = vpop.f32.mrf.mxu1 }
 0x17f   : > { %7404 = vmatprep.mubr.bf16.mxu1 %v10644_v25  ;;  %v5430_v54 = vrot.slane %v9448_v50, 5  ;;  %v9503_v23 = vpop.f32.mrf.mxu0  ;;  %v4768_v4 = vrot.slane %v4767_v27, 4  ;;  %v5429_v5 = vrot.slane %v5427_v57, 4  ;;  %v4796_v48 = vrot.slane %v4794_v31, 5  ;;  %10648 = vst [vmem:[#allocation32_spill] sm:$0xff] %v9508_v60  ;;  %v10649_v50 = vld [vmem:[#allocation15_spill] sm:$0xff] }
 0x180   : > { %v6586_v25 = vrot.slane %v5320_v45, 9  ;;  %v4782_v33 = vrot.slane %v4781_v11, 4  ;;  %v4792_v10 = vrot.slane %v4791_v0, 4  ;;  %v4808_v14 = vshll.u32 %v4583_v15, 16  ;;  %v10651_v11 = vld [vmem:[#allocation6_spill] sm:$0xff]  ;;  %v10652_v0 = vld [vmem:[#allocation5_spill] sm:$0xff] }
 0x181   : > { %v4812_v6 = vshrl.u32 %v4583_v15, 16  ;;  %v10647_v18 = vcombine.low %v9087_v53, %v9097_v9  ;;  %v10650_v7 = vcombine.low %v9194_v34, %v10649_v50  ;;  %v9513_v13 = vpop.f32.mrf.mxu0  ;;  %v5436_v27 = vrot.slane %v5434_v3, 4 }
 0x182   : > { %v5437_v57 = vrot.slane %v4584_v24, 5  ;;  %v4801_v31 = vrot.slane %v4799_v44, 4  ;;  %v4804_v45 = vrot.slane %v4802_v39, 5  ;;  %v10653_v63 = vcombine.low %v10651_v11, %v10652_v0 }
 0x183   : > { %v10654_v53 = vcombine.low %v9281_v2, %v9299_v35  ;;  %v4823_v9 = vshrl.u32 %v4585_v12, 16  ;;  %v4826_v15 = vshll.u32 %v4585_v12, 16  ;;  %v4836_v34 = vshrl.u32 %v9496_v37, 16  ;;  %v9523_v50 = vpop.f32.mrf.mxu0 }
 0x184   : > { %7525 = vmatmul.mubr.bf16.vlgmr.msra.gmra.mxu0 %v10650_v7  ;;  %v4763_v44 = vsel %vm7831_vm3, %v4758_v42, %v9446_v1  ;;  %v4773_v39 = vsel %vm7831_vm3, %v4768_v4, %v4772_v61  ;;  %v9536_v2 = vsel %vm8267_vm13, %v6586_v25, %v5434_v3  ;;  %v4787_v35 = vsel %vm7831_vm3, %v4782_v33, %v9450_v43  ;;  %v4588_v42 = vld [vmem:[#allocation2 + $0x90] sm:$0xf]  ;;  %v9545_v61 = vpop.f32.mrf.mxu1  ;;  %v5321_v25 = vld [vmem:[#allocation2 + $0x84] sm:$0xe]  ;;  %v4587_v33 = vld [vmem:[#allocation2 + $0x8c] sm:$0x1] }
 0x185   : > { %7528 = vmatprep.mubr.bf16.mxu0 %v10654_v53  ;;  %v4797_v12 = vsel %vm7831_vm3, %v4792_v10, %v4796_v48  ;;  %v9543_v7 = vrot.slane %v4808_v14, 5  ;;  %v4814_v1 = vrot.slane %v4812_v6, 4  ;;  %10655 = vst [vmem:[#allocation15_spill] sm:$0xff] %v9545_v61  ;;  %v9547_v4 = vpop.f32.mrf.mxu0  ;;  %v4805_v3 = vor.u32 %v4804_v45, %v4801_v31 }
 0x186   : > { %7405 = vmatmul.mubr.bf16.gmra.mxu1 %v10647_v18  ;;  %v4832_v18 = vshll.u32 %v9496_v37, 16  ;;  %v5441_v43 = vrot.slane %v9496_v37, 5  ;;  %v4825_v11 = vrot.slane %v4823_v9, 4  ;;  %v4828_v48 = vrot.slane %v4826_v15, 5  ;;  %v9567_v9 = vld [vmem:[#allocation2 + $0x94] sm:$0xf] }
 0x187   : > { %7408 = vmatprep.mubr.bf16.mxu1 %v10653_v63  ;;  %v9532_v63 = vsel %vm8267_vm13, %v5429_v5, %v5430_v54  ;;  %v9551_v54 = vsel %vm8267_vm13, %v5436_v27, %v5437_v57  ;;  %v4818_v5 = vshll.u32 %v4584_v24, 16  ;;  %v4838_v6 = vrot.slane %v4836_v34, 4  ;;  %v9556_v10 = vpop.f32.mrf.mxu0  ;;  %v10659_v34 = vld [vmem:[#allocation4_spill] sm:$0xff]  ;;  %v4591_v37 = vld [vmem:[#allocation2 + $0x9c] sm:$0xf] }
 0x188   : > { %v9554_v14 = vrot.slane %v4832_v18, 5  ;;  %v9558_v0 = vcombine.low %v4763_v44, %v4773_v39  ;;  %v4847_v27 = vshrl.u32 %v4588_v42, 16  ;;  %v4850_v57 = vshll.u32 %v4588_v42, 16  ;;  %v10658_v18 = vld [vmem:[#allocation7_spill] sm:$0xff] }
 0x189   : > { %v9562_v31 = vcombine.low %v4787_v35, %v4797_v12  ;;  %v4815_v24 = vor.u32 %v4814_v1, %v9543_v7  ;;  %v6587_v45 = vrot.slane %v5321_v25, 9  ;;  %v10660_v44 = vcombine.low %v10658_v18, %v10659_v34  ;;  %v9577_v35 = vpop.f32.mrf.mxu0 }
 0x18a   : > { %v9569_v15 = vpop.f32.mrf.mxu1  ;;  %v10661_v39 = vcombine.low %v9309_v38, %v9338_v36  ;;  %v9579_v12 = vrot.slane %v4805_v3, 4  ;;  %v9581_v42 = vrot.slane %v4818_v5, 5  ;;  %v5443_v1 = vrot.slane %v5441_v43, 4  ;;  %v5322_v36 = vld [vmem:[#allocation2 + $0x90] sm:$0xe] }
 0x18b   : > { %10656 = vst [vmem:[#allocation6_spill] sm:$0xff] %v9562_v31  ;;  %10657 = vst [vmem:[#allocation5_spill] sm:$0xff] %v9569_v15  ;;  %v5444_v25 = vrot.slane %v4587_v33, 5  ;;  %v10662_v53 = vcombine.low %v9342_v21, %v9355_v62  ;;  %v4829_v18 = vor.u32 %v4828_v48, %v4825_v11  ;;  %v4839_v34 = vor.u32 %v4838_v6, %v9554_v14  ;;  %v9589_v3 = vld [vmem:[#allocation2 + $0xa0] sm:$0xf] }
 0x18c   : > { %7529 = vmatmul.mubr.bf16.gmra.mxu0 %v10661_v39  ;;  %v4842_v38 = vshll.u32 %v4587_v33, 16  ;;  %v9591_v5 = vpop.f32.mrf.mxu1  ;;  %v9593_v39 = vpop.f32.mrf.mxu0  ;;  %v9595_v15 = vld [vmem:[#allocation2 + $0x98] sm:$0x1]  ;;  %v4852_v61 = vrot.slane %v4850_v57, 5  ;;  %v4856_v21 = vshll.u32 %v9567_v9, 16  ;;  %v4860_v62 = vshrl.u32 %v9567_v9, 16 }
 0x18d   : > { %7532 = vmatprep.mubr.bf16.mxu0 %v10662_v53  ;;  %10663 = vst [vmem:[#allocation7_spill] sm:$0xff] %v9591_v5  ;;  %v4816_v11 = vrot.slane %v4815_v24, 4  ;;  %v9601_v33 = vsel %vm8267_vm13, %v6587_v45, %v5441_v43  ;;  %v4871_v48 = vshrl.u32 %v4591_v37, 16  ;;  %v4874_v6 = vshll.u32 %v4591_v37, 16 }
 0x18e   : > { %7409 = vmatmul.mubr.bf16.gmra.mxu1 %v10660_v44  ;;  %v5448_v44 = vrot.slane %v9567_v9, 5  ;;  %v9603_v53 = vpop.f32.mrf.mxu1  ;;  %v9605_v5 = vpop.f32.mrf.mxu0  ;;  %v9609_v60 = vsel %vm8267_vm13, %v5443_v1, %v5444_v25  ;;  %v4880_v57 = vshll.u32 %v9589_v3, 16  ;;  %v4884_v9 = vshrl.u32 %v9589_v3, 16 }
 0x18f   : > { %7476 = vmatprep.mubr.bf16.mxu1 %v9374_v29  ;;  %v4849_v29 = vrot.slane %v4847_v27, 4  ;;  %10664 = vst [vmem:[#allocation4_spill] sm:$0xff] %v9603_v53  ;;  %10665 = vst [vmem:[#allocation33_spill] sm:$0xff] %v9605_v5  ;;  %v6588_v27 = vrot.slane %v5322_v36, 9  ;;  %v4830_v24 = vrot.slane %v4829_v18, 4  ;;  %v4840_v32 = vrot.slane %v4839_v34, 4 }
 0x190   : > { %v4844_v16 = vrot.slane %v4842_v38, 5  ;;  %v5451_v43 = vrot.slane %v9595_v15, 5  ;;  %v9614_v45 = vpop.f32.mrf.mxu1  ;;  %v9616_v37 = vpop.f32.mrf.mxu0  ;;  %v5450_v53 = vrot.slane %v5448_v44, 4  ;;  %v9618_v26 = vrot.slane %v4856_v21, 5  ;;  %v5323_v36 = vld [vmem:[#allocation2 + $0x9c] sm:$0xe] }
 0x191   : > { %10666 = vst [vmem:[#allocation34_spill] sm:$0xff] %v9614_v45  ;;  %v4853_v5 = vor.u32 %v4852_v61, %v4849_v29  ;;  %v4862_v1 = vrot.slane %v4860_v62, 4  ;;  %v4811_v25 = vsel %vm7831_vm3, %v9579_v12, %v9543_v7  ;;  %v5455_v18 = vrot.slane %v9589_v3, 5  ;;  %v4593_v12 = vld [vmem:[#allocation2 + $0xa4] sm:$0x1] }
 0x192   : > { %v4873_v34 = vrot.slane %v4871_v48, 4  ;;  %v4876_v38 = vrot.slane %v4874_v6, 5  ;;  %v10667_v45 = vcombine.low %v9416_v47, %v9444_v30  ;;  %v9629_v61 = vpop.f32.mrf.mxu0  ;;  %v4821_v29 = vsel %vm7831_vm3, %v4816_v11, %v9581_v42  ;;  %v4594_v6 = vld [vmem:[#allocation2 + $0xa8] sm:$0xf] }
 0x193   : > { %v7190_v31 = vpop.f32.mrf.mxu1  ;;  %v9636_v3 = vrot.slane %v4880_v57, 5  ;;  %v4886_v21 = vrot.slane %v4884_v9, 4  ;;  %v4835_v47 = vsel %vm7831_vm3, %v4830_v24, %v9554_v14  ;;  %v4845_v30 = vsel %vm7831_vm3, %v4840_v32, %v4844_v16 }
 0x194   : > { %7533 = vmatmul.mubr.bf16.gmra.mxu0 %v10667_v45  ;;  %v9649_v42 = vsel %vm8267_vm13, %v6588_v27, %v5448_v44  ;;  %v4866_v62 = vshll.u32 %v9595_v15, 16  ;;  %v9652_v48 = vpop.f32.mrf.mxu0  ;;  %v6589_v14 = vrot.slane %v5323_v36, 9  ;;  %v5457_v16 = vrot.slane %v5455_v18, 4  ;;  %v4595_v27 = vld [vmem:[#allocation2 + $0xac] sm:$0xf] }
 0x195   : > { %v1921_v11 = vpop.f32.mrf.mxu1  ;;  %10669 = vst [vmem:[#allocation35_spill] sm:$0xff] %v9652_v48  ;;  %v5458_v32 = vrot.slane %v4593_v12, 5  ;;  %v4877_v57 = vor.u32 %v4876_v38, %v4873_v34  ;;  %v4890_v44 = vshll.u32 %v4593_v12, 16  ;;  %v9663_v24 = vcombine.low %v4811_v25, %v4821_v29  ;;  %v10672_v12 = vld [vmem:[#allocation3_spill] sm:$0xff] }
 0x196   : > { %7477 = vmatmul.mubr.bf16.vlgmr.msra.gmra.mxu1 %v9386_v49  ;;  %v10668_v49 = vcombine.low %v9466_v56, %v9476_v46  ;;  %v9658_v56 = vrot.slane %v4853_v5, 4  ;;  %v4863_v46 = vor.u32 %v4862_v1, %v9618_v26  ;;  %v9661_v15 = vpop.f32.mrf.mxu0  ;;  %v9665_v45 = vcombine.low %v4835_v47, %v4845_v30  ;;  %v5324_v5 = vld [vmem:[#allocation2 + $0xa8] sm:$0xe] }
 0x197   : > { %7480 = vmatprep.mubr.bf16.mxu1 %v9393_v58  ;;  %v9656_v58 = vsel %vm8267_vm13, %v5450_v53, %v5451_v43  ;;  %v7191_v9 = vpop.f32.mrf.mxu1  ;;  %10670 = vst [vmem:[#allocation36_spill] sm:$0xff] %v9661_v15  ;;  %v4887_v53 = vor.u32 %v4886_v21, %v9636_v3  ;;  %v5462_v43 = vrot.slane %v4595_v27, 5  ;;  %v9670_v36 = vrot.slane %v4866_v62, 5 }
 0x198   : > { %7536 = vmatprep.mubr.bf16.mxu0 %v10668_v49  ;;  %10671 = vst [vmem:[#allocation37_spill] sm:$0xff] %v9665_v45  ;;  %v9672_v49 = vld [vmem:[#allocation2 + $0xb0] sm:$0x1]  ;;  %v4895_v34 = vshrl.u32 %v4594_v6, 16  ;;  %v4898_v38 = vshll.u32 %v4594_v6, 16  ;;  %v1930_v7 = vadd.f32 %v7190_v31, %v10672_v12  ;;  %v9675_v25 = vpop.f32.mrf.mxu0  ;;  %v4859_v29 = vsel %vm7831_vm3, %v9658_v56, %v9618_v26 }
 0x199   : > { %v1924_v15 = vpop.f32.mrf.mxu1  ;;  %10673 = vst [vmem:[#allocation3_spill] sm:$0xff] %v9675_v25  ;;  %v4864_v21 = vrot.slane %v4863_v46, 4  ;;  %v9683_v47 = vsel %vm8267_vm13, %v6589_v14, %v5455_v18  ;;  %v9687_v30 = vsel %vm8267_vm13, %v5457_v16, %v5458_v32  ;;  %v4878_v62 = vrot.slane %v4877_v57, 4  ;;  %v10676_v25 = vld [vmem:[#allocation8_spill] sm:$0xff]  ;;  %v10677_v32 = vld [vmem:[#allocation9_spill] sm:$0xff] }
 0x19a   : > { %v4892_v6 = vrot.slane %v4890_v44, 5  ;;  %v6590_v31 = vrot.slane %v5324_v5, 9  ;;  %v10674_v1 = vcombine.low %v9500_v51, %v9532_v63  ;;  %v9693_v26 = vpop.f32.mrf.mxu0  ;;  %v4888_v56 = vrot.slane %v4887_v53, 4  ;;  %v10679_v63 = vld [vmem:[#allocation10_spill] sm:$0xff] }
 0x19b   : > { %v7194_v12 = vpop.f32.mrf.mxu1  ;;  %10675 = vst [vmem:[#allocation38_spill] sm:$0xff] %v9693_v26  ;;  %v5464_v46 = vrot.slane %v5462_v43, 4  ;;  %v5465_v18 = vrot.slane %v9672_v49, 5  ;;  %v4904_v14 = vshll.u32 %v4595_v27, 16  ;;  %v1922_v16 = vadd.f32 %v1921_v11, %v10676_v25 }
 0x19c   : > { %7537 = vmatmul.mubr.bf16.gmra.mxu0 %v10674_v1  ;;  %v1933_v57 = vadd.f32 %v7191_v9, %v10677_v32  ;;  %v4897_v44 = vrot.slane %v4895_v34, 4  ;;  %v4900_v51 = vrot.slane %v4898_v38, 5  ;;  %v1925_v5 = vadd.f32 %v1924_v15, %v10679_v63  ;;  %v10680_v1 = vld [vmem:[#allocation11_spill] sm:$0xff]  ;;  %v9704_v45 = vpop.f32.mrf.mxu0  ;;  %v10681_v9 = vld [vmem:[#allocation12_spill] sm:$0xff]  ;;  %v5325_v38 = vld [vmem:[#allocation2 + $0xb4] sm:$0xe] }
 0x19d   : > { %v1946_v53 = vadd.f32 %v7194_v12, %v10680_v1  ;;  %v1937_v26 = vpop.f32.mrf.mxu1  ;;  %v4908_v48 = vshrl.u32 %v4595_v27, 16  ;;  %v9707_v11 = vadd.f32 %v9437_v17, %v1930_v7  ;;  %v4893_v17 = vsel %vm7831_vm3, %v4888_v56, %v4892_v6  ;;  %v9740_v56 = vld [vmem:[#allocation2 + $0xb8] sm:$0xf] }
 0x19e   : > { %7481 = vmatmul.mubr.bf16.gmra.mxu1 %v9400_v20  ;;  %v10678_v20 = vcombine.low %v9536_v2, %v9551_v54  ;;  %v1938_v25 = vadd.f32 %v1937_v26, %v10681_v9  ;;  %v4883_v2 = vsel %vm7831_vm3, %v4878_v62, %v9636_v3  ;;  %v9718_v54 = vsel %vm8267_vm13, %v6590_v31, %v5462_v43  ;;  %v9720_v34 = vpop.f32.mrf.mxu0  ;;  %v10682_v3 = vld [vmem:[#allocation13_spill] sm:$0xff] }
 0x19f   : > { %7484 = vmatprep.mubr.bf16.mxu1 %v9485_v52  ;;  %v4869_v52 = vsel %vm7831_vm3, %v4864_v21, %v9670_v36  ;;  %v7195_v15 = vpop.f32.mrf.mxu1  ;;  %v9726_v7 = vsel %vm8267_vm13, %v5464_v46, %v5465_v18  ;;  %v9728_v27 = vrot.slane %v4904_v14, 5  ;;  %v4914_v36 = vshll.u32 %v9672_v49, 16 }
 0x1a0   : > { %7540 = vmatprep.mubr.bf16.mxu0 %v10678_v20  ;;  %v1949_v21 = vadd.f32 %v7195_v15, %v10682_v3  ;;  %v4901_v62 = vor.u32 %v4900_v51, %v4897_v44  ;;  %v9733_v43 = vadd.f32 %v9457_v19, %v1922_v16  ;;  %v9736_v31 = vadd.f32 %v9478_v40, %v1933_v57  ;;  %v9738_v6 = vpop.f32.mrf.mxu0  ;;  %v10683_v19 = vld [vmem:[#allocation16_spill] sm:$0xff]  ;;  %v9754_v16 = vld [vmem:[#allocation2 + $0xbc] sm:$0x1]  ;;  %v10685_v51 = vld [vmem:[#allocation18_spill] sm:$0xff] }
 0x1a1   : > { %v1940_v12 = vpop.f32.mrf.mxu1  ;;  %v4910_v26 = vrot.slane %v4908_v48, 4  ;;  %v9743_v46 = vadd.f32 %v9492_v22, %v1925_v5  ;;  %v9746_v49 = vadd.f32 %v9503_v23, %v1946_v53  ;;  %v9749_v18 = vadd.f32 %v9513_v13, %v1938_v25  ;;  %v4597_v48 = vld [vmem:[#allocation2 + $0xb4] sm:$0xf]  ;;  %v4600_v15 = vld [vmem:[#allocation2 + $0xc0] sm:$0xf] }
 0x1a2   : > { %v1941_v14 = vadd.f32 %v1940_v12, %v10683_v19  ;;  %v6621_v40 = vcombine.low %v9683_v47, %v9687_v30  ;;  %v6591_v32 = vrot.slane %v5325_v38, 9  ;;  %v9757_v57 = vadd.f32 %v9523_v50, %v1949_v21  ;;  %v9767_v44 = vpop.f32.mrf.mxu0  ;;  %v9772_v50 = vld [vmem:[#allocation2 + $0xc4] sm:$0xf] }
 0x1a3   : > { %v7198_v22 = vpop.f32.mrf.mxu1  ;;  %v10684_v23 = vcombine.low %v9601_v33, %v9609_v60  ;;  %v9763_v13 = vcombine.low %v4859_v29, %v4869_v52  ;;  %v9765_v20 = vcombine.low %v4883_v2, %v4893_v17  ;;  %v6622_v47 = vcombine.low %v9718_v54, %v9726_v7  ;;  %v5326_v33 = vld [vmem:[#allocation2 + $0xc0] sm:$0xe] }
 0x1a4   : > { %v5469_v30 = vrot.slane %v9740_v56, 5  ;;  %v1962_v63 = vadd.f32 %v7198_v22, %v10685_v51  ;;  %v9779_v60 = vrot.slane %v4914_v36, 5  ;;  %v5476_v29 = vrot.slane %v9772_v50, 5  ;;  %v9785_v53 = vpop.f32.mrf.mxu0 }
 0x1a5   : > { %7541 = vmatmul.mubr.bf16.gmra.mxu0 %v10684_v23  ;;  %v9783_v5 = vadd.f32 %v9547_v4, %v1941_v14  ;;  %v1953_v1 = vpop.f32.mrf.mxu1  ;;  %v9787_v9 = vrot.slane %v4901_v62, 4  ;;  %v4911_v25 = vor.u32 %v4910_v26, %v9728_v27  ;;  %v4919_v52 = vshrl.u32 %v4597_v48, 16 }
 0x1a6   : > { %7485 = vmatmul.mubr.bf16.gmra.mxu1 %v9487_v8  ;;  %v10686_v8 = vcombine.low %v9649_v42, %v9656_v58  ;;  %v9791_v42 = vld [vmem:[#allocation2 + $0xc8] sm:$0x1]  ;;  %v10687_v58 = vld [vmem:[#allocation20_spill] sm:$0xff]  ;;  %v9796_v54 = vsel %vm8267_vm13, %v6591_v32, %v5469_v30  ;;  %v4922_v4 = vshll.u32 %v4597_v48, 16  ;;  %v9799_v17 = vadd.f32 %v9556_v10, %v1962_v63  ;;  %v9801_v36 = vpop.f32.mrf.mxu0  ;;  %v10694_v48 = vld [vmem:[#allocation27_spill] sm:$0xff] }
 0x1a7   : > { %7488 = vmatprep.mubr.bf16.mxu1 %v9558_v0  ;;  %v5472_v0 = vrot.slane %v9754_v16, 5  ;;  %v1954_v2 = vadd.f32 %v1953_v1, %v10687_v58  ;;  %v7199_v7 = vpop.f32.mrf.mxu1  ;;  %v5471_v38 = vrot.slane %v5469_v30, 4  ;;  %v4928_v3 = vshll.u32 %v9740_v56, 16  ;;  %v9835_v58 = vld [vmem:[#allocation2 + $0xd0] sm:$0xf] }
 0x1a8   : > { %7544 = vmatprep.mubr.bf16.mxu0 %v10686_v8  ;;  %v4932_v21 = vshrl.u32 %v9740_v56, 16  ;;  %v6592_v62 = vrot.slane %v5326_v33, 9  ;;  %v1965_v12 = vadd.f32 %v7199_v7, %v9318_v41  ;;  %v5478_v26 = vrot.slane %v5476_v29, 4  ;;  %v10689_v8 = vld [vmem:[#allocation6_spill] sm:$0xff] }
 0x1a9   : > { %v5479_v19 = vrot.slane %v9791_v42, 5  ;;  %v9808_v14 = vadd.f32 %v9577_v35, %v1954_v2  ;;  %v1956_v32 = vpop.f32.mrf.mxu1  ;;  %v9810_v10 = vpop.f32.mrf.mxu0  ;;  %v9816_v22 = vrot.slane %v4911_v25, 4  ;;  %v4943_v56 = vshrl.u32 %v4600_v15, 16 }
 0x1aa   : > { %v4946_v23 = vshll.u32 %v4600_v15, 16  ;;  %v1957_v41 = vadd.f32 %v1956_v32, %v9344_v59  ;;  %v9819_v30 = vrot.slane %v4919_v52, 4  ;;  %v9821_v51 = vrot.slane %v4922_v4, 5  ;;  %v10691_v15 = vld [vmem:[#allocation33_spill] sm:$0xff] }
 0x1ab   : > { %v9824_v35 = vadd.f32 %v9593_v39, %v1965_v12  ;;  %v7202_v63 = vpop.f32.mrf.mxu1  ;;  %v5473_v33 = vsel %vm8267_vm13, %v5471_v38, %v5472_v0  ;;  %v9829_v1 = vpop.f32.mrf.mxu0  ;;  %v5477_v25 = vsel %vm8267_vm13, %v6592_v62, %v5476_v29  ;;  %v4952_v59 = vshll.u32 %v9772_v50, 16  ;;  %v10690_v39 = vld [vmem:[#allocation24_spill] sm:$0xff]  ;;  %v5327_v0 = vld [vmem:[#allocation2 + $0xcc] sm:$0xe] }
 0x1ac   : > { %v4956_v52 = vshrl.u32 %v9772_v50, 16  ;;  %v1978_v2 = vadd.f32 %v7202_v63, %v10690_v39  ;;  %v5483_v4 = vrot.slane %v9835_v58, 5  ;;  %v9843_v7 = vadd.f32 %v10691_v15, %v1957_v41  ;;  %v9849_v63 = vld [vmem:[#allocation2 + $0xd4] sm:$0x1] }
 0x1ad   : > { %10688 = vst [vmem:[#allocation8_spill] sm:$0xff] %v9824_v35  ;;  %7545 = vmatmul.mubr.bf16.gmra.mxu0 %v6621_v40  ;;  %v5480_v40 = vsel %vm8267_vm13, %v5478_v26, %v5479_v19  ;;  %v1969_v29 = vpop.f32.mrf.mxu1  ;;  %v9845_v38 = vrot.slane %v4928_v3, 5  ;;  %v4934_v50 = vrot.slane %v4932_v21, 4  ;;  %v9847_v62 = vpop.f32.mrf.mxu0  ;;  %v4945_v12 = vrot.slane %v4943_v56, 4 }
 0x1ae   : > { %7489 = vmatmul.mubr.bf16.gmra.mxu1 %v10689_v8  ;;  %7548 = vmatprep.mubr.bf16.mxu0 %v6622_v47  ;;  %10692 = vst [vmem:[#allocation9_spill] sm:$0xff] %v9843_v7  ;;  %v4948_v32 = vrot.slane %v4946_v23, 5  ;;  %v6623_v26 = vcombine.low %v9796_v54, %v5473_v33  ;;  %v4938_v19 = vshll.u32 %v9754_v16, 16  ;;  %v9855_v8 = vadd.f32 %v9616_v37, %v1978_v2  ;;  %v4603_v23 = vld [vmem:[#allocation2 + $0xcc] sm:$0xf] }
 0x1af   : > { %7492 = vmatprep.mubr.bf16.mxu1 %v9663_v24  ;;  %v10693_v24 = vld [vmem:[#allocation26_spill] sm:$0xff]  ;;  %v7203_v41 = vpop.f32.mrf.mxu1  ;;  %v9857_v39 = vpop.f32.mrf.mxu0  ;;  %v6624_v3 = vcombine.low %v5477_v25, %v5480_v40  ;;  %v9859_v21 = vrot.slane %v4952_v59, 5  ;;  %v4958_v15 = vrot.slane %v4956_v52, 4  ;;  %v6593_v56 = vrot.slane %v5327_v0, 9  ;;  %v10695_v52 = vld [vmem:[#allocation29_spill] sm:$0xff]  ;;  %v10696_v0 = vld [vmem:[#allocation35_spill] sm:$0xff] }
 0x1b0   : > { %v1970_v47 = vadd.f32 %v1969_v29, %v10693_v24  ;;  %v1981_v7 = vadd.f32 %v7203_v41, %v10694_v48  ;;  %v5485_v35 = vrot.slane %v5483_v4, 4  ;;  %v5486_v29 = vrot.slane %v9849_v63, 5  ;;  %v10698_v41 = vld [vmem:[#allocation37_spill] sm:$0xff] }
 0x1b1   : > { %v1972_v16 = vpop.f32.mrf.mxu1  ;;  %v4917_v37 = vsel %vm7831_vm3, %v9816_v22, %v9779_v60  ;;  %v4925_v33 = vor.u32 %v9821_v51, %v9819_v30  ;;  %v4935_v25 = vor.u32 %v4934_v50, %v9845_v38  ;;  %v4949_v48 = vor.u32 %v4948_v32, %v4945_v12  ;;  %v10699_v12 = vld [vmem:[#allocation14_spill] sm:$0xff] }
 0x1b2   : > { %v9864_v54 = vadd.f32 %v9629_v61, %v1970_v47  ;;  %v9873_v59 = vpop.f32.mrf.mxu0  ;;  %v1973_v2 = vadd.f32 %v1972_v16, %v10695_v52  ;;  %v4962_v40 = vshll.u32 %v9791_v42, 16  ;;  %v4967_v61 = vshrl.u32 %v4603_v23, 16 }
 0x1b3   : > { %v9878_v24 = vadd.f32 %v10696_v0, %v1981_v7  ;;  %v4959_v60 = vor.u32 %v4958_v15, %v9859_v21  ;;  %v5484_v22 = vsel %vm8267_vm13, %v6593_v56, %v5483_v4  ;;  %v4970_v30 = vshll.u32 %v4603_v23, 16 }
 0x1b4   : > { %v7206_v47 = vpop.f32.mrf.mxu1  ;;  %v4976_v51 = vshll.u32 %v9835_v58, 16  ;;  %v9885_v50 = vpop.f32.mrf.mxu0  ;;  %v5487_v7 = vsel %vm8267_vm13, %v5485_v35, %v5486_v29  ;;  %v4980_v32 = vshrl.u32 %v9835_v58, 16  ;;  %v10702_v4 = vsel %vm7831_vm3, %v9787_v9, %v9728_v27  ;;  %v10704_v58 = vld [vmem:[#allocation3_spill] sm:$0xff] }
 0x1b5   : > { %10697 = vst [vmem:[#allocation10_spill] sm:$0xff] %v9878_v24  ;;  %7549 = vmatmul.mubr.bf16.gmra.mxu0 %v6623_v26  ;;  %v1994_v42 = vadd.f32 %v7206_v47, %v10699_v12  ;;  %v10700_v26 = vld [vmem:[#allocation36_spill] sm:$0xff]  ;;  %v6566_v56 = vcombine.low %v10702_v4, %v4917_v37  ;;  %v4926_v23 = vrot.slane %v4925_v33, 4  ;;  %v4936_v52 = vrot.slane %v4935_v25, 4  ;;  %v10705_v27 = vld [vmem:[#allocation19_spill] sm:$0xff]  ;;  %v10706_v33 = vld [vmem:[#allocation38_spill] sm:$0xff] }
 0x1b6   : > { %7493 = vmatmul.mubr.bf16.gmra.mxu1 %v10698_v41  ;;  %7552 = vmatprep.mubr.bf16.mxu0 %v6624_v3  ;;  %v9893_v15 = vadd.f32 %v10700_v26, %v1973_v2  ;;  %v1985_v16 = vpop.f32.mrf.mxu1  ;;  %v4940_v0 = vrot.slane %v4938_v19, 5  ;;  %v10703_v3 = vld [vmem:[#allocation17_spill] sm:$0xff]  ;;  %v4950_v35 = vrot.slane %v4949_v48, 4  ;;  %v4964_v29 = vrot.slane %v4962_v40, 5 }
 0x1b7   : > { %7496 = vmatprep.mubr.bf16.mxu1 %v9763_v13  ;;  %v9900_v13 = vpop.f32.mrf.mxu0  ;;  %v1986_v55 = vadd.f32 %v1985_v16, %v10703_v3  ;;  %v9904_v47 = vadd.f32 %v10704_v58, %v1994_v42  ;;  %v4960_v41 = vrot.slane %v4959_v60, 4  ;;  %v6625_v12 = vcombine.low %v5484_v22, %v5487_v7  ;;  %v10707_v40 = vld [vmem:[#allocation21_spill] sm:$0xff] }
 0x1b8   : > { %10701 = vst [vmem:[#allocation11_spill] sm:$0xff] %v9893_v15  ;;  %v7207_v2 = vpop.f32.mrf.mxu1  ;;  %v4969_v26 = vrot.slane %v4967_v61, 4  ;;  %v4972_v15 = vrot.slane %v4970_v30, 5  ;;  %v4978_v37 = vrot.slane %v4976_v51, 5  ;;  %v4982_v19 = vrot.slane %v4980_v32, 4 }
 0x1b9   : > { %v9906_v24 = vpop.f32.mrf.mxu0  ;;  %v1997_v9 = vadd.f32 %v7207_v2, %v10705_v27  ;;  %v9910_v25 = vadd.f32 %v10706_v33, %v1986_v55  ;;  %v4931_v60 = vsel %vm7831_vm3, %v4926_v23, %v9845_v38  ;;  %v4941_v30 = vsel %vm7831_vm3, %v4936_v52, %v4940_v0 }
 0x1ba   : > { %v1988_v16 = vpop.f32.mrf.mxu1  ;;  %v4955_v51 = vsel %vm7831_vm3, %v4950_v35, %v9859_v21  ;;  %v4965_v7 = vsel %vm7831_vm3, %v4960_v41, %v4964_v29  ;;  %v4986_v32 = vshll.u32 %v9849_v63, 16  ;;  %v4973_v23 = vor.u32 %v4972_v15, %v4969_v26  ;;  %v10709_v21 = vld [vmem:[#allocation23_spill] sm:$0xff] }
 0x1bb   : > { %v9912_v48 = vpop.f32.mrf.mxu0  ;;  %v1989_v42 = vadd.f32 %v1988_v16, %v10707_v40  ;;  %v9919_v61 = vadd.f32 %v9704_v45, %v1997_v9  ;;  %v10708_v45 = vld [vmem:[#allocation22_spill] sm:$0xff]  ;;  %v6567_v63 = vcombine.low %v4931_v60, %v4941_v30  ;;  %v6568_v58 = vcombine.low %v4955_v51, %v4965_v7 }
 0x1bc   : > { %v4988_v2 = vrot.slane %v4986_v32, 5 }
 0x1bd   : > { %v7210_v22 = vpop.f32.mrf.mxu1  ;;  %7553 = vmatmul.mubr.bf16.gmra.mxu0 %v6625_v12  ;;  %v9930_v38 = vpop.f32.mrf.mxu0  ;;  %v9934_v3 = vadd.f32 %v9720_v34, %v1989_v42  ;;  %v4974_v12 = vrot.slane %v4973_v23, 4  ;;  %v10712_v42 = vld [vmem:[#allocation30_spill] sm:$0xff] }
 0x1be   : > { %7497 = vmatmul.mubr.bf16.gmra.mxu1 %v9765_v20  ;;  %v2010_v4 = vadd.f32 %v7210_v22, %v10708_v45  ;;  %v4983_v20 = vor.u32 %v4982_v19, %v4978_v37  ;;  %v10711_v19 = vld [vmem:[#allocation28_spill] sm:$0xff] }
 0x1bf   : > { %7500 = vmatprep.mubr.bf16.mxu1 %v6566_v56  ;;  %v2001_v52 = vpop.f32.mrf.mxu1  ;;  %v9936_v0 = vpop.f32.mrf.mxu0  ;;  %v10710_v56 = vld [vmem:[#allocation25_spill] sm:$0xff]  ;;  %v4979_v22 = vsel %vm7831_vm3, %v4974_v12, %v4978_v37 }
 0x1c0   : > { %v2002_v55 = vadd.f32 %v2001_v52, %v10709_v21  ;;  %v9940_v35 = vadd.f32 %v9738_v6, %v2010_v4  ;;  %v4984_v26 = vrot.slane %v4983_v20, 4  ;;  %v10714_v52 = vld [vmem:[#allocation32_spill] sm:$0xff] }
 0x1c1   : > { %v7211_v29 = vpop.f32.mrf.mxu1  ;;  %v9942_v41 = vpop.f32.mrf.mxu0 }
 0x1c2   : > { %v2013_v15 = vadd.f32 %v7211_v29, %v10710_v56  ;;  %v9946_v34 = vadd.f32 %v9767_v44, %v2002_v55  ;;  %v4989_v44 = vsel %vm7831_vm3, %v4984_v26, %v4988_v2  ;;  %v10715_v29 = vld [vmem:[#allocation15_spill] sm:$0xff] }
 0x1c3   : > { %v2004_v27 = vpop.f32.mrf.mxu1  ;;  %v9948_v9 = vpop.f32.mrf.mxu0  ;;  %v6569_v23 = vcombine.low %v4979_v22, %v4989_v44 }
 0x1c4   : > { %v2005_v33 = vadd.f32 %v2004_v27, %v10711_v19  ;;  %v9952_v6 = vadd.f32 %v9785_v53, %v2013_v15  ;;  %v10713_v53 = vld [vmem:[#allocation31_spill] sm:$0xff] }
 0x1c5   : > { %v7214_v16 = vpop.f32.mrf.mxu1  ;;  %v9954_v40 = vpop.f32.mrf.mxu0  ;;  %v10717_v27 = vld [vmem:[#allocation7_spill] sm:$0xff] }
 0x1c6   : > { %7501 = vmatmul.mubr.bf16.gmra.mxu1 %v6567_v63  ;;  %v2026_v60 = vadd.f32 %v7214_v16, %v10712_v42  ;;  %v9962_v30 = vadd.f32 %v9801_v36, %v2005_v33  ;;  %v10718_v42 = vld [vmem:[#allocation4_spill] sm:$0xff] }
 0x1c7   : > { %7504 = vmatprep.mubr.bf16.mxu1 %v6568_v58  ;;  %v2017_v51 = vpop.f32.mrf.mxu1  ;;  %v7339_v7 = vpop.f32.mrf.mxu0 }
 0x1c8   : > { %v2018_v32 = vadd.f32 %v2017_v51, %v10713_v53  ;;  %v9966_v45 = vadd.f32 %v9810_v10, %v2026_v60  ;;  %v10716_v10 = vld [vmem:[#allocation5_spill] sm:$0xff]  ;;  %v10719_v51 = vld [vmem:[#allocation34_spill] sm:$0xff] }
 0x1c9   : > { %v7215_v4 = vpop.f32.mrf.mxu1  ;;  %v3533_v20 = vpop.f32.mrf.mxu0 }
 0x1ca   : > { %v2029_v21 = vadd.f32 %v7215_v4, %v10714_v52  ;;  %v9970_v37 = vadd.f32 %v9829_v1, %v2018_v32 }
 0x1cb   : > { %v2020_v28 = vpop.f32.mrf.mxu1  ;;  %v7342_v55 = vpop.f32.mrf.mxu0 }
 0x1cc   : > { %v2021_v36 = vadd.f32 %v2020_v28, %v10715_v29  ;;  %v9974_v63 = vadd.f32 %v9847_v62, %v2029_v21 }
 0x1cd   : > { %v3546_v2 = vpop.f32.mrf.mxu0 }
 0x1ce   : > { %v7218_v58 = vpop.f32.mrf.mxu1  ;;  %7505 = vmatmul.mubr.bf16.gmra.mxu1 %v6569_v23  ;;  %v9978_v15 = vadd.f32 %v9857_v39, %v2021_v36 }
 0x1cf   : > { %v2042_v56 = vadd.f32 %v7218_v58, %v10716_v10  ;;  %v7343_v26 = vpop.f32.mrf.mxu0 }
 0x1d0   : > { %v2033_v12 = vpop.f32.mrf.mxu1 }
 0x1d1   : > { %v2034_v1 = vadd.f32 %v2033_v12, %v10717_v27  ;;  %v9982_v19 = vadd.f32 %v9873_v59, %v2042_v56  ;;  %v3549_v16 = vpop.f32.mrf.mxu0 }
 0x1d2   : > { %v7219_v33 = vpop.f32.mrf.mxu1 }
 0x1d3   : > { %v2045_v62 = vadd.f32 %v7219_v33, %v10718_v42  ;;  %v9986_v60 = vadd.f32 %v9885_v50, %v2034_v1  ;;  %v7346_v44 = vpop.f32.mrf.mxu0 }
 0x1d4   : > { %v2036_v22 = vpop.f32.mrf.mxu1 }
 0x1d5   : > { %v2037_v53 = vadd.f32 %v2036_v22, %v10719_v51  ;;  %v9990_v39 = vadd.f32 %v9900_v13, %v2045_v62  ;;  %v3562_v4 = vpop.f32.mrf.mxu0 }
 0x1d6   : > { %v7286_v32 = vpop.f32.mrf.mxu1 }
 0x1d7   : > { %v2889_v23 = vadd.f32 %v7286_v32, %v9707_v11  ;;  %v9994_v59 = vadd.f32 %v9906_v24, %v2037_v53  ;;  %v7347_v21 = vpop.f32.mrf.mxu0 }
 0x1d8   : > { %v2760_v52 = vpop.f32.mrf.mxu1 }
 0x1d9   : > { %v2887_v28 = vadd.f32 %v2760_v52, %v9733_v43  ;;  %v9998_v50 = vadd.f32 %v9912_v48, %v2889_v23  ;;  %v3565_v36 = vpop.f32.mrf.mxu0 }
 0x1da   : > { %v7287_v29 = vpop.f32.mrf.mxu1 }
 0x1db   : > { %v2890_v58 = vadd.f32 %v7287_v29, %v9736_v31  ;;  %v10002_v13 = vadd.f32 %v9930_v38, %v2887_v28  ;;  %v7350_v56 = vpop.f32.mrf.mxu0 }
 0x1dc   : > { %v2763_v10 = vpop.f32.mrf.mxu1 }
 0x1dd   : > { %v2888_v11 = vadd.f32 %v2763_v10, %v9743_v46  ;;  %v10006_v24 = vadd.f32 %v9936_v0, %v2890_v58  ;;  %v3578_v27 = vpop.f32.mrf.mxu0  ;;  %v10720_v58 = vld [vmem:[#allocation8_spill] sm:$0xff] }
 0x1de   : > { %v7290_v12 = vpop.f32.mrf.mxu1 }
 0x1df   : > { %v2893_v43 = vadd.f32 %v7290_v12, %v9746_v49  ;;  %v10010_v48 = vadd.f32 %v9942_v41, %v2888_v11  ;;  %v7351_v33 = vpop.f32.mrf.mxu0 }
 0x1e0   : > { %v2776_v1 = vpop.f32.mrf.mxu1 }
 0x1e1   : > { %v2891_v31 = vadd.f32 %v2776_v1, %v9749_v18  ;;  %v10014_v38 = vadd.f32 %v9948_v9, %v2893_v43  ;;  %v3581_v62 = vpop.f32.mrf.mxu0 }
 0x1e2   : > { %v7291_v42 = vpop.f32.mrf.mxu1 }
 0x1e3   : > { %v2894_v46 = vadd.f32 %v7291_v42, %v9757_v57  ;;  %v10018_v0 = vadd.f32 %v9954_v40, %v2891_v31  ;;  %v7354_v51 = vpop.f32.mrf.mxu0 }
 0x1e4   : > { %v2779_v22 = vpop.f32.mrf.mxu1 }
 0x1e5   : > { %v2892_v49 = vadd.f32 %v2779_v22, %v9783_v5  ;;  %v10021_v41 = vadd.f32 %v7339_v7, %v2894_v46  ;;  %v3594_v32 = vpop.f32.mrf.mxu0  ;;  %v10721_v7 = vld [vmem:[#allocation9_spill] sm:$0xff] }
 0x1e6   : > { %v7294_v53 = vpop.f32.mrf.mxu1 }
 0x1e7   : > { %v2897_v18 = vadd.f32 %v7294_v53, %v9799_v17  ;;  %v10024_v23 = vadd.f32 %v3533_v20, %v2892_v49  ;;  %v7355_v52 = vpop.f32.mrf.mxu0 }
 0x1e8   : > { %v2792_v9 = vpop.f32.mrf.mxu1 }
 0x1e9   : > { %v2895_v28 = vadd.f32 %v2792_v9, %v9808_v14  ;;  %v10027_v57 = vadd.f32 %v7342_v55, %v2897_v18  ;;  %v3597_v29 = vpop.f32.mrf.mxu0 }
 0x1ea   : > { %v7295_v40 = vpop.f32.mrf.mxu1 }
 0x1eb   : > { %v2898_v10 = vadd.f32 %v7295_v40, %v10720_v58  ;;  %v10030_v11 = vadd.f32 %v3546_v2, %v2895_v28  ;;  %v7358_v20 = vpop.f32.mrf.mxu0  ;;  %v10722_v2 = vld [vmem:[#allocation10_spill] sm:$0xff] }
 0x1ec   : > { %v2795_v5 = vpop.f32.mrf.mxu1 }
 0x1ed   : > { %v2896_v12 = vadd.f32 %v2795_v5, %v10721_v7  ;;  %v10033_v43 = vadd.f32 %v7343_v26, %v2898_v10  ;;  %v3610_v22 = vpop.f32.mrf.mxu0  ;;  %v10723_v26 = vld [vmem:[#allocation11_spill] sm:$0xff] }
 0x1ee   : > { %v7298_v17 = vpop.f32.mrf.mxu1 }
 0x1ef   : > { %v2901_v1 = vadd.f32 %v7298_v17, %v9855_v8  ;;  %v10036_v31 = vadd.f32 %v3549_v16, %v2896_v12  ;;  %v7359_v8 = vpop.f32.mrf.mxu0 }
 0x1f0   : > { %v2808_v14 = vpop.f32.mrf.mxu1 }
 0x1f1   : > { %v2899_v55 = vadd.f32 %v2808_v14, %v9864_v54  ;;  %v10039_v42 = vadd.f32 %v7346_v44, %v2901_v1  ;;  %v3613_v7 = vpop.f32.mrf.mxu0 }
 0x1f2   : > { %v7299_v46 = vpop.f32.mrf.mxu1 }
 0x1f3   : > { %v2902_v49 = vadd.f32 %v7299_v46, %v10722_v2  ;;  %v10042_v53 = vadd.f32 %v3562_v4, %v2899_v55 }
 0x1f4   : > { %v2811_v18 = vpop.f32.mrf.mxu1 }
 0x1f5   : > { %v2900_v9 = vadd.f32 %v2811_v18, %v10723_v26  ;;  %v10045_v28 = vadd.f32 %v7347_v21, %v2902_v49 }
 0x1f6   : > { %v7302_v40 = vpop.f32.mrf.mxu1 }
 0x1f7   : > { %v2905_v16 = vadd.f32 %v7302_v40, %v9904_v47  ;;  %v10048_v58 = vadd.f32 %v3565_v36, %v2900_v9 }
 0x1f8   : > { %v2824_v54 = vpop.f32.mrf.mxu1 }
 0x1f9   : > { %v2903_v44 = vadd.f32 %v2824_v54, %v9910_v25  ;;  %v10051_v10 = vadd.f32 %v7350_v56, %v2905_v16 }
 0x1fa   : > { %v7303_v5 = vpop.f32.mrf.mxu1 }
 0x1fb   : > { %v2906_v4 = vadd.f32 %v7303_v5, %v9919_v61  ;;  %v10054_v12 = vadd.f32 %v3578_v27, %v2903_v44 }
 0x1fc   : > { %v2827_v17 = vpop.f32.mrf.mxu1  ;;  %v7362_v47 = vpop.f32.mrf.mxu0 }
 0x1fd   : > { %v2904_v21 = vadd.f32 %v2827_v17, %v9934_v3  ;;  %v10057_v1 = vadd.f32 %v7351_v33, %v2906_v4 }
 0x1fe   : > { %v7306_v14 = vpop.f32.mrf.mxu1  ;;  %v3626_v56 = vpop.f32.mrf.mxu0 }
 0x1ff   : > { %v2909_v36 = vadd.f32 %v7306_v14, %v9940_v35  ;;  %v10060_v55 = vadd.f32 %v3581_v62, %v2904_v21 }
 0x200   : > { %v2840_v25 = vpop.f32.mrf.mxu1  ;;  %v7363_v27 = vpop.f32.mrf.mxu0 }
 0x201   : > { %v2907_v46 = vadd.f32 %v2840_v25, %v9946_v34  ;;  %v10063_v2 = vadd.f32 %v7354_v51, %v2909_v36 }
 0x202   : > { %v7307_v61 = vpop.f32.mrf.mxu1  ;;  %v3629_v33 = vpop.f32.mrf.mxu0 }
 0x203   : > { %v2910_v49 = vadd.f32 %v7307_v61, %v9952_v6  ;;  %v10066_v18 = vadd.f32 %v3594_v32, %v2907_v46 }
 0x204   : > { %v2843_v3 = vpop.f32.mrf.mxu1  ;;  %v7430_v62 = vpop.f32.mrf.mxu0 }
 0x205   : > { %v2908_v26 = vadd.f32 %v2843_v3, %v9962_v30  ;;  %v10069_v9 = vadd.f32 %v7355_v52, %v2910_v49 }
 0x206   : > { %v7310_v35 = vpop.f32.mrf.mxu1  ;;  %v4399_v51 = vpop.f32.mrf.mxu0 }
 0x207   : > { %10724 = vst [vmem:[#allocation12_spill] sm:$0xff] %v10069_v9  ;;  %v2913_v40 = vadd.f32 %v7310_v35, %v9966_v45  ;;  %v10072_v16 = vadd.f32 %v3597_v29, %v2908_v26 }
 0x208   : > { %v2856_v34 = vpop.f32.mrf.mxu1  ;;  %v10077_v32 = vpop.f32.mrf.mxu0 }
 0x209   : > { %10725 = vst [vmem:[#allocation13_spill] sm:$0xff] %v10072_v16  ;;  %v2911_v54 = vadd.f32 %v2856_v34, %v9970_v37  ;;  %v10075_v44 = vadd.f32 %v7358_v20, %v2913_v40 }
 0x20a   : > { %v7311_v6 = vpop.f32.mrf.mxu1  ;;  %v10082_v4 = vpop.f32.mrf.mxu0 }
 0x20b   : > { %v2914_v5 = vadd.f32 %v7311_v6, %v9974_v63  ;;  %v10080_v30 = vadd.f32 %v3610_v22, %v2911_v54 }
 0x20c   : > { %v2859_v52 = vpop.f32.mrf.mxu1  ;;  %v7434_v21 = vpop.f32.mrf.mxu0 }
 0x20d   : > { %v2912_v45 = vadd.f32 %v2859_v52, %v9978_v15  ;;  %v10085_v29 = vadd.f32 %v7359_v8, %v2914_v5 }
 0x20e   : > { %v7314_v17 = vpop.f32.mrf.mxu1  ;;  %v4415_v36 = vpop.f32.mrf.mxu0 }
 0x20f   : > { %10726 = vst [vmem:[#allocation16_spill] sm:$0xff] %v10085_v29  ;;  %v2917_v37 = vadd.f32 %v7314_v17, %v9982_v19  ;;  %v10088_v20 = vadd.f32 %v3613_v7, %v2912_v45 }
 0x210   : > { %v2872_v14 = vpop.f32.mrf.mxu1  ;;  %v10093_v46 = vpop.f32.mrf.mxu0 }
 0x211   : > { %10727 = vst [vmem:[#allocation18_spill] sm:$0xff] %v10088_v20  ;;  %v2915_v25 = vadd.f32 %v2872_v14, %v9986_v60  ;;  %v10091_v63 = vadd.f32 %v7362_v47, %v2917_v37 }
 0x212   : > { %v7315_v22 = vpop.f32.mrf.mxu1  ;;  %v10098_v49 = vpop.f32.mrf.mxu0 }
 0x213   : > { %v2918_v61 = vadd.f32 %v7315_v22, %v9990_v39  ;;  %v10096_v15 = vadd.f32 %v3626_v56, %v2915_v25 }
 0x214   : > { %v2875_v8 = vpop.f32.mrf.mxu1  ;;  %v7438_v26 = vpop.f32.mrf.mxu0 }
 0x215   : > { %v2916_v19 = vadd.f32 %v2875_v8, %v9994_v59  ;;  %v10101_v7 = vadd.f32 %v7363_v27, %v2918_v61 }
 0x216   : > { %v7382_v3 = vpop.f32.mrf.mxu1  ;;  %v4431_v40 = vpop.f32.mrf.mxu0 }
 0x217   : > { %10728 = vst [vmem:[#allocation20_spill] sm:$0xff] %v10101_v7  ;;  %v4141_v60 = vadd.f32 %v7382_v3, %v9998_v50  ;;  %v10104_v47 = vadd.f32 %v3629_v33, %v2916_v19 }
 0x218   : > { %v4012_v35 = vpop.f32.mrf.mxu1  ;;  %v10111_v54 = vpop.f32.mrf.mxu0 }
 0x219   : > { %10729 = vst [vmem:[#allocation6_spill] sm:$0xff] %v10104_v47  ;;  %v4139_v34 = vadd.f32 %v4012_v35, %v10002_v13  ;;  %v10107_v39 = vadd.f32 %v7430_v62, %v4141_v60 }
 0x21a   : > { %v10109_v56 = vpop.f32.mrf.mxu1  ;;  %v10117_v27 = vpop.f32.mrf.mxu0 }
 0x21b   : > { %v10113_v6 = vadd.f32 %v4399_v51, %v4139_v34 }
 0x21c   : > { %v10115_v59 = vpop.f32.mrf.mxu1  ;;  %v7442_v50 = vpop.f32.mrf.mxu0 }
 0x21e   : > { %v7386_v5 = vpop.f32.mrf.mxu1  ;;  %v4447_v45 = vpop.f32.mrf.mxu0 }
 0x21f   : > { %v4145_v33 = vadd.f32 %v7386_v5, %v10014_v38 }
 0x220   : > { %v4028_v52 = vpop.f32.mrf.mxu1  ;;  %v10125_v37 = vpop.f32.mrf.mxu0 }
 0x221   : > { %v4143_v13 = vadd.f32 %v4028_v52, %v10018_v0  ;;  %v10121_v62 = vadd.f32 %v7434_v21, %v4145_v33 }
 0x222   : > { %v10123_v17 = vpop.f32.mrf.mxu1  ;;  %v10131_v25 = vpop.f32.mrf.mxu0 }
 0x223   : > { %v10127_v51 = vadd.f32 %v4415_v36, %v4143_v13 }
 0x224   : > { %v10129_v14 = vpop.f32.mrf.mxu1  ;;  %v7446_v61 = vpop.f32.mrf.mxu0 }
 0x226   : > { %v7390_v22 = vpop.f32.mrf.mxu1  ;;  %v4463_v19 = vpop.f32.mrf.mxu0 }
 0x227   : > { %v4149_v38 = vadd.f32 %v7390_v22, %v10027_v57 }
 0x228   : > { %v4044_v8 = vpop.f32.mrf.mxu1  ;;  %v10139_v60 = vpop.f32.mrf.mxu0 }
 0x229   : > { %v4147_v0 = vadd.f32 %v4044_v8, %v10030_v11  ;;  %v10135_v21 = vadd.f32 %v7438_v26, %v4149_v38 }
 0x22a   : > { %v10137_v3 = vpop.f32.mrf.mxu1  ;;  %v10145_v34 = vpop.f32.mrf.mxu0 }
 0x22b   : > { %v10141_v36 = vadd.f32 %v4431_v40, %v4147_v0  ;;  %10730 = vst [vmem:[#allocation24_spill] sm:$0xff] %v10145_v34 }
 0x22c   : > { %v10143_v35 = vpop.f32.mrf.mxu1  ;;  %v7450_v33 = vpop.f32.mrf.mxu0 }
 0x22e   : > { %v7394_v5 = vpop.f32.mrf.mxu1  ;;  %v4479_v13 = vpop.f32.mrf.mxu0 }
 0x22f   : > { %v4153_v57 = vadd.f32 %v7394_v5, %v10039_v42 }
 0x230   : > { %v4060_v52 = vpop.f32.mrf.mxu1  ;;  %v10153_v38 = vpop.f32.mrf.mxu0 }
 0x231   : > { %v4151_v11 = vadd.f32 %v4060_v52, %v10042_v53  ;;  %v10149_v26 = vadd.f32 %v7442_v50, %v4153_v57  ;;  %10731 = vst [vmem:[#allocation33_spill] sm:$0xff] %v10153_v38 }
 0x232   : > { %v10151_v22 = vpop.f32.mrf.mxu1  ;;  %v10159_v0 = vpop.f32.mrf.mxu0 }
 0x233   : > { %v10155_v40 = vadd.f32 %v4447_v45, %v4151_v11  ;;  %10732 = vst [vmem:[#allocation26_spill] sm:$0xff] %v10159_v0 }
 0x234   : > { %v10157_v8 = vpop.f32.mrf.mxu1  ;;  %v7454_v7 = vpop.f32.mrf.mxu0 }
 0x236   : > { %v7398_v47 = vpop.f32.mrf.mxu1  ;;  %v4495_v20 = vpop.f32.mrf.mxu0 }
 0x237   : > { %v4157_v42 = vadd.f32 %v7398_v47, %v10051_v10 }
 0x238   : > { %v4076_v5 = vpop.f32.mrf.mxu1  ;;  %v10167_v52 = vpop.f32.mrf.mxu0 }
 0x239   : > { %v4155_v53 = vadd.f32 %v4076_v5, %v10054_v12  ;;  %v10163_v50 = vadd.f32 %v7446_v61, %v4157_v42  ;;  %10733 = vst [vmem:[#allocation27_spill] sm:$0xff] %v10167_v52 }
 0x23a   : > { %v10165_v57 = vpop.f32.mrf.mxu1  ;;  %v10173_v29 = vpop.f32.mrf.mxu0 }
 0x23b   : > { %v10169_v45 = vadd.f32 %v4463_v19, %v4155_v53  ;;  %10734 = vst [vmem:[#allocation29_spill] sm:$0xff] %v10173_v29 }
 0x23c   : > { %v10171_v11 = vpop.f32.mrf.mxu1  ;;  %v7458_v38 = vpop.f32.mrf.mxu0 }
 0x23e   : > { %v7402_v0 = vpop.f32.mrf.mxu1  ;;  %v4511_v16 = vpop.f32.mrf.mxu0 }
 0x23f   : > { %v4161_v10 = vadd.f32 %v7402_v0, %v10063_v2 }
 0x240   : > { %v4092_v47 = vpop.f32.mrf.mxu1  ;;  %v10181_v5 = vpop.f32.mrf.mxu0 }
 0x241   : > { %v4159_v12 = vadd.f32 %v4092_v47, %v10066_v18  ;;  %v10177_v61 = vadd.f32 %v7450_v33, %v4161_v10  ;;  %10737 = vst [vmem:[#allocation14_spill] sm:$0xff] %v10181_v5 }
 0x242   : > { %v10179_v42 = vpop.f32.mrf.mxu1  ;;  %v10187_v52 = vpop.f32.mrf.mxu0 }
 0x243   : > { %10735 = vst [vmem:[#allocation35_spill] sm:$0xff] %v10177_v61  ;;  %10736 = vst [vmem:[#allocation37_spill] sm:$0xff] %v10179_v42  ;;  %v10183_v19 = vadd.f32 %v4479_v13, %v4159_v12 }
 0x244   : > { %v10185_v53 = vpop.f32.mrf.mxu1  ;;  %10740 = vst [vmem:[#allocation3_spill] sm:$0xff] %v10187_v52  ;;  %v7526_v9 = vpop.f32.mrf.mxu0 }
 0x245   : > { %10738 = vst [vmem:[#allocation36_spill] sm:$0xff] %v10183_v19  ;;  %10739 = vst [vmem:[#allocation17_spill] sm:$0xff] %v10185_v53 }
 0x246   : > { %v7406_v29 = vpop.f32.mrf.mxu1  ;;  %v5651_v34 = vpop.f32.mrf.mxu0 }
 0x247   : > { %v4165_v2 = vadd.f32 %v7406_v29, %v10075_v44 }
 0x248   : > { %v4108_v0 = vpop.f32.mrf.mxu1  ;;  %v7527_v47 = vpop.f32.mrf.mxu0 }
 0x249   : > { %v4163_v18 = vadd.f32 %v4108_v0, %v10080_v30  ;;  %v10191_v33 = vadd.f32 %v7454_v7, %v4165_v2 }
 0x24a   : > { %v10193_v10 = vpop.f32.mrf.mxu1  ;;  %v5654_v12 = vpop.f32.mrf.mxu0 }
 0x24b   : > { %10741 = vst [vmem:[#allocation19_spill] sm:$0xff] %v10191_v33  ;;  %v10195_v5 = vadd.f32 %v4495_v20, %v4163_v18  ;;  %v4142_v18 = vadd.f32 %v10109_v56, %v10006_v24 }
 0x24c   : > { %v10197_v13 = vpop.f32.mrf.mxu1  ;;  %v7530_v52 = vpop.f32.mrf.mxu0 }
 0x24d   : > { %10742 = vst [vmem:[#allocation38_spill] sm:$0xff] %v10195_v5 }
 0x24e   : > { %v7410_v19 = vpop.f32.mrf.mxu1  ;;  %v5667_v44 = vpop.f32.mrf.mxu0 }
 0x24f   : > { %v4169_v61 = vadd.f32 %v7410_v19, %v10091_v63  ;;  %v4140_v63 = vadd.f32 %v10115_v59, %v10010_v48  ;;  %v4146_v48 = vadd.f32 %v10123_v17, %v10021_v41 }
 0x250   : > { %v4124_v53 = vpop.f32.mrf.mxu1  ;;  %v7531_v7 = vpop.f32.mrf.mxu0 }
 0x251   : > { %v4167_v29 = vadd.f32 %v4124_v53, %v10096_v15  ;;  %v10201_v42 = vadd.f32 %v7458_v38, %v4169_v61  ;;  %v4527_v56 = vadd.f32 %v10082_v4, %v4140_v63 }
 0x252   : > { %v10203_v30 = vpop.f32.mrf.mxu1  ;;  %v5670_v0 = vpop.f32.mrf.mxu0 }
 0x253   : > { %10743 = vst [vmem:[#allocation21_spill] sm:$0xff] %v10201_v42  ;;  %v10205_v2 = vadd.f32 %v4511_v16, %v4167_v29  ;;  %v4529_v16 = vadd.f32 %v10077_v32, %v4142_v18 }
 0x254   : > { %v10207_v20 = vpop.f32.mrf.mxu1  ;;  %v10211_v33 = vpop.f32.mrf.mxu0 }
 0x255   : > { %10744 = vst [vmem:[#allocation22_spill] sm:$0xff] %v10205_v2  ;;  %10745 = vst [vmem:[#allocation23_spill] sm:$0xff] %v10207_v20 }
 0x256   : > { %v7478_v5 = vpop.f32.mrf.mxu1  ;;  %v10215_v38 = vpop.f32.mrf.mxu0 }
 0x257   : > { %v5282_v61 = vadd.f32 %v7478_v5, %v10107_v39 }
 0x258   : > { %v5153_v15 = vpop.f32.mrf.mxu1  ;;  %v10219_v53 = vpop.f32.mrf.mxu0 }
 0x259   : > { %v5280_v29 = vadd.f32 %v5153_v15, %v10113_v6  ;;  %v10227_v59 = vadd.f32 %v7526_v9, %v5282_v61  ;;  %v4144_v6 = vadd.f32 %v10129_v14, %v10024_v23  ;;  %v4533_v14 = vadd.f32 %v10093_v46, %v4146_v48 }
 0x25a   : > { %v7479_v19 = vpop.f32.mrf.mxu1  ;;  %v10223_v42 = vpop.f32.mrf.mxu0 }
 0x25b   : > { %v5283_v24 = vadd.f32 %v7479_v19, %v4529_v16  ;;  %v10242_v41 = vadd.f32 %v5651_v34, %v5280_v29  ;;  %v4531_v61 = vadd.f32 %v10098_v49, %v4144_v6  ;;  %v4150_v16 = vadd.f32 %v10137_v3, %v10033_v43 }
 0x25c   : > { %v5156_v2 = vpop.f32.mrf.mxu1  ;;  %v10238_v4 = vpop.f32.mrf.mxu0  ;;  %v4148_v43 = vadd.f32 %v10143_v35, %v10036_v31 }
 0x25d   : > { %v10229_v20 = vadd.f32 %v7527_v47, %v5283_v24  ;;  %v5281_v39 = vadd.f32 %v5156_v2, %v4527_v56  ;;  %v4537_v35 = vadd.f32 %v10111_v54, %v4150_v16 }
 0x25e   : > { %v7482_v32 = vpop.f32.mrf.mxu1  ;;  %v10249_v2 = vpop.f32.mrf.mxu0 }
 0x25f   : > { %v6806_v9 = vpack.c.bf16 %v10229_v20, %v10227_v59  ;;  %v10246_v17 = vadd.f32 %v5654_v12, %v5281_v39  ;;  %v5286_v5 = vadd.f32 %v7482_v32, %v10121_v62 }
 0x260   : > { %v5169_v47 = vpop.f32.mrf.mxu1  ;;  %v10258_v15 = vpop.f32.mrf.mxu0 }
 0x261   : > { %6893 = vst [vmem:[%s10236_s11 + $0x8] sm:$0xff] %v6806_v9   ;;  %v6801_v18 = vpack.c.bf16 %v10246_v17, %v10242_v41  ;;  %v5970_v63 = vadd.f32 %v10246_v17, %v10242_v41  ;;  %v5284_v23 = vadd.f32 %v5169_v47, %v10127_v51  ;;  %v10265_v19 = vadd.f32 %v7530_v52, %v5286_v5 }
 0x262   : > { %v7483_v34 = vpop.f32.mrf.mxu1  ;;  %v10267_v24 = vpop.f32.mrf.mxu0 }
 0x263   : > { %6802 = vst [vmem:[%s10236_s11] sm:$0xff] %v6801_v18   ;;  %v5971_v62 = vadd.f32 %v5970_v63, %v10227_v59  ;;  %v5287_v12 = vadd.f32 %v7483_v34, %v4533_v14  ;;  %v10269_v51 = vadd.f32 %v5667_v44, %v5284_v23  ;;  %v4535_v63 = vadd.f32 %v10117_v27, %v4148_v43 }
 0x264   : > { %v5172_v29 = vpop.f32.mrf.mxu1  ;;  %v4154_v23 = vadd.f32 %v10151_v22, %v10045_v28  ;;  %v4152_v28 = vadd.f32 %v10157_v8, %v10048_v58 }
 0x265   : > { %v5972_v46 = vadd.f32 %v5971_v62, %v10229_v20  ;;  %v10272_v56 = vadd.f32 %v7531_v7, %v5287_v12  ;;  %v5285_v48 = vadd.f32 %v5172_v29, %v4531_v61  ;;  %v10274_v32 = vpop.f32.mrf.mxu0 }
 0x266   : > { %v7486_v39 = vpop.f32.mrf.mxu1  ;;  %v4541_v8 = vadd.f32 %v10125_v37, %v4154_v23 }
 0x267   : > { %v5973_v49 = vadd.f32 %v5972_v46, %v10269_v51  ;;  %v6816_v3 = vpack.c.bf16 %v10272_v56, %v10265_v19  ;;  %v10281_v52 = vadd.f32 %v5670_v0, %v5285_v48  ;;  %v5290_v44 = vadd.f32 %v7486_v39, %v10135_v21  ;;  %v10284_v7 = vpop.f32.mrf.mxu0 }
 0x268   : > { %v5185_v6 = vpop.f32.mrf.mxu1 }
 0x269   : > { %6895 = vst [vmem:[%s10236_s11 + $0x18] sm:$0xff] %v6816_v3   ;;  %v6811_v9 = vpack.c.bf16 %v10281_v52, %v10269_v51  ;;  %v5974_v5 = vadd.f32 %v5973_v49, %v10281_v52  ;;  %v5288_v31 = vadd.f32 %v5185_v6, %v10141_v36  ;;  %v10292_v18 = vpop.f32.mrf.mxu0  ;;  %v10300_v14 = vadd.f32 %v10211_v33, %v5290_v44 }
 0x26a   : > { %v7487_v47 = vpop.f32.mrf.mxu1  ;;  %v4158_v44 = vadd.f32 %v10165_v57, %v10057_v1 }
 0x26b   : > { %6894 = vst [vmem:[%s10236_s11 + $0x10] sm:$0xff] %v6811_v9   ;;  %v5975_v0 = vadd.f32 %v5974_v5, %v10265_v19  ;;  %v5291_v21 = vadd.f32 %v7487_v47, %v4537_v35  ;;  %v10302_v36 = vpop.f32.mrf.mxu0  ;;  %v10305_v54 = vadd.f32 %v10215_v38, %v5288_v31  ;;  %v4156_v47 = vadd.f32 %v10171_v11, %v10060_v55 }
 0x26c   : > { %v5188_v34 = vpop.f32.mrf.mxu1  ;;  %v4545_v55 = vadd.f32 %v10139_v60, %v4158_v44 }
 0x26d   : > { %v5976_v62 = vadd.f32 %v5975_v0, %v10272_v56  ;;  %v10309_v12 = vadd.f32 %v10219_v53, %v5291_v21  ;;  %v5289_v61 = vadd.f32 %v5188_v34, %v4535_v63  ;;  %v10311_v16 = vpop.f32.mrf.mxu0 }
 0x26e   : > { %v7490_v27 = vpop.f32.mrf.mxu1 }
 0x26f   : > { %v5977_v22 = vadd.f32 %v5976_v62, %v10305_v54  ;;  %v6826_v33 = vpack.c.bf16 %v10309_v12, %v10300_v14  ;;  %v10319_v38 = vadd.f32 %v10223_v42, %v5289_v61  ;;  %v5294_v29 = vadd.f32 %v7490_v27, %v10149_v26  ;;  %v10322_v46 = vpop.f32.mrf.mxu0  ;;  %v10746_v62 = vld [vmem:[#allocation24_spill] sm:$0xff]  ;;  %v10748_v27 = vld [vmem:[#allocation37_spill] sm:$0xff] }
 0x270   : > { %v5201_v53 = vpop.f32.mrf.mxu1  ;;  %v4539_v26 = vadd.f32 %v10131_v25, %v4152_v28  ;;  %v4543_v61 = vadd.f32 %v10746_v62, %v4156_v47 }
 0x271   : > { %6897 = vst [vmem:[%s10236_s11 + $0x28] sm:$0xff] %v6826_v33   ;;  %v6821_v48 = vpack.c.bf16 %v10319_v38, %v10305_v54  ;;  %v5978_v39 = vadd.f32 %v5977_v22, %v10319_v38  ;;  %v5292_v58 = vadd.f32 %v5201_v53, %v10155_v40  ;;  %v7547_v49 = vpop.f32.mrf.mxu0  ;;  %v10336_v6 = vadd.f32 %v10238_v4, %v5294_v29 }
 0x272   : > { %v7491_v43 = vpop.f32.mrf.mxu1 }
 0x273   : > { %6896 = vst [vmem:[%s10236_s11 + $0x20] sm:$0xff] %v6821_v48   ;;  %v5979_v42 = vadd.f32 %v5978_v39, %v10300_v14  ;;  %v5295_v3 = vadd.f32 %v7491_v43, %v4541_v8  ;;  %v10339_v40 = vadd.f32 %v10249_v2, %v5292_v58  ;;  %v5734_v25 = vpop.f32.mrf.mxu0  ;;  %v10749_v58 = vld [vmem:[#allocation13_spill] sm:$0xff] }
 0x274   : > { %v5204_v9 = vpop.f32.mrf.mxu1  ;;  %v10750_v8 = vld [vmem:[#allocation17_spill] sm:$0xff] }
 0x275   : > { %v5980_v37 = vadd.f32 %v5979_v42, %v10309_v12  ;;  %v10343_v5 = vadd.f32 %v10258_v15, %v5295_v3  ;;  %v5293_v31 = vadd.f32 %v5204_v9, %v4539_v26  ;;  %v7550_v23 = vpop.f32.mrf.mxu0  ;;  %v4160_v43 = vadd.f32 %v10750_v8, %v10749_v58  ;;  %v10751_v3 = vld [vmem:[#allocation35_spill] sm:$0xff]  ;;  %v10758_v8 = vld [vmem:[#allocation38_spill] sm:$0xff] }
 0x276   : > { %v7494_v35 = vpop.f32.mrf.mxu1 }
 0x277   : > { %v5981_v1 = vadd.f32 %v5980_v37, %v10339_v40  ;;  %v6836_v57 = vpack.c.bf16 %v10343_v5, %v10336_v6  ;;  %v10351_v4 = vadd.f32 %v10267_v24, %v5293_v31  ;;  %v5298_v2 = vadd.f32 %v7494_v35, %v10163_v50  ;;  %v10747_v50 = vld [vmem:[#allocation12_spill] sm:$0xff]  ;;  %v5747_v39 = vpop.f32.mrf.mxu0  ;;  %v10753_v35 = vld [vmem:[#allocation33_spill] sm:$0xff] }
 0x278   : > { %v5217_v0 = vpop.f32.mrf.mxu1  ;;  %v4162_v28 = vadd.f32 %v10748_v27, %v10747_v50  ;;  %v10752_v37 = vld [vmem:[#allocation36_spill] sm:$0xff] }
 0x279   : > { %6899 = vst [vmem:[%s10236_s11 + $0x38] sm:$0xff] %v6836_v57   ;;  %v6831_v15 = vpack.c.bf16 %v10351_v4, %v10339_v40  ;;  %v5982_v21 = vadd.f32 %v5981_v1, %v10351_v4  ;;  %v5296_v63 = vadd.f32 %v5217_v0, %v10169_v45  ;;  %v10366_v22 = vadd.f32 %v10274_v32, %v5298_v2  ;;  %v7551_v57 = vpop.f32.mrf.mxu0  ;;  %v10754_v0 = vld [vmem:[#allocation26_spill] sm:$0xff] }
 0x27a   : > { %v7495_v11 = vpop.f32.mrf.mxu1  ;;  %v4549_v47 = vadd.f32 %v10753_v35, %v4162_v28  ;;  %v10756_v28 = vld [vmem:[#allocation18_spill] sm:$0xff] }
 0x27b   : > { %6898 = vst [vmem:[%s10236_s11 + $0x30] sm:$0xff] %v6831_v15   ;;  %v5983_v34 = vadd.f32 %v5982_v21, %v10336_v6  ;;  %v5299_v24 = vadd.f32 %v7495_v11, %v4545_v55  ;;  %v10369_v45 = vadd.f32 %v10284_v7, %v5296_v63  ;;  %v4547_v15 = vadd.f32 %v10754_v0, %v4160_v43  ;;  %v10755_v21 = vld [vmem:[#allocation16_spill] sm:$0xff]  ;;  %v5750_v27 = vpop.f32.mrf.mxu0 }
 0x27c   : > { %v5220_v33 = vpop.f32.mrf.mxu1  ;;  %v4166_v63 = vadd.f32 %v10193_v10, %v10755_v21  ;;  %v10762_v21 = vld [vmem:[#allocation6_spill] sm:$0xff] }
 0x27d   : > { %v5984_v60 = vadd.f32 %v5983_v34, %v10343_v5  ;;  %v10373_v29 = vadd.f32 %v10292_v18, %v5299_v24  ;;  %v5297_v53 = vadd.f32 %v5220_v33, %v4543_v61  ;;  %v4164_v33 = vadd.f32 %v10197_v13, %v10756_v28 }
 0x27e   : > { %v7498_v48 = vpop.f32.mrf.mxu1 }
 0x27f   : > { %v5985_v42 = vadd.f32 %v5984_v60, %v10369_v45  ;;  %v6846_v32 = vpack.c.bf16 %v10373_v29, %v10366_v22  ;;  %v10381_v7 = vadd.f32 %v10302_v36, %v5297_v53  ;;  %v5302_v26 = vadd.f32 %v7498_v48, %v10751_v3  ;;  %v7554_v3 = vpop.f32.mrf.mxu0 }
 0x280   : > { %v5233_v44 = vpop.f32.mrf.mxu1 }
 0x281   : > { %6901 = vst [vmem:[%s10236_s11 + $0x48] sm:$0xff] %v6846_v32   ;;  %v6841_v18 = vpack.c.bf16 %v10381_v7, %v10369_v45  ;;  %v5986_v9 = vadd.f32 %v5985_v42, %v10381_v7  ;;  %v5300_v31 = vadd.f32 %v5233_v44, %v10752_v37  ;;  %v10396_v55 = vadd.f32 %v10311_v16, %v5302_v26  ;;  %v10759_v42 = vld [vmem:[#allocation27_spill] sm:$0xff]  ;;  %v10760_v44 = vld [vmem:[#allocation29_spill] sm:$0xff] }
 0x282   : > { %v7499_v1 = vpop.f32.mrf.mxu1  ;;  %v4553_v13 = vadd.f32 %v10759_v42, %v4166_v63  ;;  %v10763_v63 = vld [vmem:[#allocation23_spill] sm:$0xff] }
 0x283   : > { %6900 = vst [vmem:[%s10236_s11 + $0x40] sm:$0xff] %v6841_v18   ;;  %v5987_v2 = vadd.f32 %v5986_v9, %v10366_v22  ;;  %v5303_v36 = vadd.f32 %v7499_v1, %v4549_v47  ;;  %v10399_v34 = vadd.f32 %v10322_v46, %v5300_v31  ;;  %v10757_v46 = vld [vmem:[#allocation19_spill] sm:$0xff]  ;;  %v4551_v18 = vadd.f32 %v10760_v44, %v4164_v33  ;;  %v10761_v9 = vld [vmem:[#allocation20_spill] sm:$0xff]  ;;  %v10765_v33 = vld [vmem:[#allocation22_spill] sm:$0xff] }
 0x284   : > { %v5236_v11 = vpop.f32.mrf.mxu1  ;;  %v4170_v37 = vadd.f32 %v10203_v30, %v10761_v9 }
 0x285   : > { %v5988_v24 = vadd.f32 %v5987_v2, %v10373_v29  ;;  %v10402_v62 = vadd.f32 %v7547_v49, %v5303_v36  ;;  %v5301_v61 = vadd.f32 %v5236_v11, %v4547_v15  ;;  %v5763_v15 = vpop.f32.mrf.mxu0  ;;  %v4168_v11 = vadd.f32 %v10763_v63, %v10762_v21 }
 0x286   : > { %v7502_v50 = vpop.f32.mrf.mxu1 }
 0x287   : > { %v5989_v10 = vadd.f32 %v5988_v24, %v10399_v34  ;;  %v6856_v16 = vpack.c.bf16 %v10402_v62, %v10396_v55  ;;  %v10409_v60 = vadd.f32 %v5734_v25, %v5301_v61  ;;  %v5306_v53 = vadd.f32 %v7502_v50, %v10757_v46 }
 0x288   : > { %v5249_v48 = vpop.f32.mrf.mxu1 }
 0x289   : > { %6903 = vst [vmem:[%s10236_s11 + $0x58] sm:$0xff] %v6856_v16   ;;  %v6851_v49 = vpack.c.bf16 %v10409_v60, %v10399_v34  ;;  %v5990_v58 = vadd.f32 %v5989_v10, %v10409_v60  ;;  %v5304_v43 = vadd.f32 %v5249_v48, %v10758_v8  ;;  %v10423_v31 = vadd.f32 %v7550_v23, %v5306_v53  ;;  %v10766_v16 = vld [vmem:[#allocation14_spill] sm:$0xff]  ;;  %v7555_v53 = vpop.f32.mrf.mxu0 }
 0x28a   : > { %v7503_v32 = vpop.f32.mrf.mxu1  ;;  %v4557_v46 = vadd.f32 %v10766_v16, %v4170_v37 }
 0x28b   : > { %6902 = vst [vmem:[%s10236_s11 + $0x50] sm:$0xff] %v6851_v49   ;;  %v5991_v26 = vadd.f32 %v5990_v58, %v10396_v55  ;;  %v5307_v25 = vadd.f32 %v7503_v32, %v4553_v13  ;;  %v10425_v47 = vadd.f32 %v5747_v39, %v5304_v43  ;;  %v10764_v39 = vld [vmem:[#allocation21_spill] sm:$0xff]  ;;  %v10767_v58 = vld [vmem:[#allocation3_spill] sm:$0xff]  ;;  %v5766_v44 = vpop.f32.mrf.mxu0 }
 0x28c   : > { %v5252_v35 = vpop.f32.mrf.mxu1  ;;  %v4555_v8 = vadd.f32 %v10767_v58, %v4168_v11 }
 0x28d   : > { %v5992_v1 = vadd.f32 %v5991_v26, %v10402_v62  ;;  %v10428_v2 = vadd.f32 %v7551_v57, %v5307_v25  ;;  %v5305_v36 = vadd.f32 %v5252_v35, %v4551_v18 }
 0x28e   : > { %v7506_v0 = vpop.f32.mrf.mxu1 }
 0x28f   : > { %v5993_v24 = vadd.f32 %v5992_v1, %v10425_v47  ;;  %v6866_v30 = vpack.c.bf16 %v10428_v2, %v10423_v31  ;;  %v10435_v23 = vadd.f32 %v5750_v27, %v5305_v36  ;;  %v5310_v61 = vadd.f32 %v7506_v0, %v10764_v39 }
 0x290   : > { %v5265_v50 = vpop.f32.mrf.mxu1 }
 0x291   : > { %6905 = vst [vmem:[%s10236_s11 + $0x68] sm:$0xff] %v6866_v30   ;;  %v6861_v57 = vpack.c.bf16 %v10435_v23, %v10425_v47  ;;  %v5994_v28 = vadd.f32 %v5993_v24, %v10435_v23  ;;  %v5308_v10 = vadd.f32 %v5265_v50, %v10765_v33  ;;  %v10447_v43 = vadd.f32 %v7554_v3, %v5310_v61 }
 0x292   : > { %v7507_v48 = vpop.f32.mrf.mxu1 }
 0x293   : > { %6904 = vst [vmem:[%s10236_s11 + $0x60] sm:$0xff] %v6861_v57   ;;  %v5995_v27 = vadd.f32 %v5994_v28, %v10423_v31  ;;  %v5311_v49 = vadd.f32 %v7507_v48, %v4557_v46  ;;  %v10449_v13 = vadd.f32 %v5763_v15, %v5308_v10 }
 0x294   : > { %v5268_v42 = vpop.f32.mrf.mxu1 }
 0x295   : > { %v5996_v32 = vadd.f32 %v5995_v27, %v10428_v2  ;;  %v10452_v26 = vadd.f32 %v7555_v53, %v5311_v49  ;;  %v5309_v25 = vadd.f32 %v5268_v42, %v4555_v8 }
 0x297   : > { %v5997_v18 = vadd.f32 %v5996_v32, %v10449_v13  ;;  %v6876_v9 = vpack.c.bf16 %v10452_v26, %v10447_v43  ;;  %v10457_v37 = vadd.f32 %v5766_v44, %v5309_v25 }
 0x299   : > { %6907 = vst [vmem:[%s10236_s11 + $0x78] sm:$0xff] %v6876_v9   ;;  %v6871_v3 = vpack.c.bf16 %v10457_v37, %v10449_v13  ;;  %v5998_v35 = vadd.f32 %v5997_v18, %v10457_v37 }
 0x29b   : > { %6906 = vst [vmem:[%s10236_s11 + $0x70] sm:$0xff] %v6871_v3   ;;  %v5999_v1 = vadd.f32 %v5998_v35, %v10447_v43 }
 0x29d   : > { %v6000_v36 = vadd.f32 %v5999_v1, %v10452_v26 }
 0x29f   : > { %v6001_v0 = vrot.slane %v6000_v36, 4 }
 0x2a1   : > { %v6002_v15 = vadd.f32 %v6001_v0, %v6000_v36 }
 0x2a3   : > { %v6003_v21 = vrot.slane %v6002_v15, 2 }
 0x2a5   : > { %v6004_v63 = vadd.f32 %v6003_v21, %v6002_v15 }
 0x2a7   : > { %v6005_v11 = vrot.slane %v6004_v63, 1 }
 0x2a9   : > { %v10466_v24 = vadd.f32 %v6005_v11, %v6004_v63 }
 0x2ab   : > { %v10469_v30 = vmul.f32 0.00390625, %v10466_v24 }
 0x2ad   : > { %v6008_v39 = vsub.f32 %v10242_v41, %v10469_v30  ;;  %v6009_v61 = vsub.f32 %v10246_v17, %v10469_v30  ;;  %v6010_v50 = vsub.f32 %v10227_v59, %v10469_v30  ;;  %v6011_v33 = vsub.f32 %v10229_v20, %v10469_v30 }
 0x2ae   : > { %v6012_v10 = vsub.f32 %v10269_v51, %v10469_v30  ;;  %v6013_v53 = vsub.f32 %v10281_v52, %v10469_v30  ;;  %v6014_v17 = vsub.f32 %v10265_v19, %v10469_v30  ;;  %v6015_v49 = vsub.f32 %v10272_v56, %v10469_v30 }
 0x2af   : > { %v6040_v57 = vmul.f32 %v6008_v39, %v6008_v39  ;;  %v6041_v28 = vmul.f32 %v6009_v61, %v6009_v61  ;;  %v6042_v16 = vmul.f32 %v6010_v50, %v6010_v50  ;;  %v6043_v41 = vmul.f32 %v6011_v33, %v6011_v33 }
 0x2b0   : > { %v6044_v27 = vmul.f32 %v6012_v10, %v6012_v10  ;;  %v6045_v58 = vmul.f32 %v6013_v53, %v6013_v53  ;;  %v6016_v51 = vsub.f32 %v10305_v54, %v10469_v30  ;;  %v6046_v8 = vmul.f32 %v6014_v17, %v6014_v17 }
 0x2b1   : > { %v6072_v46 = vadd.f32 %v6041_v28, %v6040_v57  ;;  %v6017_v52 = vsub.f32 %v10319_v38, %v10469_v30  ;;  %v6047_v32 = vmul.f32 %v6015_v49, %v6015_v49  ;;  %v6018_v19 = vsub.f32 %v10300_v14, %v10469_v30 }
 0x2b2   : > { %v6048_v44 = vmul.f32 %v6016_v51, %v6016_v51  ;;  %v6019_v56 = vsub.f32 %v10309_v12, %v10469_v30  ;;  %v6020_v54 = vsub.f32 %v10339_v40, %v10469_v30  ;;  %v6021_v38 = vsub.f32 %v10351_v4, %v10469_v30 }
 0x2b3   : > { %v6073_v48 = vadd.f32 %v6072_v46, %v6042_v16  ;;  %v6049_v9 = vmul.f32 %v6017_v52, %v6017_v52  ;;  %v6050_v35 = vmul.f32 %v6018_v19, %v6018_v19  ;;  %v6022_v14 = vsub.f32 %v10336_v6, %v10469_v30 }
 0x2b4   : > { %v6051_v36 = vmul.f32 %v6019_v56, %v6019_v56  ;;  %v6052_v15 = vmul.f32 %v6020_v54, %v6020_v54  ;;  %v6023_v12 = vsub.f32 %v10343_v5, %v10469_v30  ;;  %v6053_v63 = vmul.f32 %v6021_v38, %v6021_v38 }
 0x2b5   : > { %v6074_v59 = vadd.f32 %v6073_v48, %v6043_v41  ;;  %v6024_v40 = vsub.f32 %v10369_v45, %v10469_v30  ;;  %v6054_v39 = vmul.f32 %v6022_v14, %v6022_v14  ;;  %v6025_v4 = vsub.f32 %v10381_v7, %v10469_v30 }
 0x2b6   : > { %v6055_v50 = vmul.f32 %v6023_v12, %v6023_v12  ;;  %v6026_v6 = vsub.f32 %v10366_v22, %v10469_v30  ;;  %v6027_v5 = vsub.f32 %v10373_v29, %v10469_v30  ;;  %v6028_v45 = vsub.f32 %v10399_v34, %v10469_v30 }
 0x2b7   : > { %v6075_v20 = vadd.f32 %v6074_v59, %v6044_v27  ;;  %v6056_v28 = vmul.f32 %v6024_v40, %v6024_v40  ;;  %v6057_v10 = vmul.f32 %v6025_v4, %v6025_v4  ;;  %v6029_v7 = vsub.f32 %v10409_v60, %v10469_v30 }
 0x2b8   : > { %v6058_v46 = vmul.f32 %v6026_v6, %v6026_v6  ;;  %v6059_v41 = vmul.f32 %v6027_v5, %v6027_v5  ;;  %v6030_v22 = vsub.f32 %v10396_v55, %v10469_v30  ;;  %v6060_v17 = vmul.f32 %v6028_v45, %v6028_v45 }
 0x2b9   : > { %v6076_v42 = vadd.f32 %v6075_v20, %v6045_v58  ;;  %v6031_v29 = vsub.f32 %v10402_v62, %v10469_v30  ;;  %v6061_v59 = vmul.f32 %v6029_v7, %v6029_v7  ;;  %v6032_v34 = vsub.f32 %v10425_v47, %v10469_v30 }
 0x2ba   : > { %v6062_v58 = vmul.f32 %v6030_v22, %v6030_v22  ;;  %v6033_v60 = vsub.f32 %v10435_v23, %v10469_v30  ;;  %v6034_v55 = vsub.f32 %v10423_v31, %v10469_v30  ;;  %v6035_v62 = vsub.f32 %v10428_v2, %v10469_v30 }
 0x2bb   : > { %v6077_v25 = vadd.f32 %v6076_v42, %v6046_v8  ;;  %v6063_v51 = vmul.f32 %v6031_v29, %v6031_v29  ;;  %v6064_v42 = vmul.f32 %v6032_v34, %v6032_v34  ;;  %v6036_v47 = vsub.f32 %v10449_v13, %v10469_v30 }
 0x2bc   : > { %v6066_v19 = vmul.f32 %v6034_v55, %v6034_v55  ;;  %v6037_v23 = vsub.f32 %v10457_v37, %v10469_v30  ;;  %v6038_v31 = vsub.f32 %v10447_v43, %v10469_v30  ;;  %v6039_v2 = vsub.f32 %v10452_v26, %v10469_v30 }
 0x2bd   : > { %v6078_v18 = vadd.f32 %v6077_v25, %v6047_v32  ;;  %v6065_v32 = vmul.f32 %v6033_v60, %v6033_v60 }
 0x2be   : > { %v6069_v54 = vmul.f32 %v6037_v23, %v6037_v23  ;;  %v6071_v38 = vmul.f32 %v6039_v2, %v6039_v2 }
 0x2bf   : > { %v6079_v3 = vadd.f32 %v6078_v18, %v6048_v44  ;;  %v6067_v18 = vmul.f32 %v6035_v62, %v6035_v62 }
 0x2c1   : > { %v6080_v1 = vadd.f32 %v6079_v3, %v6049_v9  ;;  %v6068_v9 = vmul.f32 %v6036_v47, %v6036_v47 }
 0x2c3   : > { %v6081_v0 = vadd.f32 %v6080_v1, %v6050_v35  ;;  %v6070_v1 = vmul.f32 %v6038_v31, %v6038_v31 }
 0x2c5   : > { %v6082_v21 = vadd.f32 %v6081_v0, %v6051_v36 }
 0x2c7   : > { %v6083_v11 = vadd.f32 %v6082_v21, %v6052_v15 }
 0x2c9   : > { %v6084_v61 = vadd.f32 %v6083_v11, %v6053_v63 }
 0x2cb   : > { %v6085_v57 = vadd.f32 %v6084_v61, %v6054_v39 }
 0x2cd   : > { %v6086_v33 = vadd.f32 %v6085_v57, %v6055_v50 }
 0x2cf   : > { %v6087_v16 = vadd.f32 %v6086_v33, %v6056_v28 }
 0x2d1   : > { %v6088_v53 = vadd.f32 %v6087_v16, %v6057_v10 }
 0x2d3   : > { %v6089_v48 = vadd.f32 %v6088_v53, %v6058_v46 }
 0x2d5   : > { %v6090_v27 = vadd.f32 %v6089_v48, %v6059_v41 }
 0x2d7   : > { %v6091_v49 = vadd.f32 %v6090_v27, %v6060_v17 }
 0x2d9   : > { %v6092_v20 = vadd.f32 %v6091_v49, %v6061_v59 }
 0x2db   : > { %v6093_v8 = vadd.f32 %v6092_v20, %v6062_v58 }
 0x2dd   : > { %v6094_v52 = vadd.f32 %v6093_v8, %v6063_v51 }
 0x2df   : > { %v6095_v25 = vadd.f32 %v6094_v52, %v6064_v42 }
 0x2e1   : > { %v6096_v44 = vadd.f32 %v6095_v25, %v6065_v32 }
 0x2e3   : > { %v6097_v56 = vadd.f32 %v6096_v44, %v6066_v19 }
 0x2e5   : > { %v6098_v3 = vadd.f32 %v6097_v56, %v6067_v18 }
 0x2e7   : > { %v6099_v35 = vadd.f32 %v6098_v3, %v6068_v9 }
 0x2e9   : > { %v6100_v13 = vadd.f32 %v6099_v35, %v6069_v54 }
 0x2eb   : > { %v6101_v36 = vadd.f32 %v6100_v13, %v6070_v1 }
 0x2ed   : > { %v6102_v0 = vadd.f32 %v6101_v36, %v6071_v38 }
 0x2ef   : > { %v6103_v14 = vrot.slane %v6102_v0, 4 }
 0x2f1   : > { %v6104_v37 = vadd.f32 %v6103_v14, %v6102_v0 }
 0x2f3   : > { %v6105_v15 = vrot.slane %v6104_v37, 2 }
 0x2f5   : > { %v6106_v21 = vadd.f32 %v6105_v15, %v6104_v37 }
 0x2f7   : > { %v6107_v12 = vrot.slane %v6106_v21, 1 }
 0x2f9   : > { %v6108_v43 = vadd.f32 %v6107_v12, %v6106_v21 }
 0x2fb   : > { %v6110_v26 = vsel %vm892_vm5, %v10466_v24, %v6108_v43 }
 0x2fc   : > { %6111 = vst [vmem:[%s235_s14] sm:$0x3] %v6110_v26 }
 0x2fd PF: > { %s16_s18 = sadd.s32 1, %s7736_s18  }
 0x2fe   : > { %p13_p4 = scmp.ge.s32.totalorder %s16_s18, 4  }
 0x300   :  { %15 = sbr.rel (!%p13_p4) target bundleno = 1 (0x1), region = 88 }

</bundles_post_ra>
